<compile_context>
chip_gen: v5e
topology: v5e:2x2
jax: 0.10.0
libtpu: 0.0.40
codegen_flags: <defaults>
</compile_context>

<pallas_src>
import functools
import math

import jax
import jax.numpy as jnp
from jax.experimental import pallas as pl
from jax.experimental.pallas import tpu as pltpu

# Scoped-VMEM budget: above the 16/32 MiB defaults, below v7x's 64 MiB
# physical.  On 128-MiB parts (v5e/v6e) this could be raised to ~100 MiB.
_VMEM_LIMIT = 56 * 1024 * 1024


def _round_up(x, m):
    return ((x + m - 1) // m) * m


# ---------------------------------------------------------------------------
# Kernel 1: fused 3x3 convolution (pad=1) + folded-BatchNorm affine epilogue.
# Accepts n_in (input, weight-slice) pairs accumulated into one output tile,
# which also fuses the channel-concat feeding cls_seg.  Weights arrive as
# (3, 3*Cin, Cout) so the kernel contracts 3 taps of K=3*Cin instead of 9
# taps of K=Cin (fewer, larger MXU matmuls, ~3x fewer patch materializations).
# ---------------------------------------------------------------------------
def _conv3x3_kernel(*refs, n_in, height, width):
    H, W = height, width
    x_refs = refs[:n_in]
    w_refs = refs[n_in:2 * n_in]
    scale_ref = refs[2 * n_in]
    bias_ref = refs[2 * n_in + 1]
    o_ref = refs[2 * n_in + 2]

    acc = None
    for x_ref, w_ref in zip(x_refs, w_refs):
        xb = x_ref[0]                                   # (H+2, W+2, C) bf16
        C = xb.shape[-1]
        for dh in range(3):
            # (H, W, 3C): the three dw taps concatenated on channels, matching
            # the (dw, c) flattening of the weight's contraction axis.
            patch = jnp.concatenate(
                [xb[dh:dh + H, dw:dw + W, :] for dw in range(3)],
                axis=-1).reshape(H * W, 3 * C)
            d = jnp.dot(patch, w_ref[dh],               # (3C, Cout_tile) bf16
                        preferred_element_type=jnp.float32)
            acc = d if acc is None else acc + d

    res = acc * scale_ref[...] + bias_ref[...]          # f32 epilogue
    o_ref[0] = res.reshape(H, W, -1).astype(o_ref.dtype)


def conv3x3(inputs, weights, scale=None, shift=None, *,
            out_dtype=jnp.bfloat16, tile_co_max=256):
    """Fused 3x3 conv (pad=1, no conv bias) over a list of (input, weight) pairs.

    inputs: list of (B, H, W, Cin_i) bf16; weights: list of (3, 3, Cin_i, Cout)
    bf16.  Optional per-channel scale/shift (f32) implements inference BN.
    """
    B, H, W, _ = inputs[0].shape
    Cout = weights[0].shape[-1]
    if scale is None:
        scale = jnp.ones((1, Cout), jnp.float32)
    if shift is None:
        shift = jnp.zeros((1, Cout), jnp.float32)

    # TODO(synk): wrapper-side zero pad + whole-image input blocks; at real
    # module scale (H,W~97, Cin up to 2048/2560) switch to row tiles with a
    # 1-row halo (manual DMA) so each input block fits v7x's 64 MiB VMEM and
    # the pad round-trip disappears.  Likewise add a Cin-reduction grid axis
    # with an f32 VMEM accumulator for the largest weights.
    xps = [jnp.pad(x, ((0, 0), (1, 1), (1, 1), (0, 0))) for x in inputs]
    # Row-major contiguous reshape: (3,3,Cin,Cout) -> (3, 3*Cin, Cout) is free.
    w3s = [w.reshape(3, 3 * w.shape[2], w.shape[3]) for w in weights]

    tile_co = Cout if Cout <= tile_co_max else tile_co_max
    n_co = pl.cdiv(Cout, tile_co)

    in_specs = []
    for xp in xps:
        in_specs.append(pl.BlockSpec((1, H + 2, W + 2, xp.shape[-1]),
                                     lambda b, co: (b, 0, 0, 0)))
    for w3 in w3s:
        in_specs.append(pl.BlockSpec((3, w3.shape[1], tile_co),
                                     lambda b, co: (0, 0, co)))
    in_specs.append(pl.BlockSpec((1, tile_co), lambda b, co: (0, co)))
    in_specs.append(pl.BlockSpec((1, tile_co), lambda b, co: (0, co)))

    return pl.pallas_call(
        functools.partial(_conv3x3_kernel, n_in=len(inputs), height=H, width=W),
        out_shape=jax.ShapeDtypeStruct((B, H, W, Cout), out_dtype),
        grid_spec=pltpu.PrefetchScalarGridSpec(
            num_scalar_prefetch=0,
            grid=(B, n_co),
            in_specs=in_specs,
            out_specs=pl.BlockSpec((1, H, W, tile_co),
                                   lambda b, co: (b, 0, 0, co)),
        ),
        compiler_params=pltpu.CompilerParams(
            dimension_semantics=("parallel", "parallel"),
            vmem_limit_bytes=_VMEM_LIMIT),
    )(*xps, *w3s, scale, shift)


# ---------------------------------------------------------------------------
# Kernel 2: Criss-Cross Attention (CCNet), one batch element per grid step.
# Criss-cross energies only (H-branch with the reference -inf diagonal + the
# W-branch, joint softmax over H+W positions).  The recurrence is a
# lax.fori_loop so x stays VMEM-resident across iterations with bounded live
# ranges; large tensors never change layout (only (H,W) softmax stats do).
# ---------------------------------------------------------------------------
def _cca_kernel(x_ref, wq_ref, bq_ref, wk_ref, bk_ref, wv_ref, bv_ref,
                gamma_ref, o_ref, *, height, width, recurrence):
    H, W = height, width
    N, C = x_ref.shape[1], x_ref.shape[2]
    bf16 = jnp.bfloat16
    neg_inf = jnp.float32(-1e30)

    wq = wq_ref[...]                                    # bf16 in HBM/VMEM
    wk = wk_ref[...]
    wv = wv_ref[...]
    bq = bq_ref[...]                                    # f32
    bk = bk_ref[...]
    bv = bv_ref[...]
    gamma = gamma_ref[0]

    # H-branch self-position mask (reference -inf diagonal), (W, H, H) layout;
    # the self position then enters the softmax exactly once via the W branch.
    ii = jax.lax.broadcasted_iota(jnp.int32, (W, H, H), 1)
    hh = jax.lax.broadcasted_iota(jnp.int32, (W, H, H), 2)
    diag = ii == hh

    def one_iter(_, x):                                 # x: (N, C) f32 carry
        xb = x.astype(bf16)
        q = (jnp.dot(xb, wq, preferred_element_type=jnp.float32) + bq).astype(bf16)
        k = (jnp.dot(xb, wk, preferred_element_type=jnp.float32) + bk).astype(bf16)
        v = (jnp.dot(xb, wv, preferred_element_type=jnp.float32) + bv).astype(bf16)
        q = q.reshape(H, W, -1)
        k = k.reshape(H, W, -1)
        v = v.reshape(H, W, C)
        qT = jnp.transpose(q, (1, 0, 2))                # (W, H, Cq)  small
        kT = jnp.transpose(k, (1, 0, 2))
        vT = jnp.transpose(v, (1, 0, 2))                # (W, H, C)

        # column (H) branch: e_h[j, i, h] = q[i,j] . k[h,j]   -> (W, H, H)
        e_h = jax.lax.dot_general(qT, kT, (((2,), (2,)), ((0,), (0,))),
                                  preferred_element_type=jnp.float32)
        e_h = jnp.where(diag, neg_inf, e_h)             # mask self, f32
        # row (W) branch:    e_w[i, j, w] = q[i,j] . k[i,w]   -> (H, W, W)
        e_w = jax.lax.dot_general(q, k, (((2,), (2,)), ((0,), (0,))),
                                  preferred_element_type=jnp.float32)

        # joint softmax over the H+W criss-cross positions.  The big energy /
        # probability tensors stay in their native layouts; only the (H, W)
        # max / denominator stats cross layouts (cheap 2-D transposes).
        m_h = jnp.max(e_h, axis=-1)                     # (W, H)
        m_w = jnp.max(e_w, axis=-1)                     # (H, W)
        m = jnp.maximum(m_w, m_h.T)                     # (H, W)
        p_h = jnp.exp(e_h - m.T[:, :, None])            # (W, H, H)
        p_w = jnp.exp(e_w - m[:, :, None])              # (H, W, W)
        denom = jnp.sum(p_w, axis=-1) + jnp.sum(p_h, axis=-1).T   # (H, W)
        inv = pl.reciprocal(denom, approx=True)
        a_h = (p_h * inv.T[:, :, None]).astype(bf16)    # (W, H, H)
        a_w = (p_w * inv[:, :, None]).astype(bf16)      # (H, W, W)

        # out_h[j,i,c] = sum_h a_h[j,i,h] * v[h,j,c]          -> (W, H, C)
        out_h = jax.lax.dot_general(a_h, vT, (((2,), (1,)), ((0,), (0,))),
                                    preferred_element_type=jnp.float32)
        # out_w[i,j,c] = sum_w a_w[i,j,w] * v[i,w,c]          -> (H, W, C)
        out_w = jax.lax.dot_general(a_w, v, (((2,), (1,)), ((0,), (0,))),
                                    preferred_element_type=jnp.float32)
        out = jnp.transpose(out_h, (1, 0, 2)) + out_w
        return gamma * out.reshape(N, C) + x            # residual in f32

    x0 = x_ref[0].astype(jnp.float32)
    x_fin = jax.lax.fori_loop(0, recurrence, one_iter, x0, unroll=True)
    o_ref[0] = x_fin.astype(o_ref.dtype)


def criss_cross_attention(x_nhwc, p, recurrence):
    B, H, W, C = x_nhwc.shape
    N = H * W
    Cq = p["wq"].shape[1]
    xr = x_nhwc.reshape(B, N, C)
    # TODO(synk): whole-(N, C) residency per batch element; at real-module
    # scale on v7x (64 MiB VMEM) tile queries by row blocks inside the kernel
    # (energies/probs/outputs then scale with the row tile).
    out = pl.pallas_call(
        functools.partial(_cca_kernel, height=H, width=W,
                          recurrence=recurrence),
        out_shape=jax.ShapeDtypeStruct((B, N, C), jnp.bfloat16),
        grid_spec=pltpu.PrefetchScalarGridSpec(
            num_scalar_prefetch=0,
            grid=(B,),
            in_specs=[
                pl.BlockSpec((1, N, C), lambda b: (b, 0, 0)),
                pl.BlockSpec((C, Cq), lambda b: (0, 0)),
                pl.BlockSpec((1, Cq), lambda b: (0, 0)),
                pl.BlockSpec((C, Cq), lambda b: (0, 0)),
                pl.BlockSpec((1, Cq), lambda b: (0, 0)),
                pl.BlockSpec((C, C), lambda b: (0, 0)),
                pl.BlockSpec((1, C), lambda b: (0, 0)),
                pl.BlockSpec(memory_space=pltpu.MemorySpace.SMEM),  # gamma
            ],
            out_specs=pl.BlockSpec((1, N, C), lambda b: (b, 0, 0)),
        ),
        compiler_params=pltpu.CompilerParams(
            dimension_semantics=("parallel",),
            vmem_limit_bytes=_VMEM_LIMIT),
    )(xr, p["wq"], p["bq"], p["wk"], p["bk"], p["wv"], p["bv"], p["gamma"])
    return out.reshape(B, H, W, C)


# ---------------------------------------------------------------------------
# Kernel 3: GEMM with fused scale/bias epilogue (bf16 MXU inputs, f32 accum).
# Used for the align_corners bilinear x8 upsample expressed as two
# interpolation-matrix GEMMs.
# ---------------------------------------------------------------------------
def _gemm_bias_kernel(a_ref, b_ref, scale_ref, bias_ref, o_ref):
    acc = jnp.dot(a_ref[...], b_ref[...], preferred_element_type=jnp.float32)
    o_ref[...] = (acc * scale_ref[...] + bias_ref[...]).astype(o_ref.dtype)


def gemm(a, b, scale=None, bias=None, *, out_dtype=jnp.bfloat16,
         tile_m_max=256, tile_n_max=512):
    """(M,K)@(K,N) * scale[1,N] + bias[1,N] inside a Pallas kernel."""
    M, K = a.shape
    K2, N = b.shape
    assert K == K2
    a = a.astype(jnp.bfloat16)          # no-op when callers already pass bf16
    b = b.astype(jnp.bfloat16)
    if scale is None:
        scale = jnp.ones((1, N), jnp.float32)
    if bias is None:
        bias = jnp.zeros((1, N), jnp.float32)

    # tile_m: aim for >=2 grid steps on the parallel axis; tile_n
    # unconditionally when large (masked tails handle non-aligned N).
    tile_m = min(tile_m_max, max(8, _round_up(pl.cdiv(M, 2), 8)))
    tile_n = N if N <= tile_n_max else tile_n_max
    grid = (pl.cdiv(M, tile_m), pl.cdiv(N, tile_n))
    # TODO(synk): add a K reduction grid axis + f32 VMEM accumulator for
    # contraction dims too large to keep resident in VMEM.
    return pl.pallas_call(
        _gemm_bias_kernel,
        out_shape=jax.ShapeDtypeStruct((M, N), out_dtype),
        grid_spec=pltpu.PrefetchScalarGridSpec(
            num_scalar_prefetch=0,
            grid=grid,
            in_specs=[
                pl.BlockSpec((tile_m, K), lambda i, j: (i, 0)),
                pl.BlockSpec((K, tile_n), lambda i, j: (0, j)),
                pl.BlockSpec((1, tile_n), lambda i, j: (0, j)),
                pl.BlockSpec((1, tile_n), lambda i, j: (0, j)),
            ],
            out_specs=pl.BlockSpec((tile_m, tile_n), lambda i, j: (i, j)),
        ),
        compiler_params=pltpu.CompilerParams(
            dimension_semantics=("parallel", "parallel"),
            vmem_limit_bytes=_VMEM_LIMIT),
    )(a, b, scale, bias)


def _bilinear_matrix(n_in, n_out):
    # nn.Upsample(scale_factor=8, mode='bilinear', align_corners=True):
    # src = i * (n_in - 1) / (n_out - 1)
    i = jnp.arange(n_out, dtype=jnp.float32)
    src = i * (n_in - 1) / (n_out - 1)
    lo = jnp.clip(jnp.floor(src).astype(jnp.int32), 0, n_in - 2)
    frac = src - lo.astype(jnp.float32)
    rows = jnp.arange(n_out)
    R = jnp.zeros((n_out, n_in), jnp.float32)
    R = R.at[rows, lo].add(1.0 - frac)
    R = R.at[rows, lo + 1].add(frac)
    return R


def upsample_bilinear_x8_to_nchw(y):
    """align_corners bilinear x8 of NHWC logits, emitted directly as NCHW.

    Only the small low-res logits and the (8x smaller than final)
    H-upsampled intermediate are ever transposed; the full upsampled tensor
    comes straight out of the last GEMM in NCHW layout.
    """
    B, H, W, C = y.shape
    Ho, Wo = 8 * H, 8 * W
    Rh = _bilinear_matrix(H, Ho)                        # (Ho, H)
    RwT = _bilinear_matrix(W, Wo).T                     # (W, Wo)
    # rows: t[io, (b, q, c)] = sum_p Rh[io, p] * y[b, p, q, c]
    ym = jnp.transpose(y, (1, 0, 2, 3)).reshape(H, B * W * C)
    t = gemm(Rh, ym, out_dtype=jnp.bfloat16).reshape(Ho, B, W, C)
    # cols: out[(b, c, io), jo] = sum_q t[io, b, q, c] * Rw[jo, q]
    tm = jnp.transpose(t, (1, 3, 0, 2)).reshape(B * C * Ho, W)
    out = gemm(tm, RwT, out_dtype=jnp.float32)
    return out.reshape(B, C, Ho, Wo)                    # NCHW, no final transpose


# ---------------------------------------------------------------------------
# Deterministic parameter init (shapes follow RCCAModule.__init__)
# ---------------------------------------------------------------------------
def init_params(key, in_channels, num_classes):
    inter = in_channels // 4
    cq = max(1, inter // 8)
    keys = jax.random.split(key, 12)
    bf16 = jnp.bfloat16

    def w(k, shape, fan_in, dtype=jnp.float32):
        return (jax.random.normal(k, shape, jnp.float32)
                / math.sqrt(fan_in)).astype(dtype)

    def bn(k, c):
        # TODO(synk): BatchNorm2d is applied in inference mode (folded affine
        # with running_mean=0, running_var=1); training-mode batch statistics
        # are not computed.
        k1, k2 = jax.random.split(k)
        weight = 1.0 + 0.1 * jax.random.normal(k1, (1, c), jnp.float32)
        bias = 0.1 * jax.random.normal(k2, (1, c), jnp.float32)
        running_mean = jnp.zeros((1, c), jnp.float32)
        running_var = jnp.ones((1, c), jnp.float32)
        scale = weight / jnp.sqrt(running_var + 1e-5)
        shift = bias - running_mean * scale
        return scale, shift

    p = {}
    # conv / attention weights live in bf16 in HBM (halves DMA bytes + VMEM).
    p["conv_in_w"] = w(keys[0], (3, 3, in_channels, inter), 9 * in_channels, bf16)
    p["bn_in_scale"], p["bn_in_shift"] = bn(keys[1], inter)
    p["cca"] = {
        "wq": w(keys[2], (inter, cq), inter, bf16),
        "bq": 0.01 * jax.random.normal(keys[3], (1, cq), jnp.float32),
        "wk": w(keys[4], (inter, cq), inter, bf16),
        "bk": 0.01 * jax.random.normal(keys[5], (1, cq), jnp.float32),
        "wv": w(keys[6], (inter, inter), inter, bf16),
        "bv": 0.01 * jax.random.normal(keys[7], (1, inter), jnp.float32),
        # PyTorch initializes gamma to 0 (CCA would be an identity map);
        # use 0.5 here so the attention path is actually exercised.
        "gamma": jnp.array([0.5], jnp.float32),
    }
    p["conv_out_w"] = w(keys[8], (3, 3, inter, inter), 9 * inter, bf16)
    # cls1/cls2 kept as f32 masters; BN + the 1x1 conv are folded into them at
    # forward time and the folded weight reaches HBM/VMEM in bf16.
    p["cls1_w"] = w(keys[9], (3, 3, in_channels + inter, inter),
                    9 * (in_channels + inter))
    p["bn_cls_scale"], p["bn_cls_shift"] = bn(keys[10], inter)
    p["cls2_w"] = w(keys[11], (inter, num_classes), inter)
    p["cls2_b"] = jnp.zeros((1, num_classes), jnp.float32)
    return p


# ---------------------------------------------------------------------------
# RCCAModule.forward
# ---------------------------------------------------------------------------
def rcca_forward(x_nchw, p, recurrence=2):
    x = jnp.transpose(x_nchw, (0, 2, 3, 1)).astype(jnp.bfloat16)      # NHWC bf16

    # conv_in: Conv3x3 (no bias) + BatchNorm folded into the conv epilogue
    out = conv3x3([x], [p["conv_in_w"]], p["bn_in_scale"], p["bn_in_shift"])

    # recurrent criss-cross attention: recurrence fused inside the kernel
    out = criss_cross_attention(out, p["cca"], recurrence)

    # conv_out: Conv3x3, no bias, no BN
    out = conv3x3([out], [p["conv_out_w"]])

    # cls_seg: cat([x, out]) -> Conv3x3 -> BN -> Upsample(x8) -> Conv1x1.
    # The channel concat is fused (two weight slices, one accumulator); BN and
    # the trailing 1x1 conv are folded into the 3x3 weights (exact: there is
    # no nonlinearity in between); the x8 upsample then moves num_classes
    # channels and writes NCHW directly.
    Cin = x.shape[-1]
    w_s = p["cls1_w"] * p["bn_cls_scale"].reshape(1, 1, 1, -1)
    w_fold = jnp.einsum("hwim,mc->hwic", w_s, p["cls2_w"]).astype(jnp.bfloat16)
    b_fold = p["bn_cls_shift"] @ p["cls2_w"] + p["cls2_b"]            # (1, cls)
    y = conv3x3([x, out], [w_fold[:, :, :Cin, :], w_fold[:, :, Cin:, :]],
                shift=b_fold)
    return upsample_bilinear_x8_to_nchw(y)                            # NCHW f32


if __name__ == "__main__":
    B, Cin, H, W = 2, 64, 8, 8          # in_channels=64 -> inter=16, q/k dim=2
    num_classes, recurrence = 5, 2
    key = jax.random.PRNGKey(0)
    kx, kp = jax.random.split(key)
    x = jax.random.normal(kx, (B, Cin, H, W), jnp.float32)
    params = init_params(kp, Cin, num_classes)

    fwd = jax.jit(rcca_forward, static_argnames=("recurrence",))
    y = fwd(x, params, recurrence=recurrence)
    y = jax.block_until_ready(y)

    assert y.shape == (B, num_classes, 8 * H, 8 * W), y.shape
    assert bool(jnp.all(jnp.isfinite(y)))
    print("KERNEL_OK")
</pallas_src>

<mosaic_0001>
module attributes {stable_mosaic.version = 11 : i64} {
  func.func @_conv3x3_kernel(%arg0: i32, %arg1: i32, %arg2: memref<1x10x10x64xbf16, #tpu.memory_space<vmem>>, %arg3: memref<3x192x16xbf16, #tpu.memory_space<vmem>>, %arg4: memref<1x16xf32, #tpu.memory_space<vmem>>, %arg5: memref<1x16xf32, #tpu.memory_space<vmem>>, %arg6: memref<1x8x8x16xbf16, #tpu.memory_space<vmem>>) attributes {dimension_semantics = [#tpu.dimension_semantics<parallel>, #tpu.dimension_semantics<parallel>], iteration_bounds = array<i64: 2, 1>, scalar_prefetch = 0 : i64, scratch_operands = 0 : i64, tpu.core_type = #tpu.core_type<tc>, window_params = [{transform_indices = @transform_0, window_bounds = array<i64: 1, 10, 10, 64>}, {transform_indices = @transform_1, window_bounds = array<i64: 3, 192, 16>}, {transform_indices = @transform_2, window_bounds = array<i64: 1, 16>}, {transform_indices = @transform_3, window_bounds = array<i64: 1, 16>}, {transform_indices = @transform_4, window_bounds = array<i64: 1, 8, 8, 16>}]} {
    %c0 = arith.constant 0 : index
    %c0_0 = arith.constant 0 : index
    %c0_1 = arith.constant 0 : index
    %c0_2 = arith.constant 0 : index
    %0 = vector.load %arg2[%c0, %c0_0, %c0_1, %c0_2] : memref<1x10x10x64xbf16, #tpu.memory_space<vmem>>, vector<1x10x10x64xbf16>
    %1 = vector.shape_cast %0 : vector<1x10x10x64xbf16> to vector<10x10x64xbf16>
    %2 = vector.extract_strided_slice %1 {offsets = [0, 0, 0], sizes = [8, 8, 64], strides = [1, 1, 1]} : vector<10x10x64xbf16> to vector<8x8x64xbf16>
    %3 = vector.extract_strided_slice %1 {offsets = [0, 1, 0], sizes = [8, 8, 64], strides = [1, 1, 1]} : vector<10x10x64xbf16> to vector<8x8x64xbf16>
    %4 = vector.extract_strided_slice %1 {offsets = [0, 2, 0], sizes = [8, 8, 64], strides = [1, 1, 1]} : vector<10x10x64xbf16> to vector<8x8x64xbf16>
    %5 = tpu.concatenate %2, %3, %4 in 2 : vector<8x8x64xbf16>, vector<8x8x64xbf16>, vector<8x8x64xbf16> -> vector<8x8x192xbf16>
    %6 = vector.shape_cast %5 : vector<8x8x192xbf16> to vector<64x192xbf16>
    %c0_3 = arith.constant 0 : index
    %c0_4 = arith.constant 0 : index
    %c0_5 = arith.constant 0 : index
    %7 = vector.load %arg3[%c0_3, %c0_4, %c0_5] : memref<3x192x16xbf16, #tpu.memory_space<vmem>>, vector<1x192x16xbf16>
    %8 = vector.shape_cast %7 : vector<1x192x16xbf16> to vector<192x16xbf16>
    %cst = arith.constant dense<0.000000e+00> : vector<64x16xf32>
    %9 = tpu.matmul %6, %8, %cst {dimension_numbers = #tpu.dot_dimension_numbers<[1], [0], [0], [1], [0, 0, 1, 1], [], []>} : vector<64x192xbf16>, vector<192x16xbf16>, vector<64x16xf32> -> vector<64x16xf32>
    %10 = vector.extract_strided_slice %1 {offsets = [1, 0, 0], sizes = [8, 8, 64], strides = [1, 1, 1]} : vector<10x10x64xbf16> to vector<8x8x64xbf16>
    %11 = vector.extract_strided_slice %1 {offsets = [1, 1, 0], sizes = [8, 8, 64], strides = [1, 1, 1]} : vector<10x10x64xbf16> to vector<8x8x64xbf16>
    %12 = vector.extract_strided_slice %1 {offsets = [1, 2, 0], sizes = [8, 8, 64], strides = [1, 1, 1]} : vector<10x10x64xbf16> to vector<8x8x64xbf16>
    %13 = tpu.concatenate %10, %11, %12 in 2 : vector<8x8x64xbf16>, vector<8x8x64xbf16>, vector<8x8x64xbf16> -> vector<8x8x192xbf16>
    %14 = vector.shape_cast %13 : vector<8x8x192xbf16> to vector<64x192xbf16>
    %c1 = arith.constant 1 : index
    %c0_6 = arith.constant 0 : index
    %c0_7 = arith.constant 0 : index
    %15 = vector.load %arg3[%c1, %c0_6, %c0_7] : memref<3x192x16xbf16, #tpu.memory_space<vmem>>, vector<1x192x16xbf16>
    %16 = vector.shape_cast %15 : vector<1x192x16xbf16> to vector<192x16xbf16>
    %cst_8 = arith.constant dense<0.000000e+00> : vector<64x16xf32>
    %17 = tpu.matmul %14, %16, %cst_8 {dimension_numbers = #tpu.dot_dimension_numbers<[1], [0], [0], [1], [0, 0, 1, 1], [], []>} : vector<64x192xbf16>, vector<192x16xbf16>, vector<64x16xf32> -> vector<64x16xf32>
    %18 = arith.addf %9, %17 : vector<64x16xf32>
    %19 = vector.extract_strided_slice %1 {offsets = [2, 0, 0], sizes = [8, 8, 64], strides = [1, 1, 1]} : vector<10x10x64xbf16> to vector<8x8x64xbf16>
    %20 = vector.extract_strided_slice %1 {offsets = [2, 1, 0], sizes = [8, 8, 64], strides = [1, 1, 1]} : vector<10x10x64xbf16> to vector<8x8x64xbf16>
    %21 = vector.extract_strided_slice %1 {offsets = [2, 2, 0], sizes = [8, 8, 64], strides = [1, 1, 1]} : vector<10x10x64xbf16> to vector<8x8x64xbf16>
    %22 = tpu.concatenate %19, %20, %21 in 2 : vector<8x8x64xbf16>, vector<8x8x64xbf16>, vector<8x8x64xbf16> -> vector<8x8x192xbf16>
    %23 = vector.shape_cast %22 : vector<8x8x192xbf16> to vector<64x192xbf16>
    %c2 = arith.constant 2 : index
    %c0_9 = arith.constant 0 : index
    %c0_10 = arith.constant 0 : index
    %24 = vector.load %arg3[%c2, %c0_9, %c0_10] : memref<3x192x16xbf16, #tpu.memory_space<vmem>>, vector<1x192x16xbf16>
    %25 = vector.shape_cast %24 : vector<1x192x16xbf16> to vector<192x16xbf16>
    %cst_11 = arith.constant dense<0.000000e+00> : vector<64x16xf32>
    %26 = tpu.matmul %23, %25, %cst_11 {dimension_numbers = #tpu.dot_dimension_numbers<[1], [0], [0], [1], [0, 0, 1, 1], [], []>} : vector<64x192xbf16>, vector<192x16xbf16>, vector<64x16xf32> -> vector<64x16xf32>
    %27 = arith.addf %18, %26 : vector<64x16xf32>
    %c0_12 = arith.constant 0 : index
    %c0_13 = arith.constant 0 : index
    %28 = vector.load %arg4[%c0_12, %c0_13] : memref<1x16xf32, #tpu.memory_space<vmem>>, vector<1x16xf32>
    %29 = vector.broadcast %28 : vector<1x16xf32> to vector<64x16xf32>
    %30 = arith.mulf %27, %29 : vector<64x16xf32>
    %c0_14 = arith.constant 0 : index
    %c0_15 = arith.constant 0 : index
    %31 = vector.load %arg5[%c0_14, %c0_15] : memref<1x16xf32, #tpu.memory_space<vmem>>, vector<1x16xf32>
    %32 = vector.broadcast %31 : vector<1x16xf32> to vector<64x16xf32>
    %33 = arith.addf %30, %32 : vector<64x16xf32>
    %34 = vector.shape_cast %33 : vector<64x16xf32> to vector<8x8x16xf32>
    %35 = arith.truncf %34 : vector<8x8x16xf32> to vector<8x8x16xbf16>
    %c0_16 = arith.constant 0 : index
    %c0_17 = arith.constant 0 : index
    %c0_18 = arith.constant 0 : index
    %c0_19 = arith.constant 0 : index
    %36 = vector.load %arg6[%c0_16, %c0_17, %c0_18, %c0_19] : memref<1x8x8x16xbf16, #tpu.memory_space<vmem>>, vector<1x8x8x16xbf16>
    %37 = vector.shape_cast %36 : vector<1x8x8x16xbf16> to vector<8x8x16xbf16>
    %38 = vector.shape_cast %35 : vector<8x8x16xbf16> to vector<1x8x8x16xbf16>
    tpu.vector_store %arg6[%c0_16, %c0_17, %c0_18, %c0_19], %38 {strides = array<i32>} : memref<1x8x8x16xbf16, #tpu.memory_space<vmem>>, vector<1x8x8x16xbf16>,
    return
  }
  func.func @transform_0(%arg0: i32, %arg1: i32) -> (i32, i32, i32, i32) {
    %c0_i32 = arith.constant 0 : i32
    %c0_i32_0 = arith.constant 0 : i32
    %c0_i32_1 = arith.constant 0 : i32
    %c0_i32_2 = arith.constant 0 : i32
    return %arg0, %c0_i32, %c0_i32_0, %c0_i32_1 : i32, i32, i32, i32
  }
  func.func @transform_1(%arg0: i32, %arg1: i32) -> (i32, i32, i32) {
    %c0_i32 = arith.constant 0 : i32
    %c0_i32_0 = arith.constant 0 : i32
    %c0_i32_1 = arith.constant 0 : i32
    return %c0_i32, %c0_i32_0, %arg1 : i32, i32, i32
  }
  func.func @transform_2(%arg0: i32, %arg1: i32) -> (i32, i32) {
    %c0_i32 = arith.constant 0 : i32
    %c0_i32_0 = arith.constant 0 : i32
    return %c0_i32, %arg1 : i32, i32
  }
  func.func @transform_3(%arg0: i32, %arg1: i32) -> (i32, i32) {
    %c0_i32 = arith.constant 0 : i32
    %c0_i32_0 = arith.constant 0 : i32
    return %c0_i32, %arg1 : i32, i32
  }
  func.func @transform_4(%arg0: i32, %arg1: i32) -> (i32, i32, i32, i32) {
    %c0_i32 = arith.constant 0 : i32
    %c0_i32_0 = arith.constant 0 : i32
    %c0_i32_1 = arith.constant 0 : i32
    return %arg0, %c0_i32, %c0_i32_0, %arg1 : i32, i32, i32, i32
  }
}

module attributes {stable_mosaic.version = 11 : i64} {
  func.func @_cca_kernel(%arg0: i32, %arg1: memref<1x64x16xbf16, #tpu.memory_space<vmem>>, %arg2: memref<16x2xbf16, #tpu.memory_space<vmem>>, %arg3: memref<1x2xf32, #tpu.memory_space<vmem>>, %arg4: memref<16x2xbf16, #tpu.memory_space<vmem>>, %arg5: memref<1x2xf32, #tpu.memory_space<vmem>>, %arg6: memref<16x16xbf16, #tpu.memory_space<vmem>>, %arg7: memref<1x16xf32, #tpu.memory_space<vmem>>, %arg8: memref<1xf32, #tpu.memory_space<smem>>, %arg9: memref<1x64x16xbf16, #tpu.memory_space<vmem>>) attributes {dimension_semantics = [#tpu.dimension_semantics<parallel>], iteration_bounds = array<i64: 2>, scalar_prefetch = 0 : i64, scratch_operands = 0 : i64, tpu.core_type = #tpu.core_type<tc>, window_params = [{transform_indices = @transform_0, window_bounds = array<i64: 1, 64, 16>}, {pipeline_mode = #tpu.pipeline_mode<synchronous>, transform_indices = @transform_1, window_bounds = array<i64: 16, 2>}, {pipeline_mode = #tpu.pipeline_mode<synchronous>, transform_indices = @transform_2, window_bounds = array<i64: 1, 2>}, {pipeline_mode = #tpu.pipeline_mode<synchronous>, transform_indices = @transform_3, window_bounds = array<i64: 16, 2>}, {pipeline_mode = #tpu.pipeline_mode<synchronous>, transform_indices = @transform_4, window_bounds = array<i64: 1, 2>}, {pipeline_mode = #tpu.pipeline_mode<synchronous>, transform_indices = @transform_5, window_bounds = array<i64: 16, 16>}, {pipeline_mode = #tpu.pipeline_mode<synchronous>, transform_indices = @transform_6, window_bounds = array<i64: 1, 16>}, {transform_indices = @transform_7, window_bounds = array<i64: 1>}, {transform_indices = @transform_8, window_bounds = array<i64: 1, 64, 16>}]} {
    %c0 = arith.constant 0 : index
    %c0_0 = arith.constant 0 : index
    %0 = vector.load %arg2[%c0, %c0_0] : memref<16x2xbf16, #tpu.memory_space<vmem>>, vector<16x2xbf16>
    %c0_1 = arith.constant 0 : index
    %c0_2 = arith.constant 0 : index
    %1 = vector.load %arg4[%c0_1, %c0_2] : memref<16x2xbf16, #tpu.memory_space<vmem>>, vector<16x2xbf16>
    %c0_3 = arith.constant 0 : index
    %c0_4 = arith.constant 0 : index
    %2 = vector.load %arg6[%c0_3, %c0_4] : memref<16x16xbf16, #tpu.memory_space<vmem>>, vector<16x16xbf16>
    %c0_5 = arith.constant 0 : index
    %c0_6 = arith.constant 0 : index
    %3 = vector.load %arg3[%c0_5, %c0_6] : memref<1x2xf32, #tpu.memory_space<vmem>>, vector<1x2xf32>
    %c0_7 = arith.constant 0 : index
    %c0_8 = arith.constant 0 : index
    %4 = vector.load %arg5[%c0_7, %c0_8] : memref<1x2xf32, #tpu.memory_space<vmem>>, vector<1x2xf32>
    %c0_9 = arith.constant 0 : index
    %c0_10 = arith.constant 0 : index
    %5 = vector.load %arg7[%c0_9, %c0_10] : memref<1x16xf32, #tpu.memory_space<vmem>>, vector<1x16xf32>
    %c0_11 = arith.constant 0 : index
    %6 = memref.load %arg8[%c0_11] : memref<1xf32, #tpu.memory_space<smem>>
    %7 = tpu.iota {dimensions = array<i32: 1>} : vector<8x8x8xi32>
    %8 = tpu.iota {dimensions = array<i32: 2>} : vector<8x8x8xi32>
    %9 = arith.cmpi eq, %7, %8 : vector<8x8x8xi32>
    %c0_12 = arith.constant 0 : index
    %c0_13 = arith.constant 0 : index
    %c0_14 = arith.constant 0 : index
    %10 = vector.load %arg1[%c0_12, %c0_13, %c0_14] : memref<1x64x16xbf16, #tpu.memory_space<vmem>>, vector<1x64x16xbf16>
    %11 = vector.shape_cast %10 : vector<1x64x16xbf16> to vector<64x16xbf16>
    %12 = arith.extf %11 : vector<64x16xbf16> to vector<64x16xf32>
    %cst = arith.constant -1.000000e+30 : f32
    %c0_i32 = arith.constant 0 : i32
    %13 = arith.truncf %12 : vector<64x16xf32> to vector<64x16xbf16>
    %cst_15 = arith.constant dense<0.000000e+00> : vector<64x2xf32>
    %14 = tpu.matmul %13, %0, %cst_15 {dimension_numbers = #tpu.dot_dimension_numbers<[1], [0], [0], [1], [0, 0, 1, 1], [], []>} : vector<64x16xbf16>, vector<16x2xbf16>, vector<64x2xf32> -> vector<64x2xf32>
    %15 = vector.broadcast %3 : vector<1x2xf32> to vector<64x2xf32>
    %16 = arith.addf %14, %15 : vector<64x2xf32>
    %17 = arith.truncf %16 : vector<64x2xf32> to vector<64x2xbf16>
    %cst_16 = arith.constant dense<0.000000e+00> : vector<64x2xf32>
    %18 = tpu.matmul %13, %1, %cst_16 {dimension_numbers = #tpu.dot_dimension_numbers<[1], [0], [0], [1], [0, 0, 1, 1], [], []>} : vector<64x16xbf16>, vector<16x2xbf16>, vector<64x2xf32> -> vector<64x2xf32>
    %19 = vector.broadcast %4 : vector<1x2xf32> to vector<64x2xf32>
    %20 = arith.addf %18, %19 : vector<64x2xf32>
    %21 = arith.truncf %20 : vector<64x2xf32> to vector<64x2xbf16>
    %cst_17 = arith.constant dense<0.000000e+00> : vector<64x16xf32>
    %22 = tpu.matmul %13, %2, %cst_17 {dimension_numbers = #tpu.dot_dimension_numbers<[1], [0], [0], [1], [0, 0, 1, 1], [], []>} : vector<64x16xbf16>, vector<16x16xbf16>, vector<64x16xf32> -> vector<64x16xf32>
    %23 = vector.broadcast %5 : vector<1x16xf32> to vector<64x16xf32>
    %24 = arith.addf %22, %23 : vector<64x16xf32>
    %25 = arith.truncf %24 : vector<64x16xf32> to vector<64x16xbf16>
    %26 = vector.shape_cast %17 : vector<64x2xbf16> to vector<8x8x2xbf16>
    %27 = vector.shape_cast %21 : vector<64x2xbf16> to vector<8x8x2xbf16>
    %28 = vector.shape_cast %25 : vector<64x16xbf16> to vector<8x8x16xbf16>
    %29 = tpu.transpose %26, [1, 0, 2] : vector<8x8x2xbf16> -> vector<8x8x2xbf16>
    %30 = tpu.transpose %27, [1, 0, 2] : vector<8x8x2xbf16> -> vector<8x8x2xbf16>
    %31 = tpu.transpose %28, [1, 0, 2] : vector<8x8x16xbf16> -> vector<8x8x16xbf16>
    %cst_18 = arith.constant dense<0.000000e+00> : vector<8x8x8xf32>
    %32 = tpu.matmul %29, %30, %cst_18 {dimension_numbers = #tpu.dot_dimension_numbers<[2], [2], [1], [1], [0, 0, 0, 1, 1, 1], [0], [0]>} : vector<8x8x2xbf16>, vector<8x8x2xbf16>, vector<8x8x8xf32> -> vector<8x8x8xf32>
    %33 = vector.broadcast %cst : f32 to vector<8x8x8xf32>
    %34 = arith.select %9, %33, %32 : vector<8x8x8xi1>, vector<8x8x8xf32>
    %cst_19 = arith.constant dense<0.000000e+00> : vector<8x8x8xf32>
    %35 = tpu.matmul %26, %27, %cst_19 {dimension_numbers = #tpu.dot_dimension_numbers<[2], [2], [1], [1], [0, 0, 0, 1, 1, 1], [0], [0]>} : vector<8x8x2xbf16>, vector<8x8x2xbf16>, vector<8x8x8xf32> -> vector<8x8x8xf32>
    %cst_20 = arith.constant dense<0xFF800000> : vector<8x8xf32>
    %36 = vector.multi_reduction <maximumf>, %34, %cst_20 [2] : vector<8x8x8xf32> to vector<8x8xf32>
    %cst_21 = arith.constant dense<0xFF800000> : vector<8x8xf32>
    %37 = vector.multi_reduction <maximumf>, %35, %cst_21 [2] : vector<8x8x8xf32> to vector<8x8xf32>
    %38 = tpu.transpose %36, [1, 0] : vector<8x8xf32> -> vector<8x8xf32>
    %39 = arith.maximumf %37, %38 : vector<8x8xf32>
    %40 = tpu.transpose %39, [1, 0] : vector<8x8xf32> -> vector<8x8xf32>
    %41 = vector.shape_cast %40 : vector<8x8xf32> to vector<8x8x1xf32>
    %42 = vector.broadcast %41 : vector<8x8x1xf32> to vector<8x8x8xf32>
    %43 = arith.subf %34, %42 : vector<8x8x8xf32>
    %44 = math.exp %43 : vector<8x8x8xf32>
    %45 = vector.shape_cast %39 : vector<8x8xf32> to vector<8x8x1xf32>
    %46 = vector.broadcast %45 : vector<8x8x1xf32> to vector<8x8x8xf32>
    %47 = arith.subf %35, %46 : vector<8x8x8xf32>
    %48 = math.exp %47 : vector<8x8x8xf32>
    %cst_22 = arith.constant dense<0.000000e+00> : vector<8x8xf32>
    %49 = vector.multi_reduction <add>, %48, %cst_22 [2] : vector<8x8x8xf32> to vector<8x8xf32>
    %cst_23 = arith.constant dense<0.000000e+00> : vector<8x8xf32>
    %50 = vector.multi_reduction <add>, %44, %cst_23 [2] : vector<8x8x8xf32> to vector<8x8xf32>
    %51 = tpu.transpose %50, [1, 0] : vector<8x8xf32> -> vector<8x8xf32>
    %52 = arith.addf %49, %51 : vector<8x8xf32>
    %53 = tpu.reciprocal %52 {approx = true} : vector<8x8xf32> -> vector<8x8xf32>
    %54 = tpu.transpose %53, [1, 0] : vector<8x8xf32> -> vector<8x8xf32>
    %55 = vector.shape_cast %54 : vector<8x8xf32> to vector<8x8x1xf32>
    %56 = vector.broadcast %55 : vector<8x8x1xf32> to vector<8x8x8xf32>
    %57 = arith.mulf %44, %56 : vector<8x8x8xf32>
    %58 = arith.truncf %57 : vector<8x8x8xf32> to vector<8x8x8xbf16>
    %59 = vector.shape_cast %53 : vector<8x8xf32> to vector<8x8x1xf32>
    %60 = vector.broadcast %59 : vector<8x8x1xf32> to vector<8x8x8xf32>
    %61 = arith.mulf %48, %60 : vector<8x8x8xf32>
    %62 = arith.truncf %61 : vector<8x8x8xf32> to vector<8x8x8xbf16>
    %cst_24 = arith.constant dense<0.000000e+00> : vector<8x8x16xf32>
    %63 = tpu.matmul %58, %31, %cst_24 {dimension_numbers = #tpu.dot_dimension_numbers<[2], [1], [1], [2], [0, 0, 0, 1, 1, 2], [0], [0]>} : vector<8x8x8xbf16>, vector<8x8x16xbf16>, vector<8x8x16xf32> -> vector<8x8x16xf32>
    %cst_25 = arith.constant dense<0.000000e+00> : vector<8x8x16xf32>
    %64 = tpu.matmul %62, %28, %cst_25 {dimension_numbers = #tpu.dot_dimension_numbers<[2], [1], [1], [2], [0, 0, 0, 1, 1, 2], [0], [0]>} : vector<8x8x8xbf16>, vector<8x8x16xbf16>, vector<8x8x16xf32> -> vector<8x8x16xf32>
    %65 = tpu.transpose %63, [1, 0, 2] : vector<8x8x16xf32> -> vector<8x8x16xf32>
    %66 = arith.addf %65, %64 : vector<8x8x16xf32>
    %67 = vector.shape_cast %66 : vector<8x8x16xf32> to vector<64x16xf32>
    %68 = vector.broadcast %6 : f32 to vector<64x16xf32>
    %69 = arith.mulf %68, %67 : vector<64x16xf32>
    %70 = arith.addf %69, %12 : vector<64x16xf32>
    %c1_i32 = arith.constant 1 : i32
    %71 = arith.truncf %70 : vector<64x16xf32> to vector<64x16xbf16>
    %cst_26 = arith.constant dense<0.000000e+00> : vector<64x2xf32>
    %72 = tpu.matmul %71, %0, %cst_26 {dimension_numbers = #tpu.dot_dimension_numbers<[1], [0], [0], [1], [0, 0, 1, 1], [], []>} : vector<64x16xbf16>, vector<16x2xbf16>, vector<64x2xf32> -> vector<64x2xf32>
    %73 = vector.broadcast %3 : vector<1x2xf32> to vector<64x2xf32>
    %74 = arith.addf %72, %73 : vector<64x2xf32>
    %75 = arith.truncf %74 : vector<64x2xf32> to vector<64x2xbf16>
    %cst_27 = arith.constant dense<0.000000e+00> : vector<64x2xf32>
    %76 = tpu.matmul %71, %1, %cst_27 {dimension_numbers = #tpu.dot_dimension_numbers<[1], [0], [0], [1], [0, 0, 1, 1], [], []>} : vector<64x16xbf16>, vector<16x2xbf16>, vector<64x2xf32> -> vector<64x2xf32>
    %77 = vector.broadcast %4 : vector<1x2xf32> to vector<64x2xf32>
    %78 = arith.addf %76, %77 : vector<64x2xf32>
    %79 = arith.truncf %78 : vector<64x2xf32> to vector<64x2xbf16>
    %cst_28 = arith.constant dense<0.000000e+00> : vector<64x16xf32>
    %80 = tpu.matmul %71, %2, %cst_28 {dimension_numbers = #tpu.dot_dimension_numbers<[1], [0], [0], [1], [0, 0, 1, 1], [], []>} : vector<64x16xbf16>, vector<16x16xbf16>, vector<64x16xf32> -> vector<64x16xf32>
    %81 = vector.broadcast %5 : vector<1x16xf32> to vector<64x16xf32>
    %82 = arith.addf %80, %81 : vector<64x16xf32>
    %83 = arith.truncf %82 : vector<64x16xf32> to vector<64x16xbf16>
    %84 = vector.shape_cast %75 : vector<64x2xbf16> to vector<8x8x2xbf16>
    %85 = vector.shape_cast %79 : vector<64x2xbf16> to vector<8x8x2xbf16>
    %86 = vector.shape_cast %83 : vector<64x16xbf16> to vector<8x8x16xbf16>
    %87 = tpu.transpose %84, [1, 0, 2] : vector<8x8x2xbf16> -> vector<8x8x2xbf16>
    %88 = tpu.transpose %85, [1, 0, 2] : vector<8x8x2xbf16> -> vector<8x8x2xbf16>
    %89 = tpu.transpose %86, [1, 0, 2] : vector<8x8x16xbf16> -> vector<8x8x16xbf16>
    %cst_29 = arith.constant dense<0.000000e+00> : vector<8x8x8xf32>
    %90 = tpu.matmul %87, %88, %cst_29 {dimension_numbers = #tpu.dot_dimension_numbers<[2], [2], [1], [1], [0, 0, 0, 1, 1, 1], [0], [0]>} : vector<8x8x2xbf16>, vector<8x8x2xbf16>, vector<8x8x8xf32> -> vector<8x8x8xf32>
    %91 = vector.broadcast %cst : f32 to vector<8x8x8xf32>
    %92 = arith.select %9, %91, %90 : vector<8x8x8xi1>, vector<8x8x8xf32>
    %cst_30 = arith.constant dense<0.000000e+00> : vector<8x8x8xf32>
    %93 = tpu.matmul %84, %85, %cst_30 {dimension_numbers = #tpu.dot_dimension_numbers<[2], [2], [1], [1], [0, 0, 0, 1, 1, 1], [0], [0]>} : vector<8x8x2xbf16>, vector<8x8x2xbf16>, vector<8x8x8xf32> -> vector<8x8x8xf32>
    %cst_31 = arith.constant dense<0xFF800000> : vector<8x8xf32>
    %94 = vector.multi_reduction <maximumf>, %92, %cst_31 [2] : vector<8x8x8xf32> to vector<8x8xf32>
    %cst_32 = arith.constant dense<0xFF800000> : vector<8x8xf32>
    %95 = vector.multi_reduction <maximumf>, %93, %cst_32 [2] : vector<8x8x8xf32> to vector<8x8xf32>
    %96 = tpu.transpose %94, [1, 0] : vector<8x8xf32> -> vector<8x8xf32>
    %97 = arith.maximumf %95, %96 : vector<8x8xf32>
    %98 = tpu.transpose %97, [1, 0] : vector<8x8xf32> -> vector<8x8xf32>
    %99 = vector.shape_cast %98 : vector<8x8xf32> to vector<8x8x1xf32>
    %100 = vector.broadcast %99 : vector<8x8x1xf32> to vector<8x8x8xf32>
    %101 = arith.subf %92, %100 : vector<8x8x8xf32>
    %102 = math.exp %101 : vector<8x8x8xf32>
    %103 = vector.shape_cast %97 : vector<8x8xf32> to vector<8x8x1xf32>
    %104 = vector.broadcast %103 : vector<8x8x1xf32> to vector<8x8x8xf32>
    %105 = arith.subf %93, %104 : vector<8x8x8xf32>
    %106 = math.exp %105 : vector<8x8x8xf32>
    %cst_33 = arith.constant dense<0.000000e+00> : vector<8x8xf32>
    %107 = vector.multi_reduction <add>, %106, %cst_33 [2] : vector<8x8x8xf32> to vector<8x8xf32>
    %cst_34 = arith.constant dense<0.000000e+00> : vector<8x8xf32>
    %108 = vector.multi_reduction <add>, %102, %cst_34 [2] : vector<8x8x8xf32> to vector<8x8xf32>
    %109 = tpu.transpose %108, [1, 0] : vector<8x8xf32> -> vector<8x8xf32>
    %110 = arith.addf %107, %109 : vector<8x8xf32>
    %111 = tpu.reciprocal %110 {approx = true} : vector<8x8xf32> -> vector<8x8xf32>
    %112 = tpu.transpose %111, [1, 0] : vector<8x8xf32> -> vector<8x8xf32>
    %113 = vector.shape_cast %112 : vector<8x8xf32> to vector<8x8x1xf32>
    %114 = vector.broadcast %113 : vector<8x8x1xf32> to vector<8x8x8xf32>
    %115 = arith.mulf %102, %114 : vector<8x8x8xf32>
    %116 = arith.truncf %115 : vector<8x8x8xf32> to vector<8x8x8xbf16>
    %117 = vector.shape_cast %111 : vector<8x8xf32> to vector<8x8x1xf32>
    %118 = vector.broadcast %117 : vector<8x8x1xf32> to vector<8x8x8xf32>
    %119 = arith.mulf %106, %118 : vector<8x8x8xf32>
    %120 = arith.truncf %119 : vector<8x8x8xf32> to vector<8x8x8xbf16>
    %cst_35 = arith.constant dense<0.000000e+00> : vector<8x8x16xf32>
    %121 = tpu.matmul %116, %89, %cst_35 {dimension_numbers = #tpu.dot_dimension_numbers<[2], [1], [1], [2], [0, 0, 0, 1, 1, 2], [0], [0]>} : vector<8x8x8xbf16>, vector<8x8x16xbf16>, vector<8x8x16xf32> -> vector<8x8x16xf32>
    %cst_36 = arith.constant dense<0.000000e+00> : vector<8x8x16xf32>
    %122 = tpu.matmul %120, %86, %cst_36 {dimension_numbers = #tpu.dot_dimension_numbers<[2], [1], [1], [2], [0, 0, 0, 1, 1, 2], [0], [0]>} : vector<8x8x8xbf16>, vector<8x8x16xbf16>, vector<8x8x16xf32> -> vector<8x8x16xf32>
    %123 = tpu.transpose %121, [1, 0, 2] : vector<8x8x16xf32> -> vector<8x8x16xf32>
    %124 = arith.addf %123, %122 : vector<8x8x16xf32>
    %125 = vector.shape_cast %124 : vector<8x8x16xf32> to vector<64x16xf32>
    %126 = vector.broadcast %6 : f32 to vector<64x16xf32>
    %127 = arith.mulf %126, %125 : vector<64x16xf32>
    %128 = arith.addf %127, %70 : vector<64x16xf32>
    %129 = arith.truncf %128 : vector<64x16xf32> to vector<64x16xbf16>
    %c0_37 = arith.constant 0 : index
    %c0_38 = arith.constant 0 : index
    %c0_39 = arith.constant 0 : index
    %130 = vector.load %arg9[%c0_37, %c0_38, %c0_39] : memref<1x64x16xbf16, #tpu.memory_space<vmem>>, vector<1x64x16xbf16>
    %131 = vector.shape_cast %130 : vector<1x64x16xbf16> to vector<64x16xbf16>
    %132 = vector.shape_cast %129 : vector<64x16xbf16> to vector<1x64x16xbf16>
    tpu.vector_store %arg9[%c0_37, %c0_38, %c0_39], %132 {strides = array<i32>} : memref<1x64x16xbf16, #tpu.memory_space<vmem>>, vector<1x64x16xbf16>,
    return
  }
  func.func @transform_0(%arg0: i32) -> (i32, i32, i32) {
    %c0_i32 = arith.constant 0 : i32
    %c0_i32_0 = arith.constant 0 : i32
    %c0_i32_1 = arith.constant 0 : i32
    return %arg0, %c0_i32, %c0_i32_0 : i32, i32, i32
  }
  func.func @transform_1(%arg0: i32) -> (i32, i32) {
    %c0_i32 = arith.constant 0 : i32
    %c0_i32_0 = arith.constant 0 : i32
    %c0_i32_1 = arith.constant 0 : i32
    return %c0_i32, %c0_i32_0 : i32, i32
  }
  func.func @transform_2(%arg0: i32) -> (i32, i32) {
    %c0_i32 = arith.constant 0 : i32
    %c0_i32_0 = arith.constant 0 : i32
    %c0_i32_1 = arith.constant 0 : i32
    return %c0_i32, %c0_i32_0 : i32, i32
  }
  func.func @transform_3(%arg0: i32) -> (i32, i32) {
    %c0_i32 = arith.constant 0 : i32
    %c0_i32_0 = arith.constant 0 : i32
    %c0_i32_1 = arith.constant 0 : i32
    return %c0_i32, %c0_i32_0 : i32, i32
  }
  func.func @transform_4(%arg0: i32) -> (i32, i32) {
    %c0_i32 = arith.constant 0 : i32
    %c0_i32_0 = arith.constant 0 : i32
    %c0_i32_1 = arith.constant 0 : i32
    return %c0_i32, %c0_i32_0 : i32, i32
  }
  func.func @transform_5(%arg0: i32) -> (i32, i32) {
    %c0_i32 = arith.constant 0 : i32
    %c0_i32_0 = arith.constant 0 : i32
    %c0_i32_1 = arith.constant 0 : i32
    return %c0_i32, %c0_i32_0 : i32, i32
  }
  func.func @transform_6(%arg0: i32) -> (i32, i32) {
    %c0_i32 = arith.constant 0 : i32
    %c0_i32_0 = arith.constant 0 : i32
    %c0_i32_1 = arith.constant 0 : i32
    return %c0_i32, %c0_i32_0 : i32, i32
  }
  func.func @transform_7(%arg0: i32) -> i32 {
    %c0_i32 = arith.constant 0 : i32
    %c0_i32_0 = arith.constant 0 : i32
    return %c0_i32 : i32
  }
  func.func @transform_8(%arg0: i32) -> (i32, i32, i32) {
    %c0_i32 = arith.constant 0 : i32
    %c0_i32_0 = arith.constant 0 : i32
    %c0_i32_1 = arith.constant 0 : i32
    return %arg0, %c0_i32, %c0_i32_0 : i32, i32, i32
  }
}

module attributes {stable_mosaic.version = 11 : i64} {
  func.func @_conv3x3_kernel(%arg0: i32, %arg1: i32, %arg2: memref<1x10x10x16xbf16, #tpu.memory_space<vmem>>, %arg3: memref<3x48x16xbf16, #tpu.memory_space<vmem>>, %arg4: memref<1x16xf32, #tpu.memory_space<vmem>>, %arg5: memref<1x16xf32, #tpu.memory_space<vmem>>, %arg6: memref<1x8x8x16xbf16, #tpu.memory_space<vmem>>) attributes {dimension_semantics = [#tpu.dimension_semantics<parallel>, #tpu.dimension_semantics<parallel>], iteration_bounds = array<i64: 2, 1>, scalar_prefetch = 0 : i64, scratch_operands = 0 : i64, tpu.core_type = #tpu.core_type<tc>, window_params = [{transform_indices = @transform_0, window_bounds = array<i64: 1, 10, 10, 16>}, {transform_indices = @transform_1, window_bounds = array<i64: 3, 48, 16>}, {transform_indices = @transform_2, window_bounds = array<i64: 1, 16>}, {transform_indices = @transform_3, window_bounds = array<i64: 1, 16>}, {transform_indices = @transform_4, window_bounds = array<i64: 1, 8, 8, 16>}]} {
    %c0 = arith.constant 0 : index
    %c0_0 = arith.constant 0 : index
    %c0_1 = arith.constant 0 : index
    %c0_2 = arith.constant 0 : index
    %0 = vector.load %arg2[%c0, %c0_0, %c0_1, %c0_2] : memref<1x10x10x16xbf16, #tpu.memory_space<vmem>>, vector<1x10x10x16xbf16>
    %1 = vector.shape_cast %0 : vector<1x10x10x16xbf16> to vector<10x10x16xbf16>
    %2 = vector.extract_strided_slice %1 {offsets = [0, 0, 0], sizes = [8, 8, 16], strides = [1, 1, 1]} : vector<10x10x16xbf16> to vector<8x8x16xbf16>
    %3 = vector.extract_strided_slice %1 {offsets = [0, 1, 0], sizes = [8, 8, 16], strides = [1, 1, 1]} : vector<10x10x16xbf16> to vector<8x8x16xbf16>
    %4 = vector.extract_strided_slice %1 {offsets = [0, 2, 0], sizes = [8, 8, 16], strides = [1, 1, 1]} : vector<10x10x16xbf16> to vector<8x8x16xbf16>
    %5 = tpu.concatenate %2, %3, %4 in 2 : vector<8x8x16xbf16>, vector<8x8x16xbf16>, vector<8x8x16xbf16> -> vector<8x8x48xbf16>
    %6 = vector.shape_cast %5 : vector<8x8x48xbf16> to vector<64x48xbf16>
    %c0_3 = arith.constant 0 : index
    %c0_4 = arith.constant 0 : index
    %c0_5 = arith.constant 0 : index
    %7 = vector.load %arg3[%c0_3, %c0_4, %c0_5] : memref<3x48x16xbf16, #tpu.memory_space<vmem>>, vector<1x48x16xbf16>
    %8 = vector.shape_cast %7 : vector<1x48x16xbf16> to vector<48x16xbf16>
    %cst = arith.constant dense<0.000000e+00> : vector<64x16xf32>
    %9 = tpu.matmul %6, %8, %cst {dimension_numbers = #tpu.dot_dimension_numbers<[1], [0], [0], [1], [0, 0, 1, 1], [], []>} : vector<64x48xbf16>, vector<48x16xbf16>, vector<64x16xf32> -> vector<64x16xf32>
    %10 = vector.extract_strided_slice %1 {offsets = [1, 0, 0], sizes = [8, 8, 16], strides = [1, 1, 1]} : vector<10x10x16xbf16> to vector<8x8x16xbf16>
    %11 = vector.extract_strided_slice %1 {offsets = [1, 1, 0], sizes = [8, 8, 16], strides = [1, 1, 1]} : vector<10x10x16xbf16> to vector<8x8x16xbf16>
    %12 = vector.extract_strided_slice %1 {offsets = [1, 2, 0], sizes = [8, 8, 16], strides = [1, 1, 1]} : vector<10x10x16xbf16> to vector<8x8x16xbf16>
    %13 = tpu.concatenate %10, %11, %12 in 2 : vector<8x8x16xbf16>, vector<8x8x16xbf16>, vector<8x8x16xbf16> -> vector<8x8x48xbf16>
    %14 = vector.shape_cast %13 : vector<8x8x48xbf16> to vector<64x48xbf16>
    %c1 = arith.constant 1 : index
    %c0_6 = arith.constant 0 : index
    %c0_7 = arith.constant 0 : index
    %15 = vector.load %arg3[%c1, %c0_6, %c0_7] : memref<3x48x16xbf16, #tpu.memory_space<vmem>>, vector<1x48x16xbf16>
    %16 = vector.shape_cast %15 : vector<1x48x16xbf16> to vector<48x16xbf16>
    %cst_8 = arith.constant dense<0.000000e+00> : vector<64x16xf32>
    %17 = tpu.matmul %14, %16, %cst_8 {dimension_numbers = #tpu.dot_dimension_numbers<[1], [0], [0], [1], [0, 0, 1, 1], [], []>} : vector<64x48xbf16>, vector<48x16xbf16>, vector<64x16xf32> -> vector<64x16xf32>
    %18 = arith.addf %9, %17 : vector<64x16xf32>
    %19 = vector.extract_strided_slice %1 {offsets = [2, 0, 0], sizes = [8, 8, 16], strides = [1, 1, 1]} : vector<10x10x16xbf16> to vector<8x8x16xbf16>
    %20 = vector.extract_strided_slice %1 {offsets = [2, 1, 0], sizes = [8, 8, 16], strides = [1, 1, 1]} : vector<10x10x16xbf16> to vector<8x8x16xbf16>
    %21 = vector.extract_strided_slice %1 {offsets = [2, 2, 0], sizes = [8, 8, 16], strides = [1, 1, 1]} : vector<10x10x16xbf16> to vector<8x8x16xbf16>
    %22 = tpu.concatenate %19, %20, %21 in 2 : vector<8x8x16xbf16>, vector<8x8x16xbf16>, vector<8x8x16xbf16> -> vector<8x8x48xbf16>
    %23 = vector.shape_cast %22 : vector<8x8x48xbf16> to vector<64x48xbf16>
    %c2 = arith.constant 2 : index
    %c0_9 = arith.constant 0 : index
    %c0_10 = arith.constant 0 : index
    %24 = vector.load %arg3[%c2, %c0_9, %c0_10] : memref<3x48x16xbf16, #tpu.memory_space<vmem>>, vector<1x48x16xbf16>
    %25 = vector.shape_cast %24 : vector<1x48x16xbf16> to vector<48x16xbf16>
    %cst_11 = arith.constant dense<0.000000e+00> : vector<64x16xf32>
    %26 = tpu.matmul %23, %25, %cst_11 {dimension_numbers = #tpu.dot_dimension_numbers<[1], [0], [0], [1], [0, 0, 1, 1], [], []>} : vector<64x48xbf16>, vector<48x16xbf16>, vector<64x16xf32> -> vector<64x16xf32>
    %27 = arith.addf %18, %26 : vector<64x16xf32>
    %c0_12 = arith.constant 0 : index
    %c0_13 = arith.constant 0 : index
    %28 = vector.load %arg4[%c0_12, %c0_13] : memref<1x16xf32, #tpu.memory_space<vmem>>, vector<1x16xf32>
    %29 = vector.broadcast %28 : vector<1x16xf32> to vector<64x16xf32>
    %30 = arith.mulf %27, %29 : vector<64x16xf32>
    %c0_14 = arith.constant 0 : index
    %c0_15 = arith.constant 0 : index
    %31 = vector.load %arg5[%c0_14, %c0_15] : memref<1x16xf32, #tpu.memory_space<vmem>>, vector<1x16xf32>
    %32 = vector.broadcast %31 : vector<1x16xf32> to vector<64x16xf32>
    %33 = arith.addf %30, %32 : vector<64x16xf32>
    %34 = vector.shape_cast %33 : vector<64x16xf32> to vector<8x8x16xf32>
    %35 = arith.truncf %34 : vector<8x8x16xf32> to vector<8x8x16xbf16>
    %c0_16 = arith.constant 0 : index
    %c0_17 = arith.constant 0 : index
    %c0_18 = arith.constant 0 : index
    %c0_19 = arith.constant 0 : index
    %36 = vector.load %arg6[%c0_16, %c0_17, %c0_18, %c0_19] : memref<1x8x8x16xbf16, #tpu.memory_space<vmem>>, vector<1x8x8x16xbf16>
    %37 = vector.shape_cast %36 : vector<1x8x8x16xbf16> to vector<8x8x16xbf16>
    %38 = vector.shape_cast %35 : vector<8x8x16xbf16> to vector<1x8x8x16xbf16>
    tpu.vector_store %arg6[%c0_16, %c0_17, %c0_18, %c0_19], %38 {strides = array<i32>} : memref<1x8x8x16xbf16, #tpu.memory_space<vmem>>, vector<1x8x8x16xbf16>,
    return
  }
  func.func @transform_0(%arg0: i32, %arg1: i32) -> (i32, i32, i32, i32) {
    %c0_i32 = arith.constant 0 : i32
    %c0_i32_0 = arith.constant 0 : i32
    %c0_i32_1 = arith.constant 0 : i32
    %c0_i32_2 = arith.constant 0 : i32
    return %arg0, %c0_i32, %c0_i32_0, %c0_i32_1 : i32, i32, i32, i32
  }
  func.func @transform_1(%arg0: i32, %arg1: i32) -> (i32, i32, i32) {
    %c0_i32 = arith.constant 0 : i32
    %c0_i32_0 = arith.constant 0 : i32
    %c0_i32_1 = arith.constant 0 : i32
    return %c0_i32, %c0_i32_0, %arg1 : i32, i32, i32
  }
  func.func @transform_2(%arg0: i32, %arg1: i32) -> (i32, i32) {
    %c0_i32 = arith.constant 0 : i32
    %c0_i32_0 = arith.constant 0 : i32
    return %c0_i32, %arg1 : i32, i32
  }
  func.func @transform_3(%arg0: i32, %arg1: i32) -> (i32, i32) {
    %c0_i32 = arith.constant 0 : i32
    %c0_i32_0 = arith.constant 0 : i32
    return %c0_i32, %arg1 : i32, i32
  }
  func.func @transform_4(%arg0: i32, %arg1: i32) -> (i32, i32, i32, i32) {
    %c0_i32 = arith.constant 0 : i32
    %c0_i32_0 = arith.constant 0 : i32
    %c0_i32_1 = arith.constant 0 : i32
    return %arg0, %c0_i32, %c0_i32_0, %arg1 : i32, i32, i32, i32
  }
}

module attributes {stable_mosaic.version = 11 : i64} {
  func.func @_conv3x3_kernel(%arg0: i32, %arg1: i32, %arg2: memref<1x10x10x64xbf16, #tpu.memory_space<vmem>>, %arg3: memref<1x10x10x16xbf16, #tpu.memory_space<vmem>>, %arg4: memref<3x192x5xbf16, #tpu.memory_space<vmem>>, %arg5: memref<3x48x5xbf16, #tpu.memory_space<vmem>>, %arg6: memref<1x5xf32, #tpu.memory_space<vmem>>, %arg7: memref<1x5xf32, #tpu.memory_space<vmem>>, %arg8: memref<1x8x8x5xbf16, #tpu.memory_space<vmem>>) attributes {dimension_semantics = [#tpu.dimension_semantics<parallel>, #tpu.dimension_semantics<parallel>], iteration_bounds = array<i64: 2, 1>, scalar_prefetch = 0 : i64, scratch_operands = 0 : i64, tpu.core_type = #tpu.core_type<tc>, window_params = [{transform_indices = @transform_0, window_bounds = array<i64: 1, 10, 10, 64>}, {transform_indices = @transform_1, window_bounds = array<i64: 1, 10, 10, 16>}, {transform_indices = @transform_2, window_bounds = array<i64: 3, 192, 5>}, {transform_indices = @transform_3, window_bounds = array<i64: 3, 48, 5>}, {transform_indices = @transform_4, window_bounds = array<i64: 1, 5>}, {transform_indices = @transform_5, window_bounds = array<i64: 1, 5>}, {transform_indices = @transform_6, window_bounds = array<i64: 1, 8, 8, 5>}]} {
    %c0 = arith.constant 0 : index
    %c0_0 = arith.constant 0 : index
    %c0_1 = arith.constant 0 : index
    %c0_2 = arith.constant 0 : index
    %0 = vector.load %arg2[%c0, %c0_0, %c0_1, %c0_2] : memref<1x10x10x64xbf16, #tpu.memory_space<vmem>>, vector<1x10x10x64xbf16>
    %1 = vector.shape_cast %0 : vector<1x10x10x64xbf16> to vector<10x10x64xbf16>
    %2 = vector.extract_strided_slice %1 {offsets = [0, 0, 0], sizes = [8, 8, 64], strides = [1, 1, 1]} : vector<10x10x64xbf16> to vector<8x8x64xbf16>
    %3 = vector.extract_strided_slice %1 {offsets = [0, 1, 0], sizes = [8, 8, 64], strides = [1, 1, 1]} : vector<10x10x64xbf16> to vector<8x8x64xbf16>
    %4 = vector.extract_strided_slice %1 {offsets = [0, 2, 0], sizes = [8, 8, 64], strides = [1, 1, 1]} : vector<10x10x64xbf16> to vector<8x8x64xbf16>
    %5 = tpu.concatenate %2, %3, %4 in 2 : vector<8x8x64xbf16>, vector<8x8x64xbf16>, vector<8x8x64xbf16> -> vector<8x8x192xbf16>
    %6 = vector.shape_cast %5 : vector<8x8x192xbf16> to vector<64x192xbf16>
    %c0_3 = arith.constant 0 : index
    %c0_4 = arith.constant 0 : index
    %c0_5 = arith.constant 0 : index
    %7 = vector.load %arg4[%c0_3, %c0_4, %c0_5] : memref<3x192x5xbf16, #tpu.memory_space<vmem>>, vector<1x192x5xbf16>
    %8 = vector.shape_cast %7 : vector<1x192x5xbf16> to vector<192x5xbf16>
    %cst = arith.constant dense<0.000000e+00> : vector<64x5xf32>
    %9 = tpu.matmul %6, %8, %cst {dimension_numbers = #tpu.dot_dimension_numbers<[1], [0], [0], [1], [0, 0, 1, 1], [], []>} : vector<64x192xbf16>, vector<192x5xbf16>, vector<64x5xf32> -> vector<64x5xf32>
    %10 = vector.extract_strided_slice %1 {offsets = [1, 0, 0], sizes = [8, 8, 64], strides = [1, 1, 1]} : vector<10x10x64xbf16> to vector<8x8x64xbf16>
    %11 = vector.extract_strided_slice %1 {offsets = [1, 1, 0], sizes = [8, 8, 64], strides = [1, 1, 1]} : vector<10x10x64xbf16> to vector<8x8x64xbf16>
    %12 = vector.extract_strided_slice %1 {offsets = [1, 2, 0], sizes = [8, 8, 64], strides = [1, 1, 1]} : vector<10x10x64xbf16> to vector<8x8x64xbf16>
    %13 = tpu.concatenate %10, %11, %12 in 2 : vector<8x8x64xbf16>, vector<8x8x64xbf16>, vector<8x8x64xbf16> -> vector<8x8x192xbf16>
    %14 = vector.shape_cast %13 : vector<8x8x192xbf16> to vector<64x192xbf16>
    %c1 = arith.constant 1 : index
    %c0_6 = arith.constant 0 : index
    %c0_7 = arith.constant 0 : index
    %15 = vector.load %arg4[%c1, %c0_6, %c0_7] : memref<3x192x5xbf16, #tpu.memory_space<vmem>>, vector<1x192x5xbf16>
    %16 = vector.shape_cast %15 : vector<1x192x5xbf16> to vector<192x5xbf16>
    %cst_8 = arith.constant dense<0.000000e+00> : vector<64x5xf32>
    %17 = tpu.matmul %14, %16, %cst_8 {dimension_numbers = #tpu.dot_dimension_numbers<[1], [0], [0], [1], [0, 0, 1, 1], [], []>} : vector<64x192xbf16>, vector<192x5xbf16>, vector<64x5xf32> -> vector<64x5xf32>
    %18 = arith.addf %9, %17 : vector<64x5xf32>
    %19 = vector.extract_strided_slice %1 {offsets = [2, 0, 0], sizes = [8, 8, 64], strides = [1, 1, 1]} : vector<10x10x64xbf16> to vector<8x8x64xbf16>
    %20 = vector.extract_strided_slice %1 {offsets = [2, 1, 0], sizes = [8, 8, 64], strides = [1, 1, 1]} : vector<10x10x64xbf16> to vector<8x8x64xbf16>
    %21 = vector.extract_strided_slice %1 {offsets = [2, 2, 0], sizes = [8, 8, 64], strides = [1, 1, 1]} : vector<10x10x64xbf16> to vector<8x8x64xbf16>
    %22 = tpu.concatenate %19, %20, %21 in 2 : vector<8x8x64xbf16>, vector<8x8x64xbf16>, vector<8x8x64xbf16> -> vector<8x8x192xbf16>
    %23 = vector.shape_cast %22 : vector<8x8x192xbf16> to vector<64x192xbf16>
    %c2 = arith.constant 2 : index
    %c0_9 = arith.constant 0 : index
    %c0_10 = arith.constant 0 : index
    %24 = vector.load %arg4[%c2, %c0_9, %c0_10] : memref<3x192x5xbf16, #tpu.memory_space<vmem>>, vector<1x192x5xbf16>
    %25 = vector.shape_cast %24 : vector<1x192x5xbf16> to vector<192x5xbf16>
    %cst_11 = arith.constant dense<0.000000e+00> : vector<64x5xf32>
    %26 = tpu.matmul %23, %25, %cst_11 {dimension_numbers = #tpu.dot_dimension_numbers<[1], [0], [0], [1], [0, 0, 1, 1], [], []>} : vector<64x192xbf16>, vector<192x5xbf16>, vector<64x5xf32> -> vector<64x5xf32>
    %27 = arith.addf %18, %26 : vector<64x5xf32>
    %c0_12 = arith.constant 0 : index
    %c0_13 = arith.constant 0 : index
    %c0_14 = arith.constant 0 : index
    %c0_15 = arith.constant 0 : index
    %28 = vector.load %arg3[%c0_12, %c0_13, %c0_14, %c0_15] : memref<1x10x10x16xbf16, #tpu.memory_space<vmem>>, vector<1x10x10x16xbf16>
    %29 = vector.shape_cast %28 : vector<1x10x10x16xbf16> to vector<10x10x16xbf16>
    %30 = vector.extract_strided_slice %29 {offsets = [0, 0, 0], sizes = [8, 8, 16], strides = [1, 1, 1]} : vector<10x10x16xbf16> to vector<8x8x16xbf16>
    %31 = vector.extract_strided_slice %29 {offsets = [0, 1, 0], sizes = [8, 8, 16], strides = [1, 1, 1]} : vector<10x10x16xbf16> to vector<8x8x16xbf16>
    %32 = vector.extract_strided_slice %29 {offsets = [0, 2, 0], sizes = [8, 8, 16], strides = [1, 1, 1]} : vector<10x10x16xbf16> to vector<8x8x16xbf16>
    %33 = tpu.concatenate %30, %31, %32 in 2 : vector<8x8x16xbf16>, vector<8x8x16xbf16>, vector<8x8x16xbf16> -> vector<8x8x48xbf16>
    %34 = vector.shape_cast %33 : vector<8x8x48xbf16> to vector<64x48xbf16>
    %c0_16 = arith.constant 0 : index
    %c0_17 = arith.constant 0 : index
    %c0_18 = arith.constant 0 : index
    %35 = vector.load %arg5[%c0_16, %c0_17, %c0_18] : memref<3x48x5xbf16, #tpu.memory_space<vmem>>, vector<1x48x5xbf16>
    %36 = vector.shape_cast %35 : vector<1x48x5xbf16> to vector<48x5xbf16>
    %cst_19 = arith.constant dense<0.000000e+00> : vector<64x5xf32>
    %37 = tpu.matmul %34, %36, %cst_19 {dimension_numbers = #tpu.dot_dimension_numbers<[1], [0], [0], [1], [0, 0, 1, 1], [], []>} : vector<64x48xbf16>, vector<48x5xbf16>, vector<64x5xf32> -> vector<64x5xf32>
    %38 = arith.addf %27, %37 : vector<64x5xf32>
    %39 = vector.extract_strided_slice %29 {offsets = [1, 0, 0], sizes = [8, 8, 16], strides = [1, 1, 1]} : vector<10x10x16xbf16> to vector<8x8x16xbf16>
    %40 = vector.extract_strided_slice %29 {offsets = [1, 1, 0], sizes = [8, 8, 16], strides = [1, 1, 1]} : vector<10x10x16xbf16> to vector<8x8x16xbf16>
    %41 = vector.extract_strided_slice %29 {offsets = [1, 2, 0], sizes = [8, 8, 16], strides = [1, 1, 1]} : vector<10x10x16xbf16> to vector<8x8x16xbf16>
    %42 = tpu.concatenate %39, %40, %41 in 2 : vector<8x8x16xbf16>, vector<8x8x16xbf16>, vector<8x8x16xbf16> -> vector<8x8x48xbf16>
    %43 = vector.shape_cast %42 : vector<8x8x48xbf16> to vector<64x48xbf16>
    %c1_20 = arith.constant 1 : index
    %c0_21 = arith.constant 0 : index
    %c0_22 = arith.constant 0 : index
    %44 = vector.load %arg5[%c1_20, %c0_21, %c0_22] : memref<3x48x5xbf16, #tpu.memory_space<vmem>>, vector<1x48x5xbf16>
    %45 = vector.shape_cast %44 : vector<1x48x5xbf16> to vector<48x5xbf16>
    %cst_23 = arith.constant dense<0.000000e+00> : vector<64x5xf32>
    %46 = tpu.matmul %43, %45, %cst_23 {dimension_numbers = #tpu.dot_dimension_numbers<[1], [0], [0], [1], [0, 0, 1, 1], [], []>} : vector<64x48xbf16>, vector<48x5xbf16>, vector<64x5xf32> -> vector<64x5xf32>
    %47 = arith.addf %38, %46 : vector<64x5xf32>
    %48 = vector.extract_strided_slice %29 {offsets = [2, 0, 0], sizes = [8, 8, 16], strides = [1, 1, 1]} : vector<10x10x16xbf16> to vector<8x8x16xbf16>
    %49 = vector.extract_strided_slice %29 {offsets = [2, 1, 0], sizes = [8, 8, 16], strides = [1, 1, 1]} : vector<10x10x16xbf16> to vector<8x8x16xbf16>
    %50 = vector.extract_strided_slice %29 {offsets = [2, 2, 0], sizes = [8, 8, 16], strides = [1, 1, 1]} : vector<10x10x16xbf16> to vector<8x8x16xbf16>
    %51 = tpu.concatenate %48, %49, %50 in 2 : vector<8x8x16xbf16>, vector<8x8x16xbf16>, vector<8x8x16xbf16> -> vector<8x8x48xbf16>
    %52 = vector.shape_cast %51 : vector<8x8x48xbf16> to vector<64x48xbf16>
    %c2_24 = arith.constant 2 : index
    %c0_25 = arith.constant 0 : index
    %c0_26 = arith.constant 0 : index
    %53 = vector.load %arg5[%c2_24, %c0_25, %c0_26] : memref<3x48x5xbf16, #tpu.memory_space<vmem>>, vector<1x48x5xbf16>
    %54 = vector.shape_cast %53 : vector<1x48x5xbf16> to vector<48x5xbf16>
    %cst_27 = arith.constant dense<0.000000e+00> : vector<64x5xf32>
    %55 = tpu.matmul %52, %54, %cst_27 {dimension_numbers = #tpu.dot_dimension_numbers<[1], [0], [0], [1], [0, 0, 1, 1], [], []>} : vector<64x48xbf16>, vector<48x5xbf16>, vector<64x5xf32> -> vector<64x5xf32>
    %56 = arith.addf %47, %55 : vector<64x5xf32>
    %c0_28 = arith.constant 0 : index
    %c0_29 = arith.constant 0 : index
    %57 = vector.load %arg6[%c0_28, %c0_29] : memref<1x5xf32, #tpu.memory_space<vmem>>, vector<1x5xf32>
    %58 = vector.broadcast %57 : vector<1x5xf32> to vector<64x5xf32>
    %59 = arith.mulf %56, %58 : vector<64x5xf32>
    %c0_30 = arith.constant 0 : index
    %c0_31 = arith.constant 0 : index
    %60 = vector.load %arg7[%c0_30, %c0_31] : memref<1x5xf32, #tpu.memory_space<vmem>>, vector<1x5xf32>
    %61 = vector.broadcast %60 : vector<1x5xf32> to vector<64x5xf32>
    %62 = arith.addf %59, %61 : vector<64x5xf32>
    %63 = vector.shape_cast %62 : vector<64x5xf32> to vector<8x8x5xf32>
    %64 = arith.truncf %63 : vector<8x8x5xf32> to vector<8x8x5xbf16>
    %c0_32 = arith.constant 0 : index
    %c0_33 = arith.constant 0 : index
    %c0_34 = arith.constant 0 : index
    %c0_35 = arith.constant 0 : index
    %65 = vector.load %arg8[%c0_32, %c0_33, %c0_34, %c0_35] : memref<1x8x8x5xbf16, #tpu.memory_space<vmem>>, vector<1x8x8x5xbf16>
    %66 = vector.shape_cast %65 : vector<1x8x8x5xbf16> to vector<8x8x5xbf16>
    %67 = vector.shape_cast %64 : vector<8x8x5xbf16> to vector<1x8x8x5xbf16>
    tpu.vector_store %arg8[%c0_32, %c0_33, %c0_34, %c0_35], %67 {strides = array<i32>} : memref<1x8x8x5xbf16, #tpu.memory_space<vmem>>, vector<1x8x8x5xbf16>,
    return
  }
  func.func @transform_0(%arg0: i32, %arg1: i32) -> (i32, i32, i32, i32) {
    %c0_i32 = arith.constant 0 : i32
    %c0_i32_0 = arith.constant 0 : i32
    %c0_i32_1 = arith.constant 0 : i32
    %c0_i32_2 = arith.constant 0 : i32
    return %arg0, %c0_i32, %c0_i32_0, %c0_i32_1 : i32, i32, i32, i32
  }
  func.func @transform_1(%arg0: i32, %arg1: i32) -> (i32, i32, i32, i32) {
    %c0_i32 = arith.constant 0 : i32
    %c0_i32_0 = arith.constant 0 : i32
    %c0_i32_1 = arith.constant 0 : i32
    %c0_i32_2 = arith.constant 0 : i32
    return %arg0, %c0_i32, %c0_i32_0, %c0_i32_1 : i32, i32, i32, i32
  }
  func.func @transform_2(%arg0: i32, %arg1: i32) -> (i32, i32, i32) {
    %c0_i32 = arith.constant 0 : i32
    %c0_i32_0 = arith.constant 0 : i32
    %c0_i32_1 = arith.constant 0 : i32
    return %c0_i32, %c0_i32_0, %arg1 : i32, i32, i32
  }
  func.func @transform_3(%arg0: i32, %arg1: i32) -> (i32, i32, i32) {
    %c0_i32 = arith.constant 0 : i32
    %c0_i32_0 = arith.constant 0 : i32
    %c0_i32_1 = arith.constant 0 : i32
    return %c0_i32, %c0_i32_0, %arg1 : i32, i32, i32
  }
  func.func @transform_4(%arg0: i32, %arg1: i32) -> (i32, i32) {
    %c0_i32 = arith.constant 0 : i32
    %c0_i32_0 = arith.constant 0 : i32
    return %c0_i32, %arg1 : i32, i32
  }
  func.func @transform_5(%arg0: i32, %arg1: i32) -> (i32, i32) {
    %c0_i32 = arith.constant 0 : i32
    %c0_i32_0 = arith.constant 0 : i32
    return %c0_i32, %arg1 : i32, i32
  }
  func.func @transform_6(%arg0: i32, %arg1: i32) -> (i32, i32, i32, i32) {
    %c0_i32 = arith.constant 0 : i32
    %c0_i32_0 = arith.constant 0 : i32
    %c0_i32_1 = arith.constant 0 : i32
    return %arg0, %c0_i32, %c0_i32_0, %arg1 : i32, i32, i32, i32
  }
}

module attributes {stable_mosaic.version = 11 : i64} {
  func.func @_gemm_bias_kernel(%arg0: i32, %arg1: i32, %arg2: memref<32x8xbf16, #tpu.memory_space<vmem>>, %arg3: memref<8x80xbf16, #tpu.memory_space<vmem>>, %arg4: memref<1x80xf32, #tpu.memory_space<vmem>>, %arg5: memref<1x80xf32, #tpu.memory_space<vmem>>, %arg6: memref<32x80xbf16, #tpu.memory_space<vmem>>) attributes {dimension_semantics = [#tpu.dimension_semantics<parallel>, #tpu.dimension_semantics<parallel>], iteration_bounds = array<i64: 2, 1>, scalar_prefetch = 0 : i64, scratch_operands = 0 : i64, tpu.core_type = #tpu.core_type<tc>, window_params = [{transform_indices = @transform_0, window_bounds = array<i64: 32, 8>}, {transform_indices = @transform_1, window_bounds = array<i64: 8, 80>}, {transform_indices = @transform_2, window_bounds = array<i64: 1, 80>}, {transform_indices = @transform_3, window_bounds = array<i64: 1, 80>}, {transform_indices = @transform_4, window_bounds = array<i64: 32, 80>}]} {
    %c0 = arith.constant 0 : index
    %c0_0 = arith.constant 0 : index
    %0 = vector.load %arg2[%c0, %c0_0] : memref<32x8xbf16, #tpu.memory_space<vmem>>, vector<32x8xbf16>
    %c0_1 = arith.constant 0 : index
    %c0_2 = arith.constant 0 : index
    %1 = vector.load %arg3[%c0_1, %c0_2] : memref<8x80xbf16, #tpu.memory_space<vmem>>, vector<8x80xbf16>
    %cst = arith.constant dense<0.000000e+00> : vector<32x80xf32>
    %2 = tpu.matmul %0, %1, %cst {dimension_numbers = #tpu.dot_dimension_numbers<[1], [0], [0], [1], [0, 0, 1, 1], [], []>} : vector<32x8xbf16>, vector<8x80xbf16>, vector<32x80xf32> -> vector<32x80xf32>
    %c0_3 = arith.constant 0 : index
    %c0_4 = arith.constant 0 : index
    %3 = vector.load %arg4[%c0_3, %c0_4] : memref<1x80xf32, #tpu.memory_space<vmem>>, vector<1x80xf32>
    %4 = vector.broadcast %3 : vector<1x80xf32> to vector<32x80xf32>
    %5 = arith.mulf %2, %4 : vector<32x80xf32>
    %c0_5 = arith.constant 0 : index
    %c0_6 = arith.constant 0 : index
    %6 = vector.load %arg5[%c0_5, %c0_6] : memref<1x80xf32, #tpu.memory_space<vmem>>, vector<1x80xf32>
    %7 = vector.broadcast %6 : vector<1x80xf32> to vector<32x80xf32>
    %8 = arith.addf %5, %7 : vector<32x80xf32>
    %9 = arith.truncf %8 : vector<32x80xf32> to vector<32x80xbf16>
    %c0_7 = arith.constant 0 : index
    %c0_8 = arith.constant 0 : index
    %10 = vector.load %arg6[%c0_7, %c0_8] : memref<32x80xbf16, #tpu.memory_space<vmem>>, vector<32x80xbf16>
    tpu.vector_store %arg6[%c0_7, %c0_8], %9 {strides = array<i32>} : memref<32x80xbf16, #tpu.memory_space<vmem>>, vector<32x80xbf16>,
    return
  }
  func.func @transform_0(%arg0: i32, %arg1: i32) -> (i32, i32) {
    %c0_i32 = arith.constant 0 : i32
    %c0_i32_0 = arith.constant 0 : i32
    return %arg0, %c0_i32 : i32, i32
  }
  func.func @transform_1(%arg0: i32, %arg1: i32) -> (i32, i32) {
    %c0_i32 = arith.constant 0 : i32
    %c0_i32_0 = arith.constant 0 : i32
    return %c0_i32, %arg1 : i32, i32
  }
  func.func @transform_2(%arg0: i32, %arg1: i32) -> (i32, i32) {
    %c0_i32 = arith.constant 0 : i32
    %c0_i32_0 = arith.constant 0 : i32
    return %c0_i32, %arg1 : i32, i32
  }
  func.func @transform_3(%arg0: i32, %arg1: i32) -> (i32, i32) {
    %c0_i32 = arith.constant 0 : i32
    %c0_i32_0 = arith.constant 0 : i32
    return %c0_i32, %arg1 : i32, i32
  }
  func.func @transform_4(%arg0: i32, %arg1: i32) -> (i32, i32) {
    %c0_i32 = arith.constant 0 : i32
    return %arg0, %arg1 : i32, i32
  }
}

module attributes {stable_mosaic.version = 11 : i64} {
  func.func @_gemm_bias_kernel(%arg0: i32, %arg1: i32, %arg2: memref<256x8xbf16, #tpu.memory_space<vmem>>, %arg3: memref<8x64xbf16, #tpu.memory_space<vmem>>, %arg4: memref<1x64xf32, #tpu.memory_space<vmem>>, %arg5: memref<1x64xf32, #tpu.memory_space<vmem>>, %arg6: memref<256x64xf32, #tpu.memory_space<vmem>>) attributes {dimension_semantics = [#tpu.dimension_semantics<parallel>, #tpu.dimension_semantics<parallel>], iteration_bounds = array<i64: 3, 1>, scalar_prefetch = 0 : i64, scratch_operands = 0 : i64, tpu.core_type = #tpu.core_type<tc>, window_params = [{transform_indices = @transform_0, window_bounds = array<i64: 256, 8>}, {transform_indices = @transform_1, window_bounds = array<i64: 8, 64>}, {transform_indices = @transform_2, window_bounds = array<i64: 1, 64>}, {transform_indices = @transform_3, window_bounds = array<i64: 1, 64>}, {transform_indices = @transform_4, window_bounds = array<i64: 256, 64>}]} {
    %c0 = arith.constant 0 : index
    %c0_0 = arith.constant 0 : index
    %0 = vector.load %arg2[%c0, %c0_0] : memref<256x8xbf16, #tpu.memory_space<vmem>>, vector<256x8xbf16>
    %c0_1 = arith.constant 0 : index
    %c0_2 = arith.constant 0 : index
    %1 = vector.load %arg3[%c0_1, %c0_2] : memref<8x64xbf16, #tpu.memory_space<vmem>>, vector<8x64xbf16>
    %cst = arith.constant dense<0.000000e+00> : vector<256x64xf32>
    %2 = tpu.matmul %0, %1, %cst {dimension_numbers = #tpu.dot_dimension_numbers<[1], [0], [0], [1], [0, 0, 1, 1], [], []>} : vector<256x8xbf16>, vector<8x64xbf16>, vector<256x64xf32> -> vector<256x64xf32>
    %c0_3 = arith.constant 0 : index
    %c0_4 = arith.constant 0 : index
    %3 = vector.load %arg4[%c0_3, %c0_4] : memref<1x64xf32, #tpu.memory_space<vmem>>, vector<1x64xf32>
    %4 = vector.broadcast %3 : vector<1x64xf32> to vector<256x64xf32>
    %5 = arith.mulf %2, %4 : vector<256x64xf32>
    %c0_5 = arith.constant 0 : index
    %c0_6 = arith.constant 0 : index
    %6 = vector.load %arg5[%c0_5, %c0_6] : memref<1x64xf32, #tpu.memory_space<vmem>>, vector<1x64xf32>
    %7 = vector.broadcast %6 : vector<1x64xf32> to vector<256x64xf32>
    %8 = arith.addf %5, %7 : vector<256x64xf32>
    %c0_7 = arith.constant 0 : index
    %c0_8 = arith.constant 0 : index
    %9 = vector.load %arg6[%c0_7, %c0_8] : memref<256x64xf32, #tpu.memory_space<vmem>>, vector<256x64xf32>
    tpu.vector_store %arg6[%c0_7, %c0_8], %8 {strides = array<i32>} : memref<256x64xf32, #tpu.memory_space<vmem>>, vector<256x64xf32>,
    return
  }
  func.func @transform_0(%arg0: i32, %arg1: i32) -> (i32, i32) {
    %c0_i32 = arith.constant 0 : i32
    %c0_i32_0 = arith.constant 0 : i32
    return %arg0, %c0_i32 : i32, i32
  }
  func.func @transform_1(%arg0: i32, %arg1: i32) -> (i32, i32) {
    %c0_i32 = arith.constant 0 : i32
    %c0_i32_0 = arith.constant 0 : i32
    return %c0_i32, %arg1 : i32, i32
  }
  func.func @transform_2(%arg0: i32, %arg1: i32) -> (i32, i32) {
    %c0_i32 = arith.constant 0 : i32
    %c0_i32_0 = arith.constant 0 : i32
    return %c0_i32, %arg1 : i32, i32
  }
  func.func @transform_3(%arg0: i32, %arg1: i32) -> (i32, i32) {
    %c0_i32 = arith.constant 0 : i32
    %c0_i32_0 = arith.constant 0 : i32
    return %c0_i32, %arg1 : i32, i32
  }
  func.func @transform_4(%arg0: i32, %arg1: i32) -> (i32, i32) {
    %c0_i32 = arith.constant 0 : i32
    return %arg0, %arg1 : i32, i32
  }
}

</mosaic_0001>

<bundles_post_ra>
// kernel: rcca_forward.6
= control target key start
LH: loop header
LB: loop body
LE: loop exit
PB: predicated region body
PF: predicated region fallthrough
CT: control target
= control target key end

     0   :  { %s1569_s15 = smov 0   ;;  %s1571_s16 = smov 0   ;;  %s1957_s0 = inlined_call_operand.vmem [shape: bf16[2,10,10,64], index: 0, kind: input, shape index: {}]   ;;  %s1958_s1 = inlined_call_operand.vmem [shape: bf16[3,192,16], index: 1, kind: input, shape index: {}]   ;;  %s1959_s2 = inlined_call_operand.vmem [shape: f32[1,16], index: 2, kind: input, shape index: {}]   ;;  %s1960_s3 = inlined_call_operand.vmem [shape: f32[1,16], index: 3, kind: input, shape index: {}]   ;;  %s1961_s4 = inlined_call_operand.vmem [shape: bf16[2,8,8,16], index: 4, kind: output, shape index: {}]  }
   0x1   :  { %s1573_s17 = smov 0  }
   0x2 LB: > { %s26_s18 = sadd.s32 1, %s1537_s16  ;;  %p1186_p0 = scmp.ge.s32.totalorder %s1541_s17, 1  ;;  %s1541_s17 = sphi %s1573_s17, %s14_s17   ;;  %s1537_s16 = sphi %s1571_s16, %s1963_s16   ;;  %s1533_s15 = sphi %s1569_s15, %s1962_s15  }
   0x3   : > { %p28_p1 = scmp.ge.s32.totalorder %s26_s18, 2  ;;  %p201_p2 = scmp.lt.s32.totalorder %s1541_s17, 3 }
   0x5   : > { %s1965_s18 = smov (%p28_p1, %s26_s18), 0  ;;  %p202_p3 = pnand %p1186_p0, %p201_p2 }
   0x6   : > { %p240_p4 = scmp.lt.s32.totalorder (!%p202_p3), %s1533_s15, 1  ;;  %s1543_s27 = smov (!%p202_p3), 64  }
   0x7   : > { %205 = sbr.rel (%p202_p3) target bundleno = 382 (0x17e), region = 36 }
   0xc   : > { %s1967_s15 = smov (!%p240_p4, %s1533_s15), 1  ;;  %v1624_v25 = vld [vmem:[%s1958_s1 + $0x58] sm:$0xff]  ;;  %v1636_v34 = vld [vmem:[%s1958_s1 + $0x50] sm:$0xff]  ;;  %v1645_v43 = vld [vmem:[%s1958_s1 + $0x48] sm:$0xff]  ;;  %vm404_vm0 = vcmask 523264   ;;  %vm1053_vm1 = vcmask 125952  }
   0xd   : > { %s1491_s19 = smul.u32 80, %s1967_s15  ;;  %1487 = vmatpush.bf16.msra.mxu3 %v1624_v25  ;;  %v1651_v46 = vld [vmem:[%s1958_s1 + $0xb8] sm:$0xff]  ;;  %v1663_v53 = vld [vmem:[%s1958_s1 + $0xb0] sm:$0xff]  ;;  %s1436_s11 = sshll.u32 %s1967_s15, 5 }
   0xe   : > { %v1454_v50 = vld [vmem:[%s1958_s1 + $0x38] sm:$0xff]  ;;  %1483 = vmatpush.bf16.msra.mxu1 %v1651_v46  ;;  %v1453_v59 = vld [vmem:[%s1958_s1 + $0x30] sm:$0xff]  ;;  %s1900_s14 = scalar_lea.vmem %s1961_s4, %s1436_s11 }
   0xf   : > { %s1593_s22 = scalar_lea.vmem %s1957_s0, %s1491_s19  ;;  %v1466_v54 = vld [vmem:[%s1958_s1 + $0x98] sm:$0xff]  ;;  %773 = vmatpush.bf16.msra.mxu2 %v1454_v50 }
  0x10   : > { %v1196_v0 = vld [vmem:[%s1593_s22 + $0x8] sm:$0xf]  ;;  %v1438_v1 = vld [vmem:[%s1593_s22 + $0x8] sm:$0x10]  ;;  %v1192_v2 = vld [vmem:[%s1593_s22] sm:$0xf]  ;;  %619 = vmatpush.bf16.msra.mxu0 %v1466_v54 }
  0x11   : > { %v1598_v3 = vor.u32 %v1438_v1, %v1196_v0  ;;  %v1437_v4 = vld [vmem:[%s1593_s22] sm:$0x10]  ;;  %v1200_v5 = vld [vmem:[%s1593_s22 + $0x10] sm:$0xf]  ;;  %v1439_v6 = vld [vmem:[%s1593_s22 + $0x10] sm:$0x10]  ;;  %1488 = vmatpush.bf16.msra.mxu3 %v1636_v34 }
  0x12   : > { %v1603_v7 = vor.u32 %v1437_v4, %v1192_v2  ;;  %v1605_v8 = vor.u32 %v1439_v6, %v1200_v5  ;;  %v1204_v9 = vld [vmem:[%s1593_s22 + $0x18] sm:$0xf]  ;;  %v1440_v10 = vld [vmem:[%s1593_s22 + $0x18] sm:$0x10]  ;;  %v1208_v11 = vld [vmem:[%s1593_s22 + $0x20] sm:$0xf]  ;;  %1484 = vmatpush.bf16.msra.mxu1 %v1663_v53 }
  0x13   : > { %v332_v12 = vshrl.u32 %v1598_v3, 16  ;;  %v334_v13 = vshll.u32 %v1598_v3, 16  ;;  %v1205_v14 = vor.u32 %v1440_v10, %v1204_v9  ;;  %v1441_v15 = vld [vmem:[%s1593_s22 + $0x20] sm:$0x10]  ;;  %v1216_v16 = vld [vmem:[%s1593_s22 + $0x30] sm:$0xf]  ;;  %774 = vmatpush.bf16.msra.mxu2 %v1453_v59 }
  0x14   : > { %v325_v17 = vshrl.u32 %v1603_v7, 16  ;;  %v327_v18 = vshll.u32 %v1603_v7, 16  ;;  %v341_v19 = vshll.u32 %v1605_v8, 16  ;;  %v1443_v20 = vld [vmem:[%s1593_s22 + $0x30] sm:$0x10]  ;;  %v1618_v23 = vor.u32 %v1441_v15, %v1208_v11  ;;  %v1688_v4 = vld [vmem:[%s1958_s1 + $0x40] sm:$0xff] }
  0x15   : > { %v336_v21 = vrot.slane %v334_v13, 1  ;;  %v348_v22 = vshll.u32 %v1205_v14, 16  ;;  %v1220_v24 = vld [vmem:[%s1593_s22 + $0x38] sm:$0xf]  ;;  %v1444_v27 = vld [vmem:[%s1593_s22 + $0x38] sm:$0x10]  ;;  %v1217_v38 = vor.u32 %v1443_v20, %v1216_v16  ;;  %1489 = vmatpush.bf16.msra.mxu3 %v1645_v43 }
  0x16   : > { %v329_v26 = vrot.slane %v327_v18, 1  ;;  %v1212_v28 = vld [vmem:[%s1593_s22 + $0x28] sm:$0xf]  ;;  %v339_v30 = vshrl.u32 %v1605_v8, 16  ;;  %v353_v31 = vshrl.u32 %v1618_v23, 16  ;;  %v355_v32 = vshll.u32 %v1618_v23, 16 }
  0x17   : > { %v337_v29 = vor.u32 %v336_v21, %v332_v12  ;;  %v1442_v33 = vld [vmem:[%s1593_s22 + $0x28] sm:$0x10]  ;;  %v343_v36 = vrot.slane %v341_v19, 1  ;;  %v346_v37 = vshrl.u32 %v1205_v14, 16  ;;  %v350_v39 = vrot.slane %v348_v22, 1  ;;  %v1465_v2 = vld [vmem:[%s1958_s1 + $0x90] sm:$0xff] }
  0x18   : > { %v330_v35 = vor.u32 %v329_v26, %v325_v17  ;;  %v357_v40 = vrot.slane %v355_v32, 1  ;;  %v1639_v41 = vor.u32 %v1444_v27, %v1220_v24  ;;  %v1213_v42 = vor.u32 %v1442_v33, %v1212_v28  ;;  %v1224_v48 = vld [vmem:[%s1593_s22 + $0x40] sm:$0xf]  ;;  %v1445_v49 = vld [vmem:[%s1593_s22 + $0x40] sm:$0x10]  ;;  %v1694_v9 = vld [vmem:[%s1958_s1 + $0xa8] sm:$0xff]  ;;  %620 = vmatpush.bf16.msra.mxu0 %v1465_v2 }
  0x19   : > { %382 = vrot.lane.b32.xlu0 %v337_v29, %s1543_s27  ;;  %v398_v44 = vrot.slane %v1605_v8, 1  ;;  %v399_v45 = vrot.slane %v1205_v14, 1  ;;  %v369_v51 = vshll.u32 %v1217_v38, 16  ;;  %v344_v55 = vor.u32 %v343_v36, %v339_v30  ;;  %v1356_v61 = vld [vmem:[%s1593_s22 + $0x48] sm:$0xf]  ;;  %1490 = vmatpush.bf16.msra.mxu3 %v1688_v4  ;;  %v1717_v21 = vld [vmem:[%s1958_s1 + $0xa0] sm:$0xff] }
  0x1a   : > { %380 = vrot.lane.b32.xlu1 %v330_v35, %s1543_s27  ;;  %v358_v47 = vor.u32 %v357_v40, %v353_v31  ;;  %v362_v52 = vshll.u32 %v1213_v42, 16  ;;  %v351_v56 = vor.u32 %v350_v39, %v346_v37  ;;  %v376_v57 = vshll.u32 %v1639_v41, 16  ;;  %v1446_v62 = vld [vmem:[%s1593_s22 + $0x48] sm:$0x10]  ;;  %1485 = vmatpush.bf16.msra.mxu1 %v1694_v9  ;;  %v1478_v28 = vld [vmem:[%s1958_s1 + $0xf8] sm:$0xff]  ;;  %v1451_v30 = vld [vmem:[%s1958_s1 + $0x20] sm:$0xff] }
  0x1b   : > { %v360_v58 = vshrl.u32 %v1213_v42, 16  ;;  %v1675_v63 = vunpack.c.l.b16 %v398_v44  ;;  %v1677_v0 = vunpack.c.l.b16 %v399_v45  ;;  %v1679_v1 = vor.u32 %v1445_v49, %v1224_v48  ;;  %v1452_v14 = vld [vmem:[%s1958_s1 + $0x28] sm:$0xff]  ;;  %v1482_v31 = vld [vmem:[%s1958_s1 + $0x118] sm:$0xff]  ;;  %v1463_v33 = vld [vmem:[%s1958_s1 + $0x80] sm:$0xff] }
  0x1c   : > { %388 = vrot.lane.b32.xlu2 %v358_v47, %s1543_s27  ;;  %v364_v60 = vrot.slane %v362_v52, 1  ;;  %v402_v5 = vrot.slane %v1217_v38, 1  ;;  %v367_v6 = vshrl.u32 %v1217_v38, 16  ;;  %v371_v8 = vrot.slane %v369_v51, 1  ;;  %v1464_v18 = vld [vmem:[%s1958_s1 + $0x88] sm:$0xff]  ;;  %775 = vmatpush.bf16.msra.mxu2 %v1452_v14  ;;  %v1481_v35 = vld [vmem:[%s1958_s1 + $0x110] sm:$0xff] }
  0x1d   : > { %v1697_v11 = vor.u32 %v1446_v62, %v1356_v61  ;;  %v485_v12 = vshll.u32 %v1679_v1, 16  ;;  %v401_v13 = vrot.slane %v1213_v42, 1  ;;  %v374_v15 = vshrl.u32 %v1639_v41, 16  ;;  %621 = vmatpush.bf16.msra.mxu0 %v1464_v18  ;;  %988 = vmatpush.bf16.msrb.mxu3 %v1482_v31  ;;  %v1477_v39 = vld [vmem:[%s1958_s1 + $0xf0] sm:$0xff]  ;;  %v1450_v42 = vld [vmem:[%s1958_s1 + $0x18] sm:$0xff]  ;;  %v1475_v51 = vld [vmem:[%s1958_s1 + $0xe0] sm:$0xff] }
  0x1e   : > { %v365_v10 = vor.u32 %v364_v60, %v360_v58  ;;  %v378_v16 = vrot.slane %v376_v57, 1  ;;  %v1707_v17 = vpack.c.b16 %v1677_v0, %v1675_v63  ;;  %v450_v19 = vunpack.c.l.b16 %v402_v5  ;;  %1486 = vmatpush.bf16.msra.mxu1 %v1717_v21  ;;  %v1462_v44 = vld [vmem:[%s1958_s1 + $0x78] sm:$0xff]  ;;  %v1449_v48 = vld [vmem:[%s1958_s1 + $0x10] sm:$0xff]  ;;  %v1448_v54 = vld [vmem:[%s1958_s1 + $0x8] sm:$0xff] }
  0x1f   : > { %v372_v20 = vor.u32 %v371_v8, %v367_v6  ;;  %v839_v22 = vshll.u32 %v1697_v11, 16  ;;  %v483_v24 = vshrl.u32 %v1679_v1, 16  ;;  %v487_v26 = vrot.slane %v485_v12, 1  ;;  %v1474_v57 = vld [vmem:[%s1958_s1 + $0xd8] sm:$0xff]  ;;  %v1480_v59 = vld [vmem:[%s1958_s1 + $0x108] sm:$0xff]  ;;  %v1461_v60 = vld [vmem:[%s1958_s1 + $0x70] sm:$0xff] }
  0x20   : > { %v448_v27 = vunpack.c.l.b16 %v401_v13  ;;  %v379_v29 = vor.u32 %v378_v16, %v374_v15  ;;  %1351 = vmatmul.msk.bf16.vlgmr.msra.gmra.mxu3 %vm404_vm0, %v1707_v17  ;;  %v837_v36 = vshrl.u32 %v1697_v11, 16  ;;  %v400_v40 = vrot.slane %v1618_v23, 1  ;;  %776 = vmatpush.bf16.msra.mxu2 %v1451_v30  ;;  %v1476_v23 = vld [vmem:[%s1958_s1 + $0xe8] sm:$0xff]  ;;  %v1447_v61 = vld [vmem:[%s1958_s1] sm:$0xff]  ;;  %v1473_v62 = vld [vmem:[%s1958_s1 + $0xd0] sm:$0xff] }
  0x21   : > { %384 = vrot.lane.b32.xlu0 %v344_v55, %s1543_s27  ;;  %v841_v37 = vrot.slane %v839_v22, 1  ;;  %v488_v38 = vor.u32 %v487_v26, %v483_v24  ;;  %622 = vmatpush.bf16.msra.mxu0 %v1463_v33  ;;  %v491_v49 = vrot.slane %v1679_v1, 1  ;;  %v403_v50 = vrot.slane %v1639_v41, 1  ;;  %v1479_v1 = vld [vmem:[%s1958_s1 + $0x100] sm:$0xff]  ;;  %v1460_v2 = vld [vmem:[%s1958_s1 + $0x68] sm:$0xff] }
  0x22   : > { %386 = vrot.lane.b32.xlu1 %v351_v56, %s1543_s27  ;;  %v528_v32 = vpack.c.b16 %v450_v19, %v448_v27  ;;  %955 = vmatpush.bf16.msrb.mxu1 %v1478_v28  ;;  %v1758_v47 = vunpack.c.l.b16 %v400_v40  ;;  %v1472_v5 = vld [vmem:[%s1958_s1 + $0xc8] sm:$0xff]  ;;  %v1471_v6 = vld [vmem:[%s1958_s1 + $0xc0] sm:$0xff]  ;;  %v268_v15 = vld [vmem:[%s1593_s22 + $0x10] sm:$0xf]  ;;  %v845_v30 = vrot.slane %v1697_v11, 1 }
  0x23   : > { %989 = vmatpush.bf16.msrb.mxu3 %v1481_v35  ;;  %v842_v45 = vor.u32 %v841_v37, %v837_v36  ;;  %v1773_v55 = vunpack.c.l.b16 %v491_v49  ;;  %v452_v56 = vunpack.c.l.b16 %v403_v50  ;;  %v266_v8 = vld [vmem:[%s1593_s22 + $0x8] sm:$0xf]  ;;  %v272_v26 = vld [vmem:[%s1593_s22 + $0x20] sm:$0xf] }
  0x24   : > { %390 = vrot.lane.b32.xlu2 %v365_v10, %s1543_s27  ;;  %1300 = vmatmul.msk.bf16.vlgmr.msra.gmra.mxu1 %vm404_vm0, %v528_v32  ;;  %v682_v52 = vpack.c.b16 %v448_v27, %v1758_v47  ;;  %v274_v27 = vld [vmem:[%s1593_s22 + $0x28] sm:$0xf]  ;;  %v851_v32 = vunpack.c.l.b16 %v845_v30 }
  0x25   : > { %777 = vmatpush.bf16.msra.mxu2 %v1450_v42  ;;  %623 = vmatpush.bf16.msra.mxu0 %v1462_v44  ;;  %v530_v41 = vpack.c.b16 %v1773_v55, %v452_v56  ;;  %v684_v58 = vpack.c.b16 %v452_v56, %v450_v19  ;;  %v278_v42 = vld [vmem:[%s1593_s22 + $0x38] sm:$0xf] }
  0x26   : > { %956 = vmatpush.bf16.msrb.mxu1 %v1477_v39  ;;  %v878_v36 = vpack.c.b16 %v851_v32, %v1773_v55  ;;  %v276_v39 = vld [vmem:[%s1593_s22 + $0x30] sm:$0xf] }
  0x27   : > { %990 = vmatpush.bf16.msrb.mxu3 %v1480_v59 }
  0x29   : > { %392 = vrot.lane.b32.xlu0 %v372_v20, %s1543_s27  ;;  %778 = vmatpush.bf16.msra.mxu2 %v1449_v48 }
  0x2a   : > { %394 = vrot.lane.b32.xlu1 %v379_v29, %s1543_s27  ;;  %957 = vmatpush.bf16.msrb.mxu1 %v1476_v23 }
  0x2b   : > { %624 = vmatpush.bf16.msra.mxu0 %v1461_v60  ;;  %991 = vmatpush.bf16.msrb.mxu3 %v1479_v1 }
  0x2c   : > { %489 = vrot.lane.b32.xlu2 %v488_v38, %s1543_s27 }
  0x2d   : > { %779 = vmatpush.bf16.msra.mxu2 %v1448_v54  ;;  %v282_v54 = vld [vmem:[%s1593_s22 + $0x48] sm:$0xf] }
  0x2e   : > { %958 = vmatpush.bf16.msrb.mxu1 %v1475_v51  ;;  %v280_v51 = vld [vmem:[%s1593_s22 + $0x40] sm:$0xf] }
  0x2f   : > { %625 = vmatpush.bf16.msra.mxu0 %v1460_v2 }
  0x30   : > { %1352 = vmatmul.msk.bf16.gmra.mxu3 %vm404_vm0, %v682_v52 }
  0x31   : > { %843 = vrot.lane.b32.xlu0 %v842_v45, %s1543_s27  ;;  %780 = vmatpush.bf16.msra.mxu2 %v1447_v61  ;;  %v396_v61 = vrot.slane %v1603_v7, 1  ;;  %v526_v7 = vpack.c.b16 %v1758_v47, %v1677_v0 }
  0x32   : > { %959 = vmatpush.bf16.msrb.mxu1 %v1474_v57 }
  0x33   : > { %v438_v1 = vunpack.c.l.b16 %v396_v61 }
  0x34   : > { %1301 = vmatmul.msk.bf16.gmra.mxu1 %vm404_vm0, %v530_v41 }
  0x35   : > { %806 = vmatpush.bf16.msrb.mxu2 %v1624_v25  ;;  %v1459_v25 = vld [vmem:[%s1958_s1 + $0x60] sm:$0xff] }
  0x36   : > { %960 = vmatpush.bf16.msrb.mxu1 %v1473_v62  ;;  %626 = vmatpush.bf16.msra.mxu0 %v1459_v25  ;;  %v397_v62 = vrot.slane %v1598_v3, 1 }
  0x38   : > { %v440_v2 = vunpack.c.l.b16 %v397_v62 }
  0x39   : > { %807 = vmatpush.bf16.msrb.mxu2 %v1636_v34  ;;  %v264_v34 = vld [vmem:[%s1593_s22] sm:$0xf] }
  0x3a   : > { %961 = vmatpush.bf16.msrb.mxu1 %v1472_v5  ;;  %652 = vmatpush.bf16.msrb.mxu0 %v1651_v46  ;;  %v678_v5 = vpack.c.b16 %v440_v2, %v438_v1 }
  0x3d   : > { %808 = vmatpush.bf16.msrb.mxu2 %v1645_v43 }
  0x3e   : > { %962 = vmatpush.bf16.msrb.mxu1 %v1471_v6  ;;  %653 = vmatpush.bf16.msrb.mxu0 %v1663_v53  ;;  %v524_v6 = vpack.c.b16 %v1675_v63, %v440_v2 }
  0x40   : > { %1353 = vmatmul.msk.bf16.gmra.mxu3 %vm404_vm0, %v684_v58 }
  0x41   : > { %809 = vmatpush.bf16.msrb.mxu2 %v1688_v4  ;;  %v270_v4 = vld [vmem:[%s1593_s22 + $0x18] sm:$0xf] }
  0x42   : > { %654 = vmatpush.bf16.msrb.mxu0 %v1694_v9 }
  0x46   : > { %655 = vmatpush.bf16.msrb.mxu0 %v1717_v21 }
  0x50   : > { %1430 = vmatmul.msk.bf16.vlgmr.msrb.gmra.mxu3 %vm404_vm0, %v1707_v17 }
  0x60   : > { %1431 = vmatmul.msk.bf16.gmra.mxu3 %vm404_vm0, %v682_v52 }
  0x70   : > { %1432 = vmatmul.msk.bf16.gmra.mxu3 %vm404_vm0, %v684_v58 }
  0x76   : > { %v389_v9 = vpop.permute.xlu2 %388 }
  0x77   : > { %v419_v29 = vsel %vm404_vm0, %v272_v26, %v389_v9 }
  0x78   : > { %v445_v33 = vunpack.c.l.b16 %v419_v29 }
  0x7e   : > { %v391_v28 = vpop.permute.xlu2 %390 }
  0x7f   : > { %v422_v31 = vsel %vm404_vm0, %v274_v27, %v391_v28 }
  0x80   : > { %v447_v35 = vunpack.c.l.b16 %v422_v31  ;;  %1433 = vmatmul.msk.bf16.gmra.mxu3 %vm404_vm0, %v878_v36 }
  0x82   : > { %v681_v38 = vpack.c.b16 %v447_v35, %v445_v33 }
  0x86   : > { %v490_v52 = vpop.permute.xlu2 %489 }
  0x87   : > { %v494_v56 = vsel %vm404_vm0, %v280_v51, %v490_v52 }
  0x88   : > { %v496_v41 = vunpack.c.l.b16 %v494_v56 }
  0x8b   : > { %v383_v10 = vpop.permute.xlu0 %382 }
  0x8c   : > { %v410_v12 = vsel %vm404_vm0, %v266_v8, %v383_v10  ;;  %v381_v46 = vpop.permute.xlu1 %380 }
  0x8d   : > { %v439_v13 = vunpack.c.l.b16 %v410_v12  ;;  %v407_v43 = vsel %vm404_vm0, %v264_v34, %v381_v46 }
  0x8e   : > { %v437_v14 = vunpack.c.l.b16 %v407_v43 }
  0x90   : > { %v677_v53 = vpack.c.b16 %v439_v13, %v437_v14 }
  0x92   : > { %781 = vmatmul.bf16.vlgmr.msra.gmra.mxu2 %v677_v53 }
  0x93   : > { %v385_v16 = vpop.permute.xlu0 %384 }
  0x94   : > { %v413_v17 = vsel %vm404_vm0, %v268_v15, %v385_v16  ;;  %v387_v18 = vpop.permute.xlu1 %386 }
  0x95   : > { %v441_v19 = vunpack.c.l.b16 %v413_v17  ;;  %v416_v20 = vsel %vm404_vm0, %v270_v4, %v387_v18 }
  0x96   : > { %v443_v21 = vunpack.c.l.b16 %v416_v20 }
  0x97   : > { %v523_v22 = vpack.c.b16 %v441_v19, %v439_v13 }
  0x98   : > { %v679_v24 = vpack.c.b16 %v443_v21, %v441_v19  ;;  %v525_v37 = vpack.c.b16 %v445_v33, %v443_v21 }
  0x99   : > { %627 = vmatmul.bf16.vlgmr.msra.gmra.mxu0 %v523_v22 }
  0x9a   : > { %963 = vmatmul.bf16.vlgmr.msrb.gmra.mxu1 %v679_v24 }
  0x9b   : > { %v393_v40 = vpop.permute.xlu0 %392 }
  0x9c   : > { %v395_v11 = vpop.permute.xlu1 %394  ;;  %v425_v44 = vsel %vm404_vm0, %v276_v39, %v393_v40  ;;  %v1887_v40 = vld [vmem:[%s1959_s2] ss:$0 sm:$0xff] }
  0x9d   : > { %v428_v45 = vsel %vm404_vm0, %v278_v42, %v395_v11  ;;  %v449_v23 = vunpack.c.l.b16 %v425_v44  ;;  %v1892_v44 = vld [vmem:[%s1960_s3] ss:$0 sm:$0xff] }
  0x9e   : > { %v451_v48 = vunpack.c.l.b16 %v428_v45 }
  0x9f   : > { %v527_v49 = vpack.c.b16 %v449_v23, %v447_v35 }
  0xa0   : > { %v683_v50 = vpack.c.b16 %v451_v48, %v449_v23  ;;  %v529_v59 = vpack.c.b16 %v496_v41, %v451_v48 }
  0xa1   : > { %v667_v10 = vpop.f32.mrf.mxu1 }
  0xa2   : > { %786 = vmatmul.bf16.gmra.mxu2 %v679_v24 }
  0xa3   : > { %v844_v55 = vpop.permute.xlu0 %843  ;;  %v1846_v25 = vpop.f32.mrf.mxu3 }
  0xa4   : > { %v848_v57 = vsel %vm404_vm0, %v282_v54, %v844_v55 }
  0xa5   : > { %v850_v58 = vunpack.c.l.b16 %v848_v57 }
  0xa7   : > { %v877_v60 = vpack.c.b16 %v850_v58, %v496_v41 }
  0xa9   : > { %632 = vmatmul.bf16.gmra.mxu0 %v525_v37  ;;  %v669_v46 = vpop.f32.mrf.mxu1 }
  0xaa   : > { %968 = vmatmul.bf16.gmra.mxu1 %v681_v38 }
  0xab   : > { %v1850_v8 = vpop.f32.mrf.mxu3 }
  0xb1   : > { %v672_v43 = vpop.f32.mrf.mxu1 }
  0xb2   : > { %791 = vmatmul.bf16.gmra.mxu2 %v681_v38 }
  0xb3   : > { %v821_v34 = vpop.f32.mrf.mxu3 }
  0xb9   : > { %637 = vmatmul.bf16.gmra.mxu0 %v527_v49  ;;  %v1858_v53 = vpop.f32.mrf.mxu1 }
  0xba   : > { %973 = vmatmul.bf16.gmra.mxu1 %v683_v50 }
  0xbb   : > { %v823_v3 = vpop.f32.mrf.mxu3 }
  0xc2   : > { %796 = vmatmul.bf16.gmra.mxu2 %v683_v50 }
  0xc3   : > { %v826_v12 = vpop.f32.mrf.mxu3 }
  0xc9   : > { %642 = vmatmul.bf16.gmra.mxu0 %v529_v59 }
  0xca   : > { %978 = vmatmul.bf16.gmra.mxu1 %v877_v60 }
  0xcb   : > { %v1856_v13 = vpop.f32.mrf.mxu3 }
  0xd2   : > { %1350 = vmatmul.msk.bf16.vlgmr.msrb.gmra.mxu2 %vm404_vm0, %v678_v5 }
  0xd3   : > { %v993_v14 = vpop.f32.mrf.mxu3 }
  0xd9   : > { %1298 = vmatmul.msk.bf16.vlgmr.msrb.gmra.mxu0 %vm404_vm0, %v524_v6 }
  0xdb   : > { %v995_v63 = vpop.f32.mrf.mxu3 }
  0xe3   : > { %v998_v17 = vpop.f32.mrf.mxu3 }
  0xe9   : > { %1299 = vmatmul.msk.bf16.gmra.mxu0 %vm404_vm0, %v526_v7 }
  0xeb   : > { %v1000_v26 = vpop.f32.mrf.mxu3 }
  0xf3   : > { %v1003_v31 = vpop.f32.mrf.mxu3 }
  0xfb   : > { %v1005_v42 = vpop.f32.mrf.mxu3 }
 0x103   : > { %v1008_v59 = vpop.f32.mrf.mxu3 }
 0x115   : > { %v1860_v15 = vpop.f32.mrf.mxu2 }
 0x116   : > { %v1862_v4 = vpop.f32.mrf.mxu0 }
 0x117   : > { %v964_v9 = vpop.f32.mrf.mxu1 }
 0x118   : > { %v1864_v16 = vadd.f32 %v993_v14, %v964_v9  ;;  %v1010_v9 = vpop.f32.mrf.mxu3 }
 0x11d   : > { %v1866_v0 = vpop.f32.mrf.mxu2 }
 0x11e   : > { %v1868_v47 = vpop.f32.mrf.mxu0 }
 0x11f   : > { %v966_v18 = vpop.f32.mrf.mxu1 }
 0x120   : > { %v1870_v19 = vadd.f32 %v995_v63, %v966_v18 }
 0x125   : > { %v1872_v20 = vpop.f32.mrf.mxu2 }
 0x126   : > { %v1874_v21 = vpop.f32.mrf.mxu0 }
 0x127   : > { %v969_v22 = vpop.f32.mrf.mxu1 }
 0x128   : > { %v1876_v24 = vadd.f32 %v998_v17, %v969_v22 }
 0x12d   : > { %v1878_v27 = vpop.f32.mrf.mxu2 }
 0x12e   : > { %v1880_v28 = vpop.f32.mrf.mxu0 }
 0x12f   : > { %v971_v29 = vpop.f32.mrf.mxu1 }
 0x130   : > { %v1882_v30 = vadd.f32 %v1000_v26, %v971_v29 }
 0x135   : > { %v792_v32 = vpop.f32.mrf.mxu2 }
 0x136   : > { %v638_v33 = vpop.f32.mrf.mxu0 }
 0x137   : > { %v668_v35 = vadd.f32 %v667_v10, %v638_v33  ;;  %v974_v36 = vpop.f32.mrf.mxu1 }
 0x138   : > { %v1004_v39 = vadd.f32 %v1003_v31, %v974_v36 }
 0x139   : > { %v793_v37 = vadd.f32 %v792_v32, %v668_v35 }
 0x13b   : > { %v822_v38 = vadd.f32 %v821_v34, %v793_v37 }
 0x13d   : > { %v1017_v11 = vadd.f32 %v1004_v39, %v822_v38  ;;  %v794_v45 = vpop.f32.mrf.mxu2 }
 0x13e   : > { %v640_v23 = vpop.f32.mrf.mxu0 }
 0x13f   : > { %v1029_v48 = vmul.f32 %v1887_v40, %v1017_v11  ;;  %v670_v49 = vadd.f32 %v669_v46, %v640_v23  ;;  %v976_v50 = vpop.f32.mrf.mxu1 }
 0x140   : > { %v1006_v56 = vadd.f32 %v1005_v42, %v976_v50 }
 0x141   : > { %v1041_v51 = vadd.f32 %v1892_v44, %v1029_v48  ;;  %v795_v52 = vadd.f32 %v794_v45, %v670_v49 }
 0x143   : > { %v1049_v54 = vpack.c.bf16 %v1041_v51, %v1041_v51  ;;  %v824_v55 = vadd.f32 %v823_v3, %v795_v52 }
 0x145   : > { %1058 = vst.msk [vmem:[%s1900_s14 + $0x10] sm:$0xf] %vm1053_vm1, %v1049_v54  ;;  %v1018_v57 = vadd.f32 %v1006_v56, %v824_v55  ;;  %v797_v41 = vpop.f32.mrf.mxu2 }
 0x146   : > { %v643_v58 = vpop.f32.mrf.mxu0 }
 0x147   : > { %v1030_v60 = vmul.f32 %v1887_v40, %v1018_v57  ;;  %v673_v61 = vadd.f32 %v672_v43, %v643_v58  ;;  %v979_v62 = vpop.f32.mrf.mxu1 }
 0x148   : > { %v1009_v34 = vadd.f32 %v1008_v59, %v979_v62 }
 0x149   : > { %v1042_v1 = vadd.f32 %v1892_v44, %v1030_v60  ;;  %v798_v2 = vadd.f32 %v797_v41, %v673_v61 }
 0x14b   : > { %v1050_v5 = vpack.c.bf16 %v1042_v1, %v1042_v1  ;;  %v827_v6 = vadd.f32 %v826_v12, %v798_v2 }
 0x14d   : > { %1059 = vst.msk [vmem:[%s1900_s14 + $0x14] sm:$0xf] %vm1053_vm1, %v1050_v5  ;;  %v1019_v7 = vadd.f32 %v1009_v34, %v827_v6  ;;  %v799_v3 = vpop.f32.mrf.mxu2 }
 0x14e   : > { %v645_v10 = vpop.f32.mrf.mxu0 }
 0x14f   : > { %v1031_v46 = vmul.f32 %v1887_v40, %v1019_v7  ;;  %v675_v14 = vadd.f32 %v1858_v53, %v645_v10  ;;  %v981_v63 = vpop.f32.mrf.mxu1 }
 0x150   : > { %v1011_v12 = vadd.f32 %v1010_v9, %v981_v63 }
 0x151   : > { %v1043_v43 = vadd.f32 %v1892_v44, %v1031_v46  ;;  %v800_v17 = vadd.f32 %v799_v3, %v675_v14 }
 0x153   : > { %v1051_v18 = vpack.c.bf16 %v1043_v43, %v1043_v43  ;;  %v829_v22 = vadd.f32 %v1856_v13, %v800_v17 }
 0x155   : > { %1060 = vst.msk [vmem:[%s1900_s14 + $0x18] sm:$0xf] %vm1053_vm1, %v1051_v18  ;;  %v1020_v26 = vadd.f32 %v1011_v12, %v829_v22  ;;  %v811_v31 = vpop.f32.mrf.mxu2 }
 0x156   : > { %v657_v29 = vpop.f32.mrf.mxu0 }
 0x157   : > { %v1032_v32 = vmul.f32 %v1887_v40, %v1020_v26  ;;  %v658_v53 = vadd.f32 %v657_v29, %v1862_v4 }
 0x159   : > { %v1044_v33 = vadd.f32 %v1892_v44, %v1032_v32  ;;  %v783_v35 = vadd.f32 %v1860_v15, %v658_v53 }
 0x15b   : > { %v1052_v36 = vpack.c.bf16 %v1044_v33, %v1044_v33  ;;  %v812_v37 = vadd.f32 %v811_v31, %v783_v35 }
 0x15d   : > { %1061 = vst.msk [vmem:[%s1900_s14 + $0x1c] sm:$0xf] %vm1053_vm1, %v1052_v36  ;;  %v1013_v13 = vadd.f32 %v1864_v16, %v812_v37  ;;  %v813_v11 = vpop.f32.mrf.mxu2 }
 0x15e   : > { %v659_v38 = vpop.f32.mrf.mxu0 }
 0x15f   : > { %v1025_v39 = vmul.f32 %v1887_v40, %v1013_v13  ;;  %v660_v42 = vadd.f32 %v659_v38, %v1868_v47 }
 0x161   : > { %v1037_v45 = vadd.f32 %v1892_v44, %v1025_v39  ;;  %v785_v4 = vadd.f32 %v1866_v0, %v660_v42 }
 0x163   : > { %v1045_v23 = vpack.c.bf16 %v1037_v45, %v1037_v45  ;;  %v814_v48 = vadd.f32 %v813_v11, %v785_v4 }
 0x165   : > { %1054 = vst.msk [vmem:[%s1900_s14] sm:$0xf] %vm1053_vm1, %v1045_v23  ;;  %v1014_v15 = vadd.f32 %v1870_v19, %v814_v48 }
 0x166   : > { %v662_v49 = vpop.f32.mrf.mxu0 }
 0x167   : > { %v1026_v16 = vmul.f32 %v1887_v40, %v1014_v15  ;;  %v663_v50 = vadd.f32 %v662_v49, %v1874_v21 }
 0x169   : > { %v1038_v51 = vadd.f32 %v1892_v44, %v1026_v16  ;;  %v788_v47 = vadd.f32 %v1872_v20, %v663_v50 }
 0x16b   : > { %v1046_v52 = vpack.c.bf16 %v1038_v51, %v1038_v51  ;;  %v817_v0 = vadd.f32 %v1846_v25, %v788_v47 }
 0x16d   : > { %1055 = vst.msk [vmem:[%s1900_s14 + $0x4] sm:$0xf] %vm1053_vm1, %v1046_v52  ;;  %v1015_v54 = vadd.f32 %v1876_v24, %v817_v0 }
 0x16e   : > { %v664_v55 = vpop.f32.mrf.mxu0 }
 0x16f   : > { %v1027_v19 = vmul.f32 %v1887_v40, %v1015_v54  ;;  %v665_v56 = vadd.f32 %v664_v55, %v1880_v28 }
 0x171   : > { %v1039_v57 = vadd.f32 %v1892_v44, %v1027_v19  ;;  %v790_v21 = vadd.f32 %v1878_v27, %v665_v56 }
 0x173   : > { %v1047_v41 = vpack.c.bf16 %v1039_v57, %v1039_v57  ;;  %v819_v20 = vadd.f32 %v1850_v8, %v790_v21 }
 0x175   : > { %1056 = vst.msk [vmem:[%s1900_s14 + $0x8] sm:$0xf] %vm1053_vm1, %v1047_v41  ;;  %v1016_v25 = vadd.f32 %v1882_v30, %v819_v20 }
 0x177   : > { %v1028_v58 = vmul.f32 %v1887_v40, %v1016_v25 }
 0x179   : > { %v1040_v24 = vadd.f32 %v1892_v44, %v1028_v58 }
 0x17b   : > { %v1048_v59 = vpack.c.bf16 %v1040_v24, %v1040_v24 }
 0x17d   : > { %1057 = vst.msk [vmem:[%s1900_s14 + $0xc] sm:$0xf] %vm1053_vm1, %v1048_v59 }
 0x17e PF: > { %s14_s17 = sadd.s32 1, %s1541_s17   ;;  %s1962_s15 = smov %s1537_s16 }
 0x17f   : > { %p11_p5 = scmp.ge.s32.totalorder %s14_s17, 4   ;;  %s1963_s16 = smov %s1965_s18 }
 0x181   :  { %13 = sbr.rel (!%p11_p5) target bundleno = 2 (0x2), region = 77 }

// kernel: rcca_forward.8
= control target key start
LH: loop header
LB: loop body
LE: loop exit
PB: predicated region body
PF: predicated region fallthrough
CT: control target
= control target key end

     0   :  { %s1112_s15 = smov 0   ;;  %s1114_s16 = smov 0   ;;  %s1316_s0 = inlined_call_operand.vmem [shape: bf16[2,10,10,16], index: 0, kind: input, shape index: {}]   ;;  %s1317_s1 = inlined_call_operand.vmem [shape: bf16[3,48,16], index: 1, kind: input, shape index: {}]   ;;  %s1318_s2 = inlined_call_operand.vmem [shape: f32[1,16], index: 2, kind: input, shape index: {}]   ;;  %s1319_s3 = inlined_call_operand.vmem [shape: f32[1,16], index: 3, kind: input, shape index: {}]   ;;  %s1320_s4 = inlined_call_operand.vmem [shape: bf16[2,8,8,16], index: 4, kind: output, shape index: {}]  }
   0x1   :  { %s1116_s17 = smov 0  }
   0x2 LB: > { %s26_s18 = sadd.s32 1, %s1079_s16  ;;  %p897_p0 = scmp.ge.s32.totalorder %s1083_s17, 1  ;;  %s1083_s17 = sphi %s1116_s17, %s14_s17   ;;  %s1079_s16 = sphi %s1114_s16, %s1322_s16   ;;  %s1075_s15 = sphi %s1112_s15, %s1321_s15  }
   0x3   : > { %p28_p1 = scmp.ge.s32.totalorder %s26_s18, 2  ;;  %p201_p2 = scmp.lt.s32.totalorder %s1083_s17, 3 }
   0x5   : > { %s1324_s18 = smov (%p28_p1, %s26_s18), 0  ;;  %p202_p3 = pnand %p897_p0, %p201_p2 }
   0x6   : > { %p240_p4 = scmp.lt.s32.totalorder (!%p202_p3), %s1075_s15, 1  ;;  %s1085_s23 = smov (!%p202_p3), 32  }
   0x7   : > { %205 = sbr.rel (%p202_p3) target bundleno = 344 (0x158), region = 36  ;;  %s1086_s24 = smov (!%p202_p3), 16  }
   0xc   : > { %s1326_s15 = smov (!%p240_p4, %s1075_s15), 1  ;;  %vm420_vm0 = vcmask 130048   ;;  %vm445_vm1 = vcmask 261120   ;;  %vm535_vm2 = vcmask 392192   ;;  %vm764_vm3 = vcmask 125952  }
   0xd   : > { %s1032_s19 = smul.u32 80, %s1326_s15  ;;  %s1003_s25 = sshll.u32 %s1326_s15, 5 }
   0xe   : > { %s1275_s28 = scalar_lea.vmem %s1320_s4, %s1003_s25 }
   0xf   : > { %s1136_s22 = scalar_lea.vmem %s1316_s0, %s1032_s19 }
  0x10   : > { %v915_v0 = vld [vmem:[%s1136_s22 + $0x18] sm:$0xf]  ;;  %v1007_v1 = vld [vmem:[%s1136_s22 + $0x18] sm:$0x10]  ;;  %v919_v2 = vld [vmem:[%s1136_s22 + $0x20] sm:$0xf] }
  0x11   : > { %v916_v3 = vor.u32 %v1007_v1, %v915_v0  ;;  %v1008_v4 = vld [vmem:[%s1136_s22 + $0x20] sm:$0x10]  ;;  %v923_v6 = vld [vmem:[%s1136_s22 + $0x28] sm:$0xf]  ;;  %v1009_v10 = vld [vmem:[%s1136_s22 + $0x28] sm:$0x10] }
  0x12   : > { %v920_v5 = vor.u32 %v1008_v4, %v919_v2  ;;  %v911_v13 = vld [vmem:[%s1136_s22 + $0x10] sm:$0xf]  ;;  %v1006_v14 = vld [vmem:[%s1136_s22 + $0x10] sm:$0x10]  ;;  %v924_v15 = vor.u32 %v1009_v10, %v923_v6  ;;  %v907_v22 = vld [vmem:[%s1136_s22 + $0x8] sm:$0xf] }
  0x13   : > { %v399_v7 = vrot.slane %v916_v3, 1  ;;  %v346_v8 = vshrl.u32 %v916_v3, 16  ;;  %v348_v9 = vshll.u32 %v916_v3, 16  ;;  %v912_v21 = vor.u32 %v1006_v14, %v911_v13  ;;  %v1005_v23 = vld [vmem:[%s1136_s22 + $0x8] sm:$0x10] }
  0x14   : > { %v355_v12 = vshll.u32 %v920_v5, 16  ;;  %v400_v17 = vrot.slane %v920_v5, 1  ;;  %v353_v18 = vshrl.u32 %v920_v5, 16  ;;  %v401_v19 = vrot.slane %v924_v15, 1  ;;  %v927_v25 = vld [vmem:[%s1136_s22 + $0x30] sm:$0xf] }
  0x15   : > { %410 = vrot.lane.b32.xlu1 %v399_v7, %s1085_s23  ;;  %v350_v11 = vrot.slane %v348_v9, 1  ;;  %v362_v24 = vshll.u32 %v924_v15, 16  ;;  %v1010_v26 = vld [vmem:[%s1136_s22 + $0x30] sm:$0x10]  ;;  %v360_v27 = vshrl.u32 %v924_v15, 16  ;;  %v908_v29 = vor.u32 %v1005_v23, %v907_v22  ;;  %v1015_v23 = vld [vmem:[%s1317_s1 + $0x8] sm:$0xff] }
  0x16   : > { %v357_v20 = vrot.slane %v355_v12, 1  ;;  %414 = vrot.lane.b32.xlu2 %v401_v19, %s1085_s23  ;;  %v341_v31 = vshll.u32 %v912_v21, 16  ;;  %v928_v32 = vor.u32 %v1010_v26, %v927_v25  ;;  %v398_v35 = vrot.slane %v912_v21, 1  ;;  %v931_v44 = vld [vmem:[%s1136_s22 + $0x38] sm:$0xf]  ;;  %v1205_v22 = vld [vmem:[%s1317_s1 + $0x30] sm:$0xff] }
  0x17   : > { %v351_v16 = vor.u32 %v350_v11, %v346_v8  ;;  %v364_v28 = vrot.slane %v362_v24, 1  ;;  %v334_v34 = vshll.u32 %v908_v29, 16  ;;  %v339_v36 = vshrl.u32 %v912_v21, 16  ;;  %v1011_v45 = vld [vmem:[%s1136_s22 + $0x38] sm:$0x10]  ;;  %v1016_v21 = vld [vmem:[%s1317_s1 + $0x10] sm:$0xff] }
  0x18   : > { %v358_v30 = vor.u32 %v357_v20, %v353_v18  ;;  %v343_v37 = vrot.slane %v341_v31, 1  ;;  %v369_v38 = vshll.u32 %v928_v32, 16  ;;  %v332_v39 = vshrl.u32 %v908_v29, 16  ;;  %v903_v49 = vld [vmem:[%s1136_s22] sm:$0xf]  ;;  %v1193_v19 = vld [vmem:[%s1317_s1 + $0x38] sm:$0xff]  ;;  %1026 = vmatpush.bf16.msra.mxu1 %v1016_v21 }
  0x19   : > { %386 = vrot.lane.b32.xlu0 %v351_v16, %s1086_s24  ;;  %v365_v33 = vor.u32 %v364_v28, %v360_v27  ;;  %v336_v40 = vrot.slane %v334_v34, 1  ;;  %v367_v42 = vshrl.u32 %v928_v32, 16  ;;  %v932_v48 = vor.u32 %v1011_v45, %v931_v44  ;;  %v1004_v50 = vld [vmem:[%s1136_s22] sm:$0x10]  ;;  %v935_v51 = vld [vmem:[%s1136_s22 + $0x40] sm:$0xf] }
  0x1a   : > { %v344_v41 = vor.u32 %v343_v37, %v339_v36  ;;  %v371_v43 = vrot.slane %v369_v38, 1  ;;  %v1012_v52 = vld [vmem:[%s1136_s22 + $0x40] sm:$0x10]  ;;  %v904_v53 = vor.u32 %v1004_v50, %v903_v49  ;;  %v397_v54 = vrot.slane %v908_v29, 1  ;;  %v977_v4 = vld [vmem:[%s1136_s22 + $0x48] sm:$0xf] }
  0x1b   : > { %v337_v46 = vor.u32 %v336_v40, %v332_v39  ;;  %v376_v55 = vshll.u32 %v932_v48, 16  ;;  %v936_v56 = vor.u32 %v1012_v52, %v935_v51  ;;  %v402_v57 = vrot.slane %v928_v32, 1  ;;  %v1013_v5 = vld [vmem:[%s1136_s22 + $0x48] sm:$0x10]  ;;  %v1018_v18 = vld [vmem:[%s1317_s1 + $0x20] sm:$0xff]  ;;  %v1017_v20 = vld [vmem:[%s1317_s1 + $0x18] sm:$0xff] }
  0x1c   : > { %v372_v47 = vor.u32 %v371_v43, %v367_v42  ;;  %v327_v58 = vshll.u32 %v904_v53, 16  ;;  %v403_v59 = vrot.slane %v932_v48, 1  ;;  %v374_v60 = vshrl.u32 %v932_v48, 16  ;;  %v1019_v16 = vld [vmem:[%s1317_s1 + $0x28] sm:$0xff]  ;;  %1027 = vmatpush.bf16.msra.mxu1 %v1015_v23  ;;  %v1014_v25 = vld [vmem:[%s1317_s1] sm:$0xff] }
  0x1d   : > { %412 = vrot.lane.b32.xlu1 %v400_v17, %s1085_s23  ;;  %v378_v61 = vrot.slane %v376_v55, 1  ;;  %v476_v62 = vshll.u32 %v936_v56, 16  ;;  %v325_v63 = vshrl.u32 %v904_v53, 16  ;;  %v474_v2 = vshrl.u32 %v936_v56, 16  ;;  %v1184_v17 = vld [vmem:[%s1317_s1 + $0x40] sm:$0xff]  ;;  %1023 = vmatpush.bf16.msra.mxu3 %v1019_v16 }
  0x1e   : > { %390 = vrot.lane.b32.xlu2 %v365_v33, %s1086_s24  ;;  %v329_v0 = vrot.slane %v327_v58, 1  ;;  %v978_v8 = vor.u32 %v1013_v5, %v977_v4  ;;  %v396_v9 = vrot.slane %v904_v53, 1  ;;  %v482_v11 = vrot.slane %v936_v56, 1  ;;  %1029 = vmatpush.bf16.msra.mxu2 %v1184_v17  ;;  %v270_v29 = vld [vmem:[%s1136_s22 + $0x18] sm:$0xf] }
  0x1f   : > { %v379_v1 = vor.u32 %v378_v61, %v374_v60  ;;  %v478_v3 = vrot.slane %v476_v62, 1  ;;  %553 = vmatpush.bf16.msra.mxu0 %v1019_v16  ;;  %v276_v52 = vld [vmem:[%s1136_s22 + $0x30] sm:$0xf]  ;;  %v266_v53 = vld [vmem:[%s1136_s22 + $0x8] sm:$0xf] }
  0x20   : > { %v330_v6 = vor.u32 %v329_v0, %v325_v63  ;;  %v650_v10 = vshll.u32 %v978_v8, 16  ;;  %v648_v12 = vshrl.u32 %v978_v8, 16  ;;  %v656_v14 = vrot.slane %v978_v8, 1  ;;  %1028 = vmatpush.bf16.msra.mxu1 %v1014_v25  ;;  %v278_v4 = vld [vmem:[%s1136_s22 + $0x38] sm:$0xf] }
  0x21   : > { %388 = vrot.lane.b32.xlu0 %v358_v30, %s1086_s24  ;;  %v479_v7 = vor.u32 %v478_v3, %v474_v2  ;;  %1024 = vmatpush.bf16.msra.mxu3 %v1018_v18  ;;  %v274_v30 = vld [vmem:[%s1136_s22 + $0x28] sm:$0xf]  ;;  %v280_v8 = vld [vmem:[%s1136_s22 + $0x40] sm:$0xf] }
  0x22   : > { %v652_v13 = vrot.slane %v650_v10, 1  ;;  %1030 = vmatpush.bf16.msra.mxu2 %v1193_v19 }
  0x23   : > { %554 = vmatpush.bf16.msra.mxu0 %v1018_v18 }
  0x24   : > { %v653_v15 = vor.u32 %v652_v13, %v648_v12 }
  0x25   : > { %408 = vrot.lane.b32.xlu1 %v398_v35, %s1085_s23  ;;  %1025 = vmatpush.bf16.msra.mxu3 %v1017_v20  ;;  %v272_v35 = vld [vmem:[%s1136_s22 + $0x20] sm:$0xf] }
  0x26   : > { %382 = vrot.lane.b32.xlu2 %v337_v46, %s1086_s24  ;;  %1031 = vmatpush.bf16.msra.mxu2 %v1205_v22 }
  0x27   : > { %555 = vmatpush.bf16.msra.mxu0 %v1017_v20 }
  0x29   : > { %384 = vrot.lane.b32.xlu0 %v344_v41, %s1086_s24 }
  0x2b   : > { %618 = vmatpush.bf16.msrb.mxu0 %v1016_v21 }
  0x2d   : > { %392 = vrot.lane.b32.xlu1 %v372_v47, %s1086_s24  ;;  %v268_v47 = vld [vmem:[%s1136_s22 + $0x10] sm:$0xf] }
  0x2e   : > { %416 = vrot.lane.b32.xlu2 %v402_v57, %s1085_s23 }
  0x2f   : > { %619 = vmatpush.bf16.msrb.mxu0 %v1015_v23 }
  0x31   : > { %406 = vrot.lane.b32.xlu0 %v397_v54, %s1085_s23 }
  0x33   : > { %620 = vmatpush.bf16.msrb.mxu0 %v1014_v25 }
  0x35   : > { %418 = vrot.lane.b32.xlu1 %v403_v59, %s1085_s23 }
  0x36   : > { %380 = vrot.lane.b32.xlu2 %v330_v6, %s1086_s24 }
  0x39   : > { %394 = vrot.lane.b32.xlu0 %v379_v1, %s1086_s24 }
  0x3d   : > { %480 = vrot.lane.b32.xlu1 %v479_v7, %s1086_s24 }
  0x3e   : > { %483 = vrot.lane.b32.xlu2 %v482_v11, %s1085_s23 }
  0x41   : > { %404 = vrot.lane.b32.xlu0 %v396_v9, %s1085_s23  ;;  %v264_v9 = vld [vmem:[%s1136_s22] sm:$0xf] }
  0x45   : > { %657 = vrot.lane.b32.xlu1 %v656_v14, %s1085_s23 }
  0x49   : > { %654 = vrot.lane.b32.xlu0 %v653_v15, %s1086_s24 }
  0x70   : > { %v415_v24 = vpop.permute.xlu2 %414 }
  0x78   : > { %v391_v26 = vpop.permute.xlu2 %390 }
  0x79   : > { %v438_v33 = vsel %vm420_vm0, %v274_v30, %v391_v26 }
  0x7a   : > { %v457_v37 = vsel %vm445_vm1, %v438_v33, %v415_v24  ;;  %v282_v24 = vld [vmem:[%s1136_s22 + $0x48] sm:$0xf] }
  0x7b   : > { %v509_v42 = vunpack.c.l.b16 %v457_v37 }
  0x80   : > { %v383_v34 = vpop.permute.xlu2 %382 }
  0x81   : > { %v426_v58 = vsel %vm420_vm0, %v266_v53, %v383_v34  ;;  %v1262_v34 = vld [vmem:[%s1318_s2] ss:$0 sm:$0xff] }
  0x87   : > { %v411_v27 = vpop.permute.xlu1 %410 }
  0x88   : > { %v417_v48 = vpop.permute.xlu2 %416 }
  0x8b   : > { %v387_v28 = vpop.permute.xlu0 %386 }
  0x8c   : > { %v432_v32 = vsel %vm420_vm0, %v270_v29, %v387_v28 }
  0x8d   : > { %v453_v36 = vsel %vm445_vm1, %v432_v32, %v411_v27 }
  0x8e   : > { %v507_v41 = vunpack.c.l.b16 %v453_v36  ;;  %v1267_v36 = vld [vmem:[%s1319_s3] ss:$0 sm:$0xff] }
  0x8f   : > { %v413_v31 = vpop.permute.xlu1 %412 }
  0x90   : > { %v381_v63 = vpop.permute.xlu2 %380 }
  0x91   : > { %v423_v15 = vsel %vm420_vm0, %v264_v9, %v381_v63 }
  0x93   : > { %v389_v38 = vpop.permute.xlu0 %388 }
  0x94   : > { %v435_v39 = vsel %vm420_vm0, %v272_v35, %v389_v38 }
  0x95   : > { %v455_v40 = vsel %vm445_vm1, %v435_v39, %v413_v31 }
  0x96   : > { %v508_v43 = vunpack.c.l.b16 %v455_v40 }
  0x97   : > { %v409_v44 = vpop.permute.xlu1 %408 }
  0x98   : > { %v514_v45 = vpack.c.b16 %v508_v43, %v507_v41  ;;  %v581_v46 = vpack.c.b16 %v509_v42, %v508_v43  ;;  %v484_v11 = vpop.permute.xlu2 %483 }
  0x9a   : > { %956 = vmatmul.msk.bf16.vlgmr.msra.gmra.mxu3 %vm535_vm2, %v514_v45  ;;  %998 = vmatmul.msk.bf16.vlgmr.msra.gmra.mxu2 %vm535_vm2, %v581_v46 }
  0x9b   : > { %v385_v49 = vpop.permute.xlu0 %384 }
  0x9c   : > { %v429_v50 = vsel %vm420_vm0, %v268_v47, %v385_v49 }
  0x9d   : > { %v451_v51 = vsel %vm445_vm1, %v429_v50, %v409_v44 }
  0x9e   : > { %v506_v54 = vunpack.c.l.b16 %v451_v51 }
  0x9f   : > { %v393_v55 = vpop.permute.xlu1 %392 }
  0xa0   : > { %v441_v56 = vsel %vm420_vm0, %v276_v52, %v393_v55  ;;  %v580_v57 = vpack.c.b16 %v507_v41, %v506_v54 }
  0xa1   : > { %v459_v59 = vsel %vm445_vm1, %v441_v56, %v417_v48 }
  0xa2   : > { %972 = vmatmul.msk.bf16.vlgmr.msra.gmra.mxu1 %vm535_vm2, %v580_v57  ;;  %v510_v61 = vunpack.c.l.b16 %v459_v59 }
  0xa3   : > { %v407_v60 = vpop.permute.xlu0 %406 }
  0xa4   : > { %v449_v62 = vsel %vm445_vm1, %v426_v58, %v407_v60  ;;  %v515_v3 = vpack.c.b16 %v510_v61, %v509_v42 }
  0xa5   : > { %v505_v0 = vunpack.c.l.b16 %v449_v62 }
  0xa7   : > { %v419_v1 = vpop.permute.xlu1 %418  ;;  %v513_v2 = vpack.c.b16 %v506_v54, %v505_v0 }
  0xa9   : > { %955 = vmatmul.msk.bf16.vlgmr.msra.gmra.mxu0 %vm535_vm2, %v513_v2 }
  0xaa   : > { %957 = vmatmul.msk.bf16.gmra.mxu3 %vm535_vm2, %v515_v3  ;;  %700 = vmatpush.bf16.msra.mxu0 %v1184_v17 }
  0xab   : > { %v395_v5 = vpop.permute.xlu0 %394 }
  0xac   : > { %v444_v6 = vsel %vm420_vm0, %v278_v4, %v395_v5 }
  0xad   : > { %v461_v7 = vsel %vm445_vm1, %v444_v6, %v419_v1 }
  0xae   : > { %v511_v10 = vunpack.c.l.b16 %v461_v7  ;;  %701 = vmatpush.bf16.msra.mxu0 %v1193_v19 }
  0xaf   : > { %v481_v12 = vpop.permute.xlu1 %480 }
  0xb0   : > { %v487_v13 = vsel %vm420_vm0, %v280_v8, %v481_v12  ;;  %v582_v14 = vpack.c.b16 %v511_v10, %v510_v61 }
  0xb1   : > { %v489_v16 = vsel %vm445_vm1, %v487_v13, %v484_v11 }
  0xb2   : > { %973 = vmatmul.msk.bf16.gmra.mxu1 %vm535_vm2, %v581_v46  ;;  %999 = vmatmul.msk.bf16.gmra.mxu2 %vm535_vm2, %v582_v14  ;;  %v512_v18 = vunpack.c.l.b16 %v489_v16 }
  0xb3   : > { %v405_v17 = vpop.permute.xlu0 %404  ;;  %702 = vmatpush.bf16.msra.mxu0 %v1205_v22 }
  0xb4   : > { %v447_v20 = vsel %vm445_vm1, %v423_v15, %v405_v17  ;;  %v516_v23 = vpack.c.b16 %v512_v18, %v511_v10 }
  0xb5   : > { %v578_v19 = vunpack.c.l.b16 %v447_v20 }
  0xb7   : > { %v579_v21 = vpack.c.b16 %v505_v0, %v578_v19  ;;  %v658_v25 = vpop.permute.xlu1 %657 }
  0xb9   : > { %971 = vmatmul.msk.bf16.vlgmr.msrb.gmra.mxu0 %vm535_vm2, %v579_v21 }
  0xba   : > { %958 = vmatmul.msk.bf16.gmra.mxu3 %vm535_vm2, %v516_v23 }
  0xbb   : > { %v655_v26 = vpop.permute.xlu0 %654 }
  0xbc   : > { %v661_v27 = vsel %vm420_vm0, %v282_v24, %v655_v26 }
  0xbd   : > { %v663_v28 = vsel %vm445_vm1, %v661_v27, %v658_v25 }
  0xbe   : > { %v672_v29 = vunpack.c.l.b16 %v663_v28 }
  0xc0   : > { %v673_v22 = vpack.c.b16 %v672_v29, %v512_v18 }
  0xc2   : > { %974 = vmatmul.msk.bf16.gmra.mxu1 %vm535_vm2, %v582_v14  ;;  %1000 = vmatmul.msk.bf16.gmra.mxu2 %vm535_vm2, %v673_v22 }
  0xc9   : > { %997 = vmatmul.msk.bf16.vlgmr.msra.gmra.mxu0 %vm535_vm2, %v580_v57 }
 0x11d   : > { %v562_v30 = vpop.f32.mrf.mxu3  ;;  %v709_v31 = vpop.f32.mrf.mxu2 }
 0x11f   : > { %v627_v32 = vpop.f32.mrf.mxu1 }
 0x120   : > { %v628_v33 = vadd.f32 %v627_v32, %v562_v30 }
 0x122   : > { %v726_v35 = vadd.f32 %v709_v31, %v628_v33 }
 0x124   : > { %v738_v37 = vmul.f32 %v1262_v34, %v726_v35 }
 0x125   : > { %v564_v38 = vpop.f32.mrf.mxu3  ;;  %v711_v44 = vpop.f32.mrf.mxu2 }
 0x126   : > { %v750_v39 = vadd.f32 %v1267_v36, %v738_v37  ;;  %v557_v40 = vpop.f32.mrf.mxu0 }
 0x127   : > { %v629_v41 = vpop.f32.mrf.mxu1 }
 0x128   : > { %v758_v42 = vpack.c.bf16 %v750_v39, %v750_v39  ;;  %v630_v43 = vadd.f32 %v629_v41, %v564_v38 }
 0x12a   : > { %767 = vst.msk [vmem:[%s1275_s28 + $0x8] sm:$0xf] %vm764_vm3, %v758_v42  ;;  %v727_v45 = vadd.f32 %v711_v44, %v630_v43 }
 0x12c   : > { %v739_v46 = vmul.f32 %v1262_v34, %v727_v45 }
 0x12d   : > { %v567_v47 = vpop.f32.mrf.mxu3 }
 0x12e   : > { %v751_v48 = vadd.f32 %v1267_v36, %v739_v46  ;;  %v559_v49 = vpop.f32.mrf.mxu0 }
 0x12f   : > { %v632_v50 = vpop.f32.mrf.mxu1 }
 0x130   : > { %v759_v51 = vpack.c.bf16 %v751_v48, %v751_v48  ;;  %v633_v52 = vadd.f32 %v632_v50, %v567_v47 }
 0x132   : > { %768 = vst.msk [vmem:[%s1275_s28 + $0xc] sm:$0xf] %vm764_vm3, %v759_v51 }
 0x135   : > { %v714_v53 = vpop.f32.mrf.mxu2  ;;  %v569_v56 = vpop.f32.mrf.mxu3 }
 0x136   : > { %v728_v54 = vadd.f32 %v714_v53, %v633_v52  ;;  %v622_v55 = vpop.f32.mrf.mxu0 }
 0x137   : > { %v634_v57 = vpop.f32.mrf.mxu1  ;;  %v623_v7 = vadd.f32 %v622_v55, %v557_v40 }
 0x138   : > { %v740_v58 = vmul.f32 %v1262_v34, %v728_v54  ;;  %v635_v61 = vadd.f32 %v634_v57, %v569_v56 }
 0x13a   : > { %v752_v59 = vadd.f32 %v1267_v36, %v740_v58 }
 0x13c   : > { %v760_v60 = vpack.c.bf16 %v752_v59, %v752_v59 }
 0x13d   : > { %v716_v62 = vpop.f32.mrf.mxu2  ;;  %v572_v3 = vpop.f32.mrf.mxu3 }
 0x13e   : > { %769 = vst.msk [vmem:[%s1275_s28 + $0x10] sm:$0xf] %vm764_vm3, %v760_v60  ;;  %v729_v63 = vadd.f32 %v716_v62, %v635_v61  ;;  %v624_v0 = vpop.f32.mrf.mxu0 }
 0x13f   : > { %v637_v1 = vpop.f32.mrf.mxu1  ;;  %v625_v19 = vadd.f32 %v624_v0, %v559_v49 }
 0x140   : > { %v741_v2 = vmul.f32 %v1262_v34, %v729_v63  ;;  %v638_v6 = vadd.f32 %v637_v1, %v572_v3 }
 0x142   : > { %v753_v4 = vadd.f32 %v1267_v36, %v741_v2 }
 0x144   : > { %v761_v5 = vpack.c.bf16 %v753_v4, %v753_v4 }
 0x145   : > { %v719_v8 = vpop.f32.mrf.mxu2  ;;  %v574_v16 = vpop.f32.mrf.mxu3 }
 0x146   : > { %770 = vst.msk [vmem:[%s1275_s28 + $0x14] sm:$0xf] %vm764_vm3, %v761_v5  ;;  %v730_v9 = vadd.f32 %v719_v8, %v638_v6  ;;  %v704_v10 = vpop.f32.mrf.mxu0 }
 0x147   : > { %v724_v11 = vadd.f32 %v704_v10, %v623_v7  ;;  %v639_v14 = vpop.f32.mrf.mxu1 }
 0x148   : > { %v742_v12 = vmul.f32 %v1262_v34, %v730_v9  ;;  %v640_v20 = vadd.f32 %v639_v14, %v574_v16 }
 0x149   : > { %v736_v13 = vmul.f32 %v1262_v34, %v724_v11 }
 0x14a   : > { %v754_v15 = vadd.f32 %v1267_v36, %v742_v12 }
 0x14b   : > { %v748_v17 = vadd.f32 %v1267_v36, %v736_v13 }
 0x14c   : > { %v762_v18 = vpack.c.bf16 %v754_v15, %v754_v15 }
 0x14d   : > { %v756_v21 = vpack.c.bf16 %v748_v17, %v748_v17  ;;  %v721_v23 = vpop.f32.mrf.mxu2 }
 0x14e   : > { %771 = vst.msk [vmem:[%s1275_s28 + $0x18] sm:$0xf] %vm764_vm3, %v762_v18  ;;  %v731_v24 = vadd.f32 %v721_v23, %v640_v20  ;;  %v706_v25 = vpop.f32.mrf.mxu0 }
 0x14f   : > { %765 = vst.msk [vmem:[%s1275_s28] sm:$0xf] %vm764_vm3, %v756_v21  ;;  %v725_v26 = vadd.f32 %v706_v25, %v625_v19 }
 0x150   : > { %v743_v27 = vmul.f32 %v1262_v34, %v731_v24 }
 0x151   : > { %v737_v28 = vmul.f32 %v1262_v34, %v725_v26 }
 0x152   : > { %v755_v29 = vadd.f32 %v1267_v36, %v743_v27 }
 0x153   : > { %v749_v22 = vadd.f32 %v1267_v36, %v737_v28 }
 0x154   : > { %v763_v30 = vpack.c.bf16 %v755_v29, %v755_v29 }
 0x155   : > { %v757_v31 = vpack.c.bf16 %v749_v22, %v749_v22 }
 0x156   : > { %772 = vst.msk [vmem:[%s1275_s28 + $0x1c] sm:$0xf] %vm764_vm3, %v763_v30 }
 0x157   : > { %766 = vst.msk [vmem:[%s1275_s28 + $0x4] sm:$0xf] %vm764_vm3, %v757_v31 }
 0x158 PF: > { %s14_s17 = sadd.s32 1, %s1083_s17   ;;  %s1321_s15 = smov %s1079_s16 }
 0x159   : > { %p11_p5 = scmp.ge.s32.totalorder %s14_s17, 4   ;;  %s1322_s16 = smov %s1324_s18 }
 0x15b   :  { %13 = sbr.rel (!%p11_p5) target bundleno = 2 (0x2), region = 77 }

// kernel: rcca_forward.7
= control target key start
LH: loop header
LB: loop body
LE: loop exit
PB: predicated region body
PF: predicated region fallthrough
CT: control target
= control target key end

     0   :  { %s4501_s29 = smov 0   ;;  %s5923_s0 = inlined_call_operand.vmem [shape: bf16[2,64,16], index: 0, kind: input, shape index: {}]   ;;  %s5924_s1 = inlined_call_operand.vmem [shape: bf16[16,2], index: 1, kind: input, shape index: {}]   ;;  %s5925_s2 = inlined_call_operand.vmem [shape: f32[1,2], index: 2, kind: input, shape index: {}]   ;;  %s5926_s3 = inlined_call_operand.vmem [shape: bf16[16,2], index: 3, kind: input, shape index: {}]   ;;  %s5927_s4 = inlined_call_operand.vmem [shape: f32[1,2], index: 4, kind: input, shape index: {}]   ;;  %s5928_s5 = inlined_call_operand.vmem [shape: bf16[16,16], index: 5, kind: input, shape index: {}]   ;;  %s5929_s6 = inlined_call_operand.vmem [shape: f32[1,16], index: 6, kind: input, shape index: {}]   ;;  %s5930_s7 = inlined_call_operand.<no memory space> [shape: f32[1], index: 7, kind: input, shape index: {}]   ;;  %s5931_s8 = inlined_call_operand.vmem [shape: bf16[2,64,16], index: 8, kind: output, shape index: {}]  }
   0x1   :  { %13 = sst [smem:[#allocation2]] %s5930_s7 }
   0x2 LB: > { %s4166_s30 = sadd.s32 4294967295, %s4448_s29   ;;  %p4170_p0 = scmp.ge.s32.totalorder %s4448_s29, 1  ;;  %s4448_s29 = sphi %s4501_s29, %s19_s29  }
   0x3   : > { %p263_p1 = scmp.lt.s32.totalorder %s4448_s29, 3 }
   0x5   : > { %p264_p2 = pnand %p4170_p0, %p263_p1 }
   0x7   : > { %267 = sbr.rel (%p264_p2) target bundleno = 4610 (0x1202), region = 52 }
   0xc   : > { %v4295_v0 = vld [vmem:[%s5924_s1] sm:$0xff]  ;;  %p297_p3 = scmp.lt.s32.totalorder %s4166_s30, 1  ;;  %vm368_vm0 = vcmask 130048   ;;  %v4450_v24 = vmov 1983009808   ;;  %vm511_vm1 = vcmask 1047556  }
   0xd   : > { %v4296_v1 = vld [vmem:[%s5926_s3] sm:$0xff]  ;;  %388 = vmatpush.bf16.msra.mxu0 %v4295_v0  ;;  %v514_v25 = vunpack.c.l.s4 %v4450_v24  ;;  %v4451_v54 = vmov 1934713408   ;;  %vm751_vm2 = vcmask 15360   ;;  %vm1805_vm3 = vcmask 1043456   ;;  %s317_s10 = sld [smem:[#allocation2]] }
   0xe   : > { %434 = vmatpush.bf16.msra.mxu1 %v4296_v1  ;;  %s5944_s30 = smov (!%p297_p3, %s4166_s30), 1  ;;  %v4297_v4 = vld [vmem:[%s5928_s5] sm:$0xff]  ;;  %v528_v55 = vunpack.c.l.s4 %v4451_v54  ;;  %vm1064_vm5 = vcmask 64512   ;;  %vm1129_vm6 = vcmask 1041409   ;;  %vm1131_vm7 = vcmask 1042434  }
   0xf   : > { %s4293_s12 = sshll.u32 %s5944_s30, 5  ;;  %480 = vmatpush.bf16.msra.mxu2 %v4297_v4  ;;  %v4338_v17 = vld [vmem:[%s5927_s4] ss:$0 sm:$0xff]  ;;  %v4555_v32 = vunpack.c.0.s8 %v514_v25  ;;  %vm1133_vm8 = vcmask 1043459   ;;  %vm1135_vm9 = vcmask 1044484   ;;  %vm1137_vm10 = vcmask 1045509  }
  0x10   : > { %s4523_s15 = scalar_lea.vmem %s5923_s0, %s4293_s12  ;;  %v4337_v23 = vld [vmem:[%s5925_s2] ss:$0 sm:$0xff]  ;;  %vm1139_vm11 = vcmask 1046534   ;;  %vm1141_vm12 = vcmask 1047559   ;;  %s5886_s19 = scalar_lea.vmem %s5931_s8, %s4293_s12  ;;  %vm4102_vm13 = vcmask 125952  }
  0x11   : > { %v4298_v2 = vld [vmem:[%s4523_s15] sm:$0xff]  ;;  %v4299_v3 = vld [vmem:[%s4523_s15 + $0x8] sm:$0xff]  ;;  %v4300_v5 = vld [vmem:[%s4523_s15 + $0x10] sm:$0xff] }
  0x12   : > { %4195 = vmatmul.msk.bf16.vlgmr.msra.gmra.mxu0 %vm368_vm0, %v4298_v2  ;;  %4203 = vmatmul.msk.bf16.vlgmr.msra.gmra.mxu1 %vm368_vm0, %v4298_v2  ;;  %v4301_v6 = vld [vmem:[%s4523_s15 + $0x18] sm:$0xff] }
  0x13   : > { %4211 = vmatmul.msk.bf16.vlgmr.msra.gmra.mxu2 %vm368_vm0, %v4298_v2 }
  0x22   : > { %4196 = vmatmul.msk.bf16.gmra.mxu0 %vm368_vm0, %v4299_v3  ;;  %4204 = vmatmul.msk.bf16.gmra.mxu1 %vm368_vm0, %v4299_v3 }
  0x23   : > { %4212 = vmatmul.msk.bf16.gmra.mxu2 %vm368_vm0, %v4299_v3 }
  0x32   : > { %4197 = vmatmul.msk.bf16.gmra.mxu0 %vm368_vm0, %v4300_v5  ;;  %4205 = vmatmul.msk.bf16.gmra.mxu1 %vm368_vm0, %v4300_v5 }
  0x33   : > { %4213 = vmatmul.msk.bf16.gmra.mxu2 %vm368_vm0, %v4300_v5 }
  0x42   : > { %4198 = vmatmul.msk.bf16.gmra.mxu0 %vm368_vm0, %v4301_v6  ;;  %4206 = vmatmul.msk.bf16.gmra.mxu1 %vm368_vm0, %v4301_v6 }
  0x43   : > { %4214 = vmatmul.msk.bf16.gmra.mxu2 %vm368_vm0, %v4301_v6 }
  0x8f   : > { %v390_v7 = vpop.f32.mrf.mxu0  ;;  %v436_v8 = vpop.f32.mrf.mxu1 }
  0x90   : > { %v437_v22 = vadd.f32 %v4338_v17, %v436_v8  ;;  %v391_v40 = vadd.f32 %v4337_v23, %v390_v7 }
  0x92   : > { %v4553_v29 = vpack.c.bf16 %v437_v22, %v437_v22  ;;  %v4575_v51 = vpack.c.bf16 %v391_v40, %v391_v40 }
  0x97   : > { %v392_v9 = vpop.f32.mrf.mxu0  ;;  %v438_v10 = vpop.f32.mrf.mxu1 }
  0x98   : > { %v393_v42 = vadd.f32 %v4337_v23, %v392_v9  ;;  %v439_v43 = vadd.f32 %v4338_v17, %v438_v10  ;;  %v4594_v9 = vunpack.c.0.s8 %v528_v55 }
  0x9a   : > { %v4578_v56 = vpack.c.bf16 %v393_v42, %v393_v42  ;;  %v4580_v57 = vpack.c.bf16 %v439_v43, %v439_v43 }
  0x9f   : > { %v395_v11 = vpop.f32.mrf.mxu0  ;;  %v441_v12 = vpop.f32.mrf.mxu1 }
  0xa0   : > { %v442_v31 = vadd.f32 %v4338_v17, %v441_v12  ;;  %v396_v52 = vadd.f32 %v4337_v23, %v395_v11 }
  0xa2   : > { %v4570_v47 = vpack.c.bf16 %v442_v31, %v442_v31  ;;  %v4590_v6 = vpack.c.bf16 %v396_v52, %v396_v52 }
  0xa7   : > { %v397_v13 = vpop.f32.mrf.mxu0  ;;  %v443_v14 = vpop.f32.mrf.mxu1 }
  0xa8   : > { %v398_v58 = vadd.f32 %v4337_v23, %v397_v13  ;;  %v444_v60 = vadd.f32 %v4338_v17, %v443_v14 }
  0xaa   : > { %v4601_v13 = vpack.c.bf16 %v398_v58, %v398_v58 }
  0xaf   : > { %v400_v15 = vpop.f32.mrf.mxu0  ;;  %v446_v16 = vpop.f32.mrf.mxu1 }
  0xb0   : > { %v447_v18 = vadd.f32 %v4338_v17, %v446_v16  ;;  %v401_v30 = vadd.f32 %v4337_v23, %v400_v15 }
  0xb2   : > { %v4547_v19 = vpack.c.bf16 %v447_v18, %v447_v18  ;;  %v4563_v41 = vpack.c.bf16 %v401_v30, %v401_v30 }
  0xb4   : > { %v591_v26 = vrot.slane %v4547_v19, 4  ;;  %v510_v53 = vrot.slane %v4563_v41, 4 }
  0xb6   : > { %v592_v33 = vsel %vm511_vm1, %v591_v26, %v4553_v29  ;;  %v512_v7 = vsel %vm511_vm1, %v510_v53, %v4575_v51 }
  0xb7   : > { %v402_v20 = vpop.f32.mrf.mxu0  ;;  %v448_v21 = vpop.f32.mrf.mxu1  ;;  %v596_v45 = vperm.slane %v592_v33, %v4555_v32  ;;  %v516_v18 = vperm.slane %v512_v7, %v4555_v32 }
  0xb8   : > { %v403_v27 = vadd.f32 %v4337_v23, %v402_v20  ;;  %v449_v28 = vadd.f32 %v4338_v17, %v448_v21 }
  0xb9   : > { %v605_v61 = vrot.slane %v596_v45, 4  ;;  %v525_v33 = vrot.slane %v516_v18, 4 }
  0xba   : > { %v4559_v36 = vpack.c.bf16 %v403_v27, %v403_v27  ;;  %v4561_v37 = vpack.c.bf16 %v449_v28, %v449_v28 }
  0xbc   : > { %v539_v48 = vrot.slane %v4559_v36, 4  ;;  %v619_v49 = vrot.slane %v4561_v37, 4 }
  0xbe   : > { %v540_v2 = vsel %vm511_vm1, %v539_v48, %v4578_v56  ;;  %v620_v3 = vsel %vm511_vm1, %v619_v49, %v4580_v57 }
  0xbf   : > { %v405_v34 = vpop.f32.mrf.mxu0  ;;  %v451_v35 = vpop.f32.mrf.mxu1  ;;  %v544_v14 = vperm.slane %v540_v2, %v4555_v32  ;;  %v624_v15 = vperm.slane %v620_v3, %v4555_v32 }
  0xc0   : > { %v406_v38 = vadd.f32 %v4337_v23, %v405_v34  ;;  %v452_v39 = vadd.f32 %v4338_v17, %v451_v35 }
  0xc1   : > { %v553_v27 = vrot.slane %v544_v14, 4  ;;  %v633_v28 = vrot.slane %v624_v15, 4 }
  0xc2   : > { %v4565_v44 = vpack.c.bf16 %v452_v39, %v452_v39  ;;  %v4568_v46 = vpack.c.bf16 %v406_v38, %v406_v38 }
  0xc4   : > { %v597_v50 = vrot.slane %v4565_v44, 4  ;;  %v517_v62 = vrot.slane %v4568_v46, 4 }
  0xc6   : > { %v598_v59 = vsel %vm511_vm1, %v597_v50, %v4570_v47  ;;  %v518_v16 = vsel %vm511_vm1, %v517_v62, %v4590_v6 }
  0xc7   : > { %v602_v63 = vperm.slane %v598_v59, %v4555_v32  ;;  %v407_v0 = vpop.f32.mrf.mxu0  ;;  %v453_v1 = vpop.f32.mrf.mxu1  ;;  %v522_v24 = vperm.slane %v518_v16, %v4555_v32  ;;  %v916_v59 = vsel %vm751_vm2, %v4553_v29, 0 }
  0xc8   : > { %v408_v4 = vadd.f32 %v4337_v23, %v407_v0  ;;  %v454_v5 = vadd.f32 %v4338_v17, %v453_v1  ;;  %v4607_v17 = vpack.c.bf16 %v444_v60, %v444_v60 }
  0xc9   : > { %v603_v8 = vrot.slane %v602_v63, 4  ;;  %v606_v12 = vsel %vm511_vm1, %v602_v63, %v605_v61  ;;  %v523_v42 = vrot.slane %v522_v24, 4 }
  0xca   : > { %v4596_v10 = vpack.c.bf16 %v408_v4, %v408_v4  ;;  %v4598_v11 = vpack.c.bf16 %v454_v5, %v454_v5  ;;  %v614_v22 = vperm.slane %v606_v12, %v4594_v9 }
  0xcb   : > { %v604_v23 = vsel %vm511_vm1, %v603_v8, %v596_v45  ;;  %v526_v45 = vsel %vm511_vm1, %v522_v24, %v525_v33  ;;  %v524_v12 = vsel %vm511_vm1, %v523_v42, %v516_v18  ;;  %v992_v33 = vsel %vm751_vm2, %v4547_v19, 0 }
  0xcc   : > { %v545_v20 = vrot.slane %v4596_v10, 4  ;;  %v625_v21 = vrot.slane %v4598_v11, 4  ;;  %v610_v34 = vperm.slane %v604_v23, %v4594_v9  ;;  %v617_v39 = vrot.slane %v614_v22, 4 }
  0xcd   : > { %v662_v50 = vshrl.u32 %v614_v22, 16  ;;  %v534_v62 = vperm.slane %v526_v45, %v4594_v9  ;;  %v1030_v42 = vsel %vm751_vm2, %v4565_v44, 0  ;;  %v1011_v19 = vsel %vm751_vm2, %v4561_v37, 0  ;;  %v482_v37 = vpop.f32.mrf.mxu2 }
  0xce   : > { %v546_v25 = vsel %vm511_vm1, %v545_v20, %v4601_v13  ;;  %v626_v26 = vsel %vm511_vm1, %v625_v21, %v4607_v17  ;;  %v4632_v60 = vsel %vm511_vm1, 0, %v617_v39  ;;  %v650_v61 = vshrl.u32 %v610_v34, 16 }
  0xcf   : > { %v550_v30 = vperm.slane %v546_v25, %v4555_v32  ;;  %v630_v31 = vperm.slane %v626_v26, %v4555_v32  ;;  %v615_v5 = vrot.slane %v610_v34, 4  ;;  %v935_v20 = vsel %vm751_vm2, %v4580_v57, 0 }
  0xd0   : > { %v537_v25 = vrot.slane %v534_v62, 4  ;;  %v530_v26 = vperm.slane %v524_v12, %v4594_v9 }
  0xd1   : > { %v634_v35 = vsel %vm511_vm1, %v630_v31, %v633_v28  ;;  %v631_v38 = vrot.slane %v630_v31, 4  ;;  %v554_v40 = vsel %vm511_vm1, %v550_v30, %v553_v27  ;;  %v551_v48 = vrot.slane %v550_v30, 4 }
  0xd2   : > { %v642_v43 = vperm.slane %v634_v35, %v4594_v9  ;;  %v562_v52 = vperm.slane %v554_v40, %v4594_v9  ;;  %v616_v27 = vsel %vm511_vm1, 0, %v615_v5  ;;  %v582_v30 = vshrl.u32 %v534_v62, 16 }
  0xd3   : > { %v632_v49 = vsel %vm511_vm1, %v631_v38, %v624_v15  ;;  %v552_v29 = vsel %vm511_vm1, %v551_v48, %v544_v14  ;;  %v954_v14 = vsel %vm751_vm2, %v4570_v47, 0  ;;  %v538_v38 = vsel %vm511_vm1, 0, %v537_v25 }
  0xd4   : > { %v661_v53 = vpack.i.b16 %v642_v43, %v614_v22  ;;  %v638_v54 = vperm.slane %v632_v49, %v4594_v9  ;;  %v663_v55 = vshrl.u32 %v642_v43, 16  ;;  %v645_v58 = vrot.slane %v642_v43, 4 }
  0xd5   : > { %v565_v15 = vrot.slane %v562_v52, 4  ;;  %v558_v23 = vperm.slane %v552_v29, %v4594_v9  ;;  %v583_v24 = vshrl.u32 %v562_v52, 16  ;;  %v581_v28 = vpack.i.b16 %v562_v52, %v534_v62 }
  0xd6   : > { %v832_v63 = vsel %vm751_vm2, %v661_v53, 0  ;;  %v649_v0 = vpack.i.b16 %v638_v54, %v610_v34  ;;  %v664_v1 = vpack.i.b16 %v663_v55, %v662_v50  ;;  %v4637_v2 = vsel %vm511_vm1, 0, %v645_v58  ;;  %v484_v58 = vpop.f32.mrf.mxu2 }
  0xd7   : > { %841 = vmatpush.bf16.xpose.msrb.mxu0 %v832_v63  ;;  %v667_v3 = vpack.i.b16 %v4637_v2, %v4632_v60  ;;  %v651_v4 = vshrl.u32 %v638_v54, 16  ;;  %v643_v22 = vrot.slane %v638_v54, 4  ;;  %v566_v47 = vsel %vm511_vm1, 0, %v565_v15 }
  0xd8   : > { %v756_v7 = vsel %vm751_vm2, %v649_v0, 0  ;;  %v851_v8 = vsel %vm751_vm2, %v664_v1, 0  ;;  %v569_v34 = vpack.i.b16 %v558_v23, %v530_v26  ;;  %v584_v35 = vpack.i.b16 %v583_v24, %v582_v30 }
  0xd9   : > { %765 = vmatpush.bf16.xpose.msra.mxu3 %v756_v7  ;;  %860 = vmatpush.bf16.xpose.msrb.mxu1 %v851_v8  ;;  %v870_v16 = vsel %vm751_vm2, %v667_v3, 0  ;;  %v652_v21 = vpack.i.b16 %v651_v4, %v650_v61  ;;  %v644_v57 = vsel %vm511_vm1, 0, %v643_v22  ;;  %v587_v39 = vpack.i.b16 %v566_v47, %v538_v38  ;;  %v4339_v8 = vld [vmem:[%s5929_s6] ss:$0 sm:$0xff] }
  0xda   : > { %879 = vmatpush.bf16.xpose.msrb.mxu2 %v870_v16  ;;  %v655_v31 = vpack.i.b16 %v644_v57, %v616_v27  ;;  %v657_v43 = vshrl.u32 %v644_v57, 16  ;;  %v571_v45 = vshrl.u32 %v558_v23, 16  ;;  %v656_v48 = vshrl.u32 %v616_v27, 16 }
  0xdb   : > { %v775_v18 = vsel %vm751_vm2, %v652_v21, 0  ;;  %v570_v49 = vshrl.u32 %v530_v26, 16  ;;  %v563_v53 = vrot.slane %v558_v23, 4  ;;  %v669_v54 = vshrl.u32 %v4637_v2, 16 }
  0xdc   : > { %v794_v40 = vsel %vm751_vm2, %v655_v31, 0  ;;  %v658_v50 = vpack.i.b16 %v657_v43, %v656_v48  ;;  %v535_v55 = vrot.slane %v530_v26, 4  ;;  %v589_v29 = vshrl.u32 %v566_v47, 16 }
  0xdd   : > { %v572_v52 = vpack.i.b16 %v571_v45, %v570_v49  ;;  %v588_v5 = vshrl.u32 %v538_v38, 16  ;;  %v318_v7 = vlaneseq  ;;  %v483_v24 = vadd.f32 %v4339_v8, %v482_v37 }
  0xde   : > { %4219 = vmatmul.msk.bf16.vlgmr.msrb.gmra.mxu0 %vm751_vm2, %v581_v28  ;;  %v813_v44 = vsel %vm751_vm2, %v658_v50, 0  ;;  %v536_v62 = vsel %vm511_vm1, 0, %v535_v55  ;;  %v485_v25 = vadd.f32 %v4339_v8, %v484_v58 }
  0xdf   : > { %925 = vmatpush.bf16.xpose.msra.mxu0 %v916_v59  ;;  %v564_v59 = vsel %vm511_vm1, 0, %v563_v53  ;;  %v576_v1 = vshrl.u32 %v536_v62, 16  ;;  %v4716_v47 = vpack.c.bf16 %v483_v24, %v483_v24 }
  0xe0   : > { %4215 = vmatmul.msk.bf16.vlgmr.msra.gmra.mxu3 %vm751_vm2, %v569_v34  ;;  %4220 = vmatmul.msk.bf16.vlgmr.msrb.gmra.mxu1 %vm751_vm2, %v584_v35  ;;  %v577_v0 = vshrl.u32 %v564_v59, 16 }
  0xe1   : > { %944 = vmatpush.bf16.xpose.msra.mxu1 %v935_v20  ;;  %784 = vmatpush.bf16.xpose.msrb.mxu3 %v775_v18 }
  0xe2   : > { %963 = vmatpush.bf16.xpose.msra.mxu2 %v954_v14  ;;  %v578_v2 = vpack.i.b16 %v577_v0, %v576_v1 }
  0xe3   : > { %4221 = vmatmul.msk.bf16.vlgmr.msrb.gmra.mxu2 %vm751_vm2, %v587_v39 }
  0xe7   : > { %1001 = vmatpush.bf16.xpose.msrb.mxu0 %v992_v33  ;;  %v4718_v33 = vpack.c.bf16 %v485_v25, %v485_v25 }
  0xe9   : > { %803 = vmatpush.bf16.xpose.msra.mxu3 %v794_v40  ;;  %1020 = vmatpush.bf16.xpose.msrb.mxu1 %v1011_v19 }
  0xea   : > { %1039 = vmatpush.bf16.xpose.msrb.mxu2 %v1030_v42 }
  0xee   : > { %4223 = vmatmul.msk.bf16.vlgmr.msra.gmra.mxu0 %vm751_vm2, %v4575_v51  ;;  %v668_v51 = vshrl.u32 %v4632_v60, 16  ;;  %v487_v60 = vpop.f32.mrf.mxu2 }
  0xef   : > { %v488_v21 = vadd.f32 %v4339_v8, %v487_v60 }
  0xf0   : > { %4216 = vmatmul.msk.bf16.vlgmr.msrb.gmra.mxu3 %vm751_vm2, %v572_v52  ;;  %4224 = vmatmul.msk.bf16.vlgmr.msra.gmra.mxu1 %vm751_vm2, %v4578_v56  ;;  %v670_v61 = vpack.i.b16 %v669_v54, %v668_v51  ;;  %v575_v56 = vpack.i.b16 %v564_v59, %v536_v62 }
  0xf1   : > { %822 = vmatpush.bf16.xpose.msrb.mxu3 %v813_v44  ;;  %v4710_v57 = vpack.c.bf16 %v488_v21, %v488_v21 }
  0xf3   : > { %4225 = vmatmul.msk.bf16.vlgmr.msra.gmra.mxu2 %vm751_vm2, %v4590_v6  ;;  %v889_v6 = vsel %vm751_vm2, %v670_v61, 0 }
  0xf6   : > { %v489_v63 = vpop.f32.mrf.mxu2 }
  0xf7   : > { %v490_v22 = vadd.f32 %v4339_v8, %v489_v63 }
  0xf9   : > { %v4712_v28 = vpack.c.bf16 %v490_v22, %v490_v22 }
  0xfe   : > { %4227 = vmatmul.msk.bf16.vlgmr.msrb.gmra.mxu0 %vm751_vm2, %v4563_v41  ;;  %v973_v41 = vsel %vm751_vm2, %v4607_v17, 0  ;;  %v492_v3 = vpop.f32.mrf.mxu2  ;;  %v4698_v17 = vshrl.u32 %v318_v7, 7 }
  0xff   : > { %v493_v16 = vadd.f32 %v4339_v8, %v492_v3 }
 0x100   : > { %4217 = vmatmul.msk.bf16.vlgmr.msra.gmra.mxu3 %vm751_vm2, %v575_v56  ;;  %4228 = vmatmul.msk.bf16.vlgmr.msrb.gmra.mxu1 %vm751_vm2, %v4559_v36  ;;  %v590_v36 = vpack.i.b16 %v589_v29, %v588_v5 }
 0x101   : > { %898 = vmatpush.bf16.xpose.msra.mxu3 %v889_v6  ;;  %4315 = vset.pattern.permute.xlu0 %v4698_v17  ;;  %v4704_v18 = vpack.c.bf16 %v493_v16, %v493_v16 }
 0x102   : > { %4314 = vset.pattern.permute.xlu1 %v4698_v17 }
 0x103   : > { %4229 = vmatmul.msk.bf16.vlgmr.msrb.gmra.mxu2 %vm751_vm2, %v4568_v46  ;;  %v1049_v46 = vsel %vm751_vm2, %v4598_v11, 0  ;;  %v671_v34 = vrot.slane %v4704_v18, 4 }
 0x105   : > { %v672_v40 = vsel %vm511_vm1, %v671_v34, %v4716_v47 }
 0x106   : > { %v494_v4 = vpop.f32.mrf.mxu2  ;;  %v676_v45 = vperm.slane %v672_v40, %v4555_v32 }
 0x107   : > { %v495_v20 = vadd.f32 %v4339_v8, %v494_v4 }
 0x108   : > { %v685_v50 = vrot.slane %v676_v45, 4 }
 0x109   : > { %v4706_v26 = vpack.c.bf16 %v495_v20, %v495_v20 }
 0x10b   : > { %v699_v35 = vrot.slane %v4706_v26, 4 }
 0x10d   : > { %v700_v42 = vsel %vm511_vm1, %v699_v35, %v4718_v33 }
 0x10e   : > { %v497_v12 = vpop.f32.mrf.mxu2 }
 0x10f   : > { %v498_v15 = vadd.f32 %v4339_v8, %v497_v12 }
 0x110   : > { %4218 = vmatmul.msk.bf16.vlgmr.msrb.gmra.mxu3 %vm751_vm2, %v578_v2 }
 0x111   : > { %982 = vmatpush.bf16.xpose.msrb.mxu3 %v973_v41  ;;  %v4702_v11 = vpack.c.bf16 %v498_v15, %v498_v15 }
 0x113   : > { %v677_v30 = vrot.slane %v4702_v11, 4 }
 0x115   : > { %v678_v38 = vsel %vm511_vm1, %v677_v30, %v4710_v57 }
 0x116   : > { %v499_v14 = vpop.f32.mrf.mxu2  ;;  %v682_v19 = vperm.slane %v678_v38, %v4555_v32  ;;  %v4759_v38 = vand.u32 127, %v318_v7 }
 0x117   : > { %v500_v23 = vadd.f32 %v4339_v8, %v499_v14 }
 0x118   : > { %v683_v48 = vrot.slane %v682_v19, 4  ;;  %v686_v55 = vsel %vm511_vm1, %v682_v19, %v685_v50  ;;  %vm4763_vm4 = vcmp.eq.s32.totalorder %v4698_v17, %v4759_v38 }
 0x119   : > { %v4708_v27 = vpack.c.bf16 %v500_v23, %v500_v23  ;;  %v694_v62 = vperm.slane %v686_v55, %v4594_v9 }
 0x11a   : > { %v684_v44 = vsel %vm511_vm1, %v683_v48, %v676_v45 }
 0x11b   : > { %v705_v31 = vrot.slane %v4708_v27, 4  ;;  %v690_v53 = vperm.slane %v684_v44, %v4594_v9  ;;  %v742_v1 = vshrl.u32 %v694_v62, 16  ;;  %v697_v2 = vrot.slane %v694_v62, 4 }
 0x11d   : > { %v706_v39 = vsel %vm511_vm1, %v705_v31, %v4712_v28  ;;  %v730_v59 = vshrl.u32 %v690_v53, 16  ;;  %v695_v6 = vrot.slane %v690_v53, 4  ;;  %v698_v15 = vsel %vm511_vm1, 0, %v697_v2 }
 0x11e   : > { %v710_v43 = vperm.slane %v706_v39, %v4555_v32  ;;  %v748_v22 = vshrl.u32 %v698_v15, 16 }
 0x11f   : > { %v696_v3 = vsel %vm511_vm1, 0, %v695_v6 }
 0x120   : > { %4222 = vmatmul.msk.bf16.vlgmr.msra.gmra.mxu3 %vm751_vm2, %v590_v36  ;;  %v711_v49 = vrot.slane %v710_v43, 4 }
 0x121   : > { %1058 = vmatpush.bf16.xpose.msra.mxu3 %v1049_v46 }
 0x130   : > { %4226 = vmatmul.msk.bf16.vlgmr.msrb.gmra.mxu3 %vm751_vm2, %v4601_v13  ;;  %v704_v13 = vperm.slane %v700_v42, %v4555_v32 }
 0x132   : > { %v713_v52 = vrot.slane %v704_v13, 4  ;;  %v712_v37 = vsel %vm511_vm1, %v711_v49, %v704_v13 }
 0x133   : > { %v718_v54 = vperm.slane %v712_v37, %v4594_v9 }
 0x134   : > { %v714_v58 = vsel %vm511_vm1, %v710_v43, %v713_v52 }
 0x135   : > { %v729_v51 = vpack.i.b16 %v718_v54, %v690_v53  ;;  %v731_v61 = vshrl.u32 %v718_v54, 16  ;;  %v722_v56 = vperm.slane %v714_v58, %v4594_v9  ;;  %v723_v60 = vrot.slane %v718_v54, 4 }
 0x137   : > { %v1807_v63 = vsel %vm1805_vm3, %v729_v51, 0  ;;  %v732_v0 = vpack.i.b16 %v731_v61, %v730_v59  ;;  %v741_v41 = vpack.i.b16 %v722_v56, %v694_v62  ;;  %v724_v4 = vsel %vm511_vm1, 0, %v723_v60 }
 0x138   : > { %1816 = vmatpush.bf16.msra.mxu0 %v1807_v63  ;;  %v743_v29 = vshrl.u32 %v722_v56, 16  ;;  %v735_v36 = vpack.i.b16 %v724_v4, %v696_v3  ;;  %v737_v46 = vshrl.u32 %v724_v4, 16  ;;  %v725_v16 = vrot.slane %v722_v56, 4 }
 0x139   : > { %v1826_v5 = vsel %vm1805_vm3, %v732_v0, 0  ;;  %v1883_v8 = vsel %vm1805_vm3, %v741_v41, 0 }
 0x13a   : > { %1835 = vmatpush.bf16.msra.mxu1 %v1826_v5  ;;  %v744_v12 = vpack.i.b16 %v743_v29, %v742_v1  ;;  %v1845_v20 = vsel %vm1805_vm3, %v735_v36, 0  ;;  %v726_v23 = vsel %vm511_vm1, 0, %v725_v16 }
 0x13b   : > { %1854 = vmatpush.bf16.msra.mxu2 %v1845_v20  ;;  %v747_v25 = vpack.i.b16 %v726_v23, %v698_v15  ;;  %v749_v30 = vshrl.u32 %v726_v23, 16 }
 0x13c   : > { %1892 = vmatpush.bf16.msrb.mxu0 %v1883_v8  ;;  %v1902_v14 = vsel %vm1805_vm3, %v744_v12, 0 }
 0x13d   : > { %v1921_v31 = vsel %vm1805_vm3, %v747_v25, 0  ;;  %v750_v34 = vpack.i.b16 %v749_v30, %v748_v22 }
 0x13e   : > { %1911 = vmatpush.bf16.msrb.mxu1 %v1902_v14 }
 0x13f   : > { %1930 = vmatpush.bf16.msrb.mxu2 %v1921_v31  ;;  %v1940_v35 = vsel %vm1805_vm3, %v750_v34, 0 }
 0x140   : > { %4230 = vmatmul.msk.bf16.vlgmr.msra.gmra.mxu3 %vm751_vm2, %v4596_v10  ;;  %v736_v10 = vshrl.u32 %v696_v3, 16 }
 0x142   : > { %v738_v21 = vpack.i.b16 %v737_v46, %v736_v10 }
 0x144   : > { %v1864_v24 = vsel %vm1805_vm3, %v738_v21, 0 }
 0x145   : > { %1873 = vmatpush.bf16.msrb.mxu3 %v1864_v24 }
 0x149   : > { %1949 = vmatpush.bf16.msra.mxu3 %v1940_v35 }
 0x15b   : > { %v843_v40 = vpop.f32.mrf.mxu0 }
 0x15c   : > { %v4769_v42 = vsel %vm4763_vm4, -1e+30, %v843_v40 }
 0x15d   : > { %v862_v19 = vpop.f32.mrf.mxu1  ;;  %v1077_v43 = vsel %vm1064_vm5, %v4769_v42, -inf }
 0x15e   : > { %1078 = vmax.xlane.f32.xlu2 %v1077_v43  ;;  %v4775_v7 = vsel %vm4763_vm4, -1e+30, %v862_v19 }
 0x15f   : > { %v1080_v52 = vsel %vm1064_vm5, %v4775_v7, -inf }
 0x163   : > { %v767_v45 = vpop.f32.mrf.mxu3  ;;  %v845_v13 = vpop.f32.mrf.mxu0 }
 0x164   : > { %v4779_v48 = vsel %vm4763_vm4, -1e+30, %v767_v45 }
 0x165   : > { %v864_v50 = vpop.f32.mrf.mxu1  ;;  %v1065_v44 = vsel %vm1064_vm5, %v4779_v48, -inf }
 0x166   : > { %v881_v49 = vpop.f32.mrf.mxu2  ;;  %1081 = vmax.xlane.f32.xlu2 %v1080_v52  ;;  %1066 = vmax.xlane.f32.xlu0 %v1065_v44 }
 0x167   : > { %v4787_v37 = vsel %vm4763_vm4, -1e+30, %v881_v49 }
 0x168   : > { %v1083_v51 = vsel %vm1064_vm5, %v4787_v37, -inf }
 0x16b   : > { %v769_v53 = vpop.f32.mrf.mxu3  ;;  %v4789_v54 = vpop.f32.mrf.mxu0 }
 0x16c   : > { %v1089_v60 = vsel %vm1064_vm5, %v4789_v54, -inf }
 0x16d   : > { %v4791_v58 = vpop.f32.mrf.mxu1 }
 0x16e   : > { %v883_v55 = vpop.f32.mrf.mxu2  ;;  %1084 = vmax.xlane.f32.xlu0 %v1083_v51  ;;  %v1092_v59 = vsel %vm1064_vm5, %v4791_v58, -inf }
 0x16f   : > { %1093 = vmax.xlane.f32.xlu1 %v1092_v59 }
 0x173   : > { %v786_v61 = vpop.f32.mrf.mxu3  ;;  %v929_v62 = vpop.f32.mrf.mxu0 }
 0x174   : > { %v4803_v63 = vsel %vm4763_vm4, -1e+30, %v786_v61 }
 0x175   : > { %v948_v6 = vpop.f32.mrf.mxu1  ;;  %v1068_v3 = vsel %vm1064_vm5, %v4803_v63, -inf }
 0x176   : > { %v4797_v56 = vpop.f32.mrf.mxu2  ;;  %1090 = vmax.xlane.f32.xlu0 %v1089_v60 }
 0x177   : > { %v1095_v46 = vsel %vm1064_vm5, %v4797_v56, -inf }
 0x17b   : > { %v788_v0 = vpop.f32.mrf.mxu3  ;;  %v4805_v1 = vpop.f32.mrf.mxu0 }
 0x17c   : > { %v1101_v16 = vsel %vm1064_vm5, %v4805_v1, -inf }
 0x17d   : > { %v4807_v41 = vpop.f32.mrf.mxu1 }
 0x17e   : > { %v967_v2 = vpop.f32.mrf.mxu2  ;;  %1069 = vmax.xlane.f32.xlu0 %v1068_v3  ;;  %v1104_v22 = vsel %vm1064_vm5, %v4807_v41, -inf }
 0x183   : > { %v805_v4 = vpop.f32.mrf.mxu3  ;;  %v1005_v29 = vpop.f32.mrf.mxu0 }
 0x184   : > { %v4813_v5 = vsel %vm4763_vm4, -1e+30, %v805_v4 }
 0x185   : > { %v1024_v10 = vpop.f32.mrf.mxu1  ;;  %v1071_v8 = vsel %vm1064_vm5, %v4813_v5, -inf }
 0x186   : > { %v4815_v36 = vpop.f32.mrf.mxu2  ;;  %1096 = vmax.xlane.f32.xlu0 %v1095_v46  ;;  %1072 = vmax.xlane.f32.xlu1 %v1071_v8 }
 0x187   : > { %v1107_v24 = vsel %vm1064_vm5, %v4815_v36, -inf }
 0x18b   : > { %v807_v12 = vpop.f32.mrf.mxu3 }
 0x18e   : > { %v1043_v15 = vpop.f32.mrf.mxu2  ;;  %1102 = vmax.xlane.f32.xlu0 %v1101_v16 }
 0x193   : > { %v824_v20 = vpop.f32.mrf.mxu3 }
 0x194   : > { %v4825_v21 = vsel %vm4763_vm4, -1e+30, %v824_v20 }
 0x195   : > { %v1074_v14 = vsel %vm1064_vm5, %v4825_v21, -inf }
 0x196   : > { %1105 = vmax.xlane.f32.xlu0 %v1104_v22  ;;  %1075 = vmax.xlane.f32.xlu1 %v1074_v14 }
 0x19b   : > { %v826_v23 = vpop.f32.mrf.mxu3 }
 0x19e   : > { %1108 = vmax.xlane.f32.xlu0 %v1107_v24 }
 0x1a3   : > { %v900_v25 = vpop.f32.mrf.mxu3 }
 0x1a4   : > { %v4835_v30 = vsel %vm4763_vm4, -1e+30, %v900_v25 }
 0x1a5   : > { %v1086_v31 = vsel %vm1064_vm5, %v4835_v30, -inf }
 0x1a6   : > { %1087 = vmax.xlane.f32.xlu1 %v1086_v31 }
 0x1ab   : > { %v902_v34 = vpop.f32.mrf.mxu3 }
 0x1b3   : > { %v4839_v35 = vpop.f32.mrf.mxu3 }
 0x1b4   : > { %v1098_v40 = vsel %vm1064_vm5, %v4839_v35, -inf }
 0x1b5   : > { %1099 = vmax.xlane.f32.xlu1 %v1098_v40 }
 0x1bb   : > { %v986_v19 = vpop.f32.mrf.mxu3 }
 0x1c3   : > { %v4843_v43 = vpop.f32.mrf.mxu3 }
 0x1c4   : > { %v1110_v45 = vsel %vm1064_vm5, %v4843_v43, -inf }
 0x1c5   : > { %1111 = vmax.xlane.f32.xlu0 %v1110_v45 }
 0x1cb   : > { %v1062_v13 = vpop.f32.mrf.mxu3 }
 0x1cc   : > { %v5932_v13 = vmov 0  }
 0x1d1   : > { %v1079_v55 = vpop.xlane.xlu2 %1078 }
 0x1d2   : > { %v1125_v4 = vperm.slane %v1079_v55, %v4759_v38 }
 0x1d9   : > { %v1067_v49 = vpop.xlane.xlu0 %1066  ;;  %v1082_v29 = vpop.xlane.xlu2 %1081 }
 0x1da   : > { %v1121_v6 = vperm.slane %v1067_v49, %v4759_v38  ;;  %v1126_v46 = vperm.slane %v1082_v29, %v4759_v38 }
 0x1e1   : > { %v1085_v50 = vpop.xlane.xlu0 %1084 }
 0x1e2   : > { %v4847_v52 = vpop.xlane.xlu1 %1093  ;;  %v1127_v12 = vperm.slane %v1085_v50, %v4759_v38 }
 0x1e9   : > { %v4849_v44 = vpop.xlane.xlu0 %1090 }
 0x1f1   : > { %v1070_v51 = vpop.xlane.xlu0 %1069 }
 0x1f2   : > { %v1122_v61 = vperm.slane %v1070_v51, %v4759_v38 }
 0x1f4   : > { %v1130_v0 = vsel %vm1129_vm6, %v1122_v61, %v1121_v6 }
 0x1f9   : > { %v1073_v53 = vpop.xlane.xlu1 %1072  ;;  %v1097_v49 = vpop.xlane.xlu0 %1096 }
 0x1fa   : > { %v1123_v62 = vperm.slane %v1073_v53, %v4759_v38 }
 0x1fc   : > { %v1132_v2 = vsel %vm1131_vm7, %v1123_v62, %v1130_v0 }
 0x201   : > { %v1103_v50 = vpop.xlane.xlu0 %1102 }
 0x209   : > { %v1076_v59 = vpop.xlane.xlu1 %1075  ;;  %v1106_v51 = vpop.xlane.xlu0 %1105 }
 0x20a   : > { %v1124_v60 = vperm.slane %v1076_v59, %v4759_v38 }
 0x20c   : > { %v1134_v3 = vsel %vm1133_vm8, %v1124_v60, %v1132_v2 }
 0x20d   : > { %v1136_v10 = vsel %vm1135_vm9, %v1125_v4, %v1134_v3 }
 0x20e   : > { %v1138_v8 = vsel %vm1137_vm10, %v1126_v46, %v1136_v10 }
 0x20f   : > { %v1140_v20 = vsel %vm1139_vm11, %v1127_v12, %v1138_v8 }
 0x211   : > { %v1109_v59 = vpop.xlane.xlu0 %1108 }
 0x219   : > { %v1088_v15 = vpop.xlane.xlu1 %1087 }
 0x21a   : > { %v1128_v16 = vperm.slane %v1088_v15, %v4759_v38 }
 0x21c   : > { %v1142_v22 = vsel %vm1141_vm12, %v1128_v16, %v1140_v20 }
 0x21d   : > { %1144 = vxpose.xlu2.b32.start.end [1/1] (short) (narrow) %v1142_v22, 8 }
 0x228   : > { %v1100_v61 = vpop.xlane.xlu1 %1099 }
 0x238   : > { %v1112_v62 = vpop.xlane.xlu0 %1111 }
 0x27f   : > { %4316 = vset.pattern.permute.xlu2 %v4698_v17 }
 0x2b6   : > { %v1160_v14 = vpop.trf.xlu2 }
 0x2b7   : > { %v1191_v23 = vperm.slane %v1160_v14, 2  ;;  %v1177_v24 = vperm.slane %v1160_v14, 0  ;;  %v1184_v25 = vperm.slane %v1160_v14, 1  ;;  %v1198_v31 = vperm.slane %v1160_v14, 3 }
 0x2b8   : > { %v1226_v34 = vperm.slane %v1160_v14, 7  ;;  %v1205_v40 = vperm.slane %v1160_v14, 4  ;;  %v1212_v19 = vperm.slane %v1160_v14, 5  ;;  %v1219_v45 = vperm.slane %v1160_v14, 6 }
 0x2b9   : > { %1196 = vperm.xlu2 %4316, %v1191_v23   ;;  %1182 = vperm.xlu1 %4314, %v1177_v24  }
 0x2ba   : > { %1189 = vperm.xlu0 %4315, %v1184_v25  }
 0x2c1   : > { %1203 = vperm.xlu1 %4314, %v1198_v31   ;;  %4318 = vset.pattern.permute.xlu2 %v5932_v13 }
 0x2c2   : > { %1231 = vperm.xlu0 %4315, %v1226_v34  }
 0x2c9   : > { %1210 = vperm.xlu1 %4314, %v1205_v40  }
 0x2ca   : > { %4319 = vset.pattern.permute.xlu0 %v5932_v13 }
 0x2d1   : > { %1217 = vperm.xlu1 %4314, %v1212_v19  }
 0x2d9   : > { %1224 = vperm.xlu1 %4314, %v1219_v45  }
 0x2e1   : > { %4317 = vset.pattern.permute.xlu1 %v5932_v13 }
 0x313   : > { %v1197_v53 = vpop.permute.xlu2 %1196 }
 0x314   : > { %v1243_v55 = vmax.f32 %v1097_v49, %v1197_v53 }
 0x316   : > { %1264 = vperm.xlu2 %4318, %v1243_v55  }
 0x32b   : > { %v1183_v6 = vpop.permute.xlu1 %1182 }
 0x32c   : > { %v1241_v60 = vmax.f32 %v4849_v44, %v1183_v6  ;;  %v1190_v0 = vpop.permute.xlu0 %1189 }
 0x32d   : > { %v1242_v3 = vmax.f32 %v4847_v52, %v1190_v0 }
 0x32e   : > { %1258 = vperm.xlu1 %4317, %v1241_v60  }
 0x333   : > { %v1204_v2 = vpop.permute.xlu1 %1203 }
 0x334   : > { %v1244_v29 = vmax.f32 %v1100_v61, %v1204_v2  ;;  %v1232_v12 = vpop.permute.xlu0 %1231 }
 0x335   : > { %v1248_v16 = vmax.f32 %v1112_v62, %v1232_v12 }
 0x336   : > { %1261 = vperm.xlu1 %4317, %v1242_v3  }
 0x33b   : > { %v1211_v4 = vpop.permute.xlu1 %1210 }
 0x33c   : > { %v1245_v10 = vmax.f32 %v1103_v50, %v1211_v4 }
 0x33e   : > { %1270 = vperm.xlu0 %4319, %v1245_v10   ;;  %1267 = vperm.xlu1 %4317, %v1244_v29  }
 0x343   : > { %v1218_v46 = vpop.permute.xlu1 %1217 }
 0x344   : > { %v1246_v8 = vmax.f32 %v1106_v51, %v1218_v46 }
 0x346   : > { %1273 = vperm.xlu2 %4318, %v1246_v8   ;;  %4320 = vset.pattern.permute.xlu0 %v4698_v17 }
 0x34b   : > { %v1225_v15 = vpop.permute.xlu1 %1224 }
 0x34c   : > { %v1247_v44 = vmax.f32 %v1109_v59, %v1225_v15 }
 0x34e   : > { %1276 = vperm.xlu1 %4317, %v1247_v44   ;;  %1279 = vperm.xlu2 %4318, %v1248_v16  }
 0x356   : > { %4321 = vset.pattern.permute.xlu2 %v4698_v17 }
 0x370   : > { %v1265_v23 = vpop.permute.xlu2 %1264 }
 0x371   : > { %v1419_v34 = vsub.f32 %v4797_v56, %v1265_v23  ;;  %v1283_v59 = vperm.slane %v1265_v23, %v4759_v38 }
 0x373   : > { %v1429_v19 = vmul.f32 1.442695, %v1419_v34 }
 0x3a0   : > { %v1259_v52 = vpop.permute.xlu1 %1258 }
 0x3a1   : > { %v1417_v20 = vsub.f32 %v4789_v54, %v1259_v52  ;;  %v1281_v53 = vperm.slane %v1259_v52, %v4759_v38 }
 0x3a3   : > { %v1425_v22 = vmul.f32 1.442695, %v1417_v20 }
 0x3a5   : > { %4340 = vpow2.f32 %v1425_v22 }
 0x3a8   : > { %v1262_v14 = vpop.permute.xlu1 %1261 }
 0x3a9   : > { %v1418_v24 = vsub.f32 %v4791_v58, %v1262_v14  ;;  %v1282_v54 = vperm.slane %v1262_v14, %v4759_v38  ;;  %v4886_v58 = vpop.permute.xlu2 %1273 }
 0x3aa   : > { %v1286_v4 = vperm.slane %v4886_v58, %v4759_v38 }
 0x3ab   : > { %v1427_v25 = vmul.f32 1.442695, %v1418_v24  ;;  %v4876_v31 = vpop.eup %4340  ;;  %v1289_v56 = vsel %vm1129_vm6, %v1282_v54, %v1281_v53 }
 0x3ac   : > { %v1441_v40 = vsel %vm1064_vm5, %v4876_v31, 0.0  ;;  %v1290_v62 = vsel %vm1131_vm7, %v1283_v59, %v1289_v56 }
 0x3ad   : > { %4342 = vpow2.f32 %v1427_v25  ;;  %1442 = vadd.xlane.f32.xlu2 %v1441_v40 }
 0x3ae   : > { %4344 = vpow2.f32 %v1429_v19 }
 0x3b0   : > { %v1268_v50 = vpop.permute.xlu1 %1267  ;;  %v1271_v51 = vpop.permute.xlu0 %1270 }
 0x3b1   : > { %v1284_v55 = vperm.slane %v1268_v50, %v4759_v38  ;;  %v1285_v6 = vperm.slane %v1271_v51, %v4759_v38  ;;  %v4899_v2 = vpop.permute.xlu2 %1279 }
 0x3b2   : > { %v1288_v46 = vperm.slane %v4899_v2, %v4759_v38 }
 0x3b3   : > { %v4881_v45 = vpop.eup %4342  ;;  %v1291_v60 = vsel %vm1133_vm8, %v1284_v55, %v1290_v62  ;;  %v1420_v62 = vsub.f32 %v4839_v35, %v1268_v50 }
 0x3b4   : > { %v1444_v49 = vsel %vm1064_vm5, %v4881_v45, 0.0  ;;  %v4892_v61 = vpop.eup %4344  ;;  %v1292_v3 = vsel %vm1135_vm9, %v1285_v6, %v1291_v60 }
 0x3b5   : > { %1445 = vadd.xlane.f32.xlu2 %v1444_v49  ;;  %v1447_v0 = vsel %vm1064_vm5, %v4892_v61, 0.0  ;;  %v1293_v8 = vsel %vm1137_vm10, %v1286_v4, %v1292_v3 }
 0x3bd   : > { %1448 = vadd.xlane.f32.xlu2 %v1447_v0  ;;  %v1431_v0 = vmul.f32 1.442695, %v1420_v62 }
 0x3c0   : > { %v4904_v29 = vpop.permute.xlu1 %1276 }
 0x3c1   : > { %v1287_v10 = vperm.slane %v4904_v29, %v4759_v38 }
 0x3c3   : > { %v1294_v12 = vsel %vm1139_vm11, %v1287_v10, %v1293_v8  ;;  %v1421_v10 = vsub.f32 %v4805_v1, %v1271_v51  ;;  %v1422_v1 = vsub.f32 %v4807_v41, %v4886_v58  ;;  %v1423_v58 = vsub.f32 %v4815_v36, %v4904_v29 }
 0x3c4   : > { %v1295_v15 = vsel %vm1141_vm12, %v1288_v46, %v1294_v12 }
 0x3c5   : > { %1297 = vxpose.xlu1.b32.start.end [1/1] (short) (narrow) %v1295_v15, 8  ;;  %v1433_v35 = vmul.f32 1.442695, %v1421_v10 }
 0x418   : > { %4322 = vset.pattern.permute.xlu1 %v4698_v17 }
 0x420   : > { %v4914_v34 = vpop.xlane.xlu2 %1442 }
 0x428   : > { %v4916_v40 = vpop.xlane.xlu2 %1445 }
 0x430   : > { %v4918_v19 = vpop.xlane.xlu2 %1448 }
 0x469   : > { %v1313_v16 = vpop.trf.xlu1 }
 0x46a   : > { %v1336_v44 = vperm.slane %v1313_v16, 1  ;;  %v1329_v52 = vperm.slane %v1313_v16, 0  ;;  %v1343_v20 = vperm.slane %v1313_v16, 2  ;;  %v1350_v22 = vperm.slane %v1313_v16, 3 }
 0x46b   : > { %v1357_v14 = vperm.slane %v1313_v16, 4  ;;  %v1364_v23 = vperm.slane %v1313_v16, 5  ;;  %v1371_v24 = vperm.slane %v1313_v16, 6  ;;  %v1378_v25 = vperm.slane %v1313_v16, 7 }
 0x46c   : > { %1341 = vperm.xlu2 %4321, %v1336_v44   ;;  %1334 = vperm.xlu0 %4320, %v1329_v52  }
 0x474   : > { %1348 = vperm.xlu2 %4321, %v1343_v20   ;;  %1355 = vperm.xlu0 %4320, %v1350_v22  }
 0x47c   : > { %1362 = vperm.xlu2 %4321, %v1357_v14   ;;  %1369 = vperm.xlu0 %4320, %v1364_v23  }
 0x484   : > { %1376 = vperm.xlu2 %4321, %v1371_v24   ;;  %1383 = vperm.xlu0 %4320, %v1378_v25  }
 0x4c6   : > { %v1342_v54 = vpop.permute.xlu2 %1341 }
 0x4c7   : > { %v1386_v49 = vsub.f32 %v4803_v63, %v1342_v54 }
 0x4c9   : > { %v1395_v53 = vmul.f32 1.442695, %v1386_v49  ;;  %v1437_v49 = vmul.f32 1.442695, %v1423_v58 }
 0x4cb   : > { %4346 = vpow2.f32 %v1395_v53 }
 0x4ce   : > { %v1349_v56 = vpop.permute.xlu2 %1348 }
 0x4cf   : > { %v1387_v55 = vsub.f32 %v4813_v5, %v1349_v56 }
 0x4d1   : > { %v4922_v59 = vpop.eup %4346  ;;  %v1397_v6 = vmul.f32 1.442695, %v1387_v55  ;;  %v1424_v55 = vsub.f32 %v4843_v43, %v4899_v2 }
 0x4d2   : > { %v1468_v60 = vsel %vm1064_vm5, %v4922_v59, 0.0 }
 0x4d3   : > { %4348 = vpow2.f32 %v1397_v6  ;;  %1469 = vadd.xlane.f32.xlu0 %v1468_v60 }
 0x4d4   : > { %4350 = vpow2.f32 %v1431_v0  ;;  %v1439_v0 = vmul.f32 1.442695, %v1424_v55 }
 0x4d6   : > { %v1363_v3 = vpop.permute.xlu2 %1362 }
 0x4d7   : > { %v1389_v4 = vsub.f32 %v4769_v42, %v1363_v3 }
 0x4d9   : > { %v4928_v63 = vpop.eup %4348  ;;  %v1401_v5 = vmul.f32 1.442695, %v1389_v4 }
 0x4da   : > { %v1471_v46 = vsel %vm1064_vm5, %v4928_v63, 0.0  ;;  %v4933_v12 = vpop.eup %4350 }
 0x4db   : > { %4352 = vpow2.f32 %v1401_v5  ;;  %1472 = vadd.xlane.f32.xlu1 %v1471_v46  ;;  %v1450_v52 = vsel %vm1064_vm5, %v4933_v12, 0.0 }
 0x4dc   : > { %4354 = vpow2.f32 %v1433_v35 }
 0x4de   : > { %v1377_v50 = vpop.permute.xlu2 %1376  ;;  %v1335_v8 = vpop.permute.xlu0 %1334 }
 0x4df   : > { %v1391_v15 = vsub.f32 %v4787_v37, %v1377_v50  ;;  %v1385_v42 = vsub.f32 %v4779_v48, %v1335_v8  ;;  %v1435_v37 = vmul.f32 1.442695, %v1422_v1 }
 0x4e1   : > { %v4937_v16 = vpop.eup %4352  ;;  %v1405_v51 = vmul.f32 1.442695, %v1391_v15  ;;  %v1393_v44 = vmul.f32 1.442695, %v1385_v42 }
 0x4e2   : > { %v1477_v20 = vsel %vm1064_vm5, %v4937_v16, 0.0  ;;  %v4945_v22 = vpop.eup %4354 }
 0x4e3   : > { %4356 = vpow2.f32 %v1405_v51  ;;  %1451 = vadd.xlane.f32.xlu1 %v1450_v52  ;;  %1478 = vadd.xlane.f32.xlu0 %v1477_v20  ;;  %v1453_v25 = vsel %vm1064_vm5, %v4945_v22, 0.0 }
 0x4e4   : > { %4358 = vpow2.f32 %v1393_v44 }
 0x4e5   : > { %4360 = vpow2.f32 %v1435_v37 }
 0x4e6   : > { %v1356_v48 = vpop.permute.xlu0 %1355 }
 0x4e7   : > { %v1388_v14 = vsub.f32 %v4825_v21, %v1356_v48 }
 0x4e9   : > { %v4948_v41 = vpop.eup %4356  ;;  %v1399_v23 = vmul.f32 1.442695, %v1388_v14 }
 0x4ea   : > { %v4952_v24 = vpop.eup %4358  ;;  %v1483_v54 = vsel %vm1064_vm5, %v4948_v41, 0.0 }
 0x4eb   : > { %4362 = vpow2.f32 %v1399_v23  ;;  %1454 = vadd.xlane.f32.xlu1 %v1453_v25  ;;  %1484 = vadd.xlane.f32.xlu0 %v1483_v54  ;;  %v1465_v21 = vsel %vm1064_vm5, %v4952_v24, 0.0  ;;  %v4960_v56 = vpop.eup %4360 }
 0x4ec   : > { %1466 = vadd.xlane.f32.xlu2 %v1465_v21  ;;  %4364 = vpow2.f32 %v1437_v49  ;;  %v1456_v6 = vsel %vm1064_vm5, %v4960_v56, 0.0 }
 0x4ee   : > { %v1370_v53 = vpop.permute.xlu0 %1369 }
 0x4ef   : > { %v1390_v36 = vsub.f32 %v4775_v7, %v1370_v53 }
 0x4f1   : > { %v4963_v29 = vpop.eup %4362  ;;  %v1403_v62 = vmul.f32 1.442695, %v1390_v36 }
 0x4f2   : > { %v1474_v60 = vsel %vm1064_vm5, %v4963_v29, 0.0  ;;  %v4971_v4 = vpop.eup %4364 }
 0x4f3   : > { %4366 = vpow2.f32 %v1403_v62  ;;  %1457 = vadd.xlane.f32.xlu1 %v1456_v6  ;;  %v1459_v2 = vsel %vm1064_vm5, %v4971_v4, 0.0 }
 0x4f4   : > { %1475 = vadd.xlane.f32.xlu2 %v1474_v60  ;;  %4368 = vpow2.f32 %v1439_v0 }
 0x4f6   : > { %v1384_v3 = vpop.permute.xlu0 %1383 }
 0x4f7   : > { %v1392_v7 = vsub.f32 %v4835_v30, %v1384_v3 }
 0x4f9   : > { %v4974_v10 = vpop.eup %4366  ;;  %v1407_v43 = vmul.f32 1.442695, %v1392_v7 }
 0x4fa   : > { %v1480_v5 = vsel %vm1064_vm5, %v4974_v10, 0.0  ;;  %v4980_v46 = vpop.eup %4368 }
 0x4fb   : > { %4370 = vpow2.f32 %v1407_v43  ;;  %1460 = vadd.xlane.f32.xlu1 %v1459_v2  ;;  %v1462_v30 = vsel %vm1064_vm5, %v4980_v46, 0.0 }
 0x4fc   : > { %1481 = vadd.xlane.f32.xlu2 %v1480_v5 }
 0x501   : > { %v4982_v35 = vpop.eup %4370 }
 0x502   : > { %v1486_v50 = vsel %vm1064_vm5, %v4982_v35, 0.0 }
 0x503   : > { %1463 = vadd.xlane.f32.xlu1 %v1462_v30 }
 0x504   : > { %1487 = vadd.xlane.f32.xlu2 %v1486_v50 }
 0x546   : > { %v1470_v15 = vpop.xlane.xlu0 %1469 }
 0x547   : > { %v1498_v44 = vperm.slane %v1470_v15, %v4759_v38 }
 0x54e   : > { %v1473_v52 = vpop.xlane.xlu1 %1472 }
 0x54f   : > { %v1499_v48 = vperm.slane %v1473_v52, %v4759_v38 }
 0x556   : > { %v1479_v1 = vpop.xlane.xlu0 %1478  ;;  %v1452_v15 = vpop.xlane.xlu1 %1451 }
 0x557   : > { %v1501_v54 = vperm.slane %v1479_v1, %v4759_v38 }
 0x55e   : > { %v1485_v21 = vpop.xlane.xlu0 %1484 }
 0x55f   : > { %v1467_v8 = vpop.xlane.xlu2 %1466  ;;  %v1503_v36 = vperm.slane %v1485_v21, %v4759_v38 }
 0x560   : > { %v1497_v51 = vperm.slane %v1467_v8, %v4759_v38 }
 0x562   : > { %v1505_v20 = vsel %vm1129_vm6, %v1498_v44, %v1497_v51 }
 0x563   : > { %v1506_v58 = vsel %vm1131_vm7, %v1499_v48, %v1505_v20 }
 0x567   : > { %v1476_v42 = vpop.xlane.xlu2 %1475 }
 0x568   : > { %v1500_v37 = vperm.slane %v1476_v42, %v4759_v38  ;;  %v1455_v42 = vpop.xlane.xlu1 %1454 }
 0x56a   : > { %v1507_v23 = vsel %vm1133_vm8, %v1500_v37, %v1506_v58 }
 0x56b   : > { %v1508_v49 = vsel %vm1135_vm9, %v1501_v54, %v1507_v23 }
 0x56f   : > { %v1482_v14 = vpop.xlane.xlu2 %1481 }
 0x570   : > { %v1502_v25 = vperm.slane %v1482_v14, %v4759_v38  ;;  %v1458_v44 = vpop.xlane.xlu1 %1457 }
 0x572   : > { %v1509_v53 = vsel %vm1137_vm10, %v1502_v25, %v1508_v49 }
 0x573   : > { %v1510_v6 = vsel %vm1139_vm11, %v1503_v36, %v1509_v53 }
 0x577   : > { %v1488_v55 = vpop.xlane.xlu2 %1487 }
 0x578   : > { %v1504_v62 = vperm.slane %v1488_v55, %v4759_v38  ;;  %v1461_v48 = vpop.xlane.xlu1 %1460 }
 0x57a   : > { %v1511_v60 = vsel %vm1141_vm12, %v1504_v62, %v1510_v6 }
 0x57b   : > { %1513 = vxpose.xlu0.b32.start.end [1/1] (short) (narrow) %v1511_v60, 8 }
 0x580   : > { %v1464_v21 = vpop.xlane.xlu1 %1463 }
 0x61f   : > { %v1529_v0 = vpop.trf.xlu0 }
 0x620   : > { %v1595_v3 = vperm.slane %v1529_v0, 7  ;;  %v1553_v7 = vperm.slane %v1529_v0, 1  ;;  %v1546_v43 = vperm.slane %v1529_v0, 0  ;;  %v1560_v2 = vperm.slane %v1529_v0, 2 }
 0x621   : > { %v1567_v5 = vperm.slane %v1529_v0, 3  ;;  %v1574_v30 = vperm.slane %v1529_v0, 4  ;;  %v1581_v50 = vperm.slane %v1529_v0, 5  ;;  %v1588_v8 = vperm.slane %v1529_v0, 6 }
 0x622   : > { %1600 = vperm.xlu1 %4322, %v1595_v3   ;;  %1558 = vperm.xlu0 %4320, %v1553_v7  }
 0x623   : > { %1551 = vperm.xlu2 %4321, %v1546_v43  }
 0x62a   : > { %4324 = vset.pattern.permute.xlu1 %v5932_v13 }
 0x62b   : > { %1565 = vperm.xlu2 %4321, %v1560_v2  }
 0x633   : > { %1572 = vperm.xlu2 %4321, %v1567_v5  }
 0x63b   : > { %1579 = vperm.xlu2 %4321, %v1574_v30  }
 0x643   : > { %1586 = vperm.xlu2 %4321, %v1581_v50  }
 0x64b   : > { %1593 = vperm.xlu2 %4321, %v1588_v8  }
 0x653   : > { %4323 = vset.pattern.permute.xlu2 %v5932_v13 }
 0x67d   : > { %v1552_v1 = vpop.permute.xlu2 %1551 }
 0x67e   : > { %v1610_v51 = vadd.f32 %v1552_v1, %v4914_v34 }
 0x680   : > { %4372 = vrcp.f32 %v1610_v51 }
 0x685   : > { %v1566_v52 = vpop.permute.xlu2 %1565 }
 0x686   : > { %v4373_v20 = vpop.eup %4372  ;;  %v1612_v49 = vadd.f32 %v1566_v52, %v4918_v19 }
 0x687   : > { %1635 = vperm.xlu2 %4323, %v4373_v20  }
 0x68d   : > { %v1573_v37 = vpop.permute.xlu2 %1572 }
 0x68e   : > { %v1613_v14 = vadd.f32 %v1573_v37, %v1452_v15 }
 0x690   : > { %4374 = vrcp.f32 %v1613_v14 }
 0x694   : > { %v1559_v58 = vpop.permute.xlu0 %1558  ;;  %v1601_v55 = vpop.permute.xlu1 %1600 }
 0x695   : > { %v1611_v23 = vadd.f32 %v1559_v58, %v4916_v40  ;;  %v1580_v25 = vpop.permute.xlu2 %1579  ;;  %v1617_v62 = vadd.f32 %v1601_v55, %v1464_v21 }
 0x696   : > { %v4375_v54 = vpop.eup %4374  ;;  %v1614_v6 = vadd.f32 %v1580_v25, %v1455_v42 }
 0x697   : > { %1644 = vperm.xlu1 %4324, %v4375_v54   ;;  %4376 = vrcp.f32 %v1611_v23 }
 0x698   : > { %4378 = vrcp.f32 %v1612_v49 }
 0x69d   : > { %v1587_v34 = vpop.permute.xlu2 %1586  ;;  %v4377_v53 = vpop.eup %4376 }
 0x69e   : > { %v1615_v36 = vadd.f32 %v1587_v34, %v1458_v44  ;;  %1638 = vperm.xlu2 %4323, %v4377_v53   ;;  %v4379_v60 = vpop.eup %4378 }
 0x6a0   : > { %4380 = vrcp.f32 %v1615_v36 }
 0x6a1   : > { %4382 = vrcp.f32 %v1617_v62 }
 0x6a2   : > { %4384 = vrcp.f32 %v1614_v6 }
 0x6a5   : > { %v1594_v40 = vpop.permute.xlu2 %1593 }
 0x6a6   : > { %v4381_v0 = vpop.eup %4380  ;;  %1641 = vperm.xlu2 %4323, %v4379_v60   ;;  %v1616_v3 = vadd.f32 %v1594_v40, %v1461_v48 }
 0x6a7   : > { %1650 = vperm.xlu1 %4324, %v4381_v0   ;;  %v4383_v7 = vpop.eup %4382 }
 0x6a8   : > { %v4385_v43 = vpop.eup %4384  ;;  %4386 = vrcp.f32 %v1616_v3 }
 0x6ae   : > { %1647 = vperm.xlu2 %4323, %v4385_v43   ;;  %v4387_v19 = vpop.eup %4386 }
 0x6af   : > { %1656 = vperm.xlu1 %4324, %v4383_v7  }
 0x6b6   : > { %1653 = vperm.xlu2 %4323, %v4387_v19  }
 0x6b7   : > { %4325 = vset.pattern.permute.xlu1 %v4698_v17 }
 0x6e1   : > { %v5009_v2 = vpop.permute.xlu2 %1635 }
 0x6e2   : > { %v1658_v1 = vperm.slane %v5009_v2, %v4759_v38 }
 0x6f8   : > { %v5011_v5 = vpop.permute.xlu2 %1638 }
 0x6f9   : > { %v1659_v15 = vperm.slane %v5011_v5, %v4759_v38 }
 0x6fb   : > { %v1666_v52 = vsel %vm1129_vm6, %v1659_v15, %v1658_v1 }
 0x700   : > { %v5013_v30 = vpop.permute.xlu2 %1641 }
 0x701   : > { %v1660_v42 = vperm.slane %v5013_v30, %v4759_v38 }
 0x703   : > { %v1667_v20 = vsel %vm1131_vm7, %v1660_v42, %v1666_v52  ;;  %v2016_v52 = vsel %vm1805_vm3, %v4712_v28, 0 }
 0x708   : > { %v5017_v8 = vpop.permute.xlu2 %1647 }
 0x709   : > { %v5015_v50 = vpop.permute.xlu1 %1644  ;;  %v1662_v37 = vperm.slane %v5017_v8, %v4759_v38 }
 0x70a   : > { %v1661_v51 = vperm.slane %v5015_v50, %v4759_v38 }
 0x70c   : > { %v1668_v48 = vsel %vm1133_vm8, %v1661_v51, %v1667_v20  ;;  %v1959_v20 = vsel %vm1805_vm3, %v4716_v47, 0 }
 0x70d   : > { %v1669_v23 = vsel %vm1135_vm9, %v1662_v37, %v1668_v48 }
 0x710   : > { %v5036_v58 = vpop.permute.xlu2 %1653 }
 0x711   : > { %v1664_v54 = vperm.slane %v5036_v58, %v4759_v38 }
 0x719   : > { %v5027_v44 = vpop.permute.xlu1 %1650 }
 0x71a   : > { %v1663_v14 = vperm.slane %v5027_v44, %v4759_v38 }
 0x71c   : > { %v1670_v25 = vsel %vm1137_vm10, %v1663_v14, %v1669_v23 }
 0x71d   : > { %v1671_v34 = vsel %vm1139_vm11, %v1664_v54, %v1670_v25 }
 0x721   : > { %v5042_v21 = vpop.permute.xlu1 %1656 }
 0x722   : > { %v1665_v49 = vperm.slane %v5042_v21, %v4759_v38 }
 0x724   : > { %v1672_v53 = vsel %vm1141_vm12, %v1665_v49, %v1671_v34 }
 0x725   : > { %1674 = vxpose.xlu2.b32.start.end [1/1] (short) (narrow) %v1672_v53, 8 }
 0x787   : > { %4326 = vset.pattern.permute.xlu2 %v4698_v17 }
 0x7be   : > { %v1690_v36 = vpop.trf.xlu2 }
 0x7bf   : > { %v1741_v55 = vperm.slane %v1690_v36, 5  ;;  %v1727_v62 = vperm.slane %v1690_v36, 3  ;;  %v1706_v6 = vperm.slane %v1690_v36, 0  ;;  %v1720_v60 = vperm.slane %v1690_v36, 2 }
 0x7c0   : > { %v1755_v0 = vperm.slane %v1690_v36, 7  ;;  %v1713_v40 = vperm.slane %v1690_v36, 1  ;;  %v1734_v3 = vperm.slane %v1690_v36, 4  ;;  %v1748_v7 = vperm.slane %v1690_v36, 6 }
 0x7c1   : > { %1746 = vperm.xlu2 %4326, %v1741_v55   ;;  %1732 = vperm.xlu1 %4325, %v1727_v62   ;;  %v2073_v62 = vsel %vm1805_vm3, %v4702_v11, 0  ;;  %v2054_v11 = vsel %vm1805_vm3, %v4706_v26, 0  ;;  %v1787_v26 = vmul.f32 %v4881_v45, %v5011_v5  ;;  %v1792_v45 = vmul.f32 %v4971_v4, %v5036_v58 }
 0x7c2   : > { %1711 = vperm.xlu0 %4320, %v1706_v6  }
 0x7c9   : > { %1725 = vperm.xlu1 %4325, %v1720_v60  }
 0x7ca   : > { %1760 = vperm.xlu0 %4320, %v1755_v0  }
 0x7d1   : > { %1718 = vperm.xlu1 %4325, %v1713_v40  }
 0x7d2   : > { %1739 = vperm.xlu0 %4320, %v1734_v3   ;;  %v4438_v3 = vld [vmem:[%s5926_s3] sm:$0xff] }
 0x7d9   : > { %1753 = vperm.xlu1 %4325, %v1748_v7  }
 0x81b   : > { %v1747_v55 = vpop.permute.xlu2 %1746 }
 0x833   : > { %v1733_v43 = vpop.permute.xlu1 %1732 }
 0x834   : > { %v1765_v19 = vmul.f32 %v4963_v29, %v1733_v43  ;;  %v1712_v15 = vpop.permute.xlu0 %1711 }
 0x835   : > { %v1762_v42 = vmul.f32 %v4952_v24, %v1712_v15  ;;  %v1997_v24 = vsel %vm1805_vm3, %v4710_v57, 0  ;;  %v1978_v57 = vsel %vm1805_vm3, %v4718_v33, 0  ;;  %v1767_v33 = vmul.f32 %v4974_v10, %v1747_v55  ;;  %v4437_v10 = vld [vmem:[%s5928_s5] sm:$0xff] }
 0x836   : > { %v1773_v1 = vpack.c.bf16 %v1765_v19, %v1765_v19 }
 0x837   : > { %v1770_v51 = vpack.c.bf16 %v1762_v42, %v1762_v42  ;;  %v1775_v60 = vpack.c.bf16 %v1767_v33, %v1767_v33 }
 0x838   : > { %4234 = vmatmul.msk.bf16.vlgmr.msrb.gmra.mxu3 %vm1064_vm5, %v1773_v1 }
 0x839   : > { %4231 = vmatmul.msk.bf16.vlgmr.msra.gmra.mxu0 %vm1064_vm5, %v1770_v51  ;;  %2025 = vmatpush.bf16.msrb.mxu3 %v2016_v52 }
 0x83a   : > { %1968 = vmatpush.bf16.msra.mxu0 %v1959_v20 }
 0x83b   : > { %v1726_v37 = vpop.permute.xlu1 %1725 }
 0x83c   : > { %v1764_v29 = vmul.f32 %v4928_v63, %v1726_v37  ;;  %v1761_v48 = vpop.permute.xlu0 %1760  ;;  %v2035_v63 = vsel %vm1805_vm3, %v4704_v18, 0  ;;  %v1789_v18 = vmul.f32 %v4933_v12, %v5015_v50  ;;  %v1788_v12 = vmul.f32 %v4892_v61, %v5013_v30 }
 0x83d   : > { %v1769_v28 = vmul.f32 %v4982_v35, %v1761_v48  ;;  %v1790_v61 = vmul.f32 %v4945_v22, %v5017_v8  ;;  %v1795_v30 = vpack.c.bf16 %v1787_v26, %v1787_v26  ;;  %v1791_v22 = vmul.f32 %v4960_v56, %v5027_v44 }
 0x83e   : > { %v1772_v14 = vpack.c.bf16 %v1764_v29, %v1764_v29  ;;  %v1797_v6 = vpack.c.bf16 %v1789_v18, %v1789_v18 }
 0x83f   : > { %v1777_v49 = vpack.c.bf16 %v1769_v28, %v1769_v28  ;;  %v1798_v40 = vpack.c.bf16 %v1790_v61, %v1790_v61  ;;  %v1799_v5 = vpack.c.bf16 %v1791_v22, %v1791_v22 }
 0x840   : > { %4233 = vmatmul.msk.bf16.vlgmr.msra.gmra.mxu2 %vm1064_vm5, %v1772_v14 }
 0x841   : > { %2006 = vmatpush.bf16.msra.mxu2 %v1997_v24 }
 0x843   : > { %v1719_v23 = vpop.permute.xlu1 %1718 }
 0x844   : > { %v1763_v47 = vmul.f32 %v4922_v59, %v1719_v23  ;;  %v1740_v25 = vpop.permute.xlu0 %1739  ;;  %v2092_v59 = vsel %vm1805_vm3, %v4708_v27, 0  ;;  %v1786_v27 = vmul.f32 %v4876_v31, %v5009_v2  ;;  %v4436_v31 = vld [vmem:[%s5924_s1] sm:$0xff]  ;;  %v1793_v2 = vmul.f32 %v4980_v46, %v5042_v21 }
 0x845   : > { %v1766_v54 = vmul.f32 %v4937_v16, %v1740_v25  ;;  %v1800_v46 = vpack.c.bf16 %v1792_v45, %v1792_v45 }
 0x846   : > { %v1771_v34 = vpack.c.bf16 %v1763_v47, %v1763_v47  ;;  %v1794_v0 = vpack.c.bf16 %v1786_v27, %v1786_v27  ;;  %v1801_v50 = vpack.c.bf16 %v1793_v2, %v1793_v2  ;;  %v5144_v2 = vstv %s317_s10 }
 0x847   : > { %v1774_v53 = vpack.c.bf16 %v1766_v54, %v1766_v54 }
 0x848   : > { %4232 = vmatmul.msk.bf16.vlgmr.msra.gmra.mxu1 %vm1064_vm5, %v1771_v34  ;;  %4238 = vmatmul.msk.bf16.vlgmr.msra.gmra.mxu3 %vm1064_vm5, %v1777_v49 }
 0x849   : > { %4235 = vmatmul.msk.bf16.vlgmr.msrb.gmra.mxu0 %vm1064_vm5, %v1774_v53  ;;  %1987 = vmatpush.bf16.msra.mxu1 %v1978_v57 }
 0x84a   : > { %2044 = vmatpush.bf16.msrb.mxu0 %v2035_v63  ;;  %2101 = vmatpush.bf16.msra.mxu3 %v2092_v59 }
 0x84b   : > { %v1754_v16 = vpop.permute.xlu1 %1753 }
 0x84c   : > { %v1768_v35 = vmul.f32 %v4948_v41, %v1754_v16  ;;  %v1796_v41 = vpack.c.bf16 %v1788_v12, %v1788_v12 }
 0x84e   : > { %v1776_v36 = vpack.c.bf16 %v1768_v35, %v1768_v35 }
 0x850   : > { %4237 = vmatmul.msk.bf16.vlgmr.msrb.gmra.mxu2 %vm1064_vm5, %v1776_v36 }
 0x851   : > { %2082 = vmatpush.bf16.msrb.mxu2 %v2073_v62 }
 0x858   : > { %4236 = vmatmul.msk.bf16.vlgmr.msrb.gmra.mxu1 %vm1064_vm5, %v1775_v60  ;;  %4242 = vmatmul.msk.bf16.vlgmr.msrb.gmra.mxu3 %vm1064_vm5, %v1797_v6 }
 0x859   : > { %4239 = vmatmul.msk.bf16.vlgmr.msra.gmra.mxu0 %vm1064_vm5, %v1794_v0  ;;  %2063 = vmatpush.bf16.msrb.mxu1 %v2054_v11  ;;  %v323_v0 = vld [vmem:[%s4523_s15] sm:$0xff]  }
 0x85a   : > { %2268 = vmatpush.bf16.msra.mxu0 %v4436_v31  ;;  %v331_v26 = vunpack.c.l.bf16 %v323_v0 }
 0x860   : > { %4241 = vmatmul.msk.bf16.vlgmr.msra.gmra.mxu2 %vm1064_vm5, %v1796_v41 }
 0x861   : > { %2342 = vmatpush.bf16.msra.mxu2 %v4437_v10 }
 0x868   : > { %4240 = vmatmul.msk.bf16.vlgmr.msra.gmra.mxu1 %vm1064_vm5, %v1795_v30  ;;  %4246 = vmatmul.msk.bf16.vlgmr.msra.gmra.mxu3 %vm1064_vm5, %v1801_v50 }
 0x869   : > { %4243 = vmatmul.msk.bf16.vlgmr.msrb.gmra.mxu0 %vm1064_vm5, %v1798_v40  ;;  %2305 = vmatpush.bf16.msra.mxu1 %v4438_v3  ;;  %v332_v3 = vunpack.c.h.bf16 %v323_v0 }
 0x870   : > { %4245 = vmatmul.msk.bf16.vlgmr.msrb.gmra.mxu2 %vm1064_vm5, %v1800_v46 }
 0x878   : > { %4244 = vmatmul.msk.bf16.vlgmr.msrb.gmra.mxu1 %vm1064_vm5, %v1799_v5 }
 0x8b6   : > { %v5114_v8 = vpop.f32.mrf.mxu0 }
 0x8bb   : > { %v5116_v21 = vpop.f32.mrf.mxu3 }
 0x8bc   : > { %v2120_v51 = vrot.slane %v5116_v21, 4 }
 0x8be   : > { %v1820_v7 = vpop.f32.mrf.mxu0 }
 0x8c3   : > { %v5118_v43 = vpop.f32.mrf.mxu2  ;;  %v1877_v19 = vpop.f32.mrf.mxu3 }
 0x8c4   : > { %v2107_v52 = vrot.slane %v5118_v43, 4 }
 0x8c5   : > { %v1837_v15 = vpop.f32.mrf.mxu1 }
 0x8c6   : > { %v5120_v42 = vpop.f32.mrf.mxu0  ;;  %v2121_v44 = vsel %vm511_vm1, %v2120_v51, %v1837_v15  ;;  %v2109_v28 = vsel %vm511_vm1, %v2107_v52, %v5114_v8  ;;  %v2122_v22 = vrot.slane %v1837_v15, 4 }
 0x8c7   : > { %v2127_v20 = vperm.slane %v2121_v44, %v4555_v32  ;;  %v2115_v34 = vperm.slane %v2109_v28, %v4555_v32 }
 0x8c9   : > { %v2156_v54 = vrot.slane %v2127_v20, 4  ;;  %v2158_v60 = vrot.slane %v2115_v34, 4 }
 0x8cb   : > { %v1858_v4 = vpop.f32.mrf.mxu2  ;;  %v1951_v58 = vpop.f32.mrf.mxu3  ;;  %v2157_v63 = vsel %vm511_vm1, %v2156_v54, %v2115_v34  ;;  %v2159_v50 = vsel %vm511_vm1, %v2127_v20, %v2158_v60 }
 0x8cc   : > { %v2144_v48 = vrot.slane %v1951_v58, 4  ;;  %v2163_v62 = vperm.slane %v2157_v63, %v4594_v9  ;;  %v2167_v4 = vperm.slane %v2159_v50, %v4594_v9 }
 0x8cd   : > { %v1839_v1 = vpop.f32.mrf.mxu1 }
 0x8ce   : > { %v1896_v56 = vpop.f32.mrf.mxu0  ;;  %v2206_v41 = vrot.slane %v2163_v62, 4 }
 0x8cf   : > { %v2123_v56 = vsel %vm511_vm1, %v5116_v21, %v2122_v22  ;;  %v2110_v21 = vrot.slane %v5114_v8, 4  ;;  %v326_v8 = vld [vmem:[%s4523_s15 + $0xc] sm:$0xff]  }
 0x8d3   : > { %v5126_v37 = vpop.f32.mrf.mxu2  ;;  %v1953_v29 = vpop.f32.mrf.mxu3 }
 0x8d4   : > { %v2132_v14 = vrot.slane %v5126_v37, 4 }
 0x8d5   : > { %v1913_v24 = vpop.f32.mrf.mxu1 }
 0x8d6   : > { %v2133_v23 = vsel %vm511_vm1, %v2132_v14, %v5120_v42  ;;  %v2145_v47 = vsel %vm511_vm1, %v2144_v48, %v1913_v24  ;;  %v1970_v25 = vpop.f32.mrf.mxu0  ;;  %v2146_v5 = vrot.slane %v1913_v24, 4  ;;  %v2210_v48 = vrot.slane %v2167_v4, 4 }
 0x8d7   : > { %v2151_v49 = vperm.slane %v2145_v47, %v4555_v32  ;;  %v2139_v53 = vperm.slane %v2133_v23, %v4555_v32  ;;  %v2131_v24 = vperm.slane %v2123_v56, %v4555_v32 }
 0x8d8   : > { %v2147_v44 = vsel %vm511_vm1, %v1951_v58, %v2146_v5  ;;  %v2134_v58 = vrot.slane %v5120_v42, 4 }
 0x8d9   : > { %v2180_v57 = vrot.slane %v2151_v49, 4  ;;  %v2182_v27 = vrot.slane %v2139_v53, 4  ;;  %v2155_v28 = vperm.slane %v2147_v44, %v4555_v32 }
 0x8da   : > { %v2135_v34 = vsel %vm511_vm1, %v5126_v37, %v2134_v58 }
 0x8db   : > { %v2181_v59 = vsel %vm511_vm1, %v2180_v57, %v2139_v53  ;;  %v1934_v16 = vpop.f32.mrf.mxu2  ;;  %v2027_v35 = vpop.f32.mrf.mxu3  ;;  %v2183_v10 = vsel %vm511_vm1, %v2151_v49, %v2182_v27  ;;  %v2111_v49 = vsel %vm511_vm1, %v5118_v43, %v2110_v21  ;;  %v325_v53 = vld [vmem:[%s4523_s15 + $0x8] sm:$0xf]  ;;  %v2168_v57 = vrot.slane %v2131_v24, 4 }
 0x8dc   : > { %v2187_v36 = vperm.slane %v2181_v59, %v4594_v9  ;;  %v2191_v7 = vperm.slane %v2183_v10, %v4594_v9  ;;  %v2192_v63 = vrot.slane %v2155_v28, 4  ;;  %v334_v27 = vunpack.c.l.bf16 %v326_v8 }
 0x8dd   : > { %v1915_v55 = vpop.f32.mrf.mxu1 }
 0x8de   : > { %v2204_v18 = vrot.slane %v2187_v36, 4  ;;  %v1972_v33 = vpop.f32.mrf.mxu0  ;;  %v2207_v30 = vsel %vm511_vm1, %v2187_v36, %v2206_v41  ;;  %v2208_v52 = vrot.slane %v2191_v7, 4  ;;  %v2211_v47 = vsel %vm511_vm1, %v2191_v7, %v2210_v48 }
 0x8df   : > { %v2223_v59 = vadd.f32 %v2211_v47, %v2027_v35  ;;  %v2119_v36 = vperm.slane %v2111_v49, %v4555_v32  ;;  %v2143_v55 = vperm.slane %v2135_v34, %v4555_v32  ;;  %v330_v47 = vld [vmem:[%s4523_s15 + $0x18] sm:$0xff]  }
 0x8e0   : > { %v2205_v6 = vsel %vm511_vm1, %v2204_v18, %v2163_v62  ;;  %v333_v62 = vunpack.c.l.bf16 %v325_v53  ;;  %v338_v49 = vunpack.c.h.bf16 %v330_v47 }
 0x8e1   : > { %v2220_v11 = vadd.f32 %v2205_v6, %v1970_v25  ;;  %v2209_v25 = vsel %vm511_vm1, %v2208_v52, %v2167_v4  ;;  %v2232_v43 = vmul.f32 %v5144_v2, %v2223_v59  ;;  %v2169_v37 = vsel %vm511_vm1, %v2168_v57, %v2119_v36 }
 0x8e2   : > { %v2193_v6 = vsel %vm511_vm1, %v2192_v63, %v2143_v55  ;;  %v2175_v60 = vperm.slane %v2169_v37, %v4594_v9  ;;  %v335_v4 = vunpack.c.h.bf16 %v326_v8 }
 0x8e3   : > { %v2008_v12 = vpop.f32.mrf.mxu2  ;;  %v2029_v31 = vpop.f32.mrf.mxu3  ;;  %v2229_v40 = vmul.f32 %v5144_v2, %v2220_v11  ;;  %v2199_v0 = vperm.slane %v2193_v6, %v4594_v9  ;;  %v5188_v11 = vadd.f32 %v2232_v43, %v334_v27 }
 0x8e4   : > { %v2222_v54 = vadd.f32 %v2209_v25, %v2008_v12  ;;  %v2214_v10 = vrot.slane %v2175_v60, 4  ;;  %v337_v25 = vunpack.c.l.bf16 %v330_v47 }
 0x8e5   : > { %v1989_v61 = vpop.f32.mrf.mxu1  ;;  %v5152_v1 = vadd.f32 %v2229_v40, %v331_v26  ;;  %v2212_v41 = vrot.slane %v2199_v0, 4  ;;  %v328_v40 = vld [vmem:[%s4523_s15 + $0x14] sm:$0xf] }
 0x8e6   : > { %v2221_v45 = vadd.f32 %v2207_v30, %v1989_v61  ;;  %v2046_v46 = vpop.f32.mrf.mxu0  ;;  %v2231_v18 = vmul.f32 %v5144_v2, %v2222_v54  ;;  %v2215_v61 = vsel %vm511_vm1, %v2199_v0, %v2214_v10  ;;  %v336_v5 = vunpack.c.l.bf16 %v328_v40 }
 0x8e7   : > { %v2213_v50 = vsel %vm511_vm1, %v2212_v41, %v2175_v60  ;;  %v5231_v60 = vld [vmem:[%s5927_s4] ss:$0 sm:$0xff] }
 0x8e8   : > { %v2230_v19 = vmul.f32 %v5144_v2, %v2221_v45  ;;  %v5184_v35 = vadd.f32 %v2231_v18, %v333_v62  ;;  %v2224_v45 = vadd.f32 %v2213_v50, %v2046_v46 }
 0x8ea   : > { %v5154_v51 = vadd.f32 %v2230_v19, %v332_v3  ;;  %v2246_v31 = vpack.c.bf16 %v5188_v11, %v5184_v35  ;;  %v2194_v3 = vrot.slane %v2143_v55, 4  ;;  %v2170_v19 = vrot.slane %v2119_v36, 4 }
 0x8eb   : > { %v2010_v20 = vpop.f32.mrf.mxu2  ;;  %v5159_v29 = vpop.f32.mrf.mxu3  ;;  %v2233_v56 = vmul.f32 %v5144_v2, %v2224_v45 }
 0x8ec   : > { %v2245_v15 = vpack.c.bf16 %v5154_v51, %v5152_v1  ;;  %v2195_v22 = vsel %vm511_vm1, %v2155_v28, %v2194_v3  ;;  %v2171_v52 = vsel %vm511_vm1, %v2131_v24, %v2170_v19 }
 0x8ed   : > { %v1991_v14 = vpop.f32.mrf.mxu1  ;;  %v2203_v44 = vperm.slane %v2195_v22, %v4594_v9  ;;  %v2179_v46 = vperm.slane %v2171_v52, %v4594_v9 }
 0x8ee   : > { %v2048_v23 = vpop.f32.mrf.mxu0  ;;  %4247 = vmatmul.msk.bf16.vlgmr.msra.gmra.mxu0 %vm368_vm0, %v2245_v15  ;;  %4251 = vmatmul.msk.bf16.vlgmr.msra.gmra.mxu1 %vm368_vm0, %v2245_v15 }
 0x8ef   : > { %4255 = vmatmul.msk.bf16.vlgmr.msra.gmra.mxu2 %vm368_vm0, %v2245_v15  ;;  %v5205_v15 = vadd.f32 %v2233_v56, %v335_v4  ;;  %v2216_v48 = vrot.slane %v2203_v44, 4  ;;  %v2218_v28 = vrot.slane %v2179_v46, 4 }
 0x8f1   : > { %v2217_v23 = vsel %vm511_vm1, %v2216_v48, %v2179_v46  ;;  %v2219_v21 = vsel %vm511_vm1, %v2203_v44, %v2218_v28  ;;  %v5253_v44 = vld [vmem:[%s5929_s6] ss:$0 sm:$0xff] }
 0x8f2   : > { %v2227_v58 = vadd.f32 %v2219_v21, %v5159_v29 }
 0x8f3   : > { %v2084_v16 = vpop.f32.mrf.mxu2  ;;  %v2105_v42 = vpop.f32.mrf.mxu3 }
 0x8f4   : > { %v2226_v24 = vadd.f32 %v2217_v23, %v2084_v16  ;;  %v2236_v34 = vmul.f32 %v5144_v2, %v2227_v58 }
 0x8f5   : > { %v2065_v33 = vpop.f32.mrf.mxu1 }
 0x8f6   : > { %v2225_v30 = vadd.f32 %v2215_v61, %v2065_v33  ;;  %v2235_v54 = vmul.f32 %v5144_v2, %v2226_v24  ;;  %v5221_v57 = vadd.f32 %v2236_v34, %v338_v49 }
 0x8f8   : > { %v2234_v7 = vmul.f32 %v5144_v2, %v2225_v30  ;;  %v5219_v53 = vadd.f32 %v2235_v54, %v337_v25  ;;  %5939 = vst [vmem:[#allocation4_spill] sm:$0xff] %v5221_v57 }
 0x8fa   : > { %v5203_v20 = vadd.f32 %v2234_v7, %v336_v5  ;;  %v2248_v63 = vpack.c.bf16 %v5221_v57, %v5219_v53 }
 0x8fb   : > { %v2086_v12 = vpop.f32.mrf.mxu2 }
 0x8fc   : > { %5938 = vst [vmem:[#allocation3_spill] sm:$0xff] %v5203_v20  ;;  %v2247_v14 = vpack.c.bf16 %v5203_v20, %v5205_v15 }
 0x8fd   : > { %v2067_v26 = vpop.f32.mrf.mxu1 }
 0x8fe   : > { %4248 = vmatmul.msk.bf16.gmra.mxu0 %vm368_vm0, %v2246_v31  ;;  %4252 = vmatmul.msk.bf16.gmra.mxu1 %vm368_vm0, %v2246_v31  ;;  %v4440_v26 = vld [vmem:[%s5925_s2] ss:$0 sm:$0xff] }
 0x8ff   : > { %4256 = vmatmul.msk.bf16.gmra.mxu2 %vm368_vm0, %v2246_v31 }
 0x90e   : > { %4249 = vmatmul.msk.bf16.gmra.mxu0 %vm368_vm0, %v2247_v14  ;;  %4253 = vmatmul.msk.bf16.gmra.mxu1 %vm368_vm0, %v2247_v14 }
 0x90f   : > { %4257 = vmatmul.msk.bf16.gmra.mxu2 %vm368_vm0, %v2247_v14 }
 0x91e   : > { %4250 = vmatmul.msk.bf16.gmra.mxu0 %vm368_vm0, %v2248_v63  ;;  %4254 = vmatmul.msk.bf16.gmra.mxu1 %vm368_vm0, %v2248_v63 }
 0x91f   : > { %4258 = vmatmul.msk.bf16.gmra.mxu2 %vm368_vm0, %v2248_v63 }
 0x96b   : > { %v2270_v29 = vpop.f32.mrf.mxu0  ;;  %v2307_v59 = vpop.f32.mrf.mxu1 }
 0x96c   : > { %v2308_v10 = vadd.f32 %v5231_v60, %v2307_v59  ;;  %v2271_v30 = vadd.f32 %v4440_v26, %v2270_v29 }
 0x96e   : > { %v2327_v3 = vpack.c.bf16 %v2308_v10, %v2308_v10  ;;  %v5247_v7 = vpack.c.bf16 %v2271_v30, %v2271_v30 }
 0x970   : > { %v5258_v24 = vsel %vm751_vm2, %v2327_v3, 0 }
 0x972   : > { %v2344_v8 = vpop.f32.mrf.mxu2 }
 0x973   : > { %v2272_v16 = vpop.f32.mrf.mxu0  ;;  %v2309_v42 = vpop.f32.mrf.mxu1  ;;  %v2345_v52 = vadd.f32 %v5253_v44, %v2344_v8 }
 0x974   : > { %v2310_v40 = vadd.f32 %v5231_v60, %v2309_v42  ;;  %v2273_v46 = vadd.f32 %v4440_v26, %v2272_v16 }
 0x975   : > { %v5272_v16 = vpack.c.bf16 %v2345_v52, %v2345_v52 }
 0x976   : > { %v2328_v48 = vpack.c.bf16 %v2310_v40, %v2310_v40  ;;  %v5274_v42 = vpack.c.bf16 %v2273_v46, %v2273_v46 }
 0x97a   : > { %v2346_v36 = vpop.f32.mrf.mxu2 }
 0x97b   : > { %v2275_v55 = vpop.f32.mrf.mxu0  ;;  %v2312_v62 = vpop.f32.mrf.mxu1  ;;  %v2347_v14 = vadd.f32 %v5253_v44, %v2346_v36  ;;  %v5277_v36 = vsel %vm751_vm2, %v2328_v48, 0 }
 0x97c   : > { %v2313_v45 = vadd.f32 %v5231_v60, %v2312_v62  ;;  %v2276_v21 = vadd.f32 %v4440_v26, %v2275_v55 }
 0x97d   : > { %v5279_v55 = vpack.c.bf16 %v2347_v14, %v2347_v14 }
 0x97e   : > { %v2329_v25 = vpack.c.bf16 %v2313_v45, %v2313_v45  ;;  %v5281_v62 = vpack.c.bf16 %v2276_v21, %v2276_v21 }
 0x982   : > { %v2349_v18 = vpop.f32.mrf.mxu2 }
 0x983   : > { %v2277_v33 = vpop.f32.mrf.mxu0  ;;  %v2314_v27 = vpop.f32.mrf.mxu1  ;;  %v2350_v54 = vadd.f32 %v5253_v44, %v2349_v18 }
 0x984   : > { %v2278_v18 = vadd.f32 %v4440_v26, %v2277_v33  ;;  %v2315_v30 = vadd.f32 %v5231_v60, %v2314_v27 }
 0x986   : > { %v5302_v14 = vpack.c.bf16 %v2278_v18, %v2278_v18  ;;  %v5315_v18 = vpack.c.bf16 %v2315_v30, %v2315_v30 }
 0x98a   : > { %v2351_v43 = vpop.f32.mrf.mxu2 }
 0x98b   : > { %v2280_v37 = vpop.f32.mrf.mxu0  ;;  %v2317_v6 = vpop.f32.mrf.mxu1  ;;  %v2352_v45 = vadd.f32 %v5253_v44, %v2351_v43 }
 0x98c   : > { %v2318_v0 = vadd.f32 %v5231_v60, %v2317_v6  ;;  %v2281_v61 = vadd.f32 %v4440_v26, %v2280_v37 }
 0x98e   : > { %v5240_v50 = vpack.c.bf16 %v2318_v0, %v2318_v0  ;;  %v5244_v22 = vpack.c.bf16 %v2281_v61, %v2281_v61  ;;  %v5286_v0 = vsel %vm751_vm2, %v2329_v25, 0  ;;  %v5292_v61 = vpack.c.bf16 %v2350_v54, %v2350_v54 }
 0x990   : > { %v2452_v19 = vrot.slane %v5240_v50, 4  ;;  %v2372_v49 = vrot.slane %v5244_v22, 4 }
 0x992   : > { %v5234_v12 = vpop.f32.mrf.mxu2  ;;  %v2453_v63 = vsel %vm511_vm1, %v2452_v19, %v2327_v3 }
 0x993   : > { %v2282_v31 = vpop.f32.mrf.mxu0  ;;  %v2319_v41 = vpop.f32.mrf.mxu1 }
 0x994   : > { %v2320_v5 = vadd.f32 %v5231_v60, %v2319_v41  ;;  %v2283_v4 = vadd.f32 %v4440_v26, %v2282_v31  ;;  %v2373_v31 = vsel %vm511_vm1, %v2372_v49, %v5247_v7  ;;  %v2457_v41 = vperm.slane %v2453_v63, %v4555_v32 }
 0x995   : > { %v2377_v27 = vperm.slane %v2373_v31, %v4555_v32 }
 0x996   : > { %v5263_v34 = vpack.c.bf16 %v2320_v5, %v2320_v5  ;;  %v5266_v29 = vpack.c.bf16 %v2283_v4, %v2283_v4  ;;  %v2466_v21 = vrot.slane %v2457_v41, 4 }
 0x998   : > { %v2480_v10 = vrot.slane %v5263_v34, 4  ;;  %v2400_v33 = vrot.slane %v5266_v29, 4 }
 0x99a   : > { %v2356_v56 = vpop.f32.mrf.mxu2 }
 0x99b   : > { %v2285_v28 = vpop.f32.mrf.mxu0  ;;  %v2322_v23 = vpop.f32.mrf.mxu1  ;;  %v2357_v43 = vadd.f32 %v5253_v44, %v2356_v56  ;;  %v2355_v56 = vadd.f32 %v5253_v44, %v5234_v12 }
 0x99c   : > { %v2286_v58 = vadd.f32 %v4440_v26, %v2285_v28  ;;  %v2323_v47 = vadd.f32 %v5231_v60, %v2322_v23 }
 0x99e   : > { %v5268_v59 = vpack.c.bf16 %v2286_v58, %v2286_v58  ;;  %v5270_v8 = vpack.c.bf16 %v2323_v47, %v2323_v47  ;;  %v2481_v58 = vsel %vm511_vm1, %v2480_v10, %v2328_v48 }
 0x9a0   : > { %v2378_v37 = vrot.slane %v5268_v59, 4  ;;  %v2458_v6 = vrot.slane %v5270_v8, 4 }
 0x9a2   : > { %v2459_v40 = vsel %vm511_vm1, %v2458_v6, %v2329_v25  ;;  %v2359_v3 = vpop.f32.mrf.mxu2  ;;  %v2379_v5 = vsel %vm511_vm1, %v2378_v37, %v5281_v62  ;;  %v2401_v25 = vsel %vm511_vm1, %v2400_v33, %v5274_v42  ;;  %v2386_v37 = vrot.slane %v2377_v27, 4 }
 0x9a3   : > { %v2463_v19 = vperm.slane %v2459_v40, %v4555_v32  ;;  %v2360_v4 = vadd.f32 %v5253_v44, %v2359_v3  ;;  %v2287_v52 = vpop.f32.mrf.mxu0  ;;  %v2324_v46 = vpop.f32.mrf.mxu1  ;;  %v2383_v54 = vperm.slane %v2379_v5, %v4555_v32  ;;  %v2485_v6 = vperm.slane %v2481_v58, %v4555_v32 }
 0x9a4   : > { %v2288_v28 = vadd.f32 %v4440_v26, %v2287_v52  ;;  %v2325_v23 = vadd.f32 %v5231_v60, %v2324_v46  ;;  %v5317_v26 = vpack.c.bf16 %v2352_v45, %v2352_v45  ;;  %v2405_v10 = vperm.slane %v2401_v25, %v4555_v32 }
 0x9a5   : > { %v2464_v47 = vrot.slane %v2463_v19, 4  ;;  %v5319_v60 = vpack.c.bf16 %v2360_v4, %v2360_v4  ;;  %v2467_v48 = vsel %vm511_vm1, %v2463_v19, %v2466_v21  ;;  %v5327_v33 = vpack.c.bf16 %v2357_v43, %v2357_v43 }
 0x9a6   : > { %v5311_v49 = vpack.c.bf16 %v2288_v28, %v2288_v28  ;;  %v5313_v63 = vpack.c.bf16 %v2325_v23, %v2325_v23  ;;  %v2384_v3 = vrot.slane %v2383_v54, 4  ;;  %v2387_v45 = vsel %vm511_vm1, %v2383_v54, %v2386_v37 }
 0x9a7   : > { %v2465_v40 = vsel %vm511_vm1, %v2464_v47, %v2457_v41  ;;  %v2475_v12 = vperm.slane %v2467_v48, %v4594_v9  ;;  %v2538_v4 = vrot.slane %v5319_v60, 4  ;;  %v5340_v23 = vpack.c.bf16 %v2355_v56, %v2355_v56 }
 0x9a8   : > { %v2406_v31 = vrot.slane %v5311_v49, 4  ;;  %v2486_v30 = vrot.slane %v5313_v63, 4  ;;  %v2494_v41 = vrot.slane %v2485_v6, 4  ;;  %v2471_v58 = vperm.slane %v2465_v40, %v4594_v9 }
 0x9a9   : > { %v2414_v43 = vrot.slane %v2405_v10, 4  ;;  %v2560_v47 = vrot.slane %v5327_v33, 4  ;;  %v5346_v25 = vperm.slane %v2387_v45, %v4594_v9  ;;  %v2385_v48 = vsel %vm511_vm1, %v2384_v3, %v2377_v27 }
 0x9aa   : > { %v2407_v5 = vsel %vm511_vm1, %v2406_v31, %v5302_v14  ;;  %v2361_v19 = vpop.f32.mrf.mxu2  ;;  %v2487_v46 = vsel %vm511_vm1, %v2486_v30, %v5315_v18  ;;  %v2478_v56 = vrot.slane %v2475_v12, 4  ;;  %v2539_v31 = vsel %vm511_vm1, %v2538_v4, %v5292_v61 }
 0x9ab   : > { %v2411_v52 = vperm.slane %v2407_v5, %v4555_v32  ;;  %v2362_v28 = vadd.f32 %v5253_v44, %v2361_v19  ;;  %v2491_v21 = vperm.slane %v2487_v46, %v4555_v32  ;;  %v2523_v46 = vshrl.u32 %v2475_v12, 16 }
 0x9ac   : > { %v2476_v20 = vrot.slane %v2471_v58, 4 }
 0x9ad   : > { %v5348_v54 = vpack.c.bf16 %v2362_v28, %v2362_v28  ;;  %v2492_v37 = vrot.slane %v2491_v21, 4  ;;  %v2495_v44 = vsel %vm511_vm1, %v2491_v21, %v2494_v41  ;;  %v2415_v30 = vsel %vm511_vm1, %v2411_v52, %v2414_v43 }
 0x9ae   : > { %v2503_v5 = vperm.slane %v2495_v44, %v4594_v9  ;;  %v2412_v19 = vrot.slane %v2411_v52, 4  ;;  %v2511_v28 = vshrl.u32 %v2471_v58, 16  ;;  %v2423_v4 = vperm.slane %v2415_v30, %v4594_v9 }
 0x9af   : > { %v2566_v40 = vrot.slane %v5348_v54, 4  ;;  %v2493_v45 = vsel %vm511_vm1, %v2492_v37, %v2485_v6  ;;  %v5363_v43 = vsel %vm511_vm1, 0, %v2478_v56 }
 0x9b0   : > { %v2522_v3 = vpack.i.b16 %v2503_v5, %v2475_v12  ;;  %v2499_v41 = vperm.slane %v2493_v45, %v4594_v9  ;;  %v2524_v21 = vshrl.u32 %v2503_v5, 16  ;;  %v2506_v13 = vrot.slane %v2503_v5, 4 }
 0x9b1   : > { %v2567_v27 = vsel %vm511_vm1, %v2566_v40, %v5317_v26  ;;  %v2413_v57 = vsel %vm511_vm1, %v2412_v19, %v2405_v10  ;;  %v2532_v10 = vrot.slane %v5340_v23, 4  ;;  %v5380_v19 = vperm.slane %v2539_v31, %v4555_v32 }
 0x9b2   : > { %v2692_v52 = vsel %vm751_vm2, %v2522_v3, 0  ;;  %v2510_v44 = vpack.i.b16 %v2499_v41, %v2471_v58  ;;  %v2525_v6 = vpack.i.b16 %v2524_v21, %v2523_v46  ;;  %v2512_v37 = vshrl.u32 %v2499_v41, 16 }
 0x9b3   : > { %v5368_v40 = vperm.slane %v2567_v27, %v4555_v32  ;;  %2701 = vmatpush.bf16.xpose.msrb.mxu0 %v2692_v52  ;;  %v5371_v12 = vsel %vm511_vm1, 0, %v2506_v13  ;;  %v2504_v30 = vrot.slane %v2499_v41, 4  ;;  %v2426_v46 = vrot.slane %v2423_v4, 4 }
 0x9b4   : > { %v2616_v56 = vsel %vm751_vm2, %v2510_v44, 0  ;;  %v2711_v5 = vsel %vm751_vm2, %v2525_v6, 0  ;;  %v2528_v58 = vpack.i.b16 %v5371_v12, %v5363_v43  ;;  %v2513_v45 = vpack.i.b16 %v2512_v37, %v2511_v28 }
 0x9b5   : > { %2625 = vmatpush.bf16.xpose.msrb.mxu3 %v2616_v56  ;;  %2720 = vmatpush.bf16.xpose.msrb.mxu1 %v2711_v5  ;;  %v2505_v13 = vsel %vm511_vm1, 0, %v2504_v30  ;;  %v2444_v27 = vshrl.u32 %v2423_v4, 16  ;;  %v2561_v41 = vsel %vm511_vm1, %v2560_v47, %v5279_v55  ;;  %v5392_v31 = vperm.slane %v2385_v48, %v4594_v9 }
 0x9b6   : > { %v2730_v3 = vsel %vm751_vm2, %v2528_v58, 0  ;;  %v2635_v28 = vsel %vm751_vm2, %v2513_v45, 0  ;;  %v2398_v21 = vrot.slane %v5346_v25, 4  ;;  %v2443_v52 = vshrl.u32 %v5346_v25, 16 }
 0x9b7   : > { %2739 = vmatpush.bf16.xpose.msrb.mxu2 %v2730_v3  ;;  %v2572_v44 = vrot.slane %v5368_v40, 4  ;;  %v2852_v47 = vsel %vm751_vm2, %v5240_v50, 0  ;;  %v2533_v48 = vsel %vm511_vm1, %v2532_v10, %v5272_v16  ;;  %v5405_v37 = vsel %vm511_vm1, 0, %v2426_v46 }
 0x9b8   : > { %v2544_v30 = vrot.slane %v5380_v19, 4  ;;  %v5415_v50 = vsel %vm511_vm1, 0, %v2398_v21  ;;  %v2537_v56 = vperm.slane %v2533_v48, %v4555_v32 }
 0x9b9   : > { %v2448_v58 = vpack.i.b16 %v5405_v37, %v5415_v50 }
 0x9ba   : > { %v2545_v10 = vsel %vm511_vm1, %v2544_v30, %v2537_v56 }
 0x9bb   : > { %2785 = vmatpush.bf16.xpose.msra.mxu0 %v5258_v24  ;;  %v5384_v24 = vperm.slane %v2413_v57, %v4594_v9  ;;  %v2477_v57 = vsel %vm511_vm1, 0, %v2476_v20  ;;  %v2565_v20 = vperm.slane %v2561_v41, %v4555_v32 }
 0x9bc   : > { %v2516_v6 = vpack.i.b16 %v2505_v13, %v2477_v57 }
 0x9bd   : > { %2804 = vmatpush.bf16.xpose.msra.mxu1 %v5277_v36  ;;  %2644 = vmatpush.bf16.xpose.msra.mxu3 %v2635_v28  ;;  %v2442_v36 = vpack.i.b16 %v2423_v4, %v5346_v25  ;;  %v2445_v25 = vpack.i.b16 %v2444_v27, %v2443_v52  ;;  %v2871_v4 = vsel %vm751_vm2, %v5263_v34, 0  ;;  %v2573_v45 = vsel %vm511_vm1, %v2572_v44, %v2565_v20 }
 0x9be   : > { %v2654_v5 = vsel %vm751_vm2, %v2516_v6, 0  ;;  %v2890_v34 = vsel %vm751_vm2, %v5270_v8, 0  ;;  %4265 = vmatmul.msk.bf16.vlgmr.msrb.gmra.mxu2 %vm751_vm2, %v2448_v58  ;;  %v2579_v46 = vperm.slane %v2573_v45, %v4594_v9  ;;  %v2551_v27 = vperm.slane %v2545_v10, %v4594_v9 }
 0x9bf   : > { %2823 = vmatpush.bf16.xpose.msra.mxu2 %v5286_v0  ;;  %4263 = vmatmul.msk.bf16.vlgmr.msrb.gmra.mxu0 %vm751_vm2, %v2442_v36  ;;  %v2430_v0 = vpack.i.b16 %v5384_v24, %v5392_v31  ;;  %v2518_v28 = vshrl.u32 %v2505_v13, 16  ;;  %v2432_v44 = vshrl.u32 %v5384_v24, 16  ;;  %v2517_v36 = vshrl.u32 %v2477_v57, 16 }
 0x9c0   : > { %4264 = vmatmul.msk.bf16.vlgmr.msrb.gmra.mxu1 %vm751_vm2, %v2445_v25  ;;  %v2584_v3 = vrot.slane %v2579_v46, 4  ;;  %v2592_v41 = vshrl.u32 %v2579_v46, 16  ;;  %v2556_v21 = vrot.slane %v2551_v27, 4  ;;  %v2590_v52 = vpack.i.b16 %v2579_v46, %v2551_v27 }
 0x9c1   : > { %4259 = vmatmul.msk.bf16.vlgmr.msrb.gmra.mxu3 %vm751_vm2, %v2430_v0  ;;  %v2591_v6 = vshrl.u32 %v2551_v27, 16  ;;  %v2519_v48 = vpack.i.b16 %v2518_v28, %v2517_v36  ;;  %v2574_v25 = vrot.slane %v2565_v20, 4  ;;  %v2424_v10 = vrot.slane %v5384_v24, 4 }
 0x9c2   : > { %v5432_v8 = vsel %vm511_vm1, 0, %v2584_v3  ;;  %v5436_v0 = vsel %vm511_vm1, 0, %v2556_v21  ;;  %v3658_v13 = vsel %vm1805_vm3, %v2590_v52, 0  ;;  %v2396_v3 = vrot.slane %v5392_v31, 4 }
 0x9c3   : > { %2861 = vmatpush.bf16.xpose.msrb.mxu0 %v2852_v47  ;;  %v2431_v47 = vshrl.u32 %v5392_v31, 16  ;;  %v2593_v30 = vpack.i.b16 %v2592_v41, %v2591_v6  ;;  %v2596_v57 = vpack.i.b16 %v5432_v8, %v5436_v0  ;;  %v2673_v58 = vsel %vm751_vm2, %v2519_v48, 0 }
 0x9c4   : > { %v2529_v41 = vshrl.u32 %v5363_v43, 16  ;;  %v2397_v6 = vsel %vm511_vm1, 0, %v2396_v3 }
 0x9c5   : > { %2663 = vmatpush.bf16.xpose.msrb.mxu3 %v2654_v5  ;;  %2880 = vmatpush.bf16.xpose.msrb.mxu1 %v2871_v4  ;;  %v2433_v4 = vpack.i.b16 %v2432_v44, %v2431_v47  ;;  %v2546_v5 = vrot.slane %v2537_v56, 4  ;;  %v3677_v20 = vsel %vm1805_vm3, %v2593_v30, 0  ;;  %v3696_v45 = vsel %vm1805_vm3, %v2596_v57, 0 }
 0x9c6   : > { %v2449_v57 = vshrl.u32 %v5415_v50, 16 }
 0x9c7   : > { %2899 = vmatpush.bf16.xpose.msrb.mxu2 %v2890_v34  ;;  %v2547_v56 = vsel %vm511_vm1, %v5380_v19, %v2546_v5  ;;  %v2425_v19 = vsel %vm511_vm1, 0, %v2424_v10 }
 0x9c8   : > { %v2436_v31 = vpack.i.b16 %v2425_v19, %v2397_v6  ;;  %v2438_v30 = vshrl.u32 %v2425_v19, 16 }
 0x9ce   : > { %4269 = vmatmul.msk.bf16.vlgmr.msra.gmra.mxu2 %vm751_vm2, %v5281_v62 }
 0x9cf   : > { %4267 = vmatmul.msk.bf16.vlgmr.msra.gmra.mxu0 %vm751_vm2, %v5247_v7  ;;  %v2575_v7 = vsel %vm511_vm1, %v5368_v40, %v2574_v25  ;;  %3705 = vmatpush.bf16.msra.mxu2 %v3696_v45  ;;  %v2530_v40 = vshrl.u32 %v5371_v12, 16  ;;  %v2437_v25 = vshrl.u32 %v2397_v6, 16 }
 0x9d0   : > { %3667 = vmatpush.bf16.msra.mxu0 %v3658_v13  ;;  %4268 = vmatmul.msk.bf16.vlgmr.msra.gmra.mxu1 %vm751_vm2, %v5274_v42  ;;  %v2583_v34 = vperm.slane %v2575_v7, %v4594_v9  ;;  %v2555_v42 = vperm.slane %v2547_v56, %v4594_v9 }
 0x9d1   : > { %4260 = vmatmul.msk.bf16.vlgmr.msra.gmra.mxu3 %vm751_vm2, %v2433_v4  ;;  %3686 = vmatpush.bf16.msra.mxu1 %v3677_v20  ;;  %v2531_v44 = vpack.i.b16 %v2530_v40, %v2529_v41  ;;  %v2439_v13 = vpack.i.b16 %v2438_v30, %v2437_v25  ;;  %v2833_v4 = vsel %vm751_vm2, %v5315_v18, 0  ;;  %v2597_v20 = vshrl.u32 %v5436_v0, 16 }
 0x9d2   : > { %2682 = vmatpush.bf16.xpose.msra.mxu3 %v2673_v58  ;;  %v2586_v46 = vrot.slane %v2583_v34, 4  ;;  %v2604_v27 = vshrl.u32 %v2583_v34, 16  ;;  %v2558_v28 = vrot.slane %v2555_v42, 4  ;;  %v2602_v62 = vpack.i.b16 %v2583_v34, %v2555_v42 }
 0x9d3   : > { %v2603_v21 = vshrl.u32 %v2555_v42, 16  ;;  %v2749_v43 = vsel %vm751_vm2, %v2531_v44, 0  ;;  %v2598_v58 = vshrl.u32 %v5432_v8, 16 }
 0x9d4   : > { %v2587_v52 = vsel %vm511_vm1, 0, %v2586_v46  ;;  %v2559_v24 = vsel %vm511_vm1, 0, %v2558_v28  ;;  %v3734_v12 = vsel %vm1805_vm3, %v2602_v62, 0 }
 0x9d5   : > { %v2605_v36 = vpack.i.b16 %v2604_v27, %v2603_v21  ;;  %v2608_v47 = vpack.i.b16 %v2587_v52, %v2559_v24  ;;  %v2599_v7 = vpack.i.b16 %v2598_v58, %v2597_v20  ;;  %v2609_v50 = vshrl.u32 %v2559_v24, 16 }
 0x9d7   : > { %v3753_v48 = vsel %vm1805_vm3, %v2605_v36, 0  ;;  %v3715_v18 = vsel %vm1805_vm3, %v2599_v7, 0 }
 0x9de   : > { %4273 = vmatmul.msk.bf16.vlgmr.msrb.gmra.mxu2 %vm751_vm2, %v5268_v59  ;;  %v2909_v59 = vsel %vm751_vm2, %v5313_v63, 0 }
 0x9df   : > { %4271 = vmatmul.msk.bf16.vlgmr.msrb.gmra.mxu0 %vm751_vm2, %v5244_v22  ;;  %v3772_v22 = vsel %vm1805_vm3, %v2608_v47, 0 }
 0x9e0   : > { %3743 = vmatpush.bf16.msrb.mxu0 %v3734_v12  ;;  %4272 = vmatmul.msk.bf16.vlgmr.msrb.gmra.mxu1 %vm751_vm2, %v5266_v29  ;;  %v2450_v29 = vshrl.u32 %v5405_v37, 16  ;;  %v2610_v37 = vshrl.u32 %v2587_v52, 16 }
 0x9e1   : > { %4261 = vmatmul.msk.bf16.vlgmr.msrb.gmra.mxu3 %vm751_vm2, %v2436_v31  ;;  %3762 = vmatpush.bf16.msrb.mxu1 %v3753_v48 }
 0x9e2   : > { %2758 = vmatpush.bf16.xpose.msrb.mxu3 %v2749_v43  ;;  %3781 = vmatpush.bf16.msrb.mxu2 %v3772_v22  ;;  %v2451_v5 = vpack.i.b16 %v2450_v29, %v2449_v57  ;;  %v2611_v45 = vpack.i.b16 %v2610_v37, %v2609_v50 }
 0x9e4   : > { %v3791_v63 = vsel %vm1805_vm3, %v2611_v45, 0 }
 0x9f1   : > { %4262 = vmatmul.msk.bf16.vlgmr.msra.gmra.mxu3 %vm751_vm2, %v2439_v13 }
 0x9f2   : > { %2842 = vmatpush.bf16.xpose.msra.mxu3 %v2833_v4 }
 0xa01   : > { %4266 = vmatmul.msk.bf16.vlgmr.msrb.gmra.mxu3 %vm751_vm2, %v2451_v5 }
 0xa02   : > { %2918 = vmatpush.bf16.xpose.msrb.mxu3 %v2909_v59 }
 0xa11   : > { %4270 = vmatmul.msk.bf16.vlgmr.msra.gmra.mxu3 %vm751_vm2, %v5302_v14 }
 0xa12   : > { %3724 = vmatpush.bf16.msra.mxu3 %v3715_v18 }
 0xa21   : > { %4274 = vmatmul.msk.bf16.vlgmr.msrb.gmra.mxu3 %vm751_vm2, %v5311_v49 }
 0xa22   : > { %3800 = vmatpush.bf16.msrb.mxu3 %v3791_v63 }
 0xa3c   : > { %v2703_v56 = vpop.f32.mrf.mxu0 }
 0xa3d   : > { %v5494_v8 = vsel %vm4763_vm4, -1e+30, %v2703_v56  ;;  %v2722_v0 = vpop.f32.mrf.mxu1 }
 0xa3e   : > { %v2936_v14 = vsel %vm1064_vm5, %v5494_v8, -inf  ;;  %v5500_v34 = vsel %vm4763_vm4, -1e+30, %v2722_v0 }
 0xa3f   : > { %2937 = vmax.xlane.f32.xlu1 %v2936_v14  ;;  %v2939_v49 = vsel %vm1064_vm5, %v5500_v34, -inf }
 0xa40   : > { %2940 = vmax.xlane.f32.xlu0 %v2939_v49 }
 0xa41   : > { %v2741_v40 = vpop.f32.mrf.mxu2 }
 0xa42   : > { %v5512_v28 = vsel %vm4763_vm4, -1e+30, %v2741_v40 }
 0xa43   : > { %v2942_v44 = vsel %vm1064_vm5, %v5512_v28, -inf }
 0xa44   : > { %v2627_v42 = vpop.f32.mrf.mxu3  ;;  %v2705_v10 = vpop.f32.mrf.mxu0 }
 0xa45   : > { %v5506_v46 = vsel %vm4763_vm4, -1e+30, %v2627_v42  ;;  %v2724_v27 = vpop.f32.mrf.mxu1 }
 0xa46   : > { %v2924_v3 = vsel %vm1064_vm5, %v5506_v46, -inf }
 0xa47   : > { %2925 = vmax.xlane.f32.xlu1 %v2924_v3 }
 0xa49   : > { %v2743_v19 = vpop.f32.mrf.mxu2 }
 0xa4c   : > { %v2629_v62 = vpop.f32.mrf.mxu3  ;;  %v5514_v41 = vpop.f32.mrf.mxu0 }
 0xa4d   : > { %v2948_v21 = vsel %vm1064_vm5, %v5514_v41, -inf  ;;  %v5518_v52 = vpop.f32.mrf.mxu1 }
 0xa4e   : > { %2949 = vmax.xlane.f32.xlu0 %v2948_v21  ;;  %v2951_v24 = vsel %vm1064_vm5, %v5518_v52, -inf }
 0xa4f   : > { %2943 = vmax.xlane.f32.xlu1 %v2942_v44 }
 0xa51   : > { %v5524_v12 = vpop.f32.mrf.mxu2 }
 0xa52   : > { %v2954_v5 = vsel %vm1064_vm5, %v5524_v12, -inf }
 0xa54   : > { %v2646_v36 = vpop.f32.mrf.mxu3  ;;  %v2789_v6 = vpop.f32.mrf.mxu0 }
 0xa55   : > { %v2808_v31 = vpop.f32.mrf.mxu1  ;;  %v5528_v47 = vsel %vm4763_vm4, -1e+30, %v2646_v36 }
 0xa56   : > { %2952 = vmax.xlane.f32.xlu0 %v2951_v24  ;;  %v2927_v22 = vsel %vm1064_vm5, %v5528_v47, -inf }
 0xa59   : > { %v2827_v30 = vpop.f32.mrf.mxu2 }
 0xa5c   : > { %v2648_v43 = vpop.f32.mrf.mxu3  ;;  %v5530_v48 = vpop.f32.mrf.mxu0 }
 0xa5d   : > { %v5534_v25 = vpop.f32.mrf.mxu1  ;;  %v2960_v18 = vsel %vm1064_vm5, %v5530_v48, -inf }
 0xa5e   : > { %2928 = vmax.xlane.f32.xlu0 %v2927_v22  ;;  %v2963_v13 = vsel %vm1064_vm5, %v5534_v25, -inf }
 0xa5f   : > { %2964 = vmax.xlane.f32.xlu2 %v2963_v13 }
 0xa61   : > { %v5544_v59 = vpop.f32.mrf.mxu2 }
 0xa62   : > { %v2966_v45 = vsel %vm1064_vm5, %v5544_v59, -inf }
 0xa64   : > { %v2665_v4 = vpop.f32.mrf.mxu3  ;;  %v2865_v29 = vpop.f32.mrf.mxu0 }
 0xa65   : > { %v5540_v57 = vsel %vm4763_vm4, -1e+30, %v2665_v4  ;;  %v2884_v58 = vpop.f32.mrf.mxu1 }
 0xa66   : > { %2955 = vmax.xlane.f32.xlu0 %v2954_v5  ;;  %v2930_v20 = vsel %vm1064_vm5, %v5540_v57, -inf }
 0xa67   : > { %2931 = vmax.xlane.f32.xlu1 %v2930_v20 }
 0xa69   : > { %v2903_v37 = vpop.f32.mrf.mxu2 }
 0xa6c   : > { %v2667_v7 = vpop.f32.mrf.mxu3 }
 0xa6e   : > { %2961 = vmax.xlane.f32.xlu0 %v2960_v18 }
 0xa74   : > { %v2684_v50 = vpop.f32.mrf.mxu3 }
 0xa75   : > { %v5554_v63 = vsel %vm4763_vm4, -1e+30, %v2684_v50 }
 0xa76   : > { %2967 = vmax.xlane.f32.xlu0 %v2966_v45  ;;  %v2933_v0 = vsel %vm1064_vm5, %v5554_v63, -inf }
 0xa7c   : > { %v2686_v56 = vpop.f32.mrf.mxu3 }
 0xa7e   : > { %2934 = vmax.xlane.f32.xlu0 %v2933_v0 }
 0xa84   : > { %v2760_v14 = vpop.f32.mrf.mxu3 }
 0xa85   : > { %v5560_v49 = vsel %vm4763_vm4, -1e+30, %v2760_v14 }
 0xa86   : > { %v2945_v42 = vsel %vm1064_vm5, %v5560_v49, -inf }
 0xa87   : > { %2946 = vmax.xlane.f32.xlu0 %v2945_v42 }
 0xa8c   : > { %v2762_v10 = vpop.f32.mrf.mxu3 }
 0xa94   : > { %v5564_v40 = vpop.f32.mrf.mxu3 }
 0xa95   : > { %v2957_v27 = vsel %vm1064_vm5, %v5564_v40, -inf }
 0xa96   : > { %2958 = vmax.xlane.f32.xlu2 %v2957_v27 }
 0xa9c   : > { %v2846_v3 = vpop.f32.mrf.mxu3 }
 0xaa4   : > { %v5568_v62 = vpop.f32.mrf.mxu3 }
 0xaa5   : > { %v2969_v21 = vsel %vm1064_vm5, %v5568_v62, -inf }
 0xaa6   : > { %2970 = vmax.xlane.f32.xlu2 %v2969_v21 }
 0xaac   : > { %v2922_v39 = vpop.f32.mrf.mxu3 }
 0xab2   : > { %v2938_v6 = vpop.xlane.xlu1 %2937 }
 0xab3   : > { %v2941_v19 = vpop.xlane.xlu0 %2940  ;;  %v2984_v50 = vperm.slane %v2938_v6, %v4759_v38 }
 0xab4   : > { %v2985_v0 = vperm.slane %v2941_v19, %v4759_v38 }
 0xaba   : > { %v2926_v43 = vpop.xlane.xlu1 %2925 }
 0xabb   : > { %v2980_v58 = vperm.slane %v2926_v43, %v4759_v38 }
 0xac1   : > { %v2950_v44 = vpop.xlane.xlu0 %2949 }
 0xac2   : > { %v2944_v30 = vpop.xlane.xlu1 %2943 }
 0xac3   : > { %v2986_v42 = vperm.slane %v2944_v30, %v4759_v38 }
 0xac9   : > { %v2953_v36 = vpop.xlane.xlu0 %2952 }
 0xad1   : > { %v2929_v24 = vpop.xlane.xlu0 %2928 }
 0xad2   : > { %v2981_v29 = vperm.slane %v2929_v24, %v4759_v38 }
 0xad4   : > { %v2988_v7 = vsel %vm1129_vm6, %v2981_v29, %v2980_v58  ;;  %v5940_v29 = vmov 0  }
 0xad9   : > { %v2956_v31 = vpop.xlane.xlu0 %2955 }
 0xada   : > { %v2932_v4 = vpop.xlane.xlu1 %2931 }
 0xadb   : > { %v2982_v5 = vperm.slane %v2932_v4, %v4759_v38 }
 0xadd   : > { %v2989_v37 = vsel %vm1131_vm7, %v2982_v5, %v2988_v7 }
 0xae1   : > { %v2962_v22 = vpop.xlane.xlu0 %2961 }
 0xae9   : > { %v5572_v13 = vpop.xlane.xlu0 %2967 }
 0xaf1   : > { %v2935_v20 = vpop.xlane.xlu0 %2934 }
 0xaf2   : > { %v2983_v18 = vperm.slane %v2935_v20, %v4759_v38  ;;  %v2965_v20 = vpop.xlane.xlu2 %2964 }
 0xaf4   : > { %v2990_v45 = vsel %vm1133_vm8, %v2983_v18, %v2989_v37 }
 0xaf5   : > { %v2991_v56 = vsel %vm1135_vm9, %v2984_v50, %v2990_v45 }
 0xaf6   : > { %v2992_v14 = vsel %vm1137_vm10, %v2985_v0, %v2991_v56 }
 0xaf7   : > { %v2993_v3 = vsel %vm1139_vm11, %v2986_v42, %v2992_v14 }
 0xafa   : > { %v2947_v10 = vpop.xlane.xlu0 %2946 }
 0xafb   : > { %v2987_v27 = vperm.slane %v2947_v10, %v4759_v38 }
 0xafd   : > { %v2994_v21 = vsel %vm1141_vm12, %v2987_v27, %v2993_v3 }
 0xafe   : > { %2996 = vxpose.xlu1.b32.start.end [1/1] (short) (narrow) %v2994_v21, 8 }
 0xb09   : > { %v2959_v7 = vpop.xlane.xlu2 %2958 }
 0xb19   : > { %v2971_v18 = vpop.xlane.xlu2 %2970 }
 0xba2   : > { %v3012_v39 = vpop.trf.xlu1 }
 0xba3   : > { %v3050_v6 = vperm.slane %v3012_v39, 3  ;;  %v3029_v24 = vperm.slane %v3012_v39, 0  ;;  %v3036_v43 = vperm.slane %v3012_v39, 1  ;;  %v3043_v19 = vperm.slane %v3012_v39, 2 }
 0xba4   : > { %v3057_v4 = vperm.slane %v3012_v39, 4  ;;  %v3064_v30 = vperm.slane %v3012_v39, 5  ;;  %v3071_v5 = vperm.slane %v3012_v39, 6  ;;  %v3078_v58 = vperm.slane %v3012_v39, 7 }
 0xba5   : > { %3055 = vperm.xlu1 %4325, %v3050_v6   ;;  %3034 = vperm.xlu0 %4320, %v3029_v24  }
 0xba6   : > { %3041 = vperm.xlu2 %4326, %v3036_v43  }
 0xbad   : > { %3048 = vperm.xlu0 %4320, %v3043_v19   ;;  %4328 = vset.pattern.permute.xlu1 %v5940_v29 }
 0xbae   : > { %3062 = vperm.xlu2 %4326, %v3057_v4  }
 0xbb5   : > { %3069 = vperm.xlu0 %4320, %v3064_v30  }
 0xbb6   : > { %4329 = vset.pattern.permute.xlu2 %v5940_v29 }
 0xbbd   : > { %3076 = vperm.xlu0 %4320, %v3071_v5  }
 0xbc5   : > { %3083 = vperm.xlu0 %4320, %v3078_v58  }
 0xbcd   : > { %4327 = vset.pattern.permute.xlu0 %v5940_v29 }
 0xc00   : > { %v3042_v37 = vpop.permute.xlu2 %3041 }
 0xc01   : > { %v3094_v50 = vmax.f32 %v2953_v36, %v3042_v37 }
 0xc03   : > { %3113 = vperm.xlu1 %4328, %v3094_v50  }
 0xc08   : > { %v3063_v45 = vpop.permute.xlu2 %3062 }
 0xc09   : > { %v3097_v56 = vmax.f32 %v2962_v22, %v3063_v45 }
 0xc0b   : > { %3122 = vperm.xlu2 %4329, %v3097_v56  }
 0xc13   : > { %4331 = vset.pattern.permute.xlu2 %v4698_v17 }
 0xc17   : > { %v3035_v0 = vpop.permute.xlu0 %3034  ;;  %v3056_v42 = vpop.permute.xlu1 %3055 }
 0xc18   : > { %v3093_v14 = vmax.f32 %v2950_v44, %v3035_v0  ;;  %v3096_v27 = vmax.f32 %v2959_v7, %v3056_v42 }
 0xc1a   : > { %3110 = vperm.xlu0 %4327, %v3093_v14  }
 0xc1f   : > { %v3049_v10 = vpop.permute.xlu0 %3048 }
 0xc20   : > { %v3095_v3 = vmax.f32 %v2956_v31, %v3049_v10 }
 0xc22   : > { %3119 = vperm.xlu0 %4327, %v3096_v27   ;;  %3116 = vperm.xlu1 %4328, %v3095_v3  }
 0xc27   : > { %v3070_v21 = vpop.permute.xlu0 %3069 }
 0xc28   : > { %v3098_v39 = vmax.f32 %v2965_v20, %v3070_v21 }
 0xc2a   : > { %3125 = vperm.xlu1 %4328, %v3098_v39  }
 0xc2f   : > { %v3077_v6 = vpop.permute.xlu0 %3076 }
 0xc30   : > { %v3099_v36 = vmax.f32 %v5572_v13, %v3077_v6 }
 0xc32   : > { %3128 = vperm.xlu0 %4327, %v3099_v36  }
 0xc37   : > { %v3084_v22 = vpop.permute.xlu0 %3083 }
 0xc38   : > { %v3100_v24 = vmax.f32 %v2971_v18, %v3084_v22 }
 0xc3a   : > { %3131 = vperm.xlu1 %4328, %v3100_v24  }
 0xc42   : > { %4330 = vset.pattern.permute.xlu1 %v4698_v17 }
 0xc65   : > { %v5619_v10 = vpop.permute.xlu2 %3122 }
 0xc66   : > { %v3137_v6 = vperm.slane %v5619_v10, %v4759_v38 }
 0xc75   : > { %v3114_v44 = vpop.permute.xlu1 %3113 }
 0xc76   : > { %v3270_v31 = vsub.f32 %v5518_v52, %v3114_v44 }
 0xc78   : > { %v3279_v30 = vmul.f32 1.442695, %v3270_v31 }
 0xc8c   : > { %v3111_v43 = vpop.permute.xlu0 %3110 }
 0xc8d   : > { %v3269_v19 = vsub.f32 %v5514_v41, %v3111_v43  ;;  %v3133_v52 = vperm.slane %v3111_v43, %v4759_v38 }
 0xc8f   : > { %v3277_v4 = vmul.f32 1.442695, %v3269_v19 }
 0xc91   : > { %4388 = vpow2.f32 %v3277_v4 }
 0xc92   : > { %4390 = vpow2.f32 %v3279_v30 }
 0xc94   : > { %v3117_v5 = vpop.permute.xlu1 %3116  ;;  %v5604_v37 = vpop.permute.xlu0 %3119 }
 0xc95   : > { %v3271_v13 = vsub.f32 %v5524_v12, %v3117_v5  ;;  %v3135_v50 = vperm.slane %v3117_v5, %v4759_v38  ;;  %v3134_v12 = vperm.slane %v3114_v44, %v4759_v38  ;;  %v3136_v14 = vperm.slane %v5604_v37, %v4759_v38 }
 0xc97   : > { %v5597_v58 = vpop.eup %4388  ;;  %v3281_v7 = vmul.f32 1.442695, %v3271_v13  ;;  %v3141_v0 = vsel %vm1129_vm6, %v3134_v12, %v3133_v52 }
 0xc98   : > { %v3293_v20 = vsel %vm1064_vm5, %v5597_v58, 0.0  ;;  %v5602_v18 = vpop.eup %4390  ;;  %v3142_v42 = vsel %vm1131_vm7, %v3135_v50, %v3141_v0 }
 0xc99   : > { %3294 = vadd.xlane.f32.xlu1 %v3293_v20  ;;  %4392 = vpow2.f32 %v3281_v7  ;;  %v3296_v41 = vsel %vm1064_vm5, %v5602_v18, 0.0  ;;  %v3143_v21 = vsel %vm1133_vm8, %v3136_v14, %v3142_v42 }
 0xc9a   : > { %v3144_v22 = vsel %vm1135_vm9, %v3137_v6, %v3143_v21 }
 0xc9c   : > { %v5611_v45 = vpop.permute.xlu1 %3125 }
 0xc9d   : > { %v3138_v39 = vperm.slane %v5611_v45, %v4759_v38 }
 0xc9f   : > { %v5613_v56 = vpop.eup %4392  ;;  %v3145_v44 = vsel %vm1137_vm10, %v3138_v39, %v3144_v22 }
 0xca0   : > { %v3299_v3 = vsel %vm1064_vm5, %v5613_v56, 0.0 }
 0xca1   : > { %3297 = vadd.xlane.f32.xlu1 %v3296_v41 }
 0xca4   : > { %v5621_v27 = vpop.permute.xlu0 %3128 }
 0xca5   : > { %v3139_v36 = vperm.slane %v5621_v27, %v4759_v38 }
 0xca7   : > { %v3146_v19 = vsel %vm1139_vm11, %v3139_v36, %v3145_v44 }
 0xca9   : > { %3300 = vadd.xlane.f32.xlu1 %v3299_v3 }
 0xcac   : > { %v5633_v24 = vpop.permute.xlu1 %3131 }
 0xcad   : > { %v3140_v43 = vperm.slane %v5633_v24, %v4759_v38 }
 0xcaf   : > { %v3147_v31 = vsel %vm1141_vm12, %v3140_v43, %v3146_v19 }
 0xcb0   : > { %3149 = vxpose.xlu0.b32.start.end [1/1] (short) (narrow) %v3147_v31, 8 }
 0xd0c   : > { %v5641_v12 = vpop.xlane.xlu1 %3294 }
 0xd14   : > { %v5644_v3 = vpop.xlane.xlu1 %3297 }
 0xd17   : > { %4332 = vset.pattern.permute.xlu0 %v4698_v17 }
 0xd1c   : > { %v5651_v44 = vpop.xlane.xlu1 %3300 }
 0xd54   : > { %v3165_v4 = vpop.trf.xlu0 }
 0xd55   : > { %v3188_v30 = vperm.slane %v3165_v4, 1  ;;  %v3181_v5 = vperm.slane %v3165_v4, 0  ;;  %v3202_v13 = vperm.slane %v3165_v4, 3  ;;  %v3195_v20 = vperm.slane %v3165_v4, 2 }
 0xd56   : > { %v3216_v7 = vperm.slane %v3165_v4, 5  ;;  %v3209_v41 = vperm.slane %v3165_v4, 4  ;;  %v3230_v52 = vperm.slane %v3165_v4, 7  ;;  %v3223_v50 = vperm.slane %v3165_v4, 6 }
 0xd57   : > { %3193 = vperm.xlu2 %4331, %v3188_v30   ;;  %3186 = vperm.xlu1 %4330, %v3181_v5  }
 0xd5f   : > { %3207 = vperm.xlu2 %4331, %v3202_v13   ;;  %3200 = vperm.xlu1 %4330, %v3195_v20  }
 0xd67   : > { %3221 = vperm.xlu2 %4331, %v3216_v7   ;;  %3214 = vperm.xlu1 %4330, %v3209_v41  }
 0xd6f   : > { %3235 = vperm.xlu2 %4331, %v3230_v52   ;;  %3228 = vperm.xlu1 %4330, %v3223_v50  }
 0xdb1   : > { %v3194_v0 = vpop.permute.xlu2 %3193 }
 0xdb2   : > { %v3238_v14 = vsub.f32 %v5528_v47, %v3194_v0 }
 0xdb4   : > { %v3247_v42 = vmul.f32 1.442695, %v3238_v14 }
 0xdb6   : > { %4394 = vpow2.f32 %v3247_v42 }
 0xdb9   : > { %v3208_v21 = vpop.permute.xlu2 %3207 }
 0xdba   : > { %v3240_v39 = vsub.f32 %v5554_v63, %v3208_v21  ;;  %v3273_v21 = vsub.f32 %v5530_v48, %v5619_v10  ;;  %v3274_v48 = vsub.f32 %v5534_v25, %v5611_v45  ;;  %v3275_v25 = vsub.f32 %v5544_v59, %v5621_v27 }
 0xdbc   : > { %v5647_v6 = vpop.eup %4394  ;;  %v3251_v36 = vmul.f32 1.442695, %v3240_v39  ;;  %v3285_v39 = vmul.f32 1.442695, %v3273_v21 }
 0xdbd   : > { %v3320_v22 = vsel %vm1064_vm5, %v5647_v6, 0.0 }
 0xdbe   : > { %4396 = vpow2.f32 %v3251_v36  ;;  %3321 = vadd.xlane.f32.xlu1 %v3320_v22 }
 0xdc1   : > { %v3222_v43 = vpop.permute.xlu2 %3221 }
 0xdc2   : > { %v3242_v47 = vsub.f32 %v5500_v34, %v3222_v43  ;;  %v3272_v34 = vsub.f32 %v5564_v40, %v5604_v37 }
 0xdc4   : > { %v5654_v19 = vpop.eup %4396  ;;  %v3255_v31 = vmul.f32 1.442695, %v3242_v47  ;;  %v3283_v50 = vmul.f32 1.442695, %v3272_v34 }
 0xdc5   : > { %v3326_v4 = vsel %vm1064_vm5, %v5654_v19, 0.0 }
 0xdc6   : > { %4398 = vpow2.f32 %v3255_v31  ;;  %3327 = vadd.xlane.f32.xlu1 %v3326_v4  ;;  %v3287_v4 = vmul.f32 1.442695, %v3274_v48 }
 0xdc9   : > { %v3236_v63 = vpop.permute.xlu2 %3235  ;;  %v3187_v30 = vpop.permute.xlu1 %3186 }
 0xdca   : > { %v3244_v5 = vsub.f32 %v5560_v49, %v3236_v63  ;;  %v3237_v13 = vsub.f32 %v5506_v46, %v3187_v30 }
 0xdcc   : > { %v5660_v20 = vpop.eup %4398  ;;  %v3259_v7 = vmul.f32 1.442695, %v3244_v5  ;;  %v3245_v41 = vmul.f32 1.442695, %v3237_v13 }
 0xdcd   : > { %v3332_v52 = vsel %vm1064_vm5, %v5660_v20, 0.0 }
 0xdce   : > { %4400 = vpow2.f32 %v3259_v7  ;;  %3333 = vadd.xlane.f32.xlu1 %v3332_v52  ;;  %v3276_v52 = vsub.f32 %v5568_v62, %v5633_v24 }
 0xdcf   : > { %4402 = vpow2.f32 %v3245_v41  ;;  %v3289_v41 = vmul.f32 1.442695, %v3275_v25 }
 0xdd0   : > { %4404 = vpow2.f32 %v3283_v50  ;;  %v3291_v50 = vmul.f32 1.442695, %v3276_v52 }
 0xdd1   : > { %v3201_v0 = vpop.permute.xlu1 %3200 }
 0xdd2   : > { %v3239_v14 = vsub.f32 %v5540_v57, %v3201_v0 }
 0xdd4   : > { %v5667_v49 = vpop.eup %4400  ;;  %v3249_v46 = vmul.f32 1.442695, %v3239_v14 }
 0xdd5   : > { %v5669_v42 = vpop.eup %4402  ;;  %v3338_v40 = vsel %vm1064_vm5, %v5667_v49, 0.0 }
 0xdd6   : > { %4406 = vpow2.f32 %v3249_v46  ;;  %3339 = vadd.xlane.f32.xlu1 %v3338_v40  ;;  %v3317_v37 = vsel %vm1064_vm5, %v5669_v42, 0.0  ;;  %v5678_v22 = vpop.eup %4404 }
 0xdd7   : > { %3318 = vadd.xlane.f32.xlu0 %v3317_v37  ;;  %4408 = vpow2.f32 %v3285_v39  ;;  %v3302_v31 = vsel %vm1064_vm5, %v5678_v22, 0.0 }
 0xdd9   : > { %v3215_v57 = vpop.permute.xlu1 %3214 }
 0xdda   : > { %v3241_v36 = vsub.f32 %v5494_v8, %v3215_v57 }
 0xddc   : > { %v5680_v43 = vpop.eup %4406  ;;  %v3253_v47 = vmul.f32 1.442695, %v3241_v36 }
 0xddd   : > { %v3323_v10 = vsel %vm1064_vm5, %v5680_v43, 0.0  ;;  %v5689_v30 = vpop.eup %4408 }
 0xdde   : > { %4410 = vpow2.f32 %v3253_v47  ;;  %3324 = vadd.xlane.f32.xlu2 %v3323_v10  ;;  %v3305_v7 = vsel %vm1064_vm5, %v5689_v30, 0.0 }
 0xddf   : > { %3303 = vadd.xlane.f32.xlu0 %v3302_v31  ;;  %4412 = vpow2.f32 %v3287_v4 }
 0xde1   : > { %v3229_v8 = vpop.permute.xlu1 %3228 }
 0xde2   : > { %v3243_v63 = vsub.f32 %v5512_v28, %v3229_v8 }
 0xde4   : > { %v5691_v5 = vpop.eup %4410  ;;  %v3257_v13 = vmul.f32 1.442695, %v3243_v63 }
 0xde5   : > { %v3329_v45 = vsel %vm1064_vm5, %v5691_v5, 0.0  ;;  %v5699_v28 = vpop.eup %4412 }
 0xde6   : > { %4414 = vpow2.f32 %v3257_v13  ;;  %3330 = vadd.xlane.f32.xlu2 %v3329_v45  ;;  %v3308_v27 = vsel %vm1064_vm5, %v5699_v28, 0.0 }
 0xde7   : > { %3306 = vadd.xlane.f32.xlu0 %v3305_v7  ;;  %4416 = vpow2.f32 %v3289_v41 }
 0xde8   : > { %4418 = vpow2.f32 %v3291_v50 }
 0xdec   : > { %v5701_v34 = vpop.eup %4414 }
 0xded   : > { %v3335_v59 = vsel %vm1064_vm5, %v5701_v34, 0.0  ;;  %v5709_v0 = vpop.eup %4416 }
 0xdee   : > { %3336 = vadd.xlane.f32.xlu2 %v3335_v59  ;;  %v3311_v14 = vsel %vm1064_vm5, %v5709_v0, 0.0  ;;  %v5713_v46 = vpop.eup %4418 }
 0xdef   : > { %3309 = vadd.xlane.f32.xlu0 %v3308_v27  ;;  %v3314_v62 = vsel %vm1064_vm5, %v5713_v46, 0.0 }
 0xdf7   : > { %3312 = vadd.xlane.f32.xlu0 %v3311_v14 }
 0xdff   : > { %3315 = vadd.xlane.f32.xlu0 %v3314_v62 }
 0xe31   : > { %v3322_v24 = vpop.xlane.xlu1 %3321 }
 0xe32   : > { %v3350_v47 = vperm.slane %v3322_v24, %v4759_v38 }
 0xe39   : > { %v3328_v21 = vpop.xlane.xlu1 %3327 }
 0xe3a   : > { %v3352_v8 = vperm.slane %v3328_v21, %v4759_v38 }
 0xe41   : > { %v3334_v39 = vpop.xlane.xlu1 %3333 }
 0xe42   : > { %v3354_v45 = vperm.slane %v3334_v39, %v4759_v38 }
 0xe49   : > { %v3340_v13 = vpop.xlane.xlu1 %3339 }
 0xe4a   : > { %v3319_v37 = vpop.xlane.xlu0 %3318  ;;  %v3356_v52 = vperm.slane %v3340_v13, %v4759_v38 }
 0xe4b   : > { %v3349_v57 = vperm.slane %v3319_v37, %v4759_v38 }
 0xe4d   : > { %v3357_v10 = vsel %vm1129_vm6, %v3350_v47, %v3349_v57 }
 0xe51   : > { %v3325_v40 = vpop.xlane.xlu2 %3324 }
 0xe52   : > { %v3351_v36 = vperm.slane %v3325_v40, %v4759_v38  ;;  %v3304_v47 = vpop.xlane.xlu0 %3303 }
 0xe54   : > { %v3358_v31 = vsel %vm1131_vm7, %v3351_v36, %v3357_v10 }
 0xe55   : > { %v3359_v63 = vsel %vm1133_vm8, %v3352_v8, %v3358_v31 }
 0xe59   : > { %v3331_v48 = vpop.xlane.xlu2 %3330 }
 0xe5a   : > { %v3353_v4 = vperm.slane %v3331_v48, %v4759_v38 }
 0xe5c   : > { %v3360_v25 = vsel %vm1135_vm9, %v3353_v4, %v3359_v63  ;;  %v3307_v4 = vpop.xlane.xlu0 %3306 }
 0xe5d   : > { %v3361_v59 = vsel %vm1137_vm10, %v3354_v45, %v3360_v25 }
 0xe61   : > { %v3337_v7 = vpop.xlane.xlu2 %3336 }
 0xe62   : > { %v3355_v41 = vperm.slane %v3337_v7, %v4759_v38 }
 0xe64   : > { %v3362_v27 = vsel %vm1139_vm11, %v3355_v41, %v3361_v59  ;;  %v3310_v45 = vpop.xlane.xlu0 %3309 }
 0xe65   : > { %v3363_v50 = vsel %vm1141_vm12, %v3356_v52, %v3362_v27 }
 0xe66   : > { %3365 = vxpose.xlu2.b32.start.end [1/1] (short) (narrow) %v3363_v50, 8 }
 0xeff   : > { %v3381_v14 = vpop.trf.xlu2 }
 0xf00   : > { %v3447_v62 = vperm.slane %v3381_v14, 7  ;;  %v3405_v24 = vperm.slane %v3381_v14, 1  ;;  %v3398_v21 = vperm.slane %v3381_v14, 0  ;;  %v3412_v40 = vperm.slane %v3381_v14, 2 }
 0xf01   : > { %v3419_v37 = vperm.slane %v3381_v14, 3  ;;  %v3426_v39 = vperm.slane %v3381_v14, 4  ;;  %v3433_v57 = vperm.slane %v3381_v14, 5  ;;  %v3440_v36 = vperm.slane %v3381_v14, 6 }
 0xf02   : > { %3452 = vperm.xlu0 %4332, %v3447_v62   ;;  %3410 = vperm.xlu2 %4331, %v3405_v24  }
 0xf03   : > { %3403 = vperm.xlu1 %4330, %v3398_v21  }
 0xf0a   : > { %4334 = vset.pattern.permute.xlu0 %v5940_v29 }
 0xf0b   : > { %3417 = vperm.xlu1 %4330, %v3412_v40  }
 0xf13   : > { %3424 = vperm.xlu1 %4330, %v3419_v37  }
 0xf1b   : > { %3431 = vperm.xlu1 %4330, %v3426_v39  }
 0xf23   : > { %3438 = vperm.xlu1 %4330, %v3433_v57  }
 0xf2b   : > { %3445 = vperm.xlu1 %4330, %v3440_v36  }
 0xf33   : > { %4333 = vset.pattern.permute.xlu1 %v5940_v29 }
 0xf5c   : > { %v3411_v31 = vpop.permute.xlu2 %3410 }
 0xf5d   : > { %v3463_v8 = vadd.f32 %v3411_v31, %v5644_v3 }
 0xf75   : > { %v3404_v48 = vpop.permute.xlu1 %3403 }
 0xf76   : > { %v3462_v10 = vadd.f32 %v3404_v48, %v5641_v12  ;;  %v3313_v12 = vpop.xlane.xlu0 %3312 }
 0xf78   : > { %4420 = vrcp.f32 %v3462_v10 }
 0xf79   : > { %4422 = vrcp.f32 %v3463_v8 }
 0xf7d   : > { %v3418_v63 = vpop.permute.xlu1 %3417 }
 0xf7e   : > { %v4421_v13 = vpop.eup %4420  ;;  %v3464_v25 = vadd.f32 %v3418_v63, %v5651_v44  ;;  %v3316_v62 = vpop.xlane.xlu0 %3315 }
 0xf7f   : > { %3487 = vperm.xlu1 %4333, %v4421_v13   ;;  %v4423_v41 = vpop.eup %4422 }
 0xf80   : > { %4424 = vrcp.f32 %v3464_v25 }
 0xf85   : > { %v3425_v7 = vpop.permute.xlu1 %3424 }
 0xf86   : > { %v3465_v29 = vadd.f32 %v3425_v7, %v3304_v47  ;;  %v4425_v59 = vpop.eup %4424  ;;  %v3453_v37 = vpop.permute.xlu0 %3452 }
 0xf87   : > { %3490 = vperm.xlu1 %4333, %v4423_v41   ;;  %v3469_v39 = vadd.f32 %v3453_v37, %v3316_v62 }
 0xf88   : > { %4426 = vrcp.f32 %v3465_v29 }
 0xf8d   : > { %v3432_v52 = vpop.permute.xlu1 %3431 }
 0xf8e   : > { %v3466_v27 = vadd.f32 %v3432_v52, %v3307_v4  ;;  %v4427_v3 = vpop.eup %4426 }
 0xf8f   : > { %3493 = vperm.xlu1 %4333, %v4425_v59  }
 0xf90   : > { %4428 = vrcp.f32 %v3466_v27 }
 0xf95   : > { %v3439_v50 = vpop.permute.xlu1 %3438 }
 0xf96   : > { %v3467_v14 = vadd.f32 %v3439_v50, %v3310_v45  ;;  %v4429_v44 = vpop.eup %4428 }
 0xf97   : > { %3496 = vperm.xlu1 %4333, %v4427_v3  }
 0xf98   : > { %4430 = vrcp.f32 %v3467_v14 }
 0xf9d   : > { %v3446_v24 = vpop.permute.xlu1 %3445 }
 0xf9e   : > { %v4431_v21 = vpop.eup %4430  ;;  %v3468_v40 = vadd.f32 %v3446_v24, %v3313_v12 }
 0xf9f   : > { %3499 = vperm.xlu1 %4333, %v4429_v44   ;;  %3502 = vperm.xlu0 %4334, %v4431_v21  }
 0xfa0   : > { %4432 = vrcp.f32 %v3468_v40 }
 0xfa1   : > { %4434 = vrcp.f32 %v3469_v39 }
 0xfa6   : > { %v4433_v57 = vpop.eup %4432 }
 0xfa7   : > { %3505 = vperm.xlu1 %4333, %v4433_v57   ;;  %v4435_v36 = vpop.eup %4434 }
 0xfaf   : > { %3508 = vperm.xlu1 %4333, %v4435_v36  }
 0xfb7   : > { %4335 = vset.pattern.permute.xlu1 %v4698_v17 }
 0xff1   : > { %v5738_v47 = vpop.permute.xlu1 %3487 }
 0xff2   : > { %v3510_v25 = vperm.slane %v5738_v47, %v4759_v38 }
 0xff9   : > { %v5740_v48 = vpop.permute.xlu1 %3490 }
 0xffa   : > { %v3511_v8 = vperm.slane %v5740_v48, %v4759_v38 }
 0xffc   : > { %v3518_v29 = vsel %vm1129_vm6, %v3511_v8, %v3510_v25 }
0x1001   : > { %v5742_v10 = vpop.permute.xlu1 %3493 }
0x1002   : > { %v3512_v63 = vperm.slane %v5742_v10, %v4759_v38 }
0x1004   : > { %v3519_v52 = vsel %vm1131_vm7, %v3512_v63, %v3518_v29 }
0x1009   : > { %v5744_v31 = vpop.permute.xlu1 %3496 }
0x100a   : > { %v3513_v45 = vperm.slane %v5744_v31, %v4759_v38 }
0x100c   : > { %v3520_v59 = vsel %vm1133_vm8, %v3513_v45, %v3519_v52 }
0x1011   : > { %v5746_v4 = vpop.permute.xlu1 %3499  ;;  %v5758_v7 = vpop.permute.xlu0 %3502 }
0x1012   : > { %v3514_v41 = vperm.slane %v5746_v4, %v4759_v38  ;;  %v3515_v12 = vperm.slane %v5758_v7, %v4759_v38 }
0x1014   : > { %v3521_v27 = vsel %vm1135_vm9, %v3514_v41, %v3520_v59  ;;  %v3848_v41 = vsel %vm1805_vm3, %v5292_v61, 0  ;;  %v3924_v61 = vsel %vm1805_vm3, %v5319_v60, 0  ;;  %v3640_v60 = vmul.f32 %v5613_v56, %v5742_v10 }
0x1015   : > { %v3522_v14 = vsel %vm1137_vm10, %v3515_v12, %v3521_v27  ;;  %v3810_v12 = vsel %vm1805_vm3, %v5272_v16, 0 }
0x1019   : > { %v5752_v13 = vpop.permute.xlu1 %3505 }
0x101a   : > { %v3516_v50 = vperm.slane %v5752_v13, %v4759_v38 }
0x101c   : > { %v3523_v44 = vsel %vm1139_vm11, %v3516_v50, %v3522_v14 }
0x1021   : > { %v5770_v3 = vpop.permute.xlu1 %3508 }
0x1022   : > { %v3517_v62 = vperm.slane %v5770_v3, %v4759_v38 }
0x1024   : > { %v3524_v24 = vsel %vm1141_vm12, %v3517_v62, %v3523_v44 }
0x1025   : > { %3526 = vxpose.xlu0.b32.start.end [1/1] (short) (narrow) %v3524_v24, 8 }
0x108c   : > { %4336 = vset.pattern.permute.xlu0 %v4698_v17 }
0x10c9   : > { %v3542_v21 = vpop.trf.xlu0 }
0x10ca   : > { %v3579_v40 = vperm.slane %v3542_v21, 3  ;;  %v3572_v37 = vperm.slane %v3542_v21, 2  ;;  %v3565_v39 = vperm.slane %v3542_v21, 1  ;;  %v3558_v57 = vperm.slane %v3542_v21, 0 }
0x10cb   : > { %v3607_v36 = vperm.slane %v3542_v21, 7  ;;  %v3600_v8 = vperm.slane %v3542_v21, 6  ;;  %v3593_v38 = vperm.slane %v3542_v21, 5  ;;  %v3586_v63 = vperm.slane %v3542_v21, 4 }
0x10cc   : > { %3584 = vperm.xlu1 %4335, %v3579_v40   ;;  %3577 = vperm.xlu2 %4331, %v3572_v37   ;;  %v3867_v21 = vsel %vm1805_vm3, %v5317_v26, 0  ;;  %v3648_v40 = vpack.c.bf16 %v3640_v60, %v3640_v60  ;;  %v3829_v26 = vsel %vm1805_vm3, %v5279_v55, 0  ;;  %v3644_v55 = vmul.f32 %v5709_v0, %v5752_v13 }
0x10d4   : > { %3570 = vperm.xlu1 %4335, %v3565_v39   ;;  %3563 = vperm.xlu2 %4331, %v3558_v57  }
0x10dc   : > { %3612 = vperm.xlu1 %4335, %v3607_v36   ;;  %3605 = vperm.xlu2 %4331, %v3600_v8  }
0x10e4   : > { %3598 = vperm.xlu1 %4335, %v3593_v38   ;;  %3591 = vperm.xlu2 %4331, %v3586_v63   ;;  %v3642_v38 = vmul.f32 %v5689_v30, %v5746_v4  ;;  %v3645_v63 = vmul.f32 %v5713_v46, %v5770_v3 }
0x10e6   : > { %v3650_v13 = vpack.c.bf16 %v3642_v38, %v3642_v38 }
0x1126   : > { %v3578_v25 = vpop.permute.xlu2 %3577 }
0x1127   : > { %v3616_v17 = vmul.f32 %v5680_v43, %v3578_v25  ;;  %v3653_v25 = vpack.c.bf16 %v3645_v63, %v3645_v63 }
0x1129   : > { %v3624_v45 = vpack.c.bf16 %v3616_v17, %v3616_v17 }
0x112b   : > { %4277 = vmatmul.msk.bf16.vlgmr.msra.gmra.mxu2 %vm1064_vm5, %v3624_v45 }
0x112c   : > { %3857 = vmatpush.bf16.msra.mxu2 %v3848_v41 }
0x112e   : > { %v3564_v29 = vpop.permute.xlu2 %3563 }
0x112f   : > { %v3614_v52 = vmul.f32 %v5669_v42, %v3564_v29 }
0x1131   : > { %v3622_v59 = vpack.c.bf16 %v3614_v52, %v3614_v52 }
0x1133   : > { %4275 = vmatmul.msk.bf16.vlgmr.msra.gmra.mxu0 %vm1064_vm5, %v3622_v59 }
0x1134   : > { %3819 = vmatpush.bf16.msra.mxu0 %v3810_v12 }
0x1136   : > { %v3606_v27 = vpop.permute.xlu2 %3605 }
0x1137   : > { %v3620_v43 = vmul.f32 %v5701_v34, %v3606_v27  ;;  %v3886_v34 = vsel %vm1805_vm3, %v5340_v23, 0  ;;  %v3638_v23 = vmul.f32 %v5597_v58, %v5738_v47  ;;  %v3652_v58 = vpack.c.bf16 %v3644_v55, %v3644_v55 }
0x1139   : > { %v3628_v50 = vpack.c.bf16 %v3620_v43, %v3620_v43  ;;  %v3646_v56 = vpack.c.bf16 %v3638_v23, %v3638_v23 }
0x113b   : > { %4281 = vmatmul.msk.bf16.vlgmr.msrb.gmra.mxu2 %vm1064_vm5, %v3628_v50 }
0x113c   : > { %3933 = vmatpush.bf16.msrb.mxu2 %v3924_v61 }
0x113e   : > { %v3585_v14 = vpop.permute.xlu1 %3584  ;;  %v3592_v62 = vpop.permute.xlu2 %3591 }
0x113f   : > { %v3617_v42 = vmul.f32 %v5654_v19, %v3585_v14  ;;  %v3618_v44 = vmul.f32 %v5691_v5, %v3592_v62 }
0x1141   : > { %v3625_v16 = vpack.c.bf16 %v3617_v42, %v3617_v42  ;;  %v3626_v24 = vpack.c.bf16 %v3618_v44, %v3618_v44 }
0x1143   : > { %4278 = vmatmul.msk.bf16.vlgmr.msra.gmra.mxu3 %vm1064_vm5, %v3625_v16  ;;  %4279 = vmatmul.msk.bf16.vlgmr.msrb.gmra.mxu0 %vm1064_vm5, %v3626_v24 }
0x1144   : > { %3876 = vmatpush.bf16.msra.mxu3 %v3867_v21  ;;  %3895 = vmatpush.bf16.msrb.mxu0 %v3886_v34 }
0x1146   : > { %v3571_v19 = vpop.permute.xlu1 %3570 }
0x1147   : > { %v3615_v5 = vmul.f32 %v5647_v6, %v3571_v19  ;;  %v3943_v6 = vsel %vm1805_vm3, %v5348_v54, 0  ;;  %v3641_v54 = vmul.f32 %v5678_v22, %v5744_v31  ;;  %v3643_v22 = vmul.f32 %v5699_v28, %v5758_v7 }
0x1149   : > { %v3623_v37 = vpack.c.bf16 %v3615_v5, %v3615_v5  ;;  %v3649_v0 = vpack.c.bf16 %v3641_v54, %v3641_v54  ;;  %v3651_v30 = vpack.c.bf16 %v3643_v22, %v3643_v22 }
0x114b   : > { %4276 = vmatmul.msk.bf16.vlgmr.msra.gmra.mxu1 %vm1064_vm5, %v3623_v37  ;;  %4285 = vmatmul.msk.bf16.vlgmr.msra.gmra.mxu2 %vm1064_vm5, %v3648_v40 }
0x114c   : > { %3838 = vmatpush.bf16.msra.mxu1 %v3829_v26 }
0x114e   : > { %v3613_v39 = vpop.permute.xlu1 %3612 }
0x114f   : > { %v3621_v57 = vmul.f32 %v5667_v49, %v3613_v39  ;;  %v3905_v49 = vsel %vm1805_vm3, %v5327_v33, 0  ;;  %v3639_v33 = vmul.f32 %v5602_v18, %v5740_v48 }
0x1151   : > { %v3629_v10 = vpack.c.bf16 %v3621_v57, %v3621_v57 }
0x1153   : > { %4282 = vmatmul.msk.bf16.vlgmr.msrb.gmra.mxu3 %vm1064_vm5, %v3629_v10  ;;  %4283 = vmatmul.msk.bf16.vlgmr.msra.gmra.mxu0 %vm1064_vm5, %v3646_v56 }
0x1154   : > { %3952 = vmatpush.bf16.msrb.mxu3 %v3943_v6 }
0x1156   : > { %v3599_v36 = vpop.permute.xlu1 %3598 }
0x1157   : > { %v3619_v8 = vmul.f32 %v5660_v20, %v3599_v36  ;;  %v3647_v20 = vpack.c.bf16 %v3639_v33, %v3639_v33 }
0x1159   : > { %v3627_v47 = vpack.c.bf16 %v3619_v8, %v3619_v8 }
0x115b   : > { %4280 = vmatmul.msk.bf16.vlgmr.msrb.gmra.mxu1 %vm1064_vm5, %v3627_v47  ;;  %4289 = vmatmul.msk.bf16.vlgmr.msrb.gmra.mxu2 %vm1064_vm5, %v3652_v58 }
0x115c   : > { %3914 = vmatpush.bf16.msrb.mxu1 %v3905_v49 }
0x1163   : > { %4286 = vmatmul.msk.bf16.vlgmr.msra.gmra.mxu3 %vm1064_vm5, %v3649_v0  ;;  %4287 = vmatmul.msk.bf16.vlgmr.msrb.gmra.mxu0 %vm1064_vm5, %v3650_v13 }
0x116b   : > { %4284 = vmatmul.msk.bf16.vlgmr.msra.gmra.mxu1 %vm1064_vm5, %v3647_v20 }
0x1173   : > { %4290 = vmatmul.msk.bf16.vlgmr.msrb.gmra.mxu3 %vm1064_vm5, %v3653_v25 }
0x117b   : > { %4288 = vmatmul.msk.bf16.vlgmr.msrb.gmra.mxu1 %vm1064_vm5, %v3651_v30 }
0x11ae   : > { %v3707_v31 = vpop.f32.mrf.mxu2 }
0x11af   : > { %v3958_v46 = vrot.slane %v3707_v31, 4 }
0x11b0   : > { %v3669_v4 = vpop.f32.mrf.mxu0 }
0x11b1   : > { %v3960_v50 = vrot.slane %v3669_v4, 4  ;;  %v3959_v62 = vsel %vm511_vm1, %v3958_v46, %v3669_v4 }
0x11b2   : > { %v3965_v21 = vperm.slane %v3959_v62, %v4555_v32 }
0x11b3   : > { %v3961_v16 = vsel %vm511_vm1, %v3707_v31, %v3960_v50 }
0x11b4   : > { %v3969_v37 = vperm.slane %v3961_v16, %v4555_v32  ;;  %v4008_v10 = vrot.slane %v3965_v21, 4 }
0x11b6   : > { %v3709_v17 = vpop.f32.mrf.mxu2  ;;  %v4020_v47 = vrot.slane %v3969_v37, 4 }
0x11b8   : > { %v3671_v45 = vpop.f32.mrf.mxu0 }
0x11be   : > { %v3783_v18 = vpop.f32.mrf.mxu2 }
0x11bf   : > { %v3982_v43 = vrot.slane %v3783_v18, 4 }
0x11c0   : > { %v3745_v48 = vpop.f32.mrf.mxu0 }
0x11c1   : > { %v3984_v28 = vrot.slane %v3745_v48, 4  ;;  %v3983_v44 = vsel %vm511_vm1, %v3982_v43, %v3745_v48 }
0x11c2   : > { %v3989_v19 = vperm.slane %v3983_v44, %v4555_v32 }
0x11c3   : > { %v3985_v24 = vsel %vm511_vm1, %v3783_v18, %v3984_v28 }
0x11c4   : > { %v3993_v26 = vperm.slane %v3985_v24, %v4555_v32  ;;  %v4032_v8 = vrot.slane %v3989_v19, 4 }
0x11c6   : > { %v3726_v41 = vpop.f32.mrf.mxu3  ;;  %v3785_v29 = vpop.f32.mrf.mxu2  ;;  %v4044_v49 = vrot.slane %v3993_v26, 4 }
0x11c7   : > { %v3970_v3 = vrot.slane %v3726_v41, 4 }
0x11c8   : > { %v3688_v52 = vpop.f32.mrf.mxu1  ;;  %v3747_v59 = vpop.f32.mrf.mxu0 }
0x11c9   : > { %v3972_v14 = vrot.slane %v3688_v52, 4  ;;  %v3971_v42 = vsel %vm511_vm1, %v3970_v3, %v3688_v52 }
0x11ca   : > { %v3977_v60 = vperm.slane %v3971_v42, %v4555_v32 }
0x11cb   : > { %v3973_v34 = vsel %vm511_vm1, %v3726_v41, %v3972_v14 }
0x11cc   : > { %v3981_v39 = vperm.slane %v3973_v34, %v4555_v32  ;;  %v4006_v6 = vrot.slane %v3977_v60, 4  ;;  %v4009_v54 = vsel %vm511_vm1, %v3977_v60, %v4008_v10 }
0x11cd   : > { %v4017_v45 = vperm.slane %v4009_v54, %v4594_v9 }
0x11ce   : > { %v3728_v12 = vpop.f32.mrf.mxu3  ;;  %v3859_v27 = vpop.f32.mrf.mxu2  ;;  %v4018_v0 = vrot.slane %v3981_v39, 4  ;;  %v4021_v63 = vsel %vm511_vm1, %v3981_v39, %v4020_v47  ;;  %v4007_v22 = vsel %vm511_vm1, %v4006_v6, %v3965_v21 }
0x11cf   : > { %v4029_v29 = vperm.slane %v4021_v63, %v4594_v9  ;;  %v4013_v12 = vperm.slane %v4007_v22, %v4594_v9  ;;  %v4060_v14 = vrot.slane %v4017_v45, 4 }
0x11d0   : > { %v3690_v7 = vpop.f32.mrf.mxu1  ;;  %v5834_v61 = vpop.f32.mrf.mxu0  ;;  %v4019_v46 = vsel %vm511_vm1, %v4018_v0, %v3969_v37 }
0x11d1   : > { %v4025_v44 = vperm.slane %v4019_v46, %v4594_v9 }
0x11d3   : > { %v4064_v22 = vrot.slane %v4025_v44, 4 }
0x11d6   : > { %v3802_v5 = vpop.f32.mrf.mxu3  ;;  %v3861_v40 = vpop.f32.mrf.mxu2 }
0x11d7   : > { %v3994_v23 = vrot.slane %v3802_v5, 4  ;;  %v4056_v40 = vrot.slane %v4013_v12, 4 }
0x11d8   : > { %v3764_v57 = vpop.f32.mrf.mxu1  ;;  %v3823_v56 = vpop.f32.mrf.mxu0 }
0x11d9   : > { %v3995_v55 = vsel %vm511_vm1, %v3994_v23, %v3764_v57  ;;  %v3996_v36 = vrot.slane %v3764_v57, 4 }
0x11da   : > { %v4001_v58 = vperm.slane %v3995_v55, %v4555_v32 }
0x11db   : > { %v3997_v38 = vsel %vm511_vm1, %v3802_v5, %v3996_v36 }
0x11dc   : > { %v4005_v13 = vperm.slane %v3997_v38, %v4555_v32  ;;  %v4030_v33 = vrot.slane %v4001_v58, 4  ;;  %v4033_v20 = vsel %vm511_vm1, %v4001_v58, %v4032_v8 }
0x11dd   : > { %v4041_v25 = vperm.slane %v4033_v20, %v4594_v9 }
0x11de   : > { %v4042_v30 = vrot.slane %v4005_v13, 4  ;;  %v3804_v31 = vpop.f32.mrf.mxu3  ;;  %v3935_v4 = vpop.f32.mrf.mxu2  ;;  %v4045_v17 = vsel %vm511_vm1, %v4005_v13, %v4044_v49  ;;  %v4031_v18 = vsel %vm511_vm1, %v4030_v33, %v3989_v19 }
0x11df   : > { %v5861_v32 = vperm.slane %v4045_v17, %v4594_v9  ;;  %v4058_v48 = vrot.slane %v4041_v25, 4  ;;  %v4037_v41 = vperm.slane %v4031_v18, %v4594_v9  ;;  %v4061_v5 = vsel %vm511_vm1, %v4041_v25, %v4060_v14 }
0x11e0   : > { %v3766_v52 = vpop.f32.mrf.mxu1  ;;  %v3897_v59 = vpop.f32.mrf.mxu0  ;;  %v4043_v3 = vsel %vm511_vm1, %v4042_v30, %v3993_v26 }
0x11e1   : > { %v4066_v43 = vrot.slane %v5861_v32, 4  ;;  %v4049_v50 = vperm.slane %v4043_v3, %v4594_v9  ;;  %v4059_v28 = vsel %vm511_vm1, %v4058_v48, %v4017_v45  ;;  %v4054_v7 = vrot.slane %v4037_v41, 4  ;;  %v5941_v45 = vld [vmem:[#allocation4_spill] sm:$0xff]  ;;  %v5942_v52 = vld [vmem:[#allocation3_spill] sm:$0xff] }
0x11e2   : > { %v4072_v62 = vadd.f32 %v4059_v28, %v3859_v27  ;;  %v4057_v57 = vsel %vm511_vm1, %v4037_v41, %v4056_v40 }
0x11e3   : > { %v4067_v42 = vsel %vm511_vm1, %v4066_v43, %v4029_v29  ;;  %v4062_v16 = vrot.slane %v4049_v50, 4  ;;  %v4055_v24 = vsel %vm511_vm1, %v4054_v7, %v4013_v12  ;;  %v4065_v31 = vsel %vm511_vm1, %v4049_v50, %v4064_v22 }
0x11e4   : > { %v4076_v21 = vadd.f32 %v4067_v42, %v3935_v4  ;;  %v4080_v34 = vmul.f32 %v4072_v62, %v5144_v2  ;;  %v4070_v60 = vadd.f32 %v4055_v24, %v5834_v61 }
0x11e5   : > { %v4063_v19 = vsel %vm511_vm1, %v4062_v16, %v4025_v44 }
0x11e6   : > { %v4084_v27 = vmul.f32 %v4076_v21, %v5144_v2  ;;  %v4074_v37 = vadd.f32 %v4063_v19, %v3897_v59  ;;  %v3878_v26 = vpop.f32.mrf.mxu3  ;;  %v4088_v23 = vadd.f32 %v4080_v34, %v5184_v35  ;;  %v3937_v9 = vpop.f32.mrf.mxu2  ;;  %v4078_v39 = vmul.f32 %v4070_v60, %v5144_v2 }
0x11e7   : > { %v4073_v61 = vadd.f32 %v4061_v5, %v3878_v26 }
0x11e8   : > { %v4092_v56 = vadd.f32 %v4084_v27, %v5219_v53  ;;  %v4082_v10 = vmul.f32 %v4074_v37, %v5144_v2  ;;  %v4096_v35 = vpack.c.bf16 %v4088_v23, %v4088_v23  ;;  %v3840_v6 = vpop.f32.mrf.mxu1  ;;  %v4086_v55 = vadd.f32 %v4078_v39, %v5152_v1  ;;  %v3899_v36 = vpop.f32.mrf.mxu0 }
0x11e9   : > { %v4081_v8 = vmul.f32 %v4073_v61, %v5144_v2  ;;  %v4071_v58 = vadd.f32 %v4057_v57, %v3840_v6 }
0x11ea   : > { %v4100_v47 = vpack.c.bf16 %v4092_v56, %v4092_v56  ;;  %v4090_v49 = vadd.f32 %v4082_v10, %v5205_v15  ;;  %4105 = vst.msk [vmem:[%s5886_s19 + $0x8] sm:$0xf] %vm4102_vm13, %v4096_v35  ;;  %v4094_v53 = vpack.c.bf16 %v4086_v55, %v4086_v55 }
0x11eb   : > { %v4089_v54 = vadd.f32 %v4081_v8, %v5188_v11  ;;  %v4079_v38 = vmul.f32 %v4071_v58, %v5144_v2  ;;  %v4068_v11 = vrot.slane %v4029_v29, 4 }
0x11ec   : > { %4109 = vst.msk [vmem:[%s5886_s19 + $0x18] sm:$0xf] %vm4102_vm13, %v4100_v47  ;;  %v4098_v0 = vpack.c.bf16 %v4090_v49, %v4090_v49 }
0x11ed   : > { %v4097_v1 = vpack.c.bf16 %v4089_v54, %v4089_v54  ;;  %v4087_v13 = vadd.f32 %v4079_v38, %v5154_v51  ;;  %4103 = vst.msk [vmem:[%s5886_s19] sm:$0xf] %vm4102_vm13, %v4094_v53  ;;  %v4069_v25 = vsel %vm511_vm1, %v5861_v32, %v4068_v11 }
0x11ee   : > { %4107 = vst.msk [vmem:[%s5886_s19 + $0x10] sm:$0xf] %vm4102_vm13, %v4098_v0  ;;  %v3880_v33 = vpop.f32.mrf.mxu3 }
0x11ef   : > { %4106 = vst.msk [vmem:[%s5886_s19 + $0xc] sm:$0xf] %vm4102_vm13, %v4097_v1  ;;  %v4095_v15 = vpack.c.bf16 %v4087_v13, %v4087_v13 }
0x11f0   : > { %v3842_v20 = vpop.f32.mrf.mxu1 }
0x11f1   : > { %4104 = vst.msk [vmem:[%s5886_s19 + $0x4] sm:$0xf] %vm4102_vm13, %v4095_v15 }
0x11f6   : > { %v3954_v63 = vpop.f32.mrf.mxu3 }
0x11f7   : > { %v4077_v51 = vadd.f32 %v4069_v25, %v3954_v63 }
0x11f8   : > { %v3916_v30 = vpop.f32.mrf.mxu1 }
0x11f9   : > { %v4085_v4 = vmul.f32 %v4077_v51, %v5144_v2  ;;  %v4075_v17 = vadd.f32 %v4065_v31, %v3916_v30 }
0x11fb   : > { %v4093_v18 = vadd.f32 %v4085_v4, %v5941_v45  ;;  %v4083_v48 = vmul.f32 %v4075_v17, %v5144_v2 }
0x11fd   : > { %v4101_v41 = vpack.c.bf16 %v4093_v18, %v4093_v18  ;;  %v4091_v29 = vadd.f32 %v4083_v48, %v5942_v52 }
0x11fe   : > { %v3956_v59 = vpop.f32.mrf.mxu3 }
0x11ff   : > { %4110 = vst.msk [vmem:[%s5886_s19 + $0x1c] sm:$0xf] %vm4102_vm13, %v4101_v41  ;;  %v4099_v46 = vpack.c.bf16 %v4091_v29, %v4091_v29 }
0x1200   : > { %v3918_v32 = vpop.f32.mrf.mxu1 }
0x1201   : > { %4108 = vst.msk [vmem:[%s5886_s19 + $0x14] sm:$0xf] %vm4102_vm13, %v4099_v46 }
0x1202 PF: > { %s19_s29 = sadd.s32 1, %s4448_s29  }
0x1203   : > { %p16_p4 = scmp.ge.s32.totalorder %s19_s29, 4  }
0x1205   :  { %18 = sbr.rel (!%p16_p4) target bundleno = 2 (0x2), region = 82 }

// kernel: rcca_forward.9
= control target key start
LH: loop header
LB: loop body
LE: loop exit
PB: predicated region body
PF: predicated region fallthrough
CT: control target
= control target key end

     0   :  { %s2302_s21 = smov 0   ;;  %s2304_s22 = smov 0   ;;  %s2809_s0 = inlined_call_operand.vmem [shape: bf16[2,10,10,64], index: 0, kind: input, shape index: {}]   ;;  %s2810_s1 = inlined_call_operand.vmem [shape: bf16[2,10,10,16], index: 1, kind: input, shape index: {}]   ;;  %s2811_s2 = inlined_call_operand.vmem [shape: bf16[3,192,5], index: 2, kind: input, shape index: {}]   ;;  %s2812_s3 = inlined_call_operand.vmem [shape: bf16[3,48,5], index: 3, kind: input, shape index: {}]   ;;  %s2813_s4 = inlined_call_operand.vmem [shape: f32[1,5], index: 4, kind: input, shape index: {}]   ;;  %s2814_s5 = inlined_call_operand.vmem [shape: f32[1,5], index: 5, kind: input, shape index: {}]   ;;  %s2815_s6 = inlined_call_operand.vmem [shape: bf16[2,8,8,5], index: 6, kind: output, shape index: {}]  }
   0x1   :  { %s2306_s23 = smov 0  }
   0x2 LB: > { %s28_s24 = sadd.s32 1, %s2258_s22  ;;  %p1789_p0 = scmp.ge.s32.totalorder %s2262_s23, 1  ;;  %s2262_s23 = sphi %s2306_s23, %s16_s23   ;;  %s2258_s22 = sphi %s2304_s22, %s2817_s22   ;;  %s2254_s21 = sphi %s2302_s21, %s2816_s21  }
   0x3   : > { %p30_p1 = scmp.ge.s32.totalorder %s28_s24, 2  ;;  %p270_p2 = scmp.lt.s32.totalorder %s2262_s23, 3 }
   0x5   : > { %s2819_s24 = smov (%p30_p1, %s28_s24), 0  ;;  %p271_p3 = pnand %p1789_p0, %p270_p2 }
   0x6   : > { %p322_p4 = scmp.lt.s32.totalorder (!%p271_p3), %s2254_s21, 1  ;;  %s2264_s17 = smov (!%p271_p3), 64  }
   0x7   : > { %274 = sbr.rel (%p271_p3) target bundleno = 418 (0x1a2), region = 44  ;;  %s2266_s30 = smov (!%p271_p3), 32  }
   0xc   : > { %v2174_v0 = vld [vmem:[%s2811_s2 + $0xb8] sm:$0xff]  ;;  %s2821_s21 = smov (!%p322_p4, %s2254_s21), 1  ;;  %v2173_v1 = vld [vmem:[%s2811_s2 + $0xb0] sm:$0xff]  ;;  %v2172_v2 = vld [vmem:[%s2811_s2 + $0xa8] sm:$0xff]  ;;  %vm495_vm0 = vcmask 523264   ;;  %vm1268_vm1 = vcmask 130048  }
   0xd   : > { %2206 = vmatpush.bf16.msra.mxu3 %v2174_v0  ;;  %743 = vmatpush.bf16.msra.mxu1 %v2174_v0  ;;  %s2210_s29 = smul.u32 80, %s2821_s21  ;;  %v2171_v10 = vld [vmem:[%s2811_s2 + $0xa0] sm:$0xff]  ;;  %v2162_v24 = vld [vmem:[%s2811_s2 + $0x58] sm:$0xff]  ;;  %v2161_v41 = vld [vmem:[%s2811_s2 + $0x50] sm:$0xff]  ;;  %vm1293_vm2 = vcmask 261120   ;;  %vm1354_vm3 = vcmask 392192  }
   0xe   : > { %v2160_v55 = vld [vmem:[%s2811_s2 + $0x48] sm:$0xff]  ;;  %s2140_s18 = sshll.u32 %s2821_s21, 5  ;;  %vm1628_vm4 = vcmask 35840  }
   0xf   : > { %s2334_s8 = scalar_lea.vmem %s2809_s0, %s2210_s29  ;;  %s2403_s20 = scalar_lea.vmem %s2810_s1, %s2210_s29 }
  0x10   : > { %v1804_v3 = vld [vmem:[%s2334_s8 + $0x10] sm:$0xf]  ;;  %v2143_v4 = vld [vmem:[%s2334_s8 + $0x10] sm:$0x10]  ;;  %v1796_v5 = vld [vmem:[%s2334_s8] sm:$0xf]  ;;  %s2749_s26 = scalar_lea.vmem %s2815_s6, %s2140_s18 }
  0x11   : > { %2207 = vmatpush.bf16.msra.mxu3 %v2173_v1  ;;  %744 = vmatpush.bf16.msra.mxu1 %v2173_v1  ;;  %v2342_v6 = vor.u32 %v2143_v4, %v1804_v3  ;;  %v2141_v7 = vld [vmem:[%s2334_s8] sm:$0x10]  ;;  %v1808_v8 = vld [vmem:[%s2334_s8 + $0x18] sm:$0xf]  ;;  %v2144_v9 = vld [vmem:[%s2334_s8 + $0x18] sm:$0x10] }
  0x12   : > { %v2350_v11 = vor.u32 %v2141_v7, %v1796_v5  ;;  %v2352_v12 = vor.u32 %v2144_v9, %v1808_v8  ;;  %v1800_v13 = vld [vmem:[%s2334_s8 + $0x8] sm:$0xf]  ;;  %v2142_v14 = vld [vmem:[%s2334_s8 + $0x8] sm:$0x10]  ;;  %v1820_v20 = vld [vmem:[%s2334_s8 + $0x30] sm:$0xf] }
  0x13   : > { %v1816_v15 = vld [vmem:[%s2334_s8 + $0x28] sm:$0xf]  ;;  %v430_v16 = vshrl.u32 %v2342_v6, 16  ;;  %v432_v17 = vshll.u32 %v2342_v6, 16  ;;  %v2359_v18 = vor.u32 %v2142_v14, %v1800_v13  ;;  %v2146_v19 = vld [vmem:[%s2334_s8 + $0x28] sm:$0x10] }
  0x14   : > { %v416_v21 = vshrl.u32 %v2350_v11, 16  ;;  %v418_v22 = vshll.u32 %v2350_v11, 16  ;;  %v2147_v23 = vld [vmem:[%s2334_s8 + $0x30] sm:$0x10]  ;;  %v439_v26 = vshll.u32 %v2352_v12, 16  ;;  %v2371_v28 = vor.u32 %v2146_v19, %v1816_v15  ;;  %v2159_v4 = vld [vmem:[%s2811_s2 + $0x40] sm:$0xff] }
  0x15   : > { %2208 = vmatpush.bf16.msra.mxu3 %v2172_v2  ;;  %745 = vmatpush.bf16.msra.mxu1 %v2172_v2  ;;  %v434_v25 = vrot.slane %v432_v17, 1  ;;  %v425_v27 = vshll.u32 %v2359_v18, 16  ;;  %v1812_v29 = vld [vmem:[%s2334_s8 + $0x20] sm:$0xf]  ;;  %v2374_v31 = vor.u32 %v2147_v23, %v1820_v20  ;;  %v2145_v32 = vld [vmem:[%s2334_s8 + $0x20] sm:$0x10] }
  0x16   : > { %v420_v30 = vrot.slane %v418_v22, 1  ;;  %v492_v34 = vrot.slane %v2371_v28, 1  ;;  %v2378_v35 = vor.u32 %v2145_v32, %v1812_v29  ;;  %v1824_v36 = vld [vmem:[%s2334_s8 + $0x38] sm:$0xf]  ;;  %v2148_v37 = vld [vmem:[%s2334_s8 + $0x38] sm:$0x10] }
  0x17   : > { %v435_v33 = vor.u32 %v434_v25, %v430_v16  ;;  %v437_v39 = vshrl.u32 %v2352_v12, 16  ;;  %v493_v40 = vrot.slane %v2374_v31, 1  ;;  %v441_v42 = vrot.slane %v439_v26, 1  ;;  %v1828_v50 = vld [vmem:[%s2334_s8 + $0x40] sm:$0xf]  ;;  %s2265_s29 = smov 16  }
  0x18   : > { %v421_v38 = vor.u32 %v420_v30, %v416_v21  ;;  %v423_v43 = vshrl.u32 %v2359_v18, 16  ;;  %v427_v44 = vrot.slane %v425_v27, 1  ;;  %v2389_v45 = vunpack.c.l.b16 %v492_v34  ;;  %v2149_v51 = vld [vmem:[%s2334_s8 + $0x40] sm:$0x10]  ;;  %v2044_v62 = vld [vmem:[%s2403_s20 + $0x8] sm:$0xf] }
  0x19   : > { %2209 = vmatpush.bf16.msra.mxu3 %v2171_v10  ;;  %746 = vmatpush.bf16.msra.mxu1 %v2171_v10  ;;  %v2392_v46 = vunpack.c.l.b16 %v493_v40  ;;  %v444_v47 = vshrl.u32 %v2378_v35, 16  ;;  %v446_v48 = vshll.u32 %v2378_v35, 16  ;;  %v1825_v49 = vor.u32 %v2148_v37, %v1824_v36  ;;  %v2188_v63 = vld [vmem:[%s2403_s20 + $0x8] sm:$0x10]  ;;  %v1960_v0 = vld [vmem:[%s2334_s8 + $0x48] sm:$0xf] }
  0x1a   : > { %475 = vrot.lane.b32.xlu1 %v435_v33, %s2264_s17  ;;  %471 = vrot.lane.b32.xlu0 %v421_v38, %s2264_s17  ;;  %v453_v54 = vshll.u32 %v2371_v28, 16  ;;  %v442_v56 = vor.u32 %v441_v42, %v437_v39  ;;  %v428_v58 = vor.u32 %v427_v44, %v423_v43  ;;  %v460_v59 = vshll.u32 %v2374_v31, 16  ;;  %v2150_v1 = vld [vmem:[%s2334_s8 + $0x48] sm:$0x10]  ;;  %v2048_v25 = vld [vmem:[%s2403_s20 + $0x10] sm:$0xf] }
  0x1b   : > { %v619_v52 = vpack.c.b16 %v2392_v46, %v2389_v45  ;;  %v448_v53 = vrot.slane %v446_v48, 1  ;;  %v467_v57 = vshll.u32 %v1825_v49, 16  ;;  %v1829_v61 = vor.u32 %v2149_v51, %v1828_v50  ;;  %v2189_v26 = vld [vmem:[%s2403_s20 + $0x10] sm:$0x10]  ;;  %v2052_v40 = vld [vmem:[%s2403_s20 + $0x18] sm:$0xf] }
  0x1c   : > { %v451_v2 = vshrl.u32 %v2371_v28, 16  ;;  %v455_v3 = vrot.slane %v453_v54, 1  ;;  %v458_v5 = vshrl.u32 %v2374_v31, 16  ;;  %v465_v7 = vshrl.u32 %v1825_v49, 16  ;;  %v2040_v42 = vld [vmem:[%s2403_s20] sm:$0xf] }
  0x1d   : > { %897 = vmatpush.bf16.msrb.mxu3 %v2162_v24  ;;  %v449_v60 = vor.u32 %v448_v53, %v444_v47  ;;  %v469_v8 = vrot.slane %v467_v57, 1  ;;  %v2424_v9 = vor.u32 %v2188_v63, %v2044_v62  ;;  %v462_v10 = vrot.slane %v460_v59, 1  ;;  %v2187_v43 = vld [vmem:[%s2403_s20] sm:$0x10]  ;;  %v2056_v59 = vld [vmem:[%s2403_s20 + $0x20] sm:$0xf] }
  0x1e   : > { %1904 = vmatmul.msk.bf16.vlgmr.msra.gmra.mxu3 %vm495_vm0, %v619_v52  ;;  %v494_v13 = vrot.slane %v1825_v49, 1  ;;  %v582_v14 = vrot.slane %v1829_v61, 1  ;;  %v2427_v15 = vor.u32 %v2150_v1, %v1960_v0  ;;  %v456_v16 = vor.u32 %v455_v3, %v451_v2 }
  0x1f   : > { %479 = vrot.lane.b32.xlu2 %v449_v60, %s2264_s17  ;;  %v576_v17 = vshll.u32 %v1829_v61, 16  ;;  %v470_v19 = vor.u32 %v469_v8, %v465_v7  ;;  %v1182_v20 = vshll.u32 %v2424_v9, 16  ;;  %v463_v21 = vor.u32 %v462_v10, %v458_v5  ;;  %v2191_v60 = vld [vmem:[%s2403_s20 + $0x20] sm:$0x10]  ;;  %v2064_v7 = vld [vmem:[%s2403_s20 + $0x30] sm:$0xf] }
  0x20   : > { %v2430_v22 = vunpack.c.l.b16 %v494_v13  ;;  %v2432_v23 = vunpack.c.l.b16 %v582_v14  ;;  %v930_v24 = vshll.u32 %v2427_v15, 16  ;;  %v574_v27 = vshrl.u32 %v1829_v61, 16  ;;  %v2193_v8 = vld [vmem:[%s2403_s20 + $0x30] sm:$0x10]  ;;  %v2170_v10 = vld [vmem:[%s2811_s2 + $0x98] sm:$0xff] }
  0x21   : > { %898 = vmatpush.bf16.msrb.mxu3 %v2161_v41  ;;  %v578_v28 = vrot.slane %v576_v17, 1  ;;  %v1180_v29 = vshrl.u32 %v2424_v9, 16  ;;  %v1184_v30 = vrot.slane %v1182_v20, 1  ;;  %v928_v32 = vshrl.u32 %v2427_v15, 16  ;;  %v2190_v41 = vld [vmem:[%s2403_s20 + $0x18] sm:$0x10]  ;;  %710 = vmatpush.bf16.msra.mxu0 %v2170_v10 }
  0x22   : > { %477 = vrot.lane.b32.xlu1 %v442_v56, %s2264_s17  ;;  %473 = vrot.lane.b32.xlu0 %v428_v58, %s2264_s17  ;;  %v621_v31 = vpack.c.b16 %v2432_v23, %v2430_v22  ;;  %v932_v33 = vrot.slane %v930_v24, 1  ;;  %v2049_v34 = vor.u32 %v2189_v26, %v2048_v25  ;;  %v2451_v48 = vor.u32 %v2190_v41, %v2052_v40  ;;  %v2158_v14 = vld [vmem:[%s2811_s2 + $0x38] sm:$0xff]  ;;  %v2181_v24 = vld [vmem:[%s2811_s2 + $0xf0] sm:$0xff] }
  0x23   : > { %v579_v36 = vor.u32 %v578_v28, %v574_v27  ;;  %v1185_v38 = vor.u32 %v1184_v30, %v1180_v29  ;;  %v487_v49 = vrot.slane %v2350_v11, 1  ;;  %v488_v50 = vrot.slane %v2359_v18, 1  ;;  %864 = vmatpush.bf16.msra.mxu2 %v2158_v14  ;;  %v2060_v30 = vld [vmem:[%s2403_s20 + $0x28] sm:$0xf]  ;;  %v2177_v10 = vld [vmem:[%s2811_s2 + $0xd0] sm:$0xff] }
  0x24   : > { %v1189_v37 = vshll.u32 %v2049_v34, 16  ;;  %v933_v39 = vor.u32 %v932_v33, %v928_v32  ;;  %v1187_v44 = vshrl.u32 %v2049_v34, 16  ;;  %v2041_v51 = vor.u32 %v2187_v43, %v2040_v42  ;;  %v2156_v32 = vld [vmem:[%s2811_s2 + $0x28] sm:$0xff]  ;;  %v2068_v33 = vld [vmem:[%s2403_s20 + $0x38] sm:$0xf] }
  0x25   : > { %899 = vmatpush.bf16.msrb.mxu3 %v2160_v55  ;;  %v1246_v54 = vrot.slane %v2049_v34, 1  ;;  %v1196_v55 = vshll.u32 %v2451_v48, 16  ;;  %v1245_v56 = vrot.slane %v2424_v9, 1  ;;  %v529_v57 = vunpack.c.l.b16 %v487_v49  ;;  %v2194_v34 = vld [vmem:[%s2403_s20 + $0x38] sm:$0x10]  ;;  %v2167_v49 = vld [vmem:[%s2811_s2 + $0x80] sm:$0xff] }
  0x26   : > { %v1191_v47 = vrot.slane %v1189_v37, 1  ;;  %v1175_v53 = vshll.u32 %v2041_v51, 16  ;;  %v531_v58 = vunpack.c.l.b16 %v488_v50  ;;  %v489_v61 = vrot.slane %v2342_v6, 1  ;;  %v2155_v50 = vld [vmem:[%s2811_s2 + $0x20] sm:$0xff] }
  0x27   : > { %481 = vrot.lane.b32.xlu2 %v456_v16, %s2264_s17  ;;  %v1173_v11 = vshrl.u32 %v2041_v51, 16  ;;  %v1194_v62 = vshrl.u32 %v2451_v48, 16  ;;  %v1198_v63 = vrot.slane %v1196_v55, 1  ;;  %v2057_v1 = vor.u32 %v2191_v60, %v2056_v59  ;;  %v2182_v16 = vld [vmem:[%s2811_s2 + $0xf8] sm:$0xff]  ;;  %v2185_v55 = vld [vmem:[%s2811_s2 + $0x110] sm:$0xff] }
  0x28   : > { %v1192_v52 = vor.u32 %v1191_v47, %v1187_v44  ;;  %v1177_v18 = vrot.slane %v1175_v53, 1  ;;  %v769_v0 = vpack.c.b16 %v531_v58, %v529_v57  ;;  %v533_v2 = vunpack.c.l.b16 %v489_v61  ;;  %1046 = vmatpush.bf16.msrb.mxu1 %v2182_v16  ;;  %v2179_v53 = vld [vmem:[%s2811_s2 + $0xe0] sm:$0xff]  ;;  %v2166_v57 = vld [vmem:[%s2811_s2 + $0x78] sm:$0xff] }
  0x29   : > { %900 = vmatpush.bf16.msrb.mxu3 %v2159_v4  ;;  %v1199_v4 = vor.u32 %v1198_v63, %v1194_v62  ;;  %v1244_v5 = vrot.slane %v2041_v51, 1  ;;  %v1203_v6 = vshll.u32 %v2057_v1, 16  ;;  %v2473_v13 = vpack.c.b16 %v2430_v22, %v2392_v46  ;;  %v2169_v46 = vld [vmem:[%s2811_s2 + $0x90] sm:$0xff]  ;;  %v2088_v63 = vld [vmem:[%s2403_s20 + $0x40] sm:$0xf] }
  0x2a   : > { %485 = vrot.lane.b32.xlu1 %v470_v19, %s2264_s17  ;;  %483 = vrot.lane.b32.xlu0 %v463_v21, %s2264_s17  ;;  %v1178_v3 = vor.u32 %v1177_v18, %v1173_v11  ;;  %v615_v9 = vpack.c.b16 %v533_v2, %v531_v58  ;;  %v2484_v17 = vor.u32 %v2193_v8, %v2064_v7  ;;  %v490_v19 = vrot.slane %v2352_v12, 1  ;;  %v2157_v22 = vld [vmem:[%s2811_s2 + $0x30] sm:$0xff]  ;;  %v2168_v12 = vld [vmem:[%s2811_s2 + $0x88] sm:$0xff] }
  0x2b   : > { %v1201_v20 = vshrl.u32 %v2057_v1, 16  ;;  %v1205_v21 = vrot.slane %v1203_v6, 1  ;;  %v1247_v25 = vrot.slane %v2451_v48, 1  ;;  %v1248_v26 = vrot.slane %v2057_v1, 1  ;;  %711 = vmatpush.bf16.msra.mxu0 %v2169_v46  ;;  %865 = vmatpush.bf16.msra.mxu2 %v2157_v22  ;;  %v2154_v58 = vld [vmem:[%s2811_s2 + $0x18] sm:$0xff]  ;;  %v2184_v7 = vld [vmem:[%s2811_s2 + $0x108] sm:$0xff] }
  0x2c   : > { %1902 = vmatmul.msk.bf16.vlgmr.msra.gmra.mxu1 %vm495_vm0, %v615_v9  ;;  %v1217_v27 = vshll.u32 %v2484_v17, 16  ;;  %v535_v28 = vunpack.c.l.b16 %v490_v19  ;;  %v2069_v42 = vor.u32 %v2194_v34, %v2068_v33  ;;  %v2178_v11 = vld [vmem:[%s2811_s2 + $0xd8] sm:$0xff]  ;;  %v2153_v9 = vld [vmem:[%s2811_s2 + $0x10] sm:$0xff]  ;;  %v2183_v46 = vld [vmem:[%s2811_s2 + $0x100] sm:$0xff]  ;;  %v1250_v19 = vrot.slane %v2484_v17, 1 }
  0x2d   : > { %v1206_v29 = vor.u32 %v1205_v21, %v1201_v20  ;;  %1047 = vmatpush.bf16.msrb.mxu1 %v2181_v24  ;;  %v2164_v21 = vld [vmem:[%s2811_s2 + $0x68] sm:$0xff]  ;;  %v2201_v34 = vld [vmem:[%s2812_s3 + $0x20] sm:$0xff] }
  0x2e   : > { %1905 = vmatmul.msk.bf16.gmra.mxu3 %vm495_vm0, %v621_v31  ;;  %v2192_v31 = vld [vmem:[%s2403_s20 + $0x28] sm:$0x10]  ;;  %v1219_v40 = vrot.slane %v1217_v27, 1  ;;  %v2516_v41 = vpack.c.b16 %v535_v28, %v533_v2  ;;  %v1224_v48 = vshll.u32 %v2069_v42, 16  ;;  %v1222_v59 = vshrl.u32 %v2069_v42, 16 }
  0x2f   : > { %580 = vrot.lane.b32.xlu2 %v579_v36, %s2264_s17  ;;  %v2180_v36 = vld [vmem:[%s2811_s2 + $0xe8] sm:$0xff]  ;;  %v2061_v37 = vor.u32 %v2192_v31, %v2060_v30  ;;  %712 = vmatpush.bf16.msra.mxu0 %v2168_v12  ;;  %v1251_v18 = vrot.slane %v2069_v42, 1  ;;  %v2199_v12 = vld [vmem:[%s2812_s3 + $0x10] sm:$0xff]  ;;  %v2205_v30 = vld [vmem:[%s2812_s3 + $0x40] sm:$0xff] }
  0x30   : > { %866 = vmatpush.bf16.msra.mxu2 %v2156_v32  ;;  %v1226_v60 = vrot.slane %v1224_v48, 1  ;;  %v2152_v22 = vld [vmem:[%s2811_s2 + $0x8] sm:$0xff]  ;;  %v355_v42 = vld [vmem:[%s2334_s8] sm:$0xf] }
  0x31   : > { %1048 = vmatpush.bf16.msrb.mxu1 %v2180_v36  ;;  %v1249_v43 = vrot.slane %v2061_v37, 1  ;;  %v1208_v51 = vshrl.u32 %v2061_v37, 16  ;;  %v2176_v24 = vld [vmem:[%s2811_s2 + $0xc8] sm:$0xff] }
  0x32   : > { %1230 = vrot.lane.b32.xlu1 %v1185_v38, %s2265_s29  ;;  %934 = vrot.lane.b32.xlu0 %v933_v39, %s2264_s17  ;;  %v491_v38 = vrot.slane %v2378_v35, 1  ;;  %v1215_v39 = vshrl.u32 %v2484_v17, 16  ;;  %v2186_v35 = vld [vmem:[%s2811_s2 + $0x118] sm:$0xff]  ;;  %v1227_v62 = vor.u32 %v1226_v60, %v1222_v59  ;;  %v2163_v17 = vld [vmem:[%s2811_s2 + $0x60] sm:$0xff] }
  0x33   : > { %1079 = vmatpush.bf16.msra.mxu3 %v2186_v35  ;;  %713 = vmatpush.bf16.msra.mxu0 %v2167_v49  ;;  %v2202_v27 = vld [vmem:[%s2812_s3 + $0x28] sm:$0xff] }
  0x34   : > { %v537_v44 = vunpack.c.l.b16 %v491_v38  ;;  %v1220_v47 = vor.u32 %v1219_v40, %v1215_v39  ;;  %867 = vmatpush.bf16.msra.mxu2 %v2155_v50  ;;  %v2198_v36 = vld [vmem:[%s2812_s3 + $0x8] sm:$0xff]  ;;  %v2204_v38 = vld [vmem:[%s2812_s3 + $0x38] sm:$0xff]  ;;  %v359_v40 = vld [vmem:[%s2334_s8 + $0x10] sm:$0xf] }
  0x35   : > { %1049 = vmatpush.bf16.msrb.mxu1 %v2179_v53  ;;  %v365_v59 = vld [vmem:[%s2334_s8 + $0x28] sm:$0xf] }
  0x36   : > { %v773_v1 = vpack.c.b16 %v2389_v45, %v537_v44  ;;  %v2165_v45 = vld [vmem:[%s2811_s2 + $0x70] sm:$0xff] }
  0x37   : > { %1232 = vrot.lane.b32.xlu2 %v1192_v52, %s2265_s29  ;;  %v1210_v52 = vshll.u32 %v2061_v37, 16  ;;  %1080 = vmatpush.bf16.msra.mxu3 %v2185_v55 }
  0x38   : > { %714 = vmatpush.bf16.msra.mxu0 %v2166_v57  ;;  %868 = vmatpush.bf16.msra.mxu2 %v2154_v58 }
  0x39   : > { %1050 = vmatpush.bf16.msrb.mxu1 %v2178_v11  ;;  %v2197_v11 = vld [vmem:[%s2812_s3] sm:$0xff] }
  0x3a   : > { %1256 = vrot.lane.b32.xlu1 %v1246_v54, %s2266_s30  ;;  %1254 = vrot.lane.b32.xlu0 %v1245_v56, %s2266_s30  ;;  %v617_v54 = vpack.c.b16 %v537_v44, %v535_v28  ;;  %v1212_v56 = vrot.slane %v1210_v52, 1 }
  0x3b   : > { %1081 = vmatpush.bf16.msra.mxu3 %v2184_v7  ;;  %v369_v7 = vld [vmem:[%s2334_s8 + $0x38] sm:$0xf] }
  0x3c   : > { %v1213_v61 = vor.u32 %v1212_v56, %v1208_v51  ;;  %1903 = vmatmul.msk.bf16.gmra.mxu1 %vm495_vm0, %v617_v54  ;;  %715 = vmatpush.bf16.msra.mxu0 %v2165_v45  ;;  %v367_v45 = vld [vmem:[%s2334_s8 + $0x30] sm:$0xf] }
  0x3d   : > { %869 = vmatpush.bf16.msra.mxu2 %v2153_v9  ;;  %1051 = vmatpush.bf16.msrb.mxu1 %v2177_v10 }
  0x3e   : > { %1954 = vmatmul.msk.bf16.vlgmr.msrb.gmra.mxu3 %vm495_vm0, %v769_v0  ;;  %v2195_v0 = vld [vmem:[%s2403_s20 + $0x40] sm:$0x10] }
  0x3f   : > { %1228 = vrot.lane.b32.xlu2 %v1178_v3, %s2265_s29  ;;  %v2089_v2 = vor.u32 %v2195_v0, %v2088_v63  ;;  %1082 = vmatpush.bf16.msra.mxu3 %v2183_v46 }
  0x40   : > { %716 = vmatpush.bf16.msra.mxu0 %v2164_v21 }
  0x41   : > { %v1418_v3 = vrot.slane %v2089_v2, 1  ;;  %870 = vmatpush.bf16.msra.mxu2 %v2152_v22  ;;  %1052 = vmatpush.bf16.msrb.mxu1 %v2176_v24  ;;  %v1410_v28 = vshrl.u32 %v2089_v2, 16  ;;  %v373_v24 = vld [vmem:[%s2334_s8 + $0x48] sm:$0xf] }
  0x42   : > { %1234 = vrot.lane.b32.xlu1 %v1199_v4, %s2265_s29  ;;  %1252 = vrot.lane.b32.xlu0 %v1244_v5, %s2266_s30  ;;  %v2114_v4 = vld [vmem:[%s2403_s20 + $0x48] sm:$0xf]  ;;  %v2196_v5 = vld [vmem:[%s2403_s20 + $0x48] sm:$0x10] }
  0x43   : > { %v2115_v6 = vor.u32 %v2196_v5, %v2114_v4 }
  0x44   : > { %717 = vmatpush.bf16.msra.mxu0 %v2163_v17  ;;  %v371_v17 = vld [vmem:[%s2334_s8 + $0x40] sm:$0xf] }
  0x45   : > { %v1514_v8 = vshll.u32 %v2115_v6, 16  ;;  %v1512_v14 = vshrl.u32 %v2115_v6, 16  ;;  %v1520_v33 = vrot.slane %v2115_v6, 1 }
  0x47   : > { %1258 = vrot.lane.b32.xlu2 %v1247_v25, %s2266_s30  ;;  %v1516_v16 = vrot.slane %v1514_v8, 1  ;;  %v2151_v25 = vld [vmem:[%s2811_s2] sm:$0xff] }
  0x48   : > { %871 = vmatpush.bf16.msra.mxu2 %v2151_v25  ;;  %1372 = vmatpush.bf16.msrb.mxu0 %v2199_v12 }
  0x49   : > { %v1517_v20 = vor.u32 %v1516_v16, %v1512_v14 }
  0x4a   : > { %1260 = vrot.lane.b32.xlu1 %v1248_v26, %s2266_s30  ;;  %1236 = vrot.lane.b32.xlu0 %v1206_v29, %s2265_s29  ;;  %v2175_v26 = vld [vmem:[%s2811_s2 + $0xc0] sm:$0xff]  ;;  %v1412_v29 = vshll.u32 %v2089_v2, 16 }
  0x4b   : > { %1053 = vmatpush.bf16.msrb.mxu1 %v2175_v26 }
  0x4c   : > { %1474 = vmatpush.bf16.msrb.mxu2 %v2202_v27  ;;  %v1414_v31 = vrot.slane %v1412_v29, 1  ;;  %1373 = vmatpush.bf16.msrb.mxu0 %v2198_v36  ;;  %v1118_v36 = vld [vmem:[%s2403_s20 + $0x18] sm:$0xf] }
  0x4e   : > { %1955 = vmatmul.msk.bf16.gmra.mxu3 %vm495_vm0, %v2516_v41  ;;  %v1415_v32 = vor.u32 %v1414_v31, %v1410_v28 }
  0x4f   : > { %1238 = vrot.lane.b32.xlu2 %v1213_v61, %s2265_s29  ;;  %1564 = vmatpush.bf16.msra.mxu1 %v2205_v30  ;;  %v2200_v61 = vld [vmem:[%s2812_s3 + $0x18] sm:$0xff] }
  0x50   : > { %1475 = vmatpush.bf16.msrb.mxu2 %v2201_v34  ;;  %1374 = vmatpush.bf16.msrb.mxu0 %v2197_v11  ;;  %v1116_v34 = vld [vmem:[%s2403_s20 + $0x10] sm:$0xf] }
  0x52   : > { %1240 = vrot.lane.b32.xlu1 %v1220_v47, %s2265_s29  ;;  %1262 = vrot.lane.b32.xlu0 %v1249_v43, %s2266_s30  ;;  %v361_v43 = vld [vmem:[%s2334_s8 + $0x18] sm:$0xf]  ;;  %v357_v47 = vld [vmem:[%s2334_s8 + $0x8] sm:$0xf] }
  0x53   : > { %1565 = vmatpush.bf16.msra.mxu1 %v2204_v38  ;;  %v1114_v38 = vld [vmem:[%s2403_s20 + $0x8] sm:$0xf] }
  0x54   : > { %1476 = vmatpush.bf16.msrb.mxu2 %v2200_v61 }
  0x57   : > { %1264 = vrot.lane.b32.xlu2 %v1250_v19, %s2266_s30 }
  0x5a   : > { %1266 = vrot.lane.b32.xlu1 %v1251_v18, %s2266_s30  ;;  %1242 = vrot.lane.b32.xlu0 %v1227_v62, %s2265_s29  ;;  %v363_v18 = vld [vmem:[%s2334_s8 + $0x20] sm:$0xf] }
  0x5e   : > { %1956 = vmatmul.msk.bf16.gmra.mxu3 %vm495_vm0, %v773_v1 }
  0x5f   : > { %1416 = vrot.lane.b32.xlu2 %v1415_v32, %s2265_s29 }
  0x62   : > { %1419 = vrot.lane.b32.xlu0 %v1418_v3, %s2266_s30  ;;  %1518 = vrot.lane.b32.xlu1 %v1517_v20, %s2265_s29 }
  0x67   : > { %1521 = vrot.lane.b32.xlu2 %v1520_v33, %s2266_s30 }
  0x6e   : > { %1957 = vmatmul.msk.bf16.gmra.mxu3 %vm495_vm0, %v2473_v13 }
  0x79   : > { %v480_v44 = vpop.permute.xlu2 %479 }
  0x7a   : > { %v510_v63 = vsel %vm495_vm0, %v363_v18, %v480_v44  ;;  %v1120_v18 = vld [vmem:[%s2403_s20 + $0x20] sm:$0xf] }
  0x7b   : > { %v536_v2 = vunpack.c.l.b16 %v510_v63 }
  0x7e   : > { %2034 = vmatmul.msk.bf16.vlgmr.msra.gmra.mxu3 %vm495_vm0, %v2516_v41 }
  0x81   : > { %v482_v60 = vpop.permute.xlu2 %481 }
  0x82   : > { %v513_v62 = vsel %vm495_vm0, %v365_v59, %v482_v60  ;;  %v1122_v60 = vld [vmem:[%s2403_s20 + $0x28] sm:$0xf] }
  0x83   : > { %v538_v0 = vunpack.c.l.b16 %v513_v62 }
  0x85   : > { %v772_v3 = vpack.c.b16 %v538_v0, %v536_v2 }
  0x89   : > { %v581_v10 = vpop.permute.xlu2 %580 }
  0x8a   : > { %v585_v27 = vsel %vm495_vm0, %v371_v17, %v581_v10 }
  0x8b   : > { %v587_v29 = vunpack.c.l.b16 %v585_v27 }
  0x8c   : > { %v476_v37 = vpop.permute.xlu1 %475  ;;  %v472_v39 = vpop.permute.xlu0 %471 }
  0x8d   : > { %v504_v41 = vsel %vm495_vm0, %v359_v40, %v476_v37  ;;  %v498_v35 = vsel %vm495_vm0, %v355_v42, %v472_v39  ;;  %v1112_v39 = vld [vmem:[%s2403_s20] sm:$0xf] }
  0x8e   : > { %2035 = vmatmul.msk.bf16.gmra.mxu3 %vm495_vm0, %v773_v1  ;;  %v532_v48 = vunpack.c.l.b16 %v504_v41  ;;  %v528_v54 = vunpack.c.l.b16 %v498_v35  ;;  %v936_v1 = vrot.slane %v2427_v15, 1 }
  0x90   : > { %v942_v4 = vunpack.c.l.b16 %v936_v1 }
  0x91   : > { %v1233_v22 = vpop.permute.xlu2 %1232 }
  0x92   : > { %v969_v6 = vpack.c.b16 %v942_v4, %v2432_v23  ;;  %v1277_v40 = vsel %vm1268_vm1, %v1116_v34, %v1233_v22 }
  0x94   : > { %v478_v49 = vpop.permute.xlu1 %477  ;;  %v474_v51 = vpop.permute.xlu0 %473 }
  0x95   : > { %v507_v50 = vsel %vm495_vm0, %v361_v43, %v478_v49  ;;  %v501_v53 = vsel %vm495_vm0, %v357_v47, %v474_v51 }
  0x96   : > { %v534_v52 = vunpack.c.l.b16 %v507_v50  ;;  %v530_v55 = vunpack.c.l.b16 %v501_v53 }
  0x98   : > { %v770_v56 = vpack.c.b16 %v534_v52, %v532_v48  ;;  %v614_v57 = vpack.c.b16 %v532_v48, %v530_v55  ;;  %v768_v58 = vpack.c.b16 %v530_v55, %v528_v54  ;;  %v616_v5 = vpack.c.b16 %v536_v2, %v534_v52 }
  0x99   : > { %v1229_v30 = vpop.permute.xlu2 %1228 }
  0x9a   : > { %1054 = vmatmul.bf16.vlgmr.msrb.gmra.mxu1 %v770_v56  ;;  %718 = vmatmul.bf16.vlgmr.msra.gmra.mxu0 %v614_v57  ;;  %v1271_v47 = vsel %vm1268_vm1, %v1112_v39, %v1229_v30 }
  0x9b   : > { %872 = vmatmul.bf16.vlgmr.msra.gmra.mxu2 %v768_v58 }
  0x9c   : > { %v486_v8 = vpop.permute.xlu1 %485  ;;  %v484_v9 = vpop.permute.xlu0 %483 }
  0x9d   : > { %v519_v15 = vsel %vm495_vm0, %v369_v7, %v486_v8  ;;  %v516_v14 = vsel %vm495_vm0, %v367_v45, %v484_v9  ;;  %v1126_v8 = vld [vmem:[%s2403_s20 + $0x38] sm:$0xf] }
  0x9e   : > { %2036 = vmatmul.msk.bf16.gmra.mxu3 %vm495_vm0, %v2473_v13  ;;  %v2203_v13 = vld [vmem:[%s2812_s3 + $0x30] sm:$0xff]  ;;  %v542_v16 = vunpack.c.l.b16 %v519_v15  ;;  %v540_v23 = vunpack.c.l.b16 %v516_v14 }
  0x9f   : > { %1566 = vmatpush.bf16.msra.mxu1 %v2203_v13  ;;  %v1124_v15 = vld [vmem:[%s2403_s20 + $0x30] sm:$0xf] }
  0xa0   : > { %v774_v46 = vpack.c.b16 %v542_v16, %v540_v23  ;;  %v618_v21 = vpack.c.b16 %v540_v23, %v538_v0  ;;  %v620_v32 = vpack.c.b16 %v587_v29, %v542_v16 }
  0xa1   : > { %v1259_v42 = vpop.permute.xlu2 %1258  ;;  %v2659_v43 = vpop.f32.mrf.mxu3 }
  0xa4   : > { %v935_v19 = vpop.permute.xlu0 %934  ;;  %v1231_v20 = vpop.permute.xlu1 %1230 }
  0xa5   : > { %v939_v25 = vsel %vm495_vm0, %v373_v24, %v935_v19  ;;  %v1274_v44 = vsel %vm1268_vm1, %v1114_v38, %v1231_v20 }
  0xa6   : > { %v941_v28 = vunpack.c.l.b16 %v939_v25 }
  0xa8   : > { %v968_v31 = vpack.c.b16 %v941_v28, %v587_v29  ;;  %v1128_v29 = vld [vmem:[%s2403_s20 + $0x40] sm:$0xf] }
  0xa9   : > { %v2667_v57 = vpop.f32.mrf.mxu3  ;;  %v1239_v61 = vpop.permute.xlu2 %1238 }
  0xaa   : > { %1059 = vmatmul.bf16.gmra.mxu1 %v772_v3  ;;  %723 = vmatmul.bf16.gmra.mxu0 %v616_v5  ;;  %v1286_v62 = vsel %vm1268_vm1, %v1122_v60, %v1239_v61  ;;  %v748_v19 = vpop.f32.mrf.mxu1 }
  0xab   : > { %877 = vmatmul.bf16.gmra.mxu2 %v770_v56 }
  0xac   : > { %v1255_v26 = vpop.permute.xlu0 %1254  ;;  %v1257_v12 = vpop.permute.xlu1 %1256 }
  0xad   : > { %v1299_v48 = vsel %vm1293_vm2, %v1277_v40, %v1257_v12  ;;  %v1297_v49 = vsel %vm1293_vm2, %v1274_v44, %v1255_v26  ;;  %v1130_v12 = vld [vmem:[%s2403_s20 + $0x48] sm:$0xf] }
  0xae   : > { %2037 = vmatmul.msk.bf16.gmra.mxu3 %vm495_vm0, %v969_v6  ;;  %v1326_v52 = vunpack.c.l.b16 %v1299_v48  ;;  %v1325_v54 = vunpack.c.l.b16 %v1297_v49 }
  0xb0   : > { %v1435_v58 = vpack.c.b16 %v1326_v52, %v1325_v54 }
  0xb1   : > { %v2678_v5 = vpop.f32.mrf.mxu3  ;;  %v1265_v9 = vpop.permute.xlu2 %1264 }
  0xb2   : > { %v750_v27 = vpop.f32.mrf.mxu1 }
  0xb4   : > { %v1253_v33 = vpop.permute.xlu0 %1252  ;;  %v1235_v37 = vpop.permute.xlu1 %1234 }
  0xb5   : > { %v1280_v41 = vsel %vm1268_vm1, %v1118_v36, %v1235_v37  ;;  %v1295_v50 = vsel %vm1293_vm2, %v1271_v47, %v1253_v33 }
  0xb6   : > { %v1301_v35 = vsel %vm1293_vm2, %v1280_v41, %v1259_v42  ;;  %v1324_v55 = vunpack.c.l.b16 %v1295_v50 }
  0xb7   : > { %v1327_v53 = vunpack.c.l.b16 %v1301_v35 }
  0xb8   : > { %v1332_v59 = vpack.c.b16 %v1325_v54, %v1324_v55 }
  0xb9   : > { %v1333_v56 = vpack.c.b16 %v1327_v53, %v1326_v52  ;;  %v2686_v16 = vpop.f32.mrf.mxu3  ;;  %v1417_v22 = vpop.permute.xlu2 %1416 }
  0xba   : > { %1064 = vmatmul.bf16.gmra.mxu1 %v774_v46  ;;  %728 = vmatmul.bf16.gmra.mxu0 %v618_v21  ;;  %v753_v39 = vpop.f32.mrf.mxu1 }
  0xbb   : > { %882 = vmatmul.bf16.gmra.mxu2 %v772_v3 }
  0xbc   : > { %v1237_v51 = vpop.permute.xlu0 %1236  ;;  %v1261_v11 = vpop.permute.xlu1 %1260 }
  0xbd   : > { %v1283_v0 = vsel %vm1268_vm1, %v1120_v18, %v1237_v51 }
  0xbe   : > { %v1303_v2 = vsel %vm1293_vm2, %v1283_v0, %v1261_v11 }
  0xbf   : > { %v1328_v6 = vunpack.c.l.b16 %v1303_v2 }
  0xc1   : > { %v1436_v7 = vpack.c.b16 %v1328_v6, %v1327_v53  ;;  %v902_v25 = vpop.f32.mrf.mxu3 }
  0xc2   : > { %v755_v47 = vpop.f32.mrf.mxu1 }
  0xc4   : > { %v1263_v63 = vpop.permute.xlu0 %1262  ;;  %v1241_v4 = vpop.permute.xlu1 %1240 }
  0xc5   : > { %v1305_v1 = vsel %vm1293_vm2, %v1286_v62, %v1263_v63  ;;  %v1289_v23 = vsel %vm1268_vm1, %v1124_v15, %v1241_v4 }
  0xc6   : > { %v1329_v3 = vunpack.c.l.b16 %v1305_v1  ;;  %v1307_v20 = vsel %vm1293_vm2, %v1289_v23, %v1265_v9 }
  0xc7   : > { %v1330_v24 = vunpack.c.l.b16 %v1307_v20 }
  0xc8   : > { %v1334_v13 = vpack.c.b16 %v1329_v3, %v1328_v6 }
  0xc9   : > { %v1437_v26 = vpack.c.b16 %v1330_v24, %v1329_v3  ;;  %v904_v36 = vpop.f32.mrf.mxu3 }
  0xca   : > { %1069 = vmatmul.bf16.gmra.mxu1 %v968_v31  ;;  %733 = vmatmul.bf16.gmra.mxu0 %v620_v32  ;;  %v1522_v31 = vpop.permute.xlu2 %1521  ;;  %v1423_v32 = vsel %vm1268_vm1, %v1128_v29, %v1417_v22 }
  0xcb   : > { %887 = vmatmul.bf16.gmra.mxu2 %v774_v46 }
  0xcc   : > { %v1243_v45 = vpop.permute.xlu0 %1242  ;;  %v1267_v14 = vpop.permute.xlu1 %1266 }
  0xcd   : > { %v1292_v10 = vsel %vm1268_vm1, %v1126_v8, %v1243_v45 }
  0xce   : > { %v1309_v46 = vsel %vm1293_vm2, %v1292_v10, %v1267_v14 }
  0xcf   : > { %v1331_v21 = vunpack.c.l.b16 %v1309_v46 }
  0xd1   : > { %v1335_v17 = vpack.c.b16 %v1331_v21, %v1330_v24  ;;  %v907_v44 = vpop.f32.mrf.mxu3 }
  0xd4   : > { %v1519_v28 = vpop.permute.xlu1 %1518  ;;  %v1420_v33 = vpop.permute.xlu0 %1419 }
  0xd5   : > { %v1525_v30 = vsel %vm1268_vm1, %v1130_v12, %v1519_v28  ;;  %v1425_v37 = vsel %vm1293_vm2, %v1423_v32, %v1420_v33 }
  0xd6   : > { %v1527_v34 = vsel %vm1293_vm2, %v1525_v30, %v1522_v31  ;;  %v1434_v40 = vunpack.c.l.b16 %v1425_v37 }
  0xd7   : > { %v1536_v38 = vunpack.c.l.b16 %v1527_v34 }
  0xd8   : > { %v1438_v42 = vpack.c.b16 %v1434_v40, %v1331_v21 }
  0xd9   : > { %v1537_v41 = vpack.c.b16 %v1536_v38, %v1434_v40  ;;  %v909_v48 = vpop.f32.mrf.mxu3 }
  0xda   : > { %2134 = vmatmul.msk.bf16.vlgmr.msra.gmra.mxu1 %vm1354_vm3, %v1333_v56  ;;  %2082 = vmatmul.msk.bf16.vlgmr.msrb.gmra.mxu0 %vm1354_vm3, %v1332_v59 }
  0xdb   : > { %2108 = vmatmul.msk.bf16.vlgmr.msrb.gmra.mxu2 %vm1354_vm3, %v1435_v58 }
  0xe1   : > { %v2703_v52 = vpop.f32.mrf.mxu3 }
  0xe9   : > { %v2705_v18 = vpop.f32.mrf.mxu3 }
  0xea   : > { %2135 = vmatmul.msk.bf16.gmra.mxu1 %vm1354_vm3, %v1334_v13  ;;  %2083 = vmatmul.msk.bf16.gmra.mxu0 %vm1354_vm3, %v1333_v56 }
  0xeb   : > { %2109 = vmatmul.msk.bf16.gmra.mxu2 %vm1354_vm3, %v1436_v7 }
  0xf1   : > { %v2709_v6 = vpop.f32.mrf.mxu3 }
  0xf9   : > { %v2713_v10 = vpop.f32.mrf.mxu3 }
  0xfa   : > { %2136 = vmatmul.msk.bf16.gmra.mxu1 %vm1354_vm3, %v1335_v17  ;;  %2084 = vmatmul.msk.bf16.gmra.mxu0 %vm1354_vm3, %v1334_v13 }
  0xfb   : > { %2110 = vmatmul.msk.bf16.gmra.mxu2 %vm1354_vm3, %v1437_v26 }
 0x101   : > { %v1084_v20 = vpop.f32.mrf.mxu3 }
 0x109   : > { %v1086_v26 = vpop.f32.mrf.mxu3 }
 0x10a   : > { %2137 = vmatmul.msk.bf16.gmra.mxu1 %vm1354_vm3, %v1537_v41  ;;  %2085 = vmatmul.msk.bf16.gmra.mxu0 %vm1354_vm3, %v1335_v17  ;;  %v2741_v41 = vld [vmem:[%s2814_s5] ss:$0 sm:$0xff] }
 0x10b   : > { %2111 = vmatmul.msk.bf16.gmra.mxu2 %vm1354_vm3, %v1438_v42 }
 0x111   : > { %v1089_v30 = vpop.f32.mrf.mxu3 }
 0x117   : > { %v1055_v35 = vpop.f32.mrf.mxu1  ;;  %v719_v49 = vpop.f32.mrf.mxu0 }
 0x118   : > { %v749_v50 = vadd.f32 %v748_v19, %v719_v49  ;;  %v1085_v29 = vadd.f32 %v1084_v20, %v1055_v35 }
 0x11e   : > { %v873_v51 = vpop.f32.mrf.mxu2 }
 0x11f   : > { %v874_v53 = vadd.f32 %v873_v51, %v749_v50  ;;  %v1057_v54 = vpop.f32.mrf.mxu1  ;;  %v721_v55 = vpop.f32.mrf.mxu0 }
 0x120   : > { %v751_v58 = vadd.f32 %v750_v27, %v721_v55 }
 0x121   : > { %v903_v56 = vadd.f32 %v902_v25, %v874_v53 }
 0x123   : > { %v1104_v31 = vadd.f32 %v1085_v29, %v903_v56 }
 0x126   : > { %v875_v59 = vpop.f32.mrf.mxu2 }
 0x127   : > { %v876_v60 = vadd.f32 %v875_v59, %v751_v58  ;;  %v1060_v61 = vpop.f32.mrf.mxu1  ;;  %v724_v11 = vpop.f32.mrf.mxu0 }
 0x128   : > { %v754_v63 = vadd.f32 %v753_v39, %v724_v11  ;;  %v1087_v39 = vadd.f32 %v1086_v26, %v1057_v54  ;;  %v1090_v55 = vadd.f32 %v1089_v30, %v1060_v61 }
 0x129   : > { %v905_v62 = vadd.f32 %v904_v36, %v876_v60  ;;  %v2736_v36 = vld [vmem:[%s2813_s4] ss:$0 sm:$0xff] }
 0x12e   : > { %v878_v0 = vpop.f32.mrf.mxu2 }
 0x12f   : > { %v879_v1 = vadd.f32 %v878_v0, %v754_v63  ;;  %v2707_v2 = vpop.f32.mrf.mxu1  ;;  %v726_v3 = vpop.f32.mrf.mxu0 }
 0x130   : > { %v756_v13 = vadd.f32 %v755_v47, %v726_v3  ;;  %v1091_v47 = vpop.f32.mrf.mxu3 }
 0x131   : > { %v908_v4 = vadd.f32 %v907_v44, %v879_v1  ;;  %v1105_v44 = vadd.f32 %v1087_v39, %v905_v62 }
 0x133   : > { %v1106_v59 = vadd.f32 %v1090_v55, %v908_v4 }
 0x136   : > { %v880_v7 = vpop.f32.mrf.mxu2 }
 0x137   : > { %v881_v8 = vadd.f32 %v880_v7, %v756_v13  ;;  %v2711_v45 = vpop.f32.mrf.mxu1  ;;  %v729_v9 = vpop.f32.mrf.mxu0  ;;  %v1092_v7 = vadd.f32 %v1091_v47, %v2707_v2 }
 0x138   : > { %v1094_v63 = vpop.f32.mrf.mxu3 }
 0x139   : > { %v910_v15 = vadd.f32 %v909_v48, %v881_v8  ;;  %v759_v8 = vadd.f32 %v2659_v43, %v729_v9  ;;  %v1095_v2 = vadd.f32 %v1094_v63, %v2711_v45 }
 0x13b   : > { %v1107_v26 = vadd.f32 %v1092_v7, %v910_v15 }
 0x13e   : > { %v883_v14 = vpop.f32.mrf.mxu2 }
 0x13f   : > { %v2715_v23 = vpop.f32.mrf.mxu1  ;;  %v2717_v46 = vpop.f32.mrf.mxu0  ;;  %v884_v20 = vadd.f32 %v883_v14, %v759_v8 }
 0x140   : > { %v761_v43 = vadd.f32 %v2667_v57, %v2717_v46  ;;  %v1096_v9 = vpop.f32.mrf.mxu3 }
 0x141   : > { %v913_v30 = vadd.f32 %v2703_v52, %v884_v20  ;;  %v1097_v46 = vadd.f32 %v1096_v9, %v2715_v23 }
 0x146   : > { %v2719_v19 = vpop.f32.mrf.mxu2 }
 0x147   : > { %v2721_v21 = vpop.f32.mrf.mxu1  ;;  %v2723_v22 = vpop.f32.mrf.mxu0 }
 0x148   : > { %v764_v47 = vadd.f32 %v2678_v5, %v2723_v22 }
 0x14e   : > { %v2725_v24 = vpop.f32.mrf.mxu2 }
 0x14f   : > { %v2727_v17 = vpop.f32.mrf.mxu1  ;;  %v2729_v25 = vpop.f32.mrf.mxu0 }
 0x156   : > { %v2731_v27 = vpop.f32.mrf.mxu2 }
 0x157   : > { %v1568_v12 = vpop.f32.mrf.mxu1  ;;  %v1376_v28 = vpop.f32.mrf.mxu0 }
 0x158   : > { %v1396_v32 = vadd.f32 %v1376_v28, %v1104_v31 }
 0x15e   : > { %v1478_v33 = vpop.f32.mrf.mxu2 }
 0x15f   : > { %v1498_v34 = vadd.f32 %v1478_v33, %v1396_v32  ;;  %v1570_v37 = vpop.f32.mrf.mxu1  ;;  %v1378_v38 = vpop.f32.mrf.mxu0 }
 0x160   : > { %v1397_v35 = vadd.f32 %v1378_v38, %v1105_v44  ;;  %v1108_v38 = vadd.f32 %v1095_v2, %v913_v30 }
 0x161   : > { %v1588_v40 = vadd.f32 %v1568_v12, %v1498_v34  ;;  %v886_v34 = vadd.f32 %v2719_v19, %v761_v43 }
 0x163   : > { %v1600_v42 = vmul.f32 %v2736_v36, %v1588_v40  ;;  %v915_v45 = vadd.f32 %v2705_v18, %v886_v34 }
 0x165   : > { %v1612_v48 = vadd.f32 %v2741_v41, %v1600_v42 }
 0x166   : > { %v1480_v49 = vpop.f32.mrf.mxu2 }
 0x167   : > { %v1620_v50 = vpack.c.bf16 %v1612_v48, %v1612_v48  ;;  %v1499_v51 = vadd.f32 %v1480_v49, %v1397_v35  ;;  %v1573_v53 = vpop.f32.mrf.mxu1  ;;  %v1381_v54 = vpop.f32.mrf.mxu0  ;;  %v889_v35 = vadd.f32 %v2725_v24, %v764_v47 }
 0x168   : > { %v1398_v11 = vadd.f32 %v1381_v54, %v1106_v59  ;;  %v1099_v48 = vpop.f32.mrf.mxu3 }
 0x169   : > { %1629 = vst.msk [vmem:[%s2749_s26] sm:$0xf] %vm1628_vm4, %v1620_v50  ;;  %v1589_v56 = vadd.f32 %v1570_v37, %v1499_v51  ;;  %v1109_v50 = vadd.f32 %v1097_v46, %v915_v45  ;;  %v918_v23 = vadd.f32 %v2709_v6, %v889_v35  ;;  %v1100_v22 = vadd.f32 %v1099_v48, %v2721_v21 }
 0x16b   : > { %v1601_v58 = vmul.f32 %v2736_v36, %v1589_v56 }
 0x16d   : > { %v1613_v60 = vadd.f32 %v2741_v41, %v1601_v58  ;;  %v766_v58 = vadd.f32 %v2686_v16, %v2729_v25 }
 0x16e   : > { %v1483_v62 = vpop.f32.mrf.mxu2 }
 0x16f   : > { %v1621_v0 = vpack.c.bf16 %v1613_v60, %v1613_v60  ;;  %v1500_v1 = vadd.f32 %v1483_v62, %v1398_v11  ;;  %v1383_v3 = vpop.f32.mrf.mxu0  ;;  %v1575_v13 = vpop.f32.mrf.mxu1  ;;  %v891_v59 = vadd.f32 %v2731_v27, %v766_v58  ;;  %v1110_v11 = vadd.f32 %v1100_v22, %v918_v23 }
 0x170   : > { %v1399_v28 = vadd.f32 %v1383_v3, %v1107_v26  ;;  %v1101_v62 = vpop.f32.mrf.mxu3 }
 0x171   : > { %1630 = vst.msk [vmem:[%s2749_s26 + $0x4] sm:$0xf] %vm1628_vm4, %v1621_v0  ;;  %v1590_v61 = vadd.f32 %v1573_v53, %v1500_v1  ;;  %v920_v21 = vadd.f32 %v2713_v10, %v891_v59  ;;  %v1102_v16 = vadd.f32 %v1101_v62, %v2727_v17 }
 0x173   : > { %v1602_v4 = vmul.f32 %v2736_v36, %v1590_v61  ;;  %v1111_v8 = vadd.f32 %v1102_v16, %v920_v21 }
 0x175   : > { %v1614_v12 = vadd.f32 %v2741_v41, %v1602_v4 }
 0x176   : > { %v1485_v29 = vpop.f32.mrf.mxu2 }
 0x177   : > { %v1622_v31 = vpack.c.bf16 %v1614_v12, %v1614_v12  ;;  %v1501_v32 = vadd.f32 %v1485_v29, %v1399_v28  ;;  %v1386_v33 = vpop.f32.mrf.mxu0  ;;  %v1578_v15 = vpop.f32.mrf.mxu1 }
 0x178   : > { %v1400_v39 = vadd.f32 %v1386_v33, %v1108_v38 }
 0x179   : > { %1631 = vst.msk [vmem:[%s2749_s26 + $0x8] sm:$0xf] %vm1628_vm4, %v1622_v31  ;;  %v1591_v14 = vadd.f32 %v1575_v13, %v1501_v32 }
 0x17b   : > { %v1603_v37 = vmul.f32 %v2736_v36, %v1591_v14 }
 0x17d   : > { %v1615_v52 = vadd.f32 %v2741_v41, %v1603_v37 }
 0x17e   : > { %v1488_v40 = vpop.f32.mrf.mxu2 }
 0x17f   : > { %v1623_v42 = vpack.c.bf16 %v1615_v52, %v1615_v52  ;;  %v1502_v44 = vadd.f32 %v1488_v40, %v1400_v39  ;;  %v1388_v57 = vpop.f32.mrf.mxu0  ;;  %v1580_v51 = vpop.f32.mrf.mxu1 }
 0x180   : > { %v1401_v53 = vadd.f32 %v1388_v57, %v1109_v50 }
 0x181   : > { %1632 = vst.msk [vmem:[%s2749_s26 + $0xc] sm:$0xf] %vm1628_vm4, %v1623_v42  ;;  %v1592_v19 = vadd.f32 %v1578_v15, %v1502_v44 }
 0x183   : > { %v1604_v49 = vmul.f32 %v2736_v36, %v1592_v19 }
 0x185   : > { %v1616_v18 = vadd.f32 %v2741_v41, %v1604_v49 }
 0x186   : > { %v1490_v54 = vpop.f32.mrf.mxu2 }
 0x187   : > { %v1624_v55 = vpack.c.bf16 %v1616_v18, %v1616_v18  ;;  %v1503_v56 = vadd.f32 %v1490_v54, %v1401_v53  ;;  %v1391_v5 = vpop.f32.mrf.mxu0  ;;  %v1583_v0 = vpop.f32.mrf.mxu1 }
 0x188   : > { %v1402_v63 = vadd.f32 %v1391_v5, %v1110_v11 }
 0x189   : > { %1633 = vst.msk [vmem:[%s2749_s26 + $0x10] sm:$0xf] %vm1628_vm4, %v1624_v55  ;;  %v1593_v24 = vadd.f32 %v1580_v51, %v1503_v56 }
 0x18b   : > { %v1605_v60 = vmul.f32 %v2736_v36, %v1593_v24 }
 0x18d   : > { %v1617_v6 = vadd.f32 %v2741_v41, %v1605_v60 }
 0x18e   : > { %v1493_v1 = vpop.f32.mrf.mxu2 }
 0x18f   : > { %v1625_v3 = vpack.c.bf16 %v1617_v6, %v1617_v6  ;;  %v1504_v13 = vadd.f32 %v1493_v1, %v1402_v63  ;;  %v1393_v27 = vpop.f32.mrf.mxu0  ;;  %v1585_v28 = vpop.f32.mrf.mxu1 }
 0x190   : > { %v1403_v20 = vadd.f32 %v1393_v27, %v1111_v8 }
 0x191   : > { %1634 = vst.msk [vmem:[%s2749_s26 + $0x14] sm:$0xf] %vm1628_vm4, %v1625_v3  ;;  %v1594_v25 = vadd.f32 %v1583_v0, %v1504_v13 }
 0x193   : > { %v1606_v7 = vmul.f32 %v2736_v36, %v1594_v25 }
 0x195   : > { %v1618_v61 = vadd.f32 %v2741_v41, %v1606_v7 }
 0x196   : > { %v1495_v4 = vpop.f32.mrf.mxu2 }
 0x197   : > { %v1626_v26 = vpack.c.bf16 %v1618_v61, %v1618_v61  ;;  %v1505_v12 = vadd.f32 %v1495_v4, %v1403_v20 }
 0x199   : > { %1635 = vst.msk [vmem:[%s2749_s26 + $0x18] sm:$0xf] %vm1628_vm4, %v1626_v26  ;;  %v1595_v10 = vadd.f32 %v1585_v28, %v1505_v12 }
 0x19b   : > { %v1607_v17 = vmul.f32 %v2736_v36, %v1595_v10 }
 0x19d   : > { %v1619_v29 = vadd.f32 %v2741_v41, %v1607_v17 }
 0x19f   : > { %v1627_v30 = vpack.c.bf16 %v1619_v29, %v1619_v29 }
 0x1a1   : > { %1636 = vst.msk [vmem:[%s2749_s26 + $0x1c] sm:$0xf] %vm1628_vm4, %v1627_v30 }
 0x1a2 PF: > { %s16_s23 = sadd.s32 1, %s2262_s23   ;;  %s2816_s21 = smov %s2258_s22 }
 0x1a3   : > { %p13_p5 = scmp.ge.s32.totalorder %s16_s23, 4   ;;  %s2817_s22 = smov %s2819_s24 }
 0x1a5   :  { %15 = sbr.rel (!%p13_p5) target bundleno = 2 (0x2), region = 93 }

// kernel: rcca_forward.10
= control target key start
LH: loop header
LB: loop body
LE: loop exit
PB: predicated region body
PF: predicated region fallthrough
CT: control target
= control target key end

     0   :  { %s553_s15 = smov 0   ;;  %s555_s16 = smov 0   ;;  %s599_s0 = inlined_call_operand.vmem [shape: bf16[64,8], index: 0, kind: input, shape index: {}]   ;;  %s600_s1 = inlined_call_operand.vmem [shape: bf16[8,80], index: 1, kind: input, shape index: {}]   ;;  %s601_s2 = inlined_call_operand.vmem [shape: f32[1,80], index: 2, kind: input, shape index: {}]   ;;  %s602_s3 = inlined_call_operand.vmem [shape: f32[1,80], index: 3, kind: input, shape index: {}]   ;;  %s603_s4 = inlined_call_operand.vmem [shape: bf16[64,80], index: 4, kind: output, shape index: {}]  }
   0x1   :  { %s557_s17 = smov 0  }
   0x2 LB: > { %s26_s18 = sadd.s32 1, %s522_s16  ;;  %p458_p0 = scmp.ge.s32.totalorder %s526_s17, 1  ;;  %s526_s17 = sphi %s557_s17, %s14_s17   ;;  %s522_s16 = sphi %s555_s16, %s605_s16   ;;  %s518_s15 = sphi %s553_s15, %s604_s15  }
   0x3   : > { %p28_p1 = scmp.ge.s32.totalorder %s26_s18, 2  ;;  %p202_p2 = scmp.lt.s32.totalorder %s526_s17, 3 }
   0x5   : > { %s607_s18 = smov (%p28_p1, %s26_s18), 0  ;;  %p203_p3 = pnand %p458_p0, %p202_p2 }
   0x6   : > { %s459_s21 = sshll.u32 (!%p203_p3), %s518_s15, 2 }
   0x7   : > { %206 = sbr.rel (%p203_p3) target bundleno = 159 (0x9f), region = 36  ;;  %p242_p4 = scmp.lt.s32.totalorder (!%p203_p3), %s459_s21, 7 }
   0xc   : > { %v271_v0 = vld [vmem:[%s600_s1] sm:$0xf]  ;;  %vm289_vm0 = vcmask 1043456   ;;  %s609_s21 = smov (!%p242_p4, %s459_s21), 7  ;;  %vm282_vm1 = vcmask 64512   ;;  %vm332_vm2 = vcmask 650240  }
   0xd   : > { %v291_v1 = vsel %vm289_vm0, %v271_v0, 0  ;;  %s460_s22 = sshll.u32 %s609_s21, 2  ;;  %v502_v4 = vld [vmem:[%s601_s2] ss:$0 sm:$0xff] }
   0xe   : > { %300 = vmatpush.bf16.msra.mxu0 %v291_v1  ;;  %477 = vmatpush.bf16.msra.mxu1 %v291_v1  ;;  %s245_s25 = scalar_lea.vmem %s599_s0, %s460_s22  ;;  %v503_v5 = vld [vmem:[%s602_s3] ss:$0 sm:$0xff]  ;;  %s264_s6 = scalar_lea.vmem %s603_s4, %s460_s22 }
   0xf   : > { %v475_v2 = vld [vmem:[%s245_s25] sm:$0xff]  ;;  %v476_v3 = vld [vmem:[%s245_s25 + $0x8] sm:$0xff] }
  0x11   : > { %471 = vmatmul.msk.bf16.vlgmr.msra.gmra.mxu0 %vm282_vm1, %v475_v2  ;;  %472 = vmatmul.msk.bf16.vlgmr.msra.gmra.mxu1 %vm282_vm1, %v476_v3 }
  0x8e   : > { %v302_v6 = vpop.f32.mrf.mxu0  ;;  %v307_v7 = vpop.f32.mrf.mxu1 }
  0x8f   : > { %v316_v8 = vmul.f32 %v502_v4, %v302_v6  ;;  %v318_v11 = vmul.f32 %v502_v4, %v307_v7 }
  0x91   : > { %v324_v9 = vadd.f32 %v503_v5, %v316_v8  ;;  %v326_v16 = vadd.f32 %v503_v5, %v318_v11 }
  0x93   : > { %v328_v10 = vpack.c.bf16 %v324_v9, %v324_v9  ;;  %v330_v20 = vpack.c.bf16 %v326_v16, %v326_v16 }
  0x95   : > { %333 = vst.msk [vmem:[%s264_s6] sm:$0xf] %vm332_vm2, %v328_v10 }
  0x96   : > { %v304_v12 = vpop.f32.mrf.mxu0  ;;  %v309_v13 = vpop.f32.mrf.mxu1  ;;  %335 = vst.msk [vmem:[%s264_s6 + $0x8] sm:$0xf] %vm332_vm2, %v330_v20 }
  0x97   : > { %v317_v14 = vmul.f32 %v502_v4, %v304_v12  ;;  %v319_v15 = vmul.f32 %v502_v4, %v309_v13 }
  0x99   : > { %v325_v17 = vadd.f32 %v503_v5, %v317_v14  ;;  %v327_v18 = vadd.f32 %v503_v5, %v319_v15 }
  0x9b   : > { %v329_v19 = vpack.c.bf16 %v325_v17, %v325_v17  ;;  %v331_v21 = vpack.c.bf16 %v327_v18, %v327_v18 }
  0x9d   : > { %334 = vst.msk [vmem:[%s264_s6 + $0x4] sm:$0xf] %vm332_vm2, %v329_v19 }
  0x9e   : > { %336 = vst.msk [vmem:[%s264_s6 + $0xc] sm:$0xf] %vm332_vm2, %v331_v21 }
  0x9f PF: > { %s14_s17 = sadd.s32 1, %s526_s17   ;;  %s604_s15 = smov %s522_s16 }
  0xa0   : > { %p11_p5 = scmp.ge.s32.totalorder %s14_s17, 4   ;;  %s605_s16 = smov %s607_s18 }
  0xa2   :  { %13 = sbr.rel (!%p11_p5) target bundleno = 2 (0x2), region = 75 }

// kernel: rcca_forward.11
= control target key start
LH: loop header
LB: loop body
LE: loop exit
PB: predicated region body
PF: predicated region fallthrough
CT: control target
= control target key end

     0   :  { %9 = vsyncpa [#allocation3], 0  ;;  %s1368_s0 = inlined_call_operand.vmem [shape: bf16[640,8], index: 0, kind: input, shape index: {}]   ;;  %s1369_s1 = inlined_call_operand.vmem [shape: bf16[8,64], index: 1, kind: input, shape index: {}]   ;;  %s1370_s2 = inlined_call_operand.vmem [shape: f32[1,64], index: 2, kind: input, shape index: {}]   ;;  %s1371_s3 = inlined_call_operand.vmem [shape: f32[1,64], index: 3, kind: input, shape index: {}]   ;;  %s1372_s4 = inlined_call_operand.hbm [shape: f32[640,64], index: 4, kind: output, shape index: {}]  }
   0x1   :  { %11 = vsyncpa [#allocation3 + $0x1], 0  ;;  %s1075_s15 = smov 0   ;;  %s1077_s16 = smov 0  }
   0x2   :  { %s1079_s17 = smov 0   ;;  %s1081_s18 = smov 0  }
   0x3   :  { %s1083_s19 = smov 0   ;;  %s1085_s20 = smov 0  }
   0x4 LB: > { %s778_s21 = sadd.s32 4294967295, %s1045_s20   ;;  %s779_s22 = sadd.s32 4294967294, %s1045_s20   ;;  %s1045_s20 = sphi %s1085_s20, %s17_s20   ;;  %s1041_s19 = sphi %s1083_s19, %s1380_s19   ;;  %s1037_s18 = sphi %s1081_s18, %s1379_s18   ;;  %s1033_s17 = sphi %s1079_s17, %s1378_s17   ;;  %s1029_s16 = sphi %s1077_s16, %s1377_s16   ;;  %s1025_s15 = sphi %s1075_s15, %s1376_s15  }
   0x5   : > { %s29_s23 = sadd.s32 1, %s1041_s19  ;;  %s142_s24 = sadd.s32 1, %s1033_s17 }
   0x6   : > { %p31_p0 = scmp.ge.s32.totalorder %s29_s23, 3  ;;  %p152_p1 = scmp.ne.s32.totalorder %s1033_s17, %s1029_s16 }
   0x7   : > { %p153_p2 = scmp.eq.s32.totalorder %s778_s21, 2  ;;  %p158_p3 = scmp.ne.s32.totalorder %s1029_s16, %s1025_s15 }
   0x8   : > { %s1382_s23 = smov (%p31_p0, %s29_s23), 0  ;;  %p159_p5 = scmp.eq.s32.totalorder %s779_s22, 2 }
   0x9   : > { %p1115_p4 = por %p153_p2, %p152_p1  ;;  %s137_s26 = ssub.s32 %s1041_s19, %s1382_s23 }
   0xa   : > { %p785_p6 = scmp.ge.s32.totalorder %s1045_s20, 1  ;;  %p140_p7 = scmp.eq.s32.totalorder %s137_s26, 0 }
   0xb   : > { %p1122_p8 = por %p159_p5, %p158_p3  ;;  %p213_p9 = scmp.lt.s32.totalorder %s1045_s20, 4 }
   0xc   : > { %s1128_s28 = scalar_select %p140_p7, %s1033_s17, %s142_s24  }
   0xd   : > { %p214_p10 = pnand %p785_p6, %p213_p9 }
   0xe   : > { %s1134_s5 = sshll.u32 (!%p214_p10), %s1037_s18, 5  ;;  %s250_s11 = sand.u32 (!%p214_p10), 1, %s1029_s16  }
   0xf   : > { %217 = sbr.rel (%p214_p10) target bundleno = 252 (0xfc), region = 36  ;;  %p258_p11 = scmp.lt.s32.totalorder (!%p214_p10), %s1134_s5, 79 }
  0x10   : > { %s786_s14 = sshll.u32 (!%p214_p10), %s250_s11, 8  ;;  %s1302_s26 = scalar_lea.sflag (!%p214_p10), [#allocation3], %s250_s11 }
  0x11   : > { %s1174_s24 = scalar_lea.vmem (!%p214_p10), [#allocation2], %s786_s14 }
  0x14   : > { %v315_v0 = vld [vmem:[%s1369_s1] sm:$0xf]  ;;  %vm445_vm0 = vcmask 1043456   ;;  %s259_s6 = scalar_select %p258_p11, %s1134_s5, 79  ;;  %vm396_vm1 = vcmask 64512   ;;  %vm610_vm2 = vcmask 523264  }
  0x15   : > { %v447_v1 = vsel %vm445_vm0, %v315_v0, 0  ;;  %v1161_v18 = vld [vmem:[%s1370_s2] ss:$0 sm:$0xff]  ;;  %s652_s29 = ssub.s32 (%p1115_p4), 80, %s1134_s5 }
  0x16   : > { %456 = vmatpush.bf16.msra.mxu0 %v447_v1  ;;  %895 = vmatpush.bf16.msra.mxu1 %v447_v1  ;;  %s788_s7 = sshll.u32 %s259_s6, 2  ;;  %v1168_v19 = vld [vmem:[%s1371_s3] ss:$0 sm:$0xff]  ;;  %p653_p12 = scmp.lt.s32.totalorder (%p1115_p4), %s652_s29, 32 }
  0x17   : > { %896 = vmatpush.bf16.msra.mxu2 %v447_v1  ;;  %897 = vmatpush.bf16.msra.mxu3 %v447_v1  ;;  %s261_s10 = scalar_lea.vmem %s1368_s0, %s788_s7 }
  0x18   : > { %v878_v2 = vld [vmem:[%s261_s10] sm:$0xff]  ;;  %v879_v6 = vld [vmem:[%s261_s10 + $0x8] sm:$0xff]  ;;  %v880_v10 = vld [vmem:[%s261_s10 + $0x10] sm:$0xff] }
  0x19   : > { %v882_v3 = vld [vmem:[%s261_s10 + $0x20] sm:$0xff]  ;;  %853 = vmatmul.msk.bf16.vlgmr.msra.gmra.mxu0 %vm396_vm1, %v878_v2  ;;  %v883_v7 = vld [vmem:[%s261_s10 + $0x28] sm:$0xff]  ;;  %v884_v11 = vld [vmem:[%s261_s10 + $0x30] sm:$0xff] }
  0x1a   : > { %v886_v4 = vld [vmem:[%s261_s10 + $0x40] sm:$0xff]  ;;  %857 = vmatmul.msk.bf16.vlgmr.msra.gmra.mxu1 %vm396_vm1, %v882_v3  ;;  %v887_v8 = vld [vmem:[%s261_s10 + $0x48] sm:$0xff]  ;;  %v888_v12 = vld [vmem:[%s261_s10 + $0x50] sm:$0xff] }
  0x1b   : > { %v890_v5 = vld [vmem:[%s261_s10 + $0x60] sm:$0xff]  ;;  %861 = vmatmul.msk.bf16.vlgmr.msra.gmra.mxu2 %vm396_vm1, %v886_v4  ;;  %v891_v9 = vld [vmem:[%s261_s10 + $0x68] sm:$0xff]  ;;  %v892_v13 = vld [vmem:[%s261_s10 + $0x70] sm:$0xff] }
  0x1c   : > { %865 = vmatmul.msk.bf16.vlgmr.msra.gmra.mxu3 %vm396_vm1, %v890_v5  ;;  %v881_v14 = vld [vmem:[%s261_s10 + $0x18] sm:$0xff] }
  0x1d   : > { %v885_v15 = vld [vmem:[%s261_s10 + $0x38] sm:$0xff] }
  0x1e   : > { %v889_v16 = vld [vmem:[%s261_s10 + $0x58] sm:$0xff] }
  0x1f   : > { %v893_v17 = vld [vmem:[%s261_s10 + $0x78] sm:$0xff] }
  0x29   : > { %854 = vmatmul.msk.bf16.gmra.mxu0 %vm396_vm1, %v879_v6 }
  0x2a   : > { %858 = vmatmul.msk.bf16.gmra.mxu1 %vm396_vm1, %v883_v7 }
  0x2b   : > { %862 = vmatmul.msk.bf16.gmra.mxu2 %vm396_vm1, %v887_v8 }
  0x2c   : > { %866 = vmatmul.msk.bf16.gmra.mxu3 %vm396_vm1, %v891_v9 }
  0x39   : > { %855 = vmatmul.msk.bf16.gmra.mxu0 %vm396_vm1, %v880_v10 }
  0x3a   : > { %859 = vmatmul.msk.bf16.gmra.mxu1 %vm396_vm1, %v884_v11 }
  0x3b   : > { %863 = vmatmul.msk.bf16.gmra.mxu2 %vm396_vm1, %v888_v12 }
  0x3c   : > { %867 = vmatmul.msk.bf16.gmra.mxu3 %vm396_vm1, %v892_v13 }
  0x49   : > { %856 = vmatmul.msk.bf16.gmra.mxu0 %vm396_vm1, %v881_v14 }
  0x4a   : > { %860 = vmatmul.msk.bf16.gmra.mxu1 %vm396_vm1, %v885_v15 }
  0x4b   : > { %864 = vmatmul.msk.bf16.gmra.mxu2 %vm396_vm1, %v889_v16 }
  0x4c   : > { %868 = vmatmul.msk.bf16.gmra.mxu3 %vm396_vm1, %v893_v17 }
  0x96   : > { %v458_v20 = vpop.f32.mrf.mxu0 }
  0x97   : > { %v478_v21 = vpop.f32.mrf.mxu1  ;;  %v542_v22 = vmul.f32 %v1161_v18, %v458_v20 }
  0x98   : > { %v550_v23 = vmul.f32 %v1161_v18, %v478_v21 }
  0x99   : > { %v578_v24 = vadd.f32 %v1168_v19, %v542_v22 }
  0x9a   : > { %v586_v25 = vadd.f32 %v1168_v19, %v550_v23 }
  0x9b   : > { %611 = vst.msk [vmem:[%s1174_s24] sm:$0xff] %vm610_vm2, %v578_v24 }
  0x9c   : > { %619 = vst.msk [vmem:[%s1174_s24 + $0x40] sm:$0xff] %vm610_vm2, %v586_v25 }
  0x9e   : > { %v498_v26 = vpop.f32.mrf.mxu2  ;;  %v460_v30 = vpop.f32.mrf.mxu0 }
  0x9f   : > { %v518_v27 = vpop.f32.mrf.mxu3  ;;  %v558_v28 = vmul.f32 %v1161_v18, %v498_v26  ;;  %v480_v31 = vpop.f32.mrf.mxu1  ;;  %v543_v32 = vmul.f32 %v1161_v18, %v460_v30 }
  0xa0   : > { %v566_v29 = vmul.f32 %v1161_v18, %v518_v27  ;;  %v551_v33 = vmul.f32 %v1161_v18, %v480_v31 }
  0xa1   : > { %v594_v34 = vadd.f32 %v1168_v19, %v558_v28  ;;  %v579_v36 = vadd.f32 %v1168_v19, %v543_v32 }
  0xa2   : > { %v602_v35 = vadd.f32 %v1168_v19, %v566_v29  ;;  %v587_v37 = vadd.f32 %v1168_v19, %v551_v33 }
  0xa3   : > { %627 = vst.msk [vmem:[%s1174_s24 + $0x80] sm:$0xff] %vm610_vm2, %v594_v34 }
  0xa4   : > { %635 = vst.msk [vmem:[%s1174_s24 + $0xc0] sm:$0xff] %vm610_vm2, %v602_v35 }
  0xa5   : > { %612 = vst.msk [vmem:[%s1174_s24 + $0x8] sm:$0xff] %vm610_vm2, %v579_v36 }
  0xa6   : > { %620 = vst.msk [vmem:[%s1174_s24 + $0x48] sm:$0xff] %vm610_vm2, %v587_v37  ;;  %v500_v38 = vpop.f32.mrf.mxu2  ;;  %v463_v42 = vpop.f32.mrf.mxu0 }
  0xa7   : > { %v520_v39 = vpop.f32.mrf.mxu3  ;;  %v559_v40 = vmul.f32 %v1161_v18, %v500_v38  ;;  %v483_v43 = vpop.f32.mrf.mxu1  ;;  %v544_v44 = vmul.f32 %v1161_v18, %v463_v42 }
  0xa8   : > { %v567_v41 = vmul.f32 %v1161_v18, %v520_v39  ;;  %v552_v45 = vmul.f32 %v1161_v18, %v483_v43 }
  0xa9   : > { %v595_v46 = vadd.f32 %v1168_v19, %v559_v40  ;;  %v580_v48 = vadd.f32 %v1168_v19, %v544_v44 }
  0xaa   : > { %v603_v47 = vadd.f32 %v1168_v19, %v567_v41  ;;  %v588_v49 = vadd.f32 %v1168_v19, %v552_v45 }
  0xab   : > { %628 = vst.msk [vmem:[%s1174_s24 + $0x88] sm:$0xff] %vm610_vm2, %v595_v46 }
  0xac   : > { %636 = vst.msk [vmem:[%s1174_s24 + $0xc8] sm:$0xff] %vm610_vm2, %v603_v47 }
  0xad   : > { %613 = vst.msk [vmem:[%s1174_s24 + $0x10] sm:$0xff] %vm610_vm2, %v580_v48 }
  0xae   : > { %621 = vst.msk [vmem:[%s1174_s24 + $0x50] sm:$0xff] %vm610_vm2, %v588_v49  ;;  %v503_v50 = vpop.f32.mrf.mxu2  ;;  %v465_v54 = vpop.f32.mrf.mxu0 }
  0xaf   : > { %v523_v51 = vpop.f32.mrf.mxu3  ;;  %v560_v52 = vmul.f32 %v1161_v18, %v503_v50  ;;  %v485_v55 = vpop.f32.mrf.mxu1  ;;  %v545_v56 = vmul.f32 %v1161_v18, %v465_v54 }
  0xb0   : > { %v568_v53 = vmul.f32 %v1161_v18, %v523_v51  ;;  %v553_v57 = vmul.f32 %v1161_v18, %v485_v55 }
  0xb1   : > { %v596_v58 = vadd.f32 %v1168_v19, %v560_v52  ;;  %v581_v60 = vadd.f32 %v1168_v19, %v545_v56 }
  0xb2   : > { %v604_v59 = vadd.f32 %v1168_v19, %v568_v53  ;;  %v589_v61 = vadd.f32 %v1168_v19, %v553_v57 }
  0xb3   : > { %629 = vst.msk [vmem:[%s1174_s24 + $0x90] sm:$0xff] %vm610_vm2, %v596_v58 }
  0xb4   : > { %637 = vst.msk [vmem:[%s1174_s24 + $0xd0] sm:$0xff] %vm610_vm2, %v604_v59 }
  0xb5   : > { %614 = vst.msk [vmem:[%s1174_s24 + $0x18] sm:$0xff] %vm610_vm2, %v581_v60 }
  0xb6   : > { %622 = vst.msk [vmem:[%s1174_s24 + $0x58] sm:$0xff] %vm610_vm2, %v589_v61  ;;  %v505_v62 = vpop.f32.mrf.mxu2  ;;  %v468_v2 = vpop.f32.mrf.mxu0 }
  0xb7   : > { %v525_v63 = vpop.f32.mrf.mxu3  ;;  %v561_v0 = vmul.f32 %v1161_v18, %v505_v62  ;;  %v488_v3 = vpop.f32.mrf.mxu1  ;;  %v546_v4 = vmul.f32 %v1161_v18, %v468_v2 }
  0xb8   : > { %v569_v1 = vmul.f32 %v1161_v18, %v525_v63  ;;  %v554_v5 = vmul.f32 %v1161_v18, %v488_v3 }
  0xb9   : > { %v597_v6 = vadd.f32 %v1168_v19, %v561_v0  ;;  %v582_v8 = vadd.f32 %v1168_v19, %v546_v4 }
  0xba   : > { %v605_v7 = vadd.f32 %v1168_v19, %v569_v1  ;;  %v590_v9 = vadd.f32 %v1168_v19, %v554_v5 }
  0xbb   : > { %630 = vst.msk [vmem:[%s1174_s24 + $0x98] sm:$0xff] %vm610_vm2, %v597_v6 }
  0xbc   : > { %638 = vst.msk [vmem:[%s1174_s24 + $0xd8] sm:$0xff] %vm610_vm2, %v605_v7 }
  0xbd   : > { %615 = vst.msk [vmem:[%s1174_s24 + $0x20] sm:$0xff] %vm610_vm2, %v582_v8 }
  0xbe   : > { %623 = vst.msk [vmem:[%s1174_s24 + $0x60] sm:$0xff] %vm610_vm2, %v590_v9  ;;  %v508_v10 = vpop.f32.mrf.mxu2  ;;  %v470_v14 = vpop.f32.mrf.mxu0 }
  0xbf   : > { %v528_v11 = vpop.f32.mrf.mxu3  ;;  %v562_v12 = vmul.f32 %v1161_v18, %v508_v10  ;;  %v490_v15 = vpop.f32.mrf.mxu1  ;;  %v547_v16 = vmul.f32 %v1161_v18, %v470_v14 }
  0xc0   : > { %v570_v13 = vmul.f32 %v1161_v18, %v528_v11  ;;  %v555_v17 = vmul.f32 %v1161_v18, %v490_v15 }
  0xc1   : > { %v598_v20 = vadd.f32 %v1168_v19, %v562_v12  ;;  %v583_v22 = vadd.f32 %v1168_v19, %v547_v16 }
  0xc2   : > { %v606_v21 = vadd.f32 %v1168_v19, %v570_v13  ;;  %v591_v23 = vadd.f32 %v1168_v19, %v555_v17 }
  0xc3   : > { %631 = vst.msk [vmem:[%s1174_s24 + $0xa0] sm:$0xff] %vm610_vm2, %v598_v20 }
  0xc4   : > { %639 = vst.msk [vmem:[%s1174_s24 + $0xe0] sm:$0xff] %vm610_vm2, %v606_v21 }
  0xc5   : > { %616 = vst.msk [vmem:[%s1174_s24 + $0x28] sm:$0xff] %vm610_vm2, %v583_v22 }
  0xc6   : > { %624 = vst.msk [vmem:[%s1174_s24 + $0x68] sm:$0xff] %vm610_vm2, %v591_v23  ;;  %v510_v24 = vpop.f32.mrf.mxu2  ;;  %v473_v28 = vpop.f32.mrf.mxu0 }
  0xc7   : > { %v530_v25 = vpop.f32.mrf.mxu3  ;;  %v563_v26 = vmul.f32 %v1161_v18, %v510_v24  ;;  %v493_v29 = vpop.f32.mrf.mxu1  ;;  %v548_v30 = vmul.f32 %v1161_v18, %v473_v28 }
  0xc8   : > { %v571_v27 = vmul.f32 %v1161_v18, %v530_v25  ;;  %v556_v31 = vmul.f32 %v1161_v18, %v493_v29 }
  0xc9   : > { %v599_v32 = vadd.f32 %v1168_v19, %v563_v26  ;;  %v584_v34 = vadd.f32 %v1168_v19, %v548_v30 }
  0xca   : > { %v607_v33 = vadd.f32 %v1168_v19, %v571_v27  ;;  %v592_v35 = vadd.f32 %v1168_v19, %v556_v31 }
  0xcb   : > { %632 = vst.msk [vmem:[%s1174_s24 + $0xa8] sm:$0xff] %vm610_vm2, %v599_v32 }
  0xcc   : > { %640 = vst.msk [vmem:[%s1174_s24 + $0xe8] sm:$0xff] %vm610_vm2, %v607_v33 }
  0xcd   : > { %617 = vst.msk [vmem:[%s1174_s24 + $0x30] sm:$0xff] %vm610_vm2, %v584_v34 }
  0xce   : > { %625 = vst.msk [vmem:[%s1174_s24 + $0x70] sm:$0xff] %vm610_vm2, %v592_v35  ;;  %v513_v36 = vpop.f32.mrf.mxu2  ;;  %v475_v40 = vpop.f32.mrf.mxu0 }
  0xcf   : > { %v533_v37 = vpop.f32.mrf.mxu3  ;;  %v564_v38 = vmul.f32 %v1161_v18, %v513_v36  ;;  %v495_v41 = vpop.f32.mrf.mxu1  ;;  %v549_v42 = vmul.f32 %v1161_v18, %v475_v40 }
  0xd0   : > { %v572_v39 = vmul.f32 %v1161_v18, %v533_v37  ;;  %v557_v43 = vmul.f32 %v1161_v18, %v495_v41 }
  0xd1   : > { %v600_v44 = vadd.f32 %v1168_v19, %v564_v38  ;;  %v585_v46 = vadd.f32 %v1168_v19, %v549_v42 }
  0xd2   : > { %v608_v45 = vadd.f32 %v1168_v19, %v572_v39  ;;  %v593_v47 = vadd.f32 %v1168_v19, %v557_v43 }
  0xd3   : > { %633 = vst.msk [vmem:[%s1174_s24 + $0xb0] sm:$0xff] %vm610_vm2, %v600_v44 }
  0xd4   : > { %641 = vst.msk [vmem:[%s1174_s24 + $0xf0] sm:$0xff] %vm610_vm2, %v608_v45 }
  0xd5   : > { %618 = vst.msk [vmem:[%s1174_s24 + $0x38] sm:$0xff] %vm610_vm2, %v585_v46 }
  0xd6   : > { %626 = vst.msk [vmem:[%s1174_s24 + $0x78] sm:$0xff] %vm610_vm2, %v593_v47  ;;  %v515_v48 = vpop.f32.mrf.mxu2 }
  0xd7   : > { %v535_v49 = vpop.f32.mrf.mxu3  ;;  %v565_v50 = vmul.f32 %v1161_v18, %v515_v48 }
  0xd8   : > { %v573_v51 = vmul.f32 %v1161_v18, %v535_v49  ;;  %650 = sbr.rel (!%p1115_p4) target bundleno = 252 (0xfc), region = 40 }
  0xd9   : > { %v601_v52 = vadd.f32 %v1168_v19, %v565_v50 }
  0xda   : > { %v609_v53 = vadd.f32 %v1168_v19, %v573_v51 }
  0xdb   : > { %634 = vst.msk [vmem:[%s1174_s24 + $0xb8] sm:$0xff] %vm610_vm2, %v601_v52 }
  0xdc   : > { %642 = vst.msk [vmem:[%s1174_s24 + $0xf8] sm:$0xff] %vm610_vm2, %v609_v53 }
  0xdd   : > { %s1384_s29 = smov (!%p653_p12, %s652_s29), 32 }
  0xde   : > { %s871_s30 = sshll.u32 %s1384_s29, 3 }
  0xdf   : > { %s656_s6 = ssub.s32 256, %s871_s30 }
  0xe0   : > { %s657_s7 = sshll.u32 %s656_s6, 4 }
  0xe1   : > { %658 = vsyncadd %s1302_s26, %s657_s7  ;;  %p1311_p13 = scmp.ne.s32.totalorder %s871_s30, 0  ;;  %s894_s25 = sshll.u32 %s1037_s18, 8 }
  0xe2   : > { %s662_s10 = scalar_lea.hbm %s1372_s4, %s894_s25  ;;  %s664_s11 = sshll.u32 %s1174_s24, 4  ;;  %s1320_s11 = int_to_ptr.vmem [resolvable:$true] %s664_s11 }
  0xe3   : > { %s666_s12 = sshll.u32 %s662_s10, 4  ;;  %s875_s13 = sshll.u32 %s1384_s29, 7  ;;  %s1322_s12 = int_to_ptr.hbm [resolvable:$true] %s666_s12 }
  0xe4   : > { %s956_s14 = sshra.s32 %s1320_s11, 4  ;;  %s958_s21 = sshrl.u32 %s875_s13, 4  ;;  %s957_s14 = int_to_ptr.vmem [resolvable:$true] %s956_s14 }
  0xe5   : > { %s963_s22 = scalar_lea.vmem %s957_s14, %s958_s21  ;;  %s1047_s18 = smov [#allocation2]  }
  0xe6   : > { %p964_p0 = scmp.ne.s32.totalorder %s957_s14, %s963_s22  ;;  %s967_s30 = scalar_lea.vmem %s1047_s18, 512 }
  0xe7   : > { %p969_p3 = scmp.lt.s32.totalorder %s967_s30, %s963_s22 }
  0xe8   : > { %p965_p1 = pnand %p964_p0, %p1311_p13 }
  0xea   : > { %p966_p2 = pneg %p965_p1 }
  0xec   : > { %p971_p4 = pnand %p969_p3, %p966_p2 }
  0xee   : > { %974 = shalt.err (!%p971_p4)
}
  0xef   : > { %s975_s24 = sshra.s32 %s1322_s12, 4  ;;  %s986_s9 = scalar_lea.hbm %s1372_s4, 640  ;;  %s976_s24 = int_to_ptr.hbm [resolvable:$true] %s975_s24 }
  0xf0   : > { %s982_s6 = scalar_lea.hbm %s976_s24, %s958_s21  ;;  %p987_p9 = scmp.lt.s32.totalorder %s976_s24, %s1372_s4 }
  0xf1   : > { %p983_p5 = scmp.ne.s32.totalorder %s976_s24, %s982_s6  ;;  %p988_p10 = scmp.lt.s32.totalorder %s986_s9, %s982_s6 }
  0xf3   : > { %p984_p6 = pnand %p983_p5, %p1311_p13  ;;  %p989_p11 = por %p988_p10, %p987_p9 }
  0xf5   : > { %p985_p7 = pneg %p984_p6 }
  0xf7   : > { %p990_p12 = pnand %p989_p11, %p985_p7 }
  0xf9   : > { %993 = shalt.err (!%p990_p12)
}
  0xfa   : > { %s1048_s14 = smov 128   ;;  %s1049_s21 = smov 8  }
  0xfb   : > { %672 = dma.vmem_to_hbm [thread:$0]  (%p1311_p13), %s1320_s11, %s875_s13, %s1322_s12, %s1302_s26, %s1048_s14, %s1048_s14, %s1049_s21  }
  0xfc PF: > { %p903_p0 = scmp.ge.s32.totalorder %s1045_s20, 2  ;;  %s681_s22 = sand.u32 1, %s1025_s15  }
  0xfd   : > { %s682_s18 = scalar_lea.sflag [#allocation3], %s681_s22 }
  0xfe   : > { %p900_p1 = pnand %p903_p0, %p1122_p8 }
 0x100   : > { %p901_p2 = pneg %p900_p1 }
 0x102   : > { %1020 = dma.done.wait (%p901_p2), %s682_s18, 4096  }
 0x103   : > { %1022 = vsyncadd (%p901_p2), %s682_s18, 4294963200  ;;  %s17_s20 = sadd.s32 1, %s1045_s20   ;;  %s1376_s15 = smov %s1029_s16 }
 0x104   : > { %p14_p3 = scmp.ge.s32.totalorder %s17_s20, 5   ;;  %s1377_s16 = smov %s1033_s17 }
 0x105   : > { %s1378_s17 = smov %s1128_s28  ;;  %s1379_s18 = smov %s1041_s19 }
 0x106   : > { %s1380_s19 = smov %s1382_s23  ;;  %16 = sbr.rel (!%p14_p3) target bundleno = 4 (0x4), region = 80 }
 0x10b   :  { %688 = vsyncpa [#allocation3], 1 }
 0x10c   :  { %690 = vsyncpa [#allocation3 + $0x1], 1 }

</bundles_post_ra>
